<compile_context>
chip_gen: v7x
topology: tpu7x:2x2x1
jax: 0.10.0
libtpu: 0.0.40
codegen_flags: <defaults>
</compile_context>

<pallas_src>
import math
import functools

import jax
import jax.numpy as jnp
from jax import lax
from jax.experimental import pallas as pl
from jax.experimental.pallas import tpu as pltpu

# ----------------------------- configuration --------------------------------
NUM_FREQS = 8
INPUT_DIM = 3
FOURIER_DIM = INPUT_DIM * (2 * NUM_FREQS + 1)   # include_input=True, include_pi=True
LN_EPS = 1e-5


# ----------------------------- glue (plain JAX) ------------------------------
def fourier_embed(x):
    """FourierEmbedder: cat([x, sin(x*f), cos(x*f)], -1), f = pi * 2**k."""
    freqs = (2.0 ** jnp.arange(NUM_FREQS, dtype=x.dtype)) * jnp.pi
    emb = (x[..., None] * freqs).reshape(*x.shape[:-1], INPUT_DIM * NUM_FREQS)
    return jnp.concatenate([x, jnp.sin(emb), jnp.cos(emb)], axis=-1)


# ----------------------------- in-kernel helpers ----------------------------
def _layernorm(x, g, b):
    mu = jnp.mean(x, axis=-1, keepdims=True)
    xc = x - mu
    var = jnp.mean(xc * xc, axis=-1, keepdims=True)
    return xc * lax.rsqrt(var + LN_EPS) * g + b


def _gelu_exact(x):
    # PyTorch nn.GELU() default is the exact erf formulation.
    return 0.5 * x * (1.0 + lax.erf(x * 0.7071067811865476))


# ----------------------------- Pallas kernel --------------------------------
def decoder_kernel(heads,
                   q_emb_ref, lat_ref,
                   w_qp_ref, b_qp_ref,
                   ln1_g_ref, ln1_b_ref, ln2_g_ref, ln2_b_ref,
                   w_cq_ref, b_cq_ref, w_ck_ref, b_ck_ref, w_cv_ref, b_cv_ref,
                   w_cp_ref, b_cp_ref,
                   ln3_g_ref, ln3_b_ref,
                   w_fc_ref, b_fc_ref, w_mp_ref, b_mp_ref,
                   lnp_g_ref, lnp_b_ref,
                   w_out_ref, b_out_ref,
                   out_ref,
                   k_scratch, v_scratch):
    f32, bf16 = jnp.float32, jnp.bfloat16

    # ---- hoisted per-batch work: ln2(latents) + K/V projections --------------
    # The latents block / K / V are independent of the query tile; compute them
    # only on the first query tile of each batch element and carry them in VMEM
    # scratch across the (arbitrary) query-tile grid axis.
    @pl.when(pl.program_id(1) == 0)
    def _():
        lat = lat_ref[0].astype(f32)                                  # (M, W) f32 stats
        xd = _layernorm(lat, ln2_g_ref[0], ln2_b_ref[0]).astype(bf16)
        k = jnp.dot(xd, w_ck_ref[...], preferred_element_type=f32) + b_ck_ref[0]
        v = jnp.dot(xd, w_cv_ref[...], preferred_element_type=f32) + b_cv_ref[0]
        k_scratch[...] = k.astype(bf16)                               # (M, W) bf16
        v_scratch[...] = v.astype(bf16)

    # ---- per-query-tile work -------------------------------------------------
    q_emb = q_emb_ref[0]                                              # (T, F) bf16
    T = q_emb.shape[0]
    W = w_cq_ref.shape[1]
    d = W // heads
    out_ch = out_ref.shape[-1]

    # query_proj: Linear(fourier_out_dim -> width)  (bf16 MXU, f32 accumulate)
    qf = jnp.dot(q_emb, w_qp_ref[...], preferred_element_type=f32) + b_qp_ref[0]

    # --- ResidualCrossAttentionBlock: x = x + attn(ln1(x), ln2(data)) ---
    xq = _layernorm(qf, ln1_g_ref[0], ln1_b_ref[0]).astype(bf16)
    # attention scale 1/sqrt(sqrt(d)) is pre-folded into w_cq/b_cq and w_ck/b_ck.
    q = (jnp.dot(xq, w_cq_ref[...], preferred_element_type=f32) + b_cq_ref[0]).astype(bf16)

    k_all = k_scratch[...]                                            # (M, W) bf16
    v_all = v_scratch[...]

    # Per-head attention with tile-aligned lane slices (d is a multiple of 128 in
    # the demo); output projection accumulated per head to avoid relayouts/concat.
    attn_acc = jnp.zeros((T, W), f32)
    for h in range(heads):
        lo, hi = h * d, (h + 1) * d
        q_h = q[:, lo:hi]                                             # (T, d) bf16
        k_h = k_all[:, lo:hi]                                         # (M, d) bf16
        v_h = v_all[:, lo:hi]                                         # (M, d) bf16

        logits = jnp.einsum("nd,md->nm", q_h, k_h,
                            preferred_element_type=f32)               # (T, M) f32
        logits = logits - jnp.max(logits, axis=-1, keepdims=True)
        p = jnp.exp(logits)
        p = p * pl.reciprocal(jnp.sum(p, axis=-1, keepdims=True), approx=True)
        o_h = jnp.dot(p.astype(bf16), v_h, preferred_element_type=f32)  # (T, d) f32

        attn_acc = attn_acc + jnp.dot(o_h.astype(bf16), w_cp_ref[lo:hi, :],
                                      preferred_element_type=f32)
    attn = attn_acc + b_cp_ref[0]

    x = qf + attn                                                     # residual stream f32

    # --- x = x + mlp(ln3(x)) ---
    x3 = _layernorm(x, ln3_g_ref[0], ln3_b_ref[0]).astype(bf16)
    h1 = jnp.dot(x3, w_fc_ref[...], preferred_element_type=f32) + b_fc_ref[0]
    h1 = _gelu_exact(h1)                                              # exact erf GELU, f32
    h2 = jnp.dot(h1.astype(bf16), w_mp_ref[...], preferred_element_type=f32) + b_mp_ref[0]
    x = x + h2

    # --- ln_post + output_proj; store only the real out_channels columns ---
    xp = _layernorm(x, lnp_g_ref[0], lnp_b_ref[0]).astype(bf16)
    out = jnp.dot(xp, w_out_ref[...], preferred_element_type=f32) + b_out_ref[0]
    out_ref[0] = out[:, :out_ch].astype(out_ref.dtype)


# ----------------------------- params ----------------------------------------
PARAM_ORDER = [
    "w_qp", "b_qp",
    "ln1_g", "ln1_b", "ln2_g", "ln2_b",
    "w_cq", "b_cq", "w_ck", "b_ck", "w_cv", "b_cv",
    "w_cp", "b_cp",
    "ln3_g", "ln3_b",
    "w_fc", "b_fc", "w_mp", "b_mp",
    "lnp_g", "lnp_b",
    "w_out", "b_out",
]


def init_params(key, width, out_channels):
    """Raw (PyTorch-layout) f32 parameters."""
    ks = jax.random.split(key, 22)

    def lin(k, fan_in, fan_out):
        return jax.random.normal(k, (fan_in, fan_out), jnp.float32) * (0.25 / math.sqrt(fan_in))

    def bias(k, dim):
        return jax.random.normal(k, (1, dim), jnp.float32) * 0.02

    def ln_g(k, dim):
        return 1.0 + jax.random.normal(k, (1, dim), jnp.float32) * 0.05

    def ln_b(k, dim):
        return jax.random.normal(k, (1, dim), jnp.float32) * 0.05

    return {
        "w_qp": lin(ks[0], FOURIER_DIM, width), "b_qp": bias(ks[1], width),
        "ln1_g": ln_g(ks[2], width), "ln1_b": ln_b(ks[3], width),
        "ln2_g": ln_g(ks[4], width), "ln2_b": ln_b(ks[5], width),
        "w_cq": lin(ks[6], width, width), "b_cq": bias(ks[7], width),
        "w_ckv": lin(ks[8], width, 2 * width), "b_ckv": bias(ks[9], 2 * width),
        "w_cp": lin(ks[10], width, width), "b_cp": bias(ks[11], width),
        "ln3_g": ln_g(ks[12], width), "ln3_b": ln_b(ks[13], width),
        "w_fc": lin(ks[14], width, 4 * width), "b_fc": bias(ks[15], 4 * width),
        "w_mp": lin(ks[16], 4 * width, width), "b_mp": bias(ks[17], width),
        "lnp_g": ln_g(ks[18], width), "lnp_b": ln_b(ks[19], width),
        "w_out": lin(ks[20], width, out_channels), "b_out": bias(ks[21], out_channels),
    }


def prepare_params(params, width, heads):
    """One-time weight preprocessing: fold attn scale, split KV, pad w_out, cast to bf16."""
    W = width
    d = W // heads
    scale = 1.0 / math.sqrt(math.sqrt(d))
    f32, bf16 = jnp.float32, jnp.bfloat16

    # Pad w_out to 128 lanes so the final matmul stays lane-dense; the kernel only
    # stores the real out_channels columns, so there is no HBM write amplification.
    out_ch = params["w_out"].shape[1]
    c_pad = ((out_ch + 127) // 128) * 128
    w_out_p = jnp.zeros((W, c_pad), f32).at[:, :out_ch].set(params["w_out"])
    b_out_p = jnp.zeros((1, c_pad), f32).at[:, :out_ch].set(params["b_out"])

    return {
        "w_qp": params["w_qp"].astype(bf16), "b_qp": params["b_qp"].astype(f32),
        "ln1_g": params["ln1_g"].astype(f32), "ln1_b": params["ln1_b"].astype(f32),
        "ln2_g": params["ln2_g"].astype(f32), "ln2_b": params["ln2_b"].astype(f32),
        # fold 1/d**0.25 into q and k projections (weights AND biases)
        "w_cq": (params["w_cq"] * scale).astype(bf16),
        "b_cq": (params["b_cq"] * scale).astype(f32),
        "w_ck": (params["w_ckv"][:, :W] * scale).astype(bf16),
        "b_ck": (params["b_ckv"][:, :W] * scale).astype(f32),
        "w_cv": params["w_ckv"][:, W:].astype(bf16),
        "b_cv": params["b_ckv"][:, W:].astype(f32),
        "w_cp": params["w_cp"].astype(bf16), "b_cp": params["b_cp"].astype(f32),
        "ln3_g": params["ln3_g"].astype(f32), "ln3_b": params["ln3_b"].astype(f32),
        "w_fc": params["w_fc"].astype(bf16), "b_fc": params["b_fc"].astype(f32),
        "w_mp": params["w_mp"].astype(bf16), "b_mp": params["b_mp"].astype(f32),
        "lnp_g": params["lnp_g"].astype(f32), "lnp_b": params["lnp_b"].astype(f32),
        "w_out": w_out_p.astype(bf16), "b_out": b_out_p,
    }


# ----------------------------- wrapper ---------------------------------------
def cross_attention_decoder(queries, latents, prepared, heads, out_channels, *, tile_n=256):
    B, N, _ = queries.shape
    _, M, W = latents.shape
    assert W % heads == 0

    # Fourier positional embedding (plain JAX); bf16 halves its HBM traffic.
    q_emb = fourier_embed(queries).astype(jnp.bfloat16)        # (B, N, FOURIER_DIM)
    latents_bf16 = latents.astype(jnp.bfloat16)                 # halve latents DMA

    tile_n = min(tile_n, N)
    assert N % tile_n == 0, "pad N to a multiple of tile_n"
    nt = N // tile_n

    weights = [prepared[name] for name in PARAM_ORDER]

    def rep_spec(shape):  # full-array block, replicated across the whole grid
        nd = len(shape)
        return pl.BlockSpec(shape, lambda b, t, nd=nd: (0,) * nd)

    in_specs = ([pl.BlockSpec((1, tile_n, q_emb.shape[-1]), lambda b, t: (b, t, 0)),
                 pl.BlockSpec((1, M, W), lambda b, t: (b, 0, 0))]
                + [rep_spec(w.shape) for w in weights])

    out = pl.pallas_call(
        functools.partial(decoder_kernel, heads),
        out_shape=jax.ShapeDtypeStruct((B, N, out_channels), queries.dtype),
        grid_spec=pltpu.PrefetchScalarGridSpec(
            num_scalar_prefetch=0,
            grid=(B, nt),
            in_specs=in_specs,
            out_specs=pl.BlockSpec((1, tile_n, out_channels), lambda b, t: (b, t, 0)),
            scratch_shapes=[pltpu.VMEM((M, W), jnp.bfloat16),   # cached K
                            pltpu.VMEM((M, W), jnp.bfloat16)],  # cached V
        ),
        compiler_params=pltpu.CompilerParams(
            # batch axis parallel (v7x megacore), query-tile axis arbitrary so the
            # per-batch K/V scratch legally carries across tiles.
            dimension_semantics=("parallel", "arbitrary"),
            vmem_limit_bytes=32 * 1024 * 1024,
        ),
    )(q_emb, latents_bf16, *weights)

    return out


# ----------------------------- pure-JAX reference ----------------------------
def reference_forward(queries, latents, p, heads, out_channels):
    """Mirrors the kernel's bf16 matmul / f32 accumulate recipe in plain JAX."""
    f32, bf16 = jnp.float32, jnp.bfloat16

    def ln(x, g, b):
        mu = jnp.mean(x, axis=-1, keepdims=True)
        xc = x - mu
        var = jnp.mean(xc * xc, axis=-1, keepdims=True)
        return xc / jnp.sqrt(var + LN_EPS) * g + b

    B, N, _ = queries.shape
    _, M, W = latents.shape
    H = heads
    d = W // H

    q_emb = fourier_embed(queries).astype(bf16)
    qf = jnp.dot(q_emb, p["w_qp"], preferred_element_type=f32) + p["b_qp"][0]

    lat = latents.astype(bf16).astype(f32)            # kernel DMAs latents as bf16
    xq = ln(qf, p["ln1_g"][0], p["ln1_b"][0]).astype(bf16)
    xd = ln(lat, p["ln2_g"][0], p["ln2_b"][0]).astype(bf16)

    q = jnp.dot(xq, p["w_cq"], preferred_element_type=f32) + p["b_cq"][0]
    k = jnp.dot(xd, p["w_ck"], preferred_element_type=f32) + p["b_ck"][0]
    v = jnp.dot(xd, p["w_cv"], preferred_element_type=f32) + p["b_cv"][0]

    qh = q.astype(bf16).reshape(B, N, H, d)
    kh = k.astype(bf16).reshape(B, M, H, d)
    vh = v.astype(bf16).reshape(B, M, H, d)
    logits = jnp.einsum("bnhd,bmhd->bhnm", qh, kh, preferred_element_type=f32)
    w = jax.nn.softmax(logits, axis=-1)
    o = jnp.einsum("bhnm,bmhd->bnhd", w.astype(bf16), vh, preferred_element_type=f32)
    attn = jnp.dot(o.reshape(B, N, W).astype(bf16), p["w_cp"],
                   preferred_element_type=f32) + p["b_cp"][0]
    x = qf + attn

    x3 = ln(x, p["ln3_g"][0], p["ln3_b"][0]).astype(bf16)
    h1 = _gelu_exact(jnp.dot(x3, p["w_fc"], preferred_element_type=f32) + p["b_fc"][0])
    h2 = jnp.dot(h1.astype(bf16), p["w_mp"], preferred_element_type=f32) + p["b_mp"][0]
    x = x + h2

    xp = ln(x, p["lnp_g"][0], p["lnp_b"][0]).astype(bf16)
    out = jnp.dot(xp, p["w_out"], preferred_element_type=f32) + p["b_out"][0]
    return out[..., :out_channels]


# ----------------------------- main ------------------------------------------
if __name__ == "__main__":
    B = 2            # batch
    N = 256          # query points per batch
    M = 256          # num_latents
    WIDTH = 256
    HEADS = 2        # head_dim = 128 (lane-aligned)
    OUT_CH = 4
    TILE_N = 128     # query tile (multiple of 128 for MXU fill)

    key = jax.random.PRNGKey(0)
    k_q, k_l, k_p = jax.random.split(key, 3)
    queries = jax.random.uniform(k_q, (B, N, INPUT_DIM), jnp.float32, -1.0, 1.0)
    latents = jax.random.normal(k_l, (B, M, WIDTH), jnp.float32)

    raw_params = init_params(k_p, WIDTH, OUT_CH)
    prepared = prepare_params(raw_params, WIDTH, HEADS)

    out = cross_attention_decoder(queries, latents, prepared, HEADS, OUT_CH, tile_n=TILE_N)
    out = jax.block_until_ready(out)

    ref = jax.block_until_ready(reference_forward(queries, latents, prepared, HEADS, OUT_CH))

    assert out.shape == (B, N, OUT_CH), out.shape
    max_err = float(jnp.max(jnp.abs(out - ref)))
    assert jnp.allclose(out, ref, atol=2e-2, rtol=2e-2), max_err

    print("KERNEL_OK")
</pallas_src>

<mosaic_0001>
module attributes {stable_mosaic.version = 11 : i64} {
  func.func @decoder_kernel(%arg0: i32, %arg1: i32, %arg2: memref<1x128x51xbf16, #tpu.memory_space<vmem>>, %arg3: memref<1x256x256xbf16, #tpu.memory_space<vmem>>, %arg4: memref<51x256xbf16, #tpu.memory_space<vmem>>, %arg5: memref<1x256xf32, #tpu.memory_space<vmem>>, %arg6: memref<1x256xf32, #tpu.memory_space<vmem>>, %arg7: memref<1x256xf32, #tpu.memory_space<vmem>>, %arg8: memref<1x256xf32, #tpu.memory_space<vmem>>, %arg9: memref<1x256xf32, #tpu.memory_space<vmem>>, %arg10: memref<256x256xbf16, #tpu.memory_space<vmem>>, %arg11: memref<1x256xf32, #tpu.memory_space<vmem>>, %arg12: memref<256x256xbf16, #tpu.memory_space<vmem>>, %arg13: memref<1x256xf32, #tpu.memory_space<vmem>>, %arg14: memref<256x256xbf16, #tpu.memory_space<vmem>>, %arg15: memref<1x256xf32, #tpu.memory_space<vmem>>, %arg16: memref<256x256xbf16, #tpu.memory_space<vmem>>, %arg17: memref<1x256xf32, #tpu.memory_space<vmem>>, %arg18: memref<1x256xf32, #tpu.memory_space<vmem>>, %arg19: memref<1x256xf32, #tpu.memory_space<vmem>>, %arg20: memref<256x1024xbf16, #tpu.memory_space<vmem>>, %arg21: memref<1x1024xf32, #tpu.memory_space<vmem>>, %arg22: memref<1024x256xbf16, #tpu.memory_space<vmem>>, %arg23: memref<1x256xf32, #tpu.memory_space<vmem>>, %arg24: memref<1x256xf32, #tpu.memory_space<vmem>>, %arg25: memref<1x256xf32, #tpu.memory_space<vmem>>, %arg26: memref<256x128xbf16, #tpu.memory_space<vmem>>, %arg27: memref<1x128xf32, #tpu.memory_space<vmem>>, %arg28: memref<1x128x4xf32, #tpu.memory_space<vmem>>, %arg29: memref<256x256xbf16, #tpu.memory_space<vmem>>, %arg30: memref<256x256xbf16, #tpu.memory_space<vmem>>) attributes {dimension_semantics = [#tpu.dimension_semantics<parallel>, #tpu.dimension_semantics<arbitrary>], iteration_bounds = array<i64: 2, 2>, scalar_prefetch = 0 : i64, scratch_operands = 2 : i64, tpu.core_type = #tpu.core_type<tc>, window_params = [{transform_indices = @transform_0, window_bounds = array<i64: 1, 128, 51>}, {transform_indices = @transform_1, window_bounds = array<i64: 1, 256, 256>}, {pipeline_mode = #tpu.pipeline_mode<synchronous>, transform_indices = @transform_2, window_bounds = array<i64: 51, 256>}, {pipeline_mode = #tpu.pipeline_mode<synchronous>, transform_indices = @transform_3, window_bounds = array<i64: 1, 256>}, {pipeline_mode = #tpu.pipeline_mode<synchronous>, transform_indices = @transform_4, window_bounds = array<i64: 1, 256>}, {pipeline_mode = #tpu.pipeline_mode<synchronous>, transform_indices = @transform_5, window_bounds = array<i64: 1, 256>}, {pipeline_mode = #tpu.pipeline_mode<synchronous>, transform_indices = @transform_6, window_bounds = array<i64: 1, 256>}, {pipeline_mode = #tpu.pipeline_mode<synchronous>, transform_indices = @transform_7, window_bounds = array<i64: 1, 256>}, {pipeline_mode = #tpu.pipeline_mode<synchronous>, transform_indices = @transform_8, window_bounds = array<i64: 256, 256>}, {pipeline_mode = #tpu.pipeline_mode<synchronous>, transform_indices = @transform_9, window_bounds = array<i64: 1, 256>}, {pipeline_mode = #tpu.pipeline_mode<synchronous>, transform_indices = @transform_10, window_bounds = array<i64: 256, 256>}, {pipeline_mode = #tpu.pipeline_mode<synchronous>, transform_indices = @transform_11, window_bounds = array<i64: 1, 256>}, {pipeline_mode = #tpu.pipeline_mode<synchronous>, transform_indices = @transform_12, window_bounds = array<i64: 256, 256>}, {pipeline_mode = #tpu.pipeline_mode<synchronous>, transform_indices = @transform_13, window_bounds = array<i64: 1, 256>}, {pipeline_mode = #tpu.pipeline_mode<synchronous>, transform_indices = @transform_14, window_bounds = array<i64: 256, 256>}, {pipeline_mode = #tpu.pipeline_mode<synchronous>, transform_indices = @transform_15, window_bounds = array<i64: 1, 256>}, {pipeline_mode = #tpu.pipeline_mode<synchronous>, transform_indices = @transform_16, window_bounds = array<i64: 1, 256>}, {pipeline_mode = #tpu.pipeline_mode<synchronous>, transform_indices = @transform_17, window_bounds = array<i64: 1, 256>}, {pipeline_mode = #tpu.pipeline_mode<synchronous>, transform_indices = @transform_18, window_bounds = array<i64: 256, 1024>}, {pipeline_mode = #tpu.pipeline_mode<synchronous>, transform_indices = @transform_19, window_bounds = array<i64: 1, 1024>}, {pipeline_mode = #tpu.pipeline_mode<synchronous>, transform_indices = @transform_20, window_bounds = array<i64: 1024, 256>}, {pipeline_mode = #tpu.pipeline_mode<synchronous>, transform_indices = @transform_21, window_bounds = array<i64: 1, 256>}, {pipeline_mode = #tpu.pipeline_mode<synchronous>, transform_indices = @transform_22, window_bounds = array<i64: 1, 256>}, {pipeline_mode = #tpu.pipeline_mode<synchronous>, transform_indices = @transform_23, window_bounds = array<i64: 1, 256>}, {pipeline_mode = #tpu.pipeline_mode<synchronous>, transform_indices = @transform_24, window_bounds = array<i64: 256, 128>}, {pipeline_mode = #tpu.pipeline_mode<synchronous>, transform_indices = @transform_25, window_bounds = array<i64: 1, 128>}, {transform_indices = @transform_26, window_bounds = array<i64: 1, 128, 4>}]} {
    %c0_i32 = arith.constant 0 : i32
    %0 = arith.cmpi eq, %arg1, %c0_i32 : i32
    %1 = arith.extui %0 : i1 to i32
    %c0_i32_0 = arith.constant 0 : i32
    %2 = arith.cmpi ne, %1, %c0_i32_0 : i32
    scf.if %2 {
      %c0_80 = arith.constant 0 : index
      %c0_81 = arith.constant 0 : index
      %c0_82 = arith.constant 0 : index
      %185 = vector.load %arg3[%c0_80, %c0_81, %c0_82] : memref<1x256x256xbf16, #tpu.memory_space<vmem>>, vector<1x256x256xbf16>
      %186 = vector.shape_cast %185 : vector<1x256x256xbf16> to vector<256x256xbf16>
      %187 = arith.extf %186 : vector<256x256xbf16> to vector<256x256xf32>
      %c0_83 = arith.constant 0 : index
      %c0_84 = arith.constant 0 : index
      %188 = vector.load %arg8[%c0_83, %c0_84] : memref<1x256xf32, #tpu.memory_space<vmem>>, vector<1x256xf32>
      %189 = vector.shape_cast %188 : vector<1x256xf32> to vector<256xf32>
      %c0_85 = arith.constant 0 : index
      %c0_86 = arith.constant 0 : index
      %190 = vector.load %arg9[%c0_85, %c0_86] : memref<1x256xf32, #tpu.memory_space<vmem>>, vector<1x256xf32>
      %191 = vector.shape_cast %190 : vector<1x256xf32> to vector<256xf32>
      %cst_87 = arith.constant dense<0.000000e+00> : vector<256xf32>
      %192 = vector.multi_reduction <add>, %187, %cst_87 [1] : vector<256x256xf32> to vector<256xf32>
      %193 = vector.shape_cast %192 : vector<256xf32> to vector<256x1xf32>
      %cst_88 = arith.constant 2.560000e+02 : f32
      %194 = vector.broadcast %cst_88 : f32 to vector<256x1xf32>
      %195 = arith.divf %193, %194 : vector<256x1xf32>
      %196 = vector.broadcast %195 : vector<256x1xf32> to vector<256x256xf32>
      %197 = arith.subf %187, %196 : vector<256x256xf32>
      %198 = arith.mulf %197, %197 : vector<256x256xf32>
      %cst_89 = arith.constant dense<0.000000e+00> : vector<256xf32>
      %199 = vector.multi_reduction <add>, %198, %cst_89 [1] : vector<256x256xf32> to vector<256xf32>
      %200 = vector.shape_cast %199 : vector<256xf32> to vector<256x1xf32>
      %cst_90 = arith.constant 2.560000e+02 : f32
      %201 = vector.broadcast %cst_90 : f32 to vector<256x1xf32>
      %202 = arith.divf %200, %201 : vector<256x1xf32>
      %cst_91 = arith.constant 9.99999974E-6 : f32
      %203 = vector.broadcast %cst_91 : f32 to vector<256x1xf32>
      %204 = arith.addf %202, %203 : vector<256x1xf32>
      %205 = math.rsqrt %204 : vector<256x1xf32>
      %206 = vector.broadcast %205 : vector<256x1xf32> to vector<256x256xf32>
      %207 = arith.mulf %197, %206 : vector<256x256xf32>
      %208 = vector.shape_cast %189 : vector<256xf32> to vector<1x256xf32>
      %209 = vector.broadcast %208 : vector<1x256xf32> to vector<256x256xf32>
      %210 = arith.mulf %207, %209 : vector<256x256xf32>
      %211 = vector.shape_cast %191 : vector<256xf32> to vector<1x256xf32>
      %212 = vector.broadcast %211 : vector<1x256xf32> to vector<256x256xf32>
      %213 = arith.addf %210, %212 : vector<256x256xf32>
      %214 = arith.truncf %213 : vector<256x256xf32> to vector<256x256xbf16>
      %c0_92 = arith.constant 0 : index
      %c0_93 = arith.constant 0 : index
      %215 = vector.load %arg12[%c0_92, %c0_93] : memref<256x256xbf16, #tpu.memory_space<vmem>>, vector<256x256xbf16>
      %cst_94 = arith.constant dense<0.000000e+00> : vector<256x256xf32>
      %216 = tpu.matmul %214, %215, %cst_94 {dimension_numbers = #tpu.dot_dimension_numbers<[1], [0], [0], [1], [0, 0, 1, 1], [], []>} : vector<256x256xbf16>, vector<256x256xbf16>, vector<256x256xf32> -> vector<256x256xf32>
      %c0_95 = arith.constant 0 : index
      %c0_96 = arith.constant 0 : index
      %217 = vector.load %arg13[%c0_95, %c0_96] : memref<1x256xf32, #tpu.memory_space<vmem>>, vector<1x256xf32>
      %218 = vector.shape_cast %217 : vector<1x256xf32> to vector<256xf32>
      %219 = vector.shape_cast %218 : vector<256xf32> to vector<1x256xf32>
      %220 = vector.broadcast %219 : vector<1x256xf32> to vector<256x256xf32>
      %221 = arith.addf %216, %220 : vector<256x256xf32>
      %c0_97 = arith.constant 0 : index
      %c0_98 = arith.constant 0 : index
      %222 = vector.load %arg14[%c0_97, %c0_98] : memref<256x256xbf16, #tpu.memory_space<vmem>>, vector<256x256xbf16>
      %cst_99 = arith.constant dense<0.000000e+00> : vector<256x256xf32>
      %223 = tpu.matmul %214, %222, %cst_99 {dimension_numbers = #tpu.dot_dimension_numbers<[1], [0], [0], [1], [0, 0, 1, 1], [], []>} : vector<256x256xbf16>, vector<256x256xbf16>, vector<256x256xf32> -> vector<256x256xf32>
      %c0_100 = arith.constant 0 : index
      %c0_101 = arith.constant 0 : index
      %224 = vector.load %arg15[%c0_100, %c0_101] : memref<1x256xf32, #tpu.memory_space<vmem>>, vector<1x256xf32>
      %225 = vector.shape_cast %224 : vector<1x256xf32> to vector<256xf32>
      %226 = vector.shape_cast %225 : vector<256xf32> to vector<1x256xf32>
      %227 = vector.broadcast %226 : vector<1x256xf32> to vector<256x256xf32>
      %228 = arith.addf %223, %227 : vector<256x256xf32>
      %229 = arith.truncf %221 : vector<256x256xf32> to vector<256x256xbf16>
      %c0_102 = arith.constant 0 : index
      %c0_103 = arith.constant 0 : index
      %230 = vector.load %arg29[%c0_102, %c0_103] : memref<256x256xbf16, #tpu.memory_space<vmem>>, vector<256x256xbf16>
      tpu.vector_store %arg29[%c0_102, %c0_103], %229 {strides = array<i32>} : memref<256x256xbf16, #tpu.memory_space<vmem>>, vector<256x256xbf16>,
      %231 = arith.truncf %228 : vector<256x256xf32> to vector<256x256xbf16>
      %c0_104 = arith.constant 0 : index
      %c0_105 = arith.constant 0 : index
      %232 = vector.load %arg30[%c0_104, %c0_105] : memref<256x256xbf16, #tpu.memory_space<vmem>>, vector<256x256xbf16>
      tpu.vector_store %arg30[%c0_104, %c0_105], %231 {strides = array<i32>} : memref<256x256xbf16, #tpu.memory_space<vmem>>, vector<256x256xbf16>,
    } else {
    }
    %c0 = arith.constant 0 : index
    %c0_1 = arith.constant 0 : index
    %c0_2 = arith.constant 0 : index
    %3 = vector.load %arg2[%c0, %c0_1, %c0_2] : memref<1x128x51xbf16, #tpu.memory_space<vmem>>, vector<1x128x51xbf16>
    %4 = vector.shape_cast %3 : vector<1x128x51xbf16> to vector<128x51xbf16>
    %c0_3 = arith.constant 0 : index
    %c0_4 = arith.constant 0 : index
    %5 = vector.load %arg4[%c0_3, %c0_4] : memref<51x256xbf16, #tpu.memory_space<vmem>>, vector<51x256xbf16>
    %cst = arith.constant dense<0.000000e+00> : vector<128x256xf32>
    %6 = tpu.matmul %4, %5, %cst {dimension_numbers = #tpu.dot_dimension_numbers<[1], [0], [0], [1], [0, 0, 1, 1], [], []>} : vector<128x51xbf16>, vector<51x256xbf16>, vector<128x256xf32> -> vector<128x256xf32>
    %c0_5 = arith.constant 0 : index
    %c0_6 = arith.constant 0 : index
    %7 = vector.load %arg5[%c0_5, %c0_6] : memref<1x256xf32, #tpu.memory_space<vmem>>, vector<1x256xf32>
    %8 = vector.shape_cast %7 : vector<1x256xf32> to vector<256xf32>
    %9 = vector.shape_cast %8 : vector<256xf32> to vector<1x256xf32>
    %10 = vector.broadcast %9 : vector<1x256xf32> to vector<128x256xf32>
    %11 = arith.addf %6, %10 : vector<128x256xf32>
    %c0_7 = arith.constant 0 : index
    %c0_8 = arith.constant 0 : index
    %12 = vector.load %arg6[%c0_7, %c0_8] : memref<1x256xf32, #tpu.memory_space<vmem>>, vector<1x256xf32>
    %13 = vector.shape_cast %12 : vector<1x256xf32> to vector<256xf32>
    %c0_9 = arith.constant 0 : index
    %c0_10 = arith.constant 0 : index
    %14 = vector.load %arg7[%c0_9, %c0_10] : memref<1x256xf32, #tpu.memory_space<vmem>>, vector<1x256xf32>
    %15 = vector.shape_cast %14 : vector<1x256xf32> to vector<256xf32>
    %cst_11 = arith.constant dense<0.000000e+00> : vector<128xf32>
    %16 = vector.multi_reduction <add>, %11, %cst_11 [1] : vector<128x256xf32> to vector<128xf32>
    %17 = vector.shape_cast %16 : vector<128xf32> to vector<128x1xf32>
    %cst_12 = arith.constant 2.560000e+02 : f32
    %18 = vector.broadcast %cst_12 : f32 to vector<128x1xf32>
    %19 = arith.divf %17, %18 : vector<128x1xf32>
    %20 = vector.broadcast %19 : vector<128x1xf32> to vector<128x256xf32>
    %21 = arith.subf %11, %20 : vector<128x256xf32>
    %22 = arith.mulf %21, %21 : vector<128x256xf32>
    %cst_13 = arith.constant dense<0.000000e+00> : vector<128xf32>
    %23 = vector.multi_reduction <add>, %22, %cst_13 [1] : vector<128x256xf32> to vector<128xf32>
    %24 = vector.shape_cast %23 : vector<128xf32> to vector<128x1xf32>
    %cst_14 = arith.constant 2.560000e+02 : f32
    %25 = vector.broadcast %cst_14 : f32 to vector<128x1xf32>
    %26 = arith.divf %24, %25 : vector<128x1xf32>
    %cst_15 = arith.constant 9.99999974E-6 : f32
    %27 = vector.broadcast %cst_15 : f32 to vector<128x1xf32>
    %28 = arith.addf %26, %27 : vector<128x1xf32>
    %29 = math.rsqrt %28 : vector<128x1xf32>
    %30 = vector.broadcast %29 : vector<128x1xf32> to vector<128x256xf32>
    %31 = arith.mulf %21, %30 : vector<128x256xf32>
    %32 = vector.shape_cast %13 : vector<256xf32> to vector<1x256xf32>
    %33 = vector.broadcast %32 : vector<1x256xf32> to vector<128x256xf32>
    %34 = arith.mulf %31, %33 : vector<128x256xf32>
    %35 = vector.shape_cast %15 : vector<256xf32> to vector<1x256xf32>
    %36 = vector.broadcast %35 : vector<1x256xf32> to vector<128x256xf32>
    %37 = arith.addf %34, %36 : vector<128x256xf32>
    %38 = arith.truncf %37 : vector<128x256xf32> to vector<128x256xbf16>
    %c0_16 = arith.constant 0 : index
    %c0_17 = arith.constant 0 : index
    %39 = vector.load %arg10[%c0_16, %c0_17] : memref<256x256xbf16, #tpu.memory_space<vmem>>, vector<256x256xbf16>
    %cst_18 = arith.constant dense<0.000000e+00> : vector<128x256xf32>
    %40 = tpu.matmul %38, %39, %cst_18 {dimension_numbers = #tpu.dot_dimension_numbers<[1], [0], [0], [1], [0, 0, 1, 1], [], []>} : vector<128x256xbf16>, vector<256x256xbf16>, vector<128x256xf32> -> vector<128x256xf32>
    %c0_19 = arith.constant 0 : index
    %c0_20 = arith.constant 0 : index
    %41 = vector.load %arg11[%c0_19, %c0_20] : memref<1x256xf32, #tpu.memory_space<vmem>>, vector<1x256xf32>
    %42 = vector.shape_cast %41 : vector<1x256xf32> to vector<256xf32>
    %43 = vector.shape_cast %42 : vector<256xf32> to vector<1x256xf32>
    %44 = vector.broadcast %43 : vector<1x256xf32> to vector<128x256xf32>
    %45 = arith.addf %40, %44 : vector<128x256xf32>
    %46 = arith.truncf %45 : vector<128x256xf32> to vector<128x256xbf16>
    %c0_21 = arith.constant 0 : index
    %c0_22 = arith.constant 0 : index
    %47 = vector.load %arg29[%c0_21, %c0_22] : memref<256x256xbf16, #tpu.memory_space<vmem>>, vector<256x256xbf16>
    %c0_23 = arith.constant 0 : index
    %c0_24 = arith.constant 0 : index
    %48 = vector.load %arg30[%c0_23, %c0_24] : memref<256x256xbf16, #tpu.memory_space<vmem>>, vector<256x256xbf16>
    %cst_25 = arith.constant 0.000000e+00 : f32
    %49 = vector.broadcast %cst_25 : f32 to vector<128x256xf32>
    %50 = vector.extract_strided_slice %46 {offsets = [0, 0], sizes = [128, 128], strides = [1, 1]} : vector<128x256xbf16> to vector<128x128xbf16>
    %51 = vector.extract_strided_slice %47 {offsets = [0, 0], sizes = [256, 128], strides = [1, 1]} : vector<256x256xbf16> to vector<256x128xbf16>
    %52 = vector.extract_strided_slice %48 {offsets = [0, 0], sizes = [256, 128], strides = [1, 1]} : vector<256x256xbf16> to vector<256x128xbf16>
    "tpu.trace_start"() <{level = 10 : i32, message = "nd,md->nm"}> : () -> ()
    %cst_26 = arith.constant dense<0.000000e+00> : vector<128x256xf32>
    %53 = tpu.matmul %50, %51, %cst_26 {dimension_numbers = #tpu.dot_dimension_numbers<[1], [1], [0], [0], [0, 0, 1, 0], [], []>} : vector<128x128xbf16>, vector<256x128xbf16>, vector<128x256xf32> -> vector<128x256xf32>
    "tpu.trace_stop"() : () -> ()
    %cst_27 = arith.constant dense<0xFF800000> : vector<128xf32>
    %54 = vector.multi_reduction <maximumf>, %53, %cst_27 [1] : vector<128x256xf32> to vector<128xf32>
    %55 = vector.shape_cast %54 : vector<128xf32> to vector<128x1xf32>
    %56 = vector.broadcast %55 : vector<128x1xf32> to vector<128x256xf32>
    %57 = arith.subf %53, %56 : vector<128x256xf32>
    %58 = math.exp %57 : vector<128x256xf32>
    %cst_28 = arith.constant dense<0.000000e+00> : vector<128xf32>
    %59 = vector.multi_reduction <add>, %58, %cst_28 [1] : vector<128x256xf32> to vector<128xf32>
    %60 = vector.shape_cast %59 : vector<128xf32> to vector<128x1xf32>
    %61 = tpu.reciprocal %60 {approx = true} : vector<128x1xf32> -> vector<128x1xf32>
    %62 = vector.broadcast %61 : vector<128x1xf32> to vector<128x256xf32>
    %63 = arith.mulf %58, %62 : vector<128x256xf32>
    %64 = arith.truncf %63 : vector<128x256xf32> to vector<128x256xbf16>
    %cst_29 = arith.constant dense<0.000000e+00> : vector<128x128xf32>
    %65 = tpu.matmul %64, %52, %cst_29 {dimension_numbers = #tpu.dot_dimension_numbers<[1], [0], [0], [1], [0, 0, 1, 1], [], []>} : vector<128x256xbf16>, vector<256x128xbf16>, vector<128x128xf32> -> vector<128x128xf32>
    %66 = arith.truncf %65 : vector<128x128xf32> to vector<128x128xbf16>
    %c0_30 = arith.constant 0 : index
    %c0_31 = arith.constant 0 : index
    %67 = vector.load %arg16[%c0_30, %c0_31] : memref<256x256xbf16, #tpu.memory_space<vmem>>, vector<128x256xbf16>
    %cst_32 = arith.constant dense<0.000000e+00> : vector<128x256xf32>
    %68 = tpu.matmul %66, %67, %cst_32 {dimension_numbers = #tpu.dot_dimension_numbers<[1], [0], [0], [1], [0, 0, 1, 1], [], []>} : vector<128x128xbf16>, vector<128x256xbf16>, vector<128x256xf32> -> vector<128x256xf32>
    %69 = arith.addf %49, %68 : vector<128x256xf32>
    %70 = vector.extract_strided_slice %46 {offsets = [0, 128], sizes = [128, 128], strides = [1, 1]} : vector<128x256xbf16> to vector<128x128xbf16>
    %71 = vector.extract_strided_slice %47 {offsets = [0, 128], sizes = [256, 128], strides = [1, 1]} : vector<256x256xbf16> to vector<256x128xbf16>
    %72 = vector.extract_strided_slice %48 {offsets = [0, 128], sizes = [256, 128], strides = [1, 1]} : vector<256x256xbf16> to vector<256x128xbf16>
    "tpu.trace_start"() <{level = 10 : i32, message = "nd,md->nm"}> : () -> ()
    %cst_33 = arith.constant dense<0.000000e+00> : vector<128x256xf32>
    %73 = tpu.matmul %70, %71, %cst_33 {dimension_numbers = #tpu.dot_dimension_numbers<[1], [1], [0], [0], [0, 0, 1, 0], [], []>} : vector<128x128xbf16>, vector<256x128xbf16>, vector<128x256xf32> -> vector<128x256xf32>
    "tpu.trace_stop"() : () -> ()
    %cst_34 = arith.constant dense<0xFF800000> : vector<128xf32>
    %74 = vector.multi_reduction <maximumf>, %73, %cst_34 [1] : vector<128x256xf32> to vector<128xf32>
    %75 = vector.shape_cast %74 : vector<128xf32> to vector<128x1xf32>
    %76 = vector.broadcast %75 : vector<128x1xf32> to vector<128x256xf32>
    %77 = arith.subf %73, %76 : vector<128x256xf32>
    %78 = math.exp %77 : vector<128x256xf32>
    %cst_35 = arith.constant dense<0.000000e+00> : vector<128xf32>
    %79 = vector.multi_reduction <add>, %78, %cst_35 [1] : vector<128x256xf32> to vector<128xf32>
    %80 = vector.shape_cast %79 : vector<128xf32> to vector<128x1xf32>
    %81 = tpu.reciprocal %80 {approx = true} : vector<128x1xf32> -> vector<128x1xf32>
    %82 = vector.broadcast %81 : vector<128x1xf32> to vector<128x256xf32>
    %83 = arith.mulf %78, %82 : vector<128x256xf32>
    %84 = arith.truncf %83 : vector<128x256xf32> to vector<128x256xbf16>
    %cst_36 = arith.constant dense<0.000000e+00> : vector<128x128xf32>
    %85 = tpu.matmul %84, %72, %cst_36 {dimension_numbers = #tpu.dot_dimension_numbers<[1], [0], [0], [1], [0, 0, 1, 1], [], []>} : vector<128x256xbf16>, vector<256x128xbf16>, vector<128x128xf32> -> vector<128x128xf32>
    %86 = arith.truncf %85 : vector<128x128xf32> to vector<128x128xbf16>
    %c128 = arith.constant 128 : index
    %c0_37 = arith.constant 0 : index
    %87 = vector.load %arg16[%c128, %c0_37] : memref<256x256xbf16, #tpu.memory_space<vmem>>, vector<128x256xbf16>
    %cst_38 = arith.constant dense<0.000000e+00> : vector<128x256xf32>
    %88 = tpu.matmul %86, %87, %cst_38 {dimension_numbers = #tpu.dot_dimension_numbers<[1], [0], [0], [1], [0, 0, 1, 1], [], []>} : vector<128x128xbf16>, vector<128x256xbf16>, vector<128x256xf32> -> vector<128x256xf32>
    %89 = arith.addf %69, %88 : vector<128x256xf32>
    %c0_39 = arith.constant 0 : index
    %c0_40 = arith.constant 0 : index
    %90 = vector.load %arg17[%c0_39, %c0_40] : memref<1x256xf32, #tpu.memory_space<vmem>>, vector<1x256xf32>
    %91 = vector.shape_cast %90 : vector<1x256xf32> to vector<256xf32>
    %92 = vector.shape_cast %91 : vector<256xf32> to vector<1x256xf32>
    %93 = vector.broadcast %92 : vector<1x256xf32> to vector<128x256xf32>
    %94 = arith.addf %89, %93 : vector<128x256xf32>
    %95 = arith.addf %11, %94 : vector<128x256xf32>
    %c0_41 = arith.constant 0 : index
    %c0_42 = arith.constant 0 : index
    %96 = vector.load %arg18[%c0_41, %c0_42] : memref<1x256xf32, #tpu.memory_space<vmem>>, vector<1x256xf32>
    %97 = vector.shape_cast %96 : vector<1x256xf32> to vector<256xf32>
    %c0_43 = arith.constant 0 : index
    %c0_44 = arith.constant 0 : index
    %98 = vector.load %arg19[%c0_43, %c0_44] : memref<1x256xf32, #tpu.memory_space<vmem>>, vector<1x256xf32>
    %99 = vector.shape_cast %98 : vector<1x256xf32> to vector<256xf32>
    %cst_45 = arith.constant dense<0.000000e+00> : vector<128xf32>
    %100 = vector.multi_reduction <add>, %95, %cst_45 [1] : vector<128x256xf32> to vector<128xf32>
    %101 = vector.shape_cast %100 : vector<128xf32> to vector<128x1xf32>
    %cst_46 = arith.constant 2.560000e+02 : f32
    %102 = vector.broadcast %cst_46 : f32 to vector<128x1xf32>
    %103 = arith.divf %101, %102 : vector<128x1xf32>
    %104 = vector.broadcast %103 : vector<128x1xf32> to vector<128x256xf32>
    %105 = arith.subf %95, %104 : vector<128x256xf32>
    %106 = arith.mulf %105, %105 : vector<128x256xf32>
    %cst_47 = arith.constant dense<0.000000e+00> : vector<128xf32>
    %107 = vector.multi_reduction <add>, %106, %cst_47 [1] : vector<128x256xf32> to vector<128xf32>
    %108 = vector.shape_cast %107 : vector<128xf32> to vector<128x1xf32>
    %cst_48 = arith.constant 2.560000e+02 : f32
    %109 = vector.broadcast %cst_48 : f32 to vector<128x1xf32>
    %110 = arith.divf %108, %109 : vector<128x1xf32>
    %cst_49 = arith.constant 9.99999974E-6 : f32
    %111 = vector.broadcast %cst_49 : f32 to vector<128x1xf32>
    %112 = arith.addf %110, %111 : vector<128x1xf32>
    %113 = math.rsqrt %112 : vector<128x1xf32>
    %114 = vector.broadcast %113 : vector<128x1xf32> to vector<128x256xf32>
    %115 = arith.mulf %105, %114 : vector<128x256xf32>
    %116 = vector.shape_cast %97 : vector<256xf32> to vector<1x256xf32>
    %117 = vector.broadcast %116 : vector<1x256xf32> to vector<128x256xf32>
    %118 = arith.mulf %115, %117 : vector<128x256xf32>
    %119 = vector.shape_cast %99 : vector<256xf32> to vector<1x256xf32>
    %120 = vector.broadcast %119 : vector<1x256xf32> to vector<128x256xf32>
    %121 = arith.addf %118, %120 : vector<128x256xf32>
    %122 = arith.truncf %121 : vector<128x256xf32> to vector<128x256xbf16>
    %c0_50 = arith.constant 0 : index
    %c0_51 = arith.constant 0 : index
    %123 = vector.load %arg20[%c0_50, %c0_51] : memref<256x1024xbf16, #tpu.memory_space<vmem>>, vector<256x1024xbf16>
    %cst_52 = arith.constant dense<0.000000e+00> : vector<128x1024xf32>
    %124 = tpu.matmul %122, %123, %cst_52 {dimension_numbers = #tpu.dot_dimension_numbers<[1], [0], [0], [1], [0, 0, 1, 1], [], []>} : vector<128x256xbf16>, vector<256x1024xbf16>, vector<128x1024xf32> -> vector<128x1024xf32>
    %c0_53 = arith.constant 0 : index
    %c0_54 = arith.constant 0 : index
    %125 = vector.load %arg21[%c0_53, %c0_54] : memref<1x1024xf32, #tpu.memory_space<vmem>>, vector<1x1024xf32>
    %126 = vector.shape_cast %125 : vector<1x1024xf32> to vector<1024xf32>
    %127 = vector.shape_cast %126 : vector<1024xf32> to vector<1x1024xf32>
    %128 = vector.broadcast %127 : vector<1x1024xf32> to vector<128x1024xf32>
    %129 = arith.addf %124, %128 : vector<128x1024xf32>
    %cst_55 = arith.constant 5.000000e-01 : f32
    %130 = vector.broadcast %cst_55 : f32 to vector<128x1024xf32>
    %131 = arith.mulf %130, %129 : vector<128x1024xf32>
    %cst_56 = arith.constant 0.707106769 : f32
    %132 = vector.broadcast %cst_56 : f32 to vector<128x1024xf32>
    %133 = arith.mulf %129, %132 : vector<128x1024xf32>
    %134 = math.erf %133 : vector<128x1024xf32>
    %cst_57 = arith.constant 1.000000e+00 : f32
    %135 = vector.broadcast %cst_57 : f32 to vector<128x1024xf32>
    %136 = arith.addf %135, %134 : vector<128x1024xf32>
    %137 = arith.mulf %131, %136 : vector<128x1024xf32>
    %138 = arith.truncf %137 : vector<128x1024xf32> to vector<128x1024xbf16>
    %c0_58 = arith.constant 0 : index
    %c0_59 = arith.constant 0 : index
    %139 = vector.load %arg22[%c0_58, %c0_59] : memref<1024x256xbf16, #tpu.memory_space<vmem>>, vector<1024x256xbf16>
    %cst_60 = arith.constant dense<0.000000e+00> : vector<128x256xf32>
    %140 = tpu.matmul %138, %139, %cst_60 {dimension_numbers = #tpu.dot_dimension_numbers<[1], [0], [0], [1], [0, 0, 1, 1], [], []>} : vector<128x1024xbf16>, vector<1024x256xbf16>, vector<128x256xf32> -> vector<128x256xf32>
    %c0_61 = arith.constant 0 : index
    %c0_62 = arith.constant 0 : index
    %141 = vector.load %arg23[%c0_61, %c0_62] : memref<1x256xf32, #tpu.memory_space<vmem>>, vector<1x256xf32>
    %142 = vector.shape_cast %141 : vector<1x256xf32> to vector<256xf32>
    %143 = vector.shape_cast %142 : vector<256xf32> to vector<1x256xf32>
    %144 = vector.broadcast %143 : vector<1x256xf32> to vector<128x256xf32>
    %145 = arith.addf %140, %144 : vector<128x256xf32>
    %146 = arith.addf %95, %145 : vector<128x256xf32>
    %c0_63 = arith.constant 0 : index
    %c0_64 = arith.constant 0 : index
    %147 = vector.load %arg24[%c0_63, %c0_64] : memref<1x256xf32, #tpu.memory_space<vmem>>, vector<1x256xf32>
    %148 = vector.shape_cast %147 : vector<1x256xf32> to vector<256xf32>
    %c0_65 = arith.constant 0 : index
    %c0_66 = arith.constant 0 : index
    %149 = vector.load %arg25[%c0_65, %c0_66] : memref<1x256xf32, #tpu.memory_space<vmem>>, vector<1x256xf32>
    %150 = vector.shape_cast %149 : vector<1x256xf32> to vector<256xf32>
    %cst_67 = arith.constant dense<0.000000e+00> : vector<128xf32>
    %151 = vector.multi_reduction <add>, %146, %cst_67 [1] : vector<128x256xf32> to vector<128xf32>
    %152 = vector.shape_cast %151 : vector<128xf32> to vector<128x1xf32>
    %cst_68 = arith.constant 2.560000e+02 : f32
    %153 = vector.broadcast %cst_68 : f32 to vector<128x1xf32>
    %154 = arith.divf %152, %153 : vector<128x1xf32>
    %155 = vector.broadcast %154 : vector<128x1xf32> to vector<128x256xf32>
    %156 = arith.subf %146, %155 : vector<128x256xf32>
    %157 = arith.mulf %156, %156 : vector<128x256xf32>
    %cst_69 = arith.constant dense<0.000000e+00> : vector<128xf32>
    %158 = vector.multi_reduction <add>, %157, %cst_69 [1] : vector<128x256xf32> to vector<128xf32>
    %159 = vector.shape_cast %158 : vector<128xf32> to vector<128x1xf32>
    %cst_70 = arith.constant 2.560000e+02 : f32
    %160 = vector.broadcast %cst_70 : f32 to vector<128x1xf32>
    %161 = arith.divf %159, %160 : vector<128x1xf32>
    %cst_71 = arith.constant 9.99999974E-6 : f32
    %162 = vector.broadcast %cst_71 : f32 to vector<128x1xf32>
    %163 = arith.addf %161, %162 : vector<128x1xf32>
    %164 = math.rsqrt %163 : vector<128x1xf32>
    %165 = vector.broadcast %164 : vector<128x1xf32> to vector<128x256xf32>
    %166 = arith.mulf %156, %165 : vector<128x256xf32>
    %167 = vector.shape_cast %148 : vector<256xf32> to vector<1x256xf32>
    %168 = vector.broadcast %167 : vector<1x256xf32> to vector<128x256xf32>
    %169 = arith.mulf %166, %168 : vector<128x256xf32>
    %170 = vector.shape_cast %150 : vector<256xf32> to vector<1x256xf32>
    %171 = vector.broadcast %170 : vector<1x256xf32> to vector<128x256xf32>
    %172 = arith.addf %169, %171 : vector<128x256xf32>
    %173 = arith.truncf %172 : vector<128x256xf32> to vector<128x256xbf16>
    %c0_72 = arith.constant 0 : index
    %c0_73 = arith.constant 0 : index
    %174 = vector.load %arg26[%c0_72, %c0_73] : memref<256x128xbf16, #tpu.memory_space<vmem>>, vector<256x128xbf16>
    %cst_74 = arith.constant dense<0.000000e+00> : vector<128x128xf32>
    %175 = tpu.matmul %173, %174, %cst_74 {dimension_numbers = #tpu.dot_dimension_numbers<[1], [0], [0], [1], [0, 0, 1, 1], [], []>} : vector<128x256xbf16>, vector<256x128xbf16>, vector<128x128xf32> -> vector<128x128xf32>
    %c0_75 = arith.constant 0 : index
    %c0_76 = arith.constant 0 : index
    %176 = vector.load %arg27[%c0_75, %c0_76] : memref<1x128xf32, #tpu.memory_space<vmem>>, vector<1x128xf32>
    %177 = vector.shape_cast %176 : vector<1x128xf32> to vector<128xf32>
    %178 = vector.shape_cast %177 : vector<128xf32> to vector<1x128xf32>
    %179 = vector.broadcast %178 : vector<1x128xf32> to vector<128x128xf32>
    %180 = arith.addf %175, %179 : vector<128x128xf32>
    %181 = vector.extract_strided_slice %180 {offsets = [0, 0], sizes = [128, 4], strides = [1, 1]} : vector<128x128xf32> to vector<128x4xf32>
    %c0_77 = arith.constant 0 : index
    %c0_78 = arith.constant 0 : index
    %c0_79 = arith.constant 0 : index
    %182 = vector.load %arg28[%c0_77, %c0_78, %c0_79] : memref<1x128x4xf32, #tpu.memory_space<vmem>>, vector<1x128x4xf32>
    %183 = vector.shape_cast %182 : vector<1x128x4xf32> to vector<128x4xf32>
    %184 = vector.shape_cast %181 : vector<128x4xf32> to vector<1x128x4xf32>
    tpu.vector_store %arg28[%c0_77, %c0_78, %c0_79], %184 {strides = array<i32>} : memref<1x128x4xf32, #tpu.memory_space<vmem>>, vector<1x128x4xf32>,
    return
  }
  func.func @transform_0(%arg0: i32, %arg1: i32) -> (i32, i32, i32) {
    %c0_i32 = arith.constant 0 : i32
    %c0_i32_0 = arith.constant 0 : i32
    return %arg0, %arg1, %c0_i32 : i32, i32, i32
  }
  func.func @transform_1(%arg0: i32, %arg1: i32) -> (i32, i32, i32) {
    %c0_i32 = arith.constant 0 : i32
    %c0_i32_0 = arith.constant 0 : i32
    %c0_i32_1 = arith.constant 0 : i32
    return %arg0, %c0_i32, %c0_i32_0 : i32, i32, i32
  }
  func.func @transform_2(%arg0: i32, %arg1: i32) -> (i32, i32) {
    %c0_i32 = arith.constant 0 : i32
    %c0_i32_0 = arith.constant 0 : i32
    %c0_i32_1 = arith.constant 0 : i32
    return %c0_i32, %c0_i32_0 : i32, i32
  }
  func.func @transform_3(%arg0: i32, %arg1: i32) -> (i32, i32) {
    %c0_i32 = arith.constant 0 : i32
    %c0_i32_0 = arith.constant 0 : i32
    %c0_i32_1 = arith.constant 0 : i32
    return %c0_i32, %c0_i32_0 : i32, i32
  }
  func.func @transform_4(%arg0: i32, %arg1: i32) -> (i32, i32) {
    %c0_i32 = arith.constant 0 : i32
    %c0_i32_0 = arith.constant 0 : i32
    %c0_i32_1 = arith.constant 0 : i32
    return %c0_i32, %c0_i32_0 : i32, i32
  }
  func.func @transform_5(%arg0: i32, %arg1: i32) -> (i32, i32) {
    %c0_i32 = arith.constant 0 : i32
    %c0_i32_0 = arith.constant 0 : i32
    %c0_i32_1 = arith.constant 0 : i32
    return %c0_i32, %c0_i32_0 : i32, i32
  }
  func.func @transform_6(%arg0: i32, %arg1: i32) -> (i32, i32) {
    %c0_i32 = arith.constant 0 : i32
    %c0_i32_0 = arith.constant 0 : i32
    %c0_i32_1 = arith.constant 0 : i32
    return %c0_i32, %c0_i32_0 : i32, i32
  }
  func.func @transform_7(%arg0: i32, %arg1: i32) -> (i32, i32) {
    %c0_i32 = arith.constant 0 : i32
    %c0_i32_0 = arith.constant 0 : i32
    %c0_i32_1 = arith.constant 0 : i32
    return %c0_i32, %c0_i32_0 : i32, i32
  }
  func.func @transform_8(%arg0: i32, %arg1: i32) -> (i32, i32) {
    %c0_i32 = arith.constant 0 : i32
    %c0_i32_0 = arith.constant 0 : i32
    %c0_i32_1 = arith.constant 0 : i32
    return %c0_i32, %c0_i32_0 : i32, i32
  }
  func.func @transform_9(%arg0: i32, %arg1: i32) -> (i32, i32) {
    %c0_i32 = arith.constant 0 : i32
    %c0_i32_0 = arith.constant 0 : i32
    %c0_i32_1 = arith.constant 0 : i32
    return %c0_i32, %c0_i32_0 : i32, i32
  }
  func.func @transform_10(%arg0: i32, %arg1: i32) -> (i32, i32) {
    %c0_i32 = arith.constant 0 : i32
    %c0_i32_0 = arith.constant 0 : i32
    %c0_i32_1 = arith.constant 0 : i32
    return %c0_i32, %c0_i32_0 : i32, i32
  }
  func.func @transform_11(%arg0: i32, %arg1: i32) -> (i32, i32) {
    %c0_i32 = arith.constant 0 : i32
    %c0_i32_0 = arith.constant 0 : i32
    %c0_i32_1 = arith.constant 0 : i32
    return %c0_i32, %c0_i32_0 : i32, i32
  }
  func.func @transform_12(%arg0: i32, %arg1: i32) -> (i32, i32) {
    %c0_i32 = arith.constant 0 : i32
    %c0_i32_0 = arith.constant 0 : i32
    %c0_i32_1 = arith.constant 0 : i32
    return %c0_i32, %c0_i32_0 : i32, i32
  }
  func.func @transform_13(%arg0: i32, %arg1: i32) -> (i32, i32) {
    %c0_i32 = arith.constant 0 : i32
    %c0_i32_0 = arith.constant 0 : i32
    %c0_i32_1 = arith.constant 0 : i32
    return %c0_i32, %c0_i32_0 : i32, i32
  }
  func.func @transform_14(%arg0: i32, %arg1: i32) -> (i32, i32) {
    %c0_i32 = arith.constant 0 : i32
    %c0_i32_0 = arith.constant 0 : i32
    %c0_i32_1 = arith.constant 0 : i32
    return %c0_i32, %c0_i32_0 : i32, i32
  }
  func.func @transform_15(%arg0: i32, %arg1: i32) -> (i32, i32) {
    %c0_i32 = arith.constant 0 : i32
    %c0_i32_0 = arith.constant 0 : i32
    %c0_i32_1 = arith.constant 0 : i32
    return %c0_i32, %c0_i32_0 : i32, i32
  }
  func.func @transform_16(%arg0: i32, %arg1: i32) -> (i32, i32) {
    %c0_i32 = arith.constant 0 : i32
    %c0_i32_0 = arith.constant 0 : i32
    %c0_i32_1 = arith.constant 0 : i32
    return %c0_i32, %c0_i32_0 : i32, i32
  }
  func.func @transform_17(%arg0: i32, %arg1: i32) -> (i32, i32) {
    %c0_i32 = arith.constant 0 : i32
    %c0_i32_0 = arith.constant 0 : i32
    %c0_i32_1 = arith.constant 0 : i32
    return %c0_i32, %c0_i32_0 : i32, i32
  }
  func.func @transform_18(%arg0: i32, %arg1: i32) -> (i32, i32) {
    %c0_i32 = arith.constant 0 : i32
    %c0_i32_0 = arith.constant 0 : i32
    %c0_i32_1 = arith.constant 0 : i32
    return %c0_i32, %c0_i32_0 : i32, i32
  }
  func.func @transform_19(%arg0: i32, %arg1: i32) -> (i32, i32) {
    %c0_i32 = arith.constant 0 : i32
    %c0_i32_0 = arith.constant 0 : i32
    %c0_i32_1 = arith.constant 0 : i32
    return %c0_i32, %c0_i32_0 : i32, i32
  }
  func.func @transform_20(%arg0: i32, %arg1: i32) -> (i32, i32) {
    %c0_i32 = arith.constant 0 : i32
    %c0_i32_0 = arith.constant 0 : i32
    %c0_i32_1 = arith.constant 0 : i32
    return %c0_i32, %c0_i32_0 : i32, i32
  }
  func.func @transform_21(%arg0: i32, %arg1: i32) -> (i32, i32) {
    %c0_i32 = arith.constant 0 : i32
    %c0_i32_0 = arith.constant 0 : i32
    %c0_i32_1 = arith.constant 0 : i32
    return %c0_i32, %c0_i32_0 : i32, i32
  }
  func.func @transform_22(%arg0: i32, %arg1: i32) -> (i32, i32) {
    %c0_i32 = arith.constant 0 : i32
    %c0_i32_0 = arith.constant 0 : i32
    %c0_i32_1 = arith.constant 0 : i32
    return %c0_i32, %c0_i32_0 : i32, i32
  }
  func.func @transform_23(%arg0: i32, %arg1: i32) -> (i32, i32) {
    %c0_i32 = arith.constant 0 : i32
    %c0_i32_0 = arith.constant 0 : i32
    %c0_i32_1 = arith.constant 0 : i32
    return %c0_i32, %c0_i32_0 : i32, i32
  }
  func.func @transform_24(%arg0: i32, %arg1: i32) -> (i32, i32) {
    %c0_i32 = arith.constant 0 : i32
    %c0_i32_0 = arith.constant 0 : i32
    %c0_i32_1 = arith.constant 0 : i32
    return %c0_i32, %c0_i32_0 : i32, i32
  }
  func.func @transform_25(%arg0: i32, %arg1: i32) -> (i32, i32) {
    %c0_i32 = arith.constant 0 : i32
    %c0_i32_0 = arith.constant 0 : i32
    %c0_i32_1 = arith.constant 0 : i32
    return %c0_i32, %c0_i32_0 : i32, i32
  }
  func.func @transform_26(%arg0: i32, %arg1: i32) -> (i32, i32, i32) {
    %c0_i32 = arith.constant 0 : i32
    %c0_i32_0 = arith.constant 0 : i32
    return %arg0, %arg1, %c0_i32 : i32, i32, i32
  }
}

</mosaic_0001>

<bundles_post_ra>
// kernel: tpu_custom_call.1
= control target key start
LH: loop header
LB: loop body
LE: loop exit
PB: predicated region body
PF: predicated region fallthrough
CT: control target
= control target key end

     0   :  { %s17435_s0 = inlined_call_operand.vmem [shape: bf16[2,256,51], index: 0, kind: input, shape index: {}]   ;;  %s17436_s1 = inlined_call_operand.hbm [shape: bf16[2,256,256], index: 1, kind: input, shape index: {}]   ;;  %s17437_s2 = inlined_call_operand.hbm [shape: bf16[51,256], index: 2, kind: input, shape index: {}]   ;;  %s17438_s3 = inlined_call_operand.vmem [shape: f32[1,256], index: 3, kind: input, shape index: {}]   ;;  %s17439_s4 = inlined_call_operand.hbm [shape: f32[1,256], index: 4, kind: input, shape index: {}]   ;;  %s17440_s5 = inlined_call_operand.hbm [shape: f32[1,256], index: 5, kind: input, shape index: {}]   ;;  %s17441_s6 = inlined_call_operand.hbm [shape: f32[1,256], index: 6, kind: input, shape index: {}]   ;;  %s17442_s7 = inlined_call_operand.hbm [shape: f32[1,256], index: 7, kind: input, shape index: {}]   ;;  %s17443_s8 = inlined_call_operand.vmem [shape: bf16[256,256], index: 8, kind: input, shape index: {}]   ;;  %s17444_s9 = inlined_call_operand.hbm [shape: f32[1,256], index: 9, kind: input, shape index: {}]   ;;  %s17445_s10 = inlined_call_operand.hbm [shape: bf16[256,256], index: 10, kind: input, shape index: {}]   ;;  %s17446_s11 = inlined_call_operand.hbm [shape: f32[1,256], index: 11, kind: input, shape index: {}]   ;;  %s17447_s12 = inlined_call_operand.hbm [shape: bf16[256,256], index: 12, kind: input, shape index: {}]   ;;  %s17448_s13 = inlined_call_operand.vmem [shape: f32[1,256], index: 13, kind: input, shape index: {}]   ;;  %s17449_s14 = inlined_call_operand.hbm [shape: bf16[256,256], index: 14, kind: input, shape index: {}]   ;;  %s17450_s15 = inlined_call_operand.vmem [shape: f32[1,256], index: 15, kind: input, shape index: {}]   ;;  %s17451_s16 = inlined_call_operand.vmem [shape: f32[1,256], index: 16, kind: input, shape index: {}]   ;;  %s17452_s17 = inlined_call_operand.vmem [shape: f32[1,256], index: 17, kind: input, shape index: {}]   ;;  %s17453_s18 = inlined_call_operand.hbm [shape: bf16[256,1024], index: 18, kind: input, shape index: {}]   ;;  %s17454_s19 = inlined_call_operand.vmem [shape: f32[1,1024], index: 19, kind: input, shape index: {}]   ;;  %s17455_s20 = inlined_call_operand.hbm [shape: bf16[1024,256], index: 20, kind: input, shape index: {}]   ;;  %s17456_s21 = inlined_call_operand.vmem [shape: f32[1,256], index: 21, kind: input, shape index: {}]   ;;  %s17457_s22 = inlined_call_operand.vmem [shape: f32[1,256], index: 22, kind: input, shape index: {}]   ;;  %s17458_s23 = inlined_call_operand.vmem [shape: f32[1,256], index: 23, kind: input, shape index: {}]   ;;  %s17459_s24 = inlined_call_operand.vmem [shape: bf16[256,128], index: 24, kind: input, shape index: {}]   ;;  %s17460_s25 = inlined_call_operand.vmem [shape: f32[1,128], index: 25, kind: input, shape index: {}]   ;;  %s17461_s26 = inlined_call_operand.vmem [shape: f32[2,256,4], index: 26, kind: output, shape index: {}]  }
   0x1   :  { %17684 = sst [smem:[#allocation109_spill]] %s17435_s0 }
   0x2   :  { %17685 = sst [smem:[#allocation110_spill]] %s17436_s1 }
   0x3   :  { %17686 = sst [smem:[#allocation111_spill]] %s17437_s2 }
   0x4   :  { %17687 = sst [smem:[#allocation112_spill]] %s17438_s3 }
   0x5   :  { %17688 = sst [smem:[#allocation113_spill]] %s17439_s4 }
   0x6   :  { %17689 = sst [smem:[#allocation114_spill]] %s17440_s5 }
   0x7   :  { %17690 = sst [smem:[#allocation115_spill]] %s17441_s6 }
   0x8   :  { %17691 = sst [smem:[#allocation116_spill]] %s17442_s7 }
   0x9   :  { %17692 = sst [smem:[#allocation117_spill]] %s17443_s8 }
   0xa   :  { %17693 = sst [smem:[#allocation118_spill]] %s17444_s9 }
   0xb   :  { %17694 = sst [smem:[#allocation119_spill]] %s17445_s10 }
   0xc   :  { %17695 = sst [smem:[#allocation120_spill]] %s17447_s12 }
   0xd   :  { %17696 = sst [smem:[#allocation121_spill]] %s17448_s13 }
   0xe   :  { %17697 = sst [smem:[#allocation122_spill]] %s17450_s15 }
   0xf   :  { %17698 = sst [smem:[#allocation123_spill]] %s17451_s16 }
  0x10   :  { %17699 = sst [smem:[#allocation124_spill]] %s17452_s17 }
  0x11   :  { %17700 = sst [smem:[#allocation125_spill]] %s17454_s19 }
  0x12   :  { %17701 = sst [smem:[#allocation126_spill]] %s17456_s21 }
  0x13   :  { %17702 = sst [smem:[#allocation127_spill]] %s17457_s22 }
  0x14   :  { %17703 = sst [smem:[#allocation128_spill]] %s17458_s23 }
  0x15   :  { %17704 = sst [smem:[#allocation129_spill]] %s17459_s24 }
  0x16   :  { %17705 = sst [smem:[#allocation130_spill]] %s17460_s25 }
  0x17   :  { %17706 = sst [smem:[#allocation131_spill]] %s17461_s26 }
  0x18   :  { %31 = vsyncpa [#allocation5], 0 }
  0x19   :  { %33 = vsyncpa [#allocation5 + $0x1], 0 }
  0x1a   :  { %34 = vsyncpa [#allocation7], 0 }
  0x1b   :  { %35 = vsyncpa [#allocation10], 0 }
  0x1c   :  { %36 = vsyncpa [#allocation13], 0 }
  0x1d   :  { %37 = vsyncpa [#allocation16], 0 }
  0x1e   :  { %38 = vsyncpa [#allocation19], 0 }
  0x1f   :  { %39 = vsyncpa [#allocation22], 0  ;;  %s12359_s27 = smov 0   ;;  %s12361_s3 = smov 0  }
  0x20   :  { %s12363_s7 = smov 0   ;;  %s12365_s28 = smov 0  }
  0x21   :  { %s12367_s8 = smov 0   ;;  %s12369_s4 = smov 0  }
  0x22   :  { %s12371_s29 = smov 0   ;;  %s12373_s0 = smov 0  }
  0x23 LB: > { %17707 = sst [smem:[#allocation31_spill]] %s12187_s28  ;;  %s9637_s9 = sadd.s32 4294967295, %s12203_s0   ;;  %s12203_s0 = sphi %s12373_s0, %s45_s0   ;;  %s12199_s29 = sphi %s12371_s29, %s18149_s29   ;;  %s12195_s4 = sphi %s12369_s4, %s18148_s4   ;;  %s12191_s8 = sphi %s12367_s8, %s18147_s8   ;;  %s12187_s28 = sphi %s12365_s28, %s18146_s28   ;;  %s12183_s7 = sphi %s12363_s7, %s18145_s7   ;;  %s12179_s3 = sphi %s12361_s3, %s18144_s3   ;;  %s12175_s27 = sphi %s12359_s27, %s18143_s27  }
  0x24   : > { %17708 = sst [smem:[#allocation32_spill]] %s12191_s8  ;;  %p9639_p0 = scmp.ge.s32.totalorder %s12203_s0, 1 }
  0x25   : > { %p12401_p1 = scmp.eq.s32.totalorder %s9637_s9, 0  ;;  %p648_p2 = scmp.lt.s32.totalorder %s12203_s0, 5 }
  0x26   : > { %s12205_s5 = smov [#allocation6]   ;;  %s12206_s1 = smov [#allocation9]  }
  0x27   : > { %s17709_s30 = scalar_select %p12401_p1, 1, 0 }
  0x28   : > { %p12406_p3 = pnand %p9639_p0, %p648_p2  ;;  %s660_s10 = sshll.u32 %s12205_s5, 4  ;;  %s12410_s10 = int_to_ptr.vmem [resolvable:$true] %s660_s10 }
  0x29   : > { %s688_s9 = sshll.u32 %s12206_s1, 4  ;;  %s12207_s25 = smov [#allocation12]   ;;  %s12420_s9 = int_to_ptr.vmem [resolvable:$true] %s688_s9 }
  0x2a   : > { %s17710_s2 = scalar_select %p12406_p3, 1, 0 }
  0x2b   : > { %p10571_p4 = pneg %p12406_p3  ;;  %s12422_s23 = sshll.u32 %s12207_s25, 4  ;;  %s711_s23 = int_to_ptr.vmem [resolvable:$true] %s12422_s23 }
  0x2c   : > { %s17712_s5 = sld [smem:[#allocation111_spill]] }
  0x2d   : > { %p12416_p5 = pnand %p10571_p4, %p12401_p1 }
  0x2f   : > { %p12432_p7 = pneg %p12416_p5 }
  0x32   : > { %s11747_s21 = scalar_lea.hbm %s17712_s5, 896 }
  0x33   : > { %p11748_p6 = scmp.ne.s32.totalorder %s17712_s5, %s11747_s21  ;;  %p11754_p10 = scmp.lt.u32.totalorder %s11747_s21, %s17712_s5 }
  0x35   : > { %p11750_p8 = pnand %p12432_p7, %p11748_p6 }
  0x37   : > { %p11751_p9 = pneg %p11750_p8 }
  0x39   : > { %p11756_p11 = pnand %p11754_p10, %p11751_p9 }
  0x3b   : > { %11759 = shalt.err (!%p11756_p11)
}
  0x3c   : > { %s11760_s17 = scalar_lea.vmem %s12410_s10, 896  ;;  %p11768_p2 = scmp.lt.s32.totalorder %s12410_s10, %s12410_s10 }
  0x3d   : > { %p11761_p12 = scmp.ne.s32.totalorder %s12410_s10, %s11760_s17  ;;  %p11769_p4 = scmp.lt.s32.totalorder %s11760_s17, %s11760_s17 }
  0x3f   : > { %p11763_p13 = pnand %p11761_p12, %p12432_p7  ;;  %p11770_p6 = por %p11769_p4, %p11768_p2 }
  0x41   : > { %p11764_p0 = pneg %p11763_p13 }
  0x43   : > { %p11771_p8 = pnand %p11770_p6, %p11764_p0 }
  0x45   : > { %11774 = shalt.err (!%p11771_p8)
}
  0x46   : > { %s17478_s19 = smov 128   ;;  %s17480_s21 = smov 8  }
  0x47   : > { %10574 = dma.hbm_to_vmem [thread:$0]  (!%p12416_p5), %s17712_s5, 896, %s12410_s10, [#allocation7], %s17478_s19, %s17478_s19, %s17480_s21  }
  0x48   : > { %s17714_s15 = sld [smem:[#allocation114_spill]] }
  0x4e   : > { %s11775_s17 = scalar_lea.hbm %s17714_s15, 32 }
  0x4f   : > { %p11776_p9 = scmp.ne.s32.totalorder %s17714_s15, %s11775_s17  ;;  %p11782_p12 = scmp.lt.u32.totalorder %s11775_s17, %s17714_s15 }
  0x51   : > { %p11778_p10 = pnand %p11776_p9, %p12432_p7 }
  0x53   : > { %p11779_p11 = pneg %p11778_p10 }
  0x55   : > { %p11784_p13 = pnand %p11782_p12, %p11779_p11 }
  0x57   : > { %11787 = shalt.err (!%p11784_p13)
}
  0x58   : > { %s11788_s10 = scalar_lea.vmem %s12420_s9, 32  ;;  %p11796_p6 = scmp.lt.s32.totalorder %s12420_s9, %s12420_s9 }
  0x59   : > { %p11789_p0 = scmp.ne.s32.totalorder %s12420_s9, %s11788_s10  ;;  %p11797_p8 = scmp.lt.s32.totalorder %s11788_s10, %s11788_s10 }
  0x5b   : > { %p11791_p2 = pnand %p11789_p0, %p12432_p7  ;;  %p11798_p9 = por %p11797_p8, %p11796_p6 }
  0x5d   : > { %p11792_p4 = pneg %p11791_p2 }
  0x5f   : > { %p11799_p10 = pnand %p11798_p9, %p11792_p4 }
  0x61   : > { %11802 = shalt.err (!%p11799_p10)
}
  0x62   : > { %10580 = dma.hbm_to_vmem [thread:$0]  (!%p12416_p5), %s17714_s15, 32, %s12420_s9, [#allocation10]  }
  0x63   : > { %s17715_s22 = sld [smem:[#allocation116_spill]] }
  0x69   : > { %s11803_s24 = scalar_lea.hbm %s17715_s22, 32 }
  0x6a   : > { %p11804_p11 = scmp.ne.s32.totalorder %s17715_s22, %s11803_s24  ;;  %p11810_p0 = scmp.lt.u32.totalorder %s11803_s24, %s17715_s22 }
  0x6c   : > { %p11806_p12 = pnand %p11804_p11, %p12432_p7 }
  0x6e   : > { %p11807_p13 = pneg %p11806_p12 }
  0x70   : > { %p11812_p2 = pnand %p11810_p0, %p11807_p13 }
  0x72   : > { %11815 = shalt.err (!%p11812_p2)
}
  0x73   : > { %s11816_s13 = scalar_lea.vmem %s711_s23, 32  ;;  %p11824_p9 = scmp.lt.s32.totalorder %s711_s23, %s711_s23 }
  0x74   : > { %p11817_p4 = scmp.ne.s32.totalorder %s711_s23, %s11816_s13  ;;  %p11825_p10 = scmp.lt.s32.totalorder %s11816_s13, %s11816_s13 }
  0x76   : > { %p11819_p6 = pnand %p11817_p4, %p12432_p7  ;;  %p11826_p3 = por %p11825_p10, %p11824_p9 }
  0x78   : > { %p11820_p8 = pneg %p11819_p6 }
  0x7a   : > { %p11827_p1 = pnand %p11826_p3, %p11820_p8 }
  0x7c   : > { %11830 = shalt.err (!%p11827_p1)
}
  0x7d   : > { %10586 = dma.hbm_to_vmem [thread:$0]  (!%p12416_p5), %s17715_s22, 32, %s711_s23, [#allocation13]  }
  0x7e   : > { %s12210_s28 = smov [#allocation15]   ;;  %s12211_s24 = smov [#allocation18]  }
  0x7f   : > { %s734_s8 = sshll.u32 %s12210_s28, 4  ;;  %s758_s1 = sshll.u32 %s12211_s24, 4  ;;  %s735_s8 = int_to_ptr.vmem [resolvable:$true] %s734_s8  ;;  %s759_s1 = int_to_ptr.vmem [resolvable:$true] %s758_s1 }
  0x80   : > { %s17716_s10 = sld [smem:[#allocation119_spill]] }
  0x86   : > { %s11831_s19 = scalar_lea.hbm %s17716_s10, 4096 }
  0x87   : > { %p11832_p1 = scmp.ne.s32.totalorder %s17716_s10, %s11831_s19  ;;  %p11838_p12 = scmp.lt.u32.totalorder %s11831_s19, %s17716_s10 }
  0x89   : > { %p11834_p3 = pnand %p11832_p1, %p12432_p7 }
  0x8b   : > { %p11835_p11 = pneg %p11834_p3 }
  0x8d   : > { %p11840_p13 = pnand %p11838_p12, %p11835_p11 }
  0x8f   : > { %11843 = shalt.err (!%p11840_p13)
}
  0x90   : > { %s11844_s23 = scalar_lea.vmem %s735_s8, 4096  ;;  %p11852_p6 = scmp.lt.s32.totalorder %s735_s8, %s735_s8 }
  0x91   : > { %p11845_p0 = scmp.ne.s32.totalorder %s735_s8, %s11844_s23  ;;  %p11853_p8 = scmp.lt.s32.totalorder %s11844_s23, %s11844_s23 }
  0x93   : > { %p11847_p2 = pnand %p11845_p0, %p12432_p7  ;;  %p11854_p9 = por %p11853_p8, %p11852_p6 }
  0x95   : > { %p11848_p4 = pneg %p11847_p2 }
  0x97   : > { %p11855_p10 = pnand %p11854_p9, %p11848_p4 }
  0x99   : > { %11858 = shalt.err (!%p11855_p10)
}
  0x9a   : > { %s17717_s21 = smov 8   ;;  %s17718_s26 = smov 128  }
  0x9b   : > { %10592 = dma.hbm_to_vmem [thread:$0]  (!%p12416_p5), %s17716_s10, 4096, %s735_s8, [#allocation16], %s17718_s26, %s17718_s26, %s17717_s21  }
  0x9c   : > { %s17719_s12 = sld [smem:[#allocation120_spill]] }
  0xa2   : > { %s11859_s25 = scalar_lea.hbm %s17719_s12, 4096 }
  0xa3   : > { %p11860_p1 = scmp.ne.s32.totalorder %s17719_s12, %s11859_s25  ;;  %p11866_p12 = scmp.lt.u32.totalorder %s11859_s25, %s17719_s12 }
  0xa5   : > { %p11862_p3 = pnand %p11860_p1, %p12432_p7 }
  0xa7   : > { %p11863_p11 = pneg %p11862_p3 }
  0xa9   : > { %p11868_p13 = pnand %p11866_p12, %p11863_p11 }
  0xab   : > { %11871 = shalt.err (!%p11868_p13)
}
  0xac   : > { %s11872_s5 = scalar_lea.vmem %s759_s1, 4096  ;;  %p11880_p6 = scmp.lt.s32.totalorder %s759_s1, %s759_s1 }
  0xad   : > { %p11873_p0 = scmp.ne.s32.totalorder %s759_s1, %s11872_s5  ;;  %p11881_p8 = scmp.lt.s32.totalorder %s11872_s5, %s11872_s5 }
  0xaf   : > { %p11875_p2 = pnand %p11873_p0, %p12432_p7  ;;  %p11882_p9 = por %p11881_p8, %p11880_p6 }
  0xb1   : > { %p11876_p4 = pneg %p11875_p2 }
  0xb3   : > { %p11883_p10 = pnand %p11882_p9, %p11876_p4 }
  0xb5   : > { %11886 = shalt.err (!%p11883_p10)
}
  0xb6   : > { %10598 = dma.hbm_to_vmem [thread:$0]  (!%p12416_p5), %s17719_s12, 4096, %s759_s1, [#allocation19], %s17718_s26, %s17718_s26, %s17717_s21  }
  0xb7   : > { %s12212_s28 = smov [#allocation21]   ;;  %s11887_s13 = scalar_lea.hbm %s17453_s18, 16384 }
  0xb8   : > { %s796_s24 = sshll.u32 %s12212_s28, 4  ;;  %p11888_p1 = scmp.ne.s32.totalorder %s17453_s18, %s11887_s13  ;;  %s797_s24 = int_to_ptr.vmem [resolvable:$true] %s796_s24 }
  0xb9   : > { %p11894_p12 = scmp.lt.u32.totalorder %s11887_s13, %s17453_s18 }
  0xba   : > { %p11890_p3 = pnand %p11888_p1, %p12432_p7 }
  0xbc   : > { %p11891_p11 = pneg %p11890_p3 }
  0xbe   : > { %p11896_p13 = pnand %p11894_p12, %p11891_p11 }
  0xc0   : > { %11899 = shalt.err (!%p11896_p13)
}
  0xc1   : > { %s11900_s1 = scalar_lea.vmem %s797_s24, 16384  ;;  %p11908_p6 = scmp.lt.s32.totalorder %s797_s24, %s797_s24 }
  0xc2   : > { %p11901_p0 = scmp.ne.s32.totalorder %s797_s24, %s11900_s1  ;;  %p11909_p8 = scmp.lt.s32.totalorder %s11900_s1, %s11900_s1 }
  0xc4   : > { %p11903_p2 = pnand %p11901_p0, %p12432_p7  ;;  %p11910_p9 = por %p11909_p8, %p11908_p6 }
  0xc6   : > { %p11904_p4 = pneg %p11903_p2 }
  0xc8   : > { %p11911_p10 = pnand %p11910_p9, %p11904_p4 }
  0xca   : > { %11914 = shalt.err (!%p11911_p10)
}
  0xcb   : > { %s12213_s8 = smov 512   ;;  %s12214_s19 = smov 32  }
  0xcc   : > { %10604 = dma.hbm_to_vmem [thread:$0]  (!%p12416_p5), %s17453_s18, 16384, %s797_s24, [#allocation22], %s12213_s8, %s12213_s8, %s12214_s19  }
  0xcd   : > { %s12215_s25 = smov [#allocation8]   ;;  %s12216_s13 = smov [#allocation11]  }
  0xce   : > { %s677_s17 = sshll.u32 %s12215_s25, 4  ;;  %s699_s9 = sshll.u32 %s12216_s13, 4  ;;  %s678_s17 = int_to_ptr.vmem [resolvable:$true] %s677_s17  ;;  %s12558_s9 = int_to_ptr.vmem [resolvable:$true] %s699_s9 }
  0xcf   : > { %s17720_s1 = sld [smem:[#allocation113_spill]] }
  0xd5   : > { %s11915_s12 = scalar_lea.hbm %s17720_s1, 32 }
  0xd6   : > { %p11916_p1 = scmp.ne.s32.totalorder %s17720_s1, %s11915_s12  ;;  %p11922_p12 = scmp.lt.u32.totalorder %s11915_s12, %s17720_s1 }
  0xd8   : > { %p11918_p3 = pnand %p11916_p1, %p12432_p7 }
  0xda   : > { %p11919_p11 = pneg %p11918_p3 }
  0xdc   : > { %p11924_p13 = pnand %p11922_p12, %p11919_p11 }
  0xde   : > { %11927 = shalt.err (!%p11924_p13)
}
  0xdf   : > { %s11928_s8 = scalar_lea.vmem %s678_s17, 32  ;;  %p11936_p6 = scmp.lt.s32.totalorder %s678_s17, %s678_s17 }
  0xe0   : > { %p11929_p0 = scmp.ne.s32.totalorder %s678_s17, %s11928_s8  ;;  %p11937_p8 = scmp.lt.s32.totalorder %s11928_s8, %s11928_s8 }
  0xe2   : > { %p11931_p2 = pnand %p11929_p0, %p12432_p7  ;;  %p11938_p9 = por %p11937_p8, %p11936_p6 }
  0xe4   : > { %p11932_p4 = pneg %p11931_p2 }
  0xe6   : > { %p11939_p10 = pnand %p11938_p9, %p11932_p4 }
  0xe8   : > { %11942 = shalt.err (!%p11939_p10)
}
  0xe9   : > { %10577 = dma.hbm_to_vmem [thread:$0]  (!%p12416_p5), %s17720_s1, 32, %s678_s17, [#allocation7]  }
  0xea   : > { %s17721_s28 = sld [smem:[#allocation115_spill]] }
  0xf0   : > { %s17722_s25 = smov %s17721_s28  ;;  %s11943_s13 = scalar_lea.hbm %s17721_s28, 32 }
  0xf1   : > { %p11944_p1 = scmp.ne.s32.totalorder %s17722_s25, %s11943_s13  ;;  %p11950_p12 = scmp.lt.u32.totalorder %s11943_s13, %s17722_s25 }
  0xf3   : > { %p11946_p3 = pnand %p11944_p1, %p12432_p7 }
  0xf5   : > { %p11947_p11 = pneg %p11946_p3 }
  0xf7   : > { %p11952_p13 = pnand %p11950_p12, %p11947_p11 }
  0xf9   : > { %11955 = shalt.err (!%p11952_p13)
}
  0xfa   : > { %s11956_s17 = scalar_lea.vmem %s12558_s9, 32  ;;  %p11964_p6 = scmp.lt.s32.totalorder %s12558_s9, %s12558_s9 }
  0xfb   : > { %p11957_p0 = scmp.ne.s32.totalorder %s12558_s9, %s11956_s17  ;;  %p11965_p8 = scmp.lt.s32.totalorder %s11956_s17, %s11956_s17 }
  0xfd   : > { %p11959_p2 = pnand %p11957_p0, %p12432_p7  ;;  %p11966_p9 = por %p11965_p8, %p11964_p6 }
  0xff   : > { %p11960_p4 = pneg %p11959_p2 }
 0x101   : > { %p11967_p10 = pnand %p11966_p9, %p11960_p4 }
 0x103   : > { %11970 = shalt.err (!%p11967_p10)
}
 0x104   : > { %10583 = dma.hbm_to_vmem [thread:$0]  (!%p12416_p5), %s17722_s25, 32, %s12558_s9, [#allocation10]  }
 0x105   : > { %s12217_s22 = smov [#allocation14]   ;;  %s12218_s19 = smov [#allocation17]  }
 0x106   : > { %s724_s12 = sshll.u32 %s12217_s22, 4  ;;  %s748_s28 = sshll.u32 %s12218_s19, 4  ;;  %s725_s12 = int_to_ptr.vmem [resolvable:$true] %s724_s12  ;;  %s12601_s28 = int_to_ptr.vmem [resolvable:$true] %s748_s28 }
 0x107   : > { %s17723_s5 = sld [smem:[#allocation118_spill]] }
 0x10d   : > { %s11971_s10 = scalar_lea.hbm %s17723_s5, 32 }
 0x10e   : > { %p11972_p1 = scmp.ne.s32.totalorder %s17723_s5, %s11971_s10  ;;  %p11978_p12 = scmp.lt.u32.totalorder %s11971_s10, %s17723_s5 }
 0x110   : > { %p11974_p3 = pnand %p11972_p1, %p12432_p7 }
 0x112   : > { %p11975_p11 = pneg %p11974_p3 }
 0x114   : > { %p11980_p13 = pnand %p11978_p12, %p11975_p11 }
 0x116   : > { %11983 = shalt.err (!%p11980_p13)
}
 0x117   : > { %s11984_s15 = scalar_lea.vmem %s725_s12, 32  ;;  %p11992_p6 = scmp.lt.s32.totalorder %s725_s12, %s725_s12 }
 0x118   : > { %p11985_p0 = scmp.ne.s32.totalorder %s725_s12, %s11984_s15  ;;  %p11993_p8 = scmp.lt.s32.totalorder %s11984_s15, %s11984_s15 }
 0x11a   : > { %p11987_p2 = pnand %p11985_p0, %p12432_p7  ;;  %p11994_p9 = por %p11993_p8, %p11992_p6 }
 0x11c   : > { %p11988_p4 = pneg %p11987_p2 }
 0x11e   : > { %p11995_p10 = pnand %p11994_p9, %p11988_p4 }
 0x120   : > { %11998 = shalt.err (!%p11995_p10)
}
 0x121   : > { %10589 = dma.hbm_to_vmem [thread:$0]  (!%p12416_p5), %s17723_s5, 32, %s725_s12, [#allocation13]  }
 0x122   : > { %s11999_s10 = scalar_lea.hbm %s17446_s11, 32 }
 0x123   : > { %p12000_p1 = scmp.ne.s32.totalorder %s17446_s11, %s11999_s10  ;;  %p12006_p12 = scmp.lt.u32.totalorder %s11999_s10, %s17446_s11 }
 0x125   : > { %p12002_p3 = pnand %p12000_p1, %p12432_p7 }
 0x127   : > { %p12003_p11 = pneg %p12002_p3 }
 0x129   : > { %p12008_p13 = pnand %p12006_p12, %p12003_p11 }
 0x12b   : > { %12011 = shalt.err (!%p12008_p13)
}
 0x12c   : > { %s12012_s12 = scalar_lea.vmem %s12601_s28, 32  ;;  %p12020_p6 = scmp.lt.s32.totalorder %s12601_s28, %s12601_s28 }
 0x12d   : > { %p12013_p0 = scmp.ne.s32.totalorder %s12601_s28, %s12012_s12  ;;  %p12021_p8 = scmp.lt.s32.totalorder %s12012_s12, %s12012_s12 }
 0x12f   : > { %p12015_p2 = pnand %p12013_p0, %p12432_p7  ;;  %p12022_p9 = por %p12021_p8, %p12020_p6 }
 0x131   : > { %p12016_p4 = pneg %p12015_p2 }
 0x133   : > { %p12023_p10 = pnand %p12022_p9, %p12016_p4 }
 0x135   : > { %12026 = shalt.err (!%p12023_p10)
}
 0x136   : > { %10595 = dma.hbm_to_vmem [thread:$0]  (!%p12416_p5), %s17446_s11, 32, %s12601_s28, [#allocation16]  }
 0x137   : > { %s12219_s19 = smov [#allocation20]   ;;  %s12220_s23 = smov [#allocation23]  }
 0x138   : > { %s774_s13 = sshll.u32 %s12219_s19, 4  ;;  %s812_s10 = sshll.u32 %s12220_s23, 4  ;;  %s775_s13 = int_to_ptr.vmem [resolvable:$true] %s774_s13  ;;  %s12644_s10 = int_to_ptr.vmem [resolvable:$true] %s812_s10 }
 0x139   : > { %s12027_s8 = scalar_lea.hbm %s17449_s14, 4096 }
 0x13a   : > { %p12028_p1 = scmp.ne.s32.totalorder %s17449_s14, %s12027_s8  ;;  %p12034_p12 = scmp.lt.u32.totalorder %s12027_s8, %s17449_s14 }
 0x13c   : > { %p12030_p3 = pnand %p12028_p1, %p12432_p7 }
 0x13e   : > { %p12031_p11 = pneg %p12030_p3 }
 0x140   : > { %p12036_p13 = pnand %p12034_p12, %p12031_p11 }
 0x142   : > { %12039 = shalt.err (!%p12036_p13)
}
 0x143   : > { %s12040_s22 = scalar_lea.vmem %s775_s13, 4096  ;;  %p12048_p6 = scmp.lt.s32.totalorder %s775_s13, %s775_s13 }
 0x144   : > { %p12041_p0 = scmp.ne.s32.totalorder %s775_s13, %s12040_s22  ;;  %p12049_p8 = scmp.lt.s32.totalorder %s12040_s22, %s12040_s22 }
 0x146   : > { %p12043_p2 = pnand %p12041_p0, %p12432_p7  ;;  %p12050_p9 = por %p12049_p8, %p12048_p6 }
 0x148   : > { %p12044_p4 = pneg %p12043_p2 }
 0x14a   : > { %p12051_p10 = pnand %p12050_p9, %p12044_p4 }
 0x14c   : > { %12054 = shalt.err (!%p12051_p10)
}
 0x14d   : > { %10601 = dma.hbm_to_vmem [thread:$0]  (!%p12416_p5), %s17449_s14, 4096, %s775_s13, [#allocation19], %s17718_s26, %s17718_s26, %s17717_s21  }
 0x14e   : > { %s12055_s8 = scalar_lea.hbm %s17455_s20, 16384 }
 0x14f   : > { %p12056_p1 = scmp.ne.s32.totalorder %s17455_s20, %s12055_s8  ;;  %p12062_p12 = scmp.lt.u32.totalorder %s12055_s8, %s17455_s20 }
 0x151   : > { %p12058_p3 = pnand %p12056_p1, %p12432_p7 }
 0x153   : > { %p12059_p11 = pneg %p12058_p3 }
 0x155   : > { %p12064_p13 = pnand %p12062_p12, %p12059_p11 }
 0x157   : > { %12067 = shalt.err (!%p12064_p13)
}
 0x158   : > { %s12068_s13 = scalar_lea.vmem %s12644_s10, 16384  ;;  %p12076_p6 = scmp.lt.s32.totalorder %s12644_s10, %s12644_s10 }
 0x159   : > { %p12069_p0 = scmp.ne.s32.totalorder %s12644_s10, %s12068_s13  ;;  %p12077_p8 = scmp.lt.s32.totalorder %s12068_s13, %s12068_s13 }
 0x15b   : > { %p12071_p2 = pnand %p12069_p0, %p12432_p7  ;;  %p12078_p9 = por %p12077_p8, %p12076_p6 }
 0x15d   : > { %p12072_p4 = pneg %p12071_p2 }
 0x15f   : > { %p12079_p10 = pnand %p12078_p9, %p12072_p4 }
 0x161   : > { %12082 = shalt.err (!%p12079_p10)
}
 0x162   : > { %10607 = dma.hbm_to_vmem [thread:$0]  (!%p12416_p5), %s17455_s20, 16384, %s12644_s10, [#allocation22], %s17718_s26, %s17718_s26, %s17717_s21  }
 0x163   : > { %s54_s16 = sadd.s32 1, %s12195_s4  ;;  %s57_s6 = sadd.s32 1, %s12199_s29 }
 0x164   : > { %p55_p7 = scmp.ge.s32.totalorder %s54_s16, 2  ;;  %s92_s23 = sadd.s32 1, %s12183_s7 }
 0x165   : > { %p99_p1 = scmp.ne.s32.totalorder %s12183_s7, %s12179_s3  ;;  %p100_p3 = scmp.eq.s32.totalorder %s12203_s0, 0 }
 0x166   : > { %s18151_s16 = smov (%p55_p7, %s54_s16), 0  ;;  %s18153_s6 = smov (!%p55_p7, %s57_s6), %s12199_s29 }
 0x167   : > { %p12702_p11 = por %p100_p3, %p99_p1  ;;  %p105_p12 = scmp.ne.s32.totalorder %s12179_s3, %s12175_s27 }
 0x168   : > { %p59_p5 = scmp.ge.s32.totalorder %s18153_s6, 2  ;;  %p10624_p13 = scmp.lt.s32.totalorder %s12203_s0, 4 }
 0x169   : > { %p17725_p0 = scmp.ne.s32.totalorder %s17709_s30, 0  ;;  %s854_s17 = sand.u32 1, %s12183_s7  }
 0x16a   : > { %s18155_s6 = smov (%p59_p5, %s18153_s6), 0  ;;  %s9653_s8 = sshll.u32 %s854_s17, 8 }
 0x16b   : > { %p12711_p2 = por %p17725_p0, %p105_p12  ;;  %s89_s9 = ssub.s32 %s12199_s29, %s18155_s6 }
 0x16c   : > { %p90_p4 = scmp.eq.s32.totalorder %s89_s9, 0  ;;  %s10104_s12 = sshll.u32 %s12199_s29, 12 }
 0x16d   : > { %s17727_s13 = sld [smem:[#allocation110_spill]]  ;;  %s858_s27 = scalar_lea.vmem [#allocation4], %s9653_s8 }
 0x16e   : > { %s865_s19 = sshll.u32 %s858_s27, 4  ;;  %p12735_p6 = pnand %p10624_p13, %p12702_p11  ;;  %s12729_s19 = int_to_ptr.vmem [resolvable:$true] %s865_s19 }
 0x16f   : > { %s12727_s1 = scalar_select %p90_p4, %s12183_s7, %s92_s23  }
 0x170   : > { %p12085_p9 = pneg %p12735_p6 }
 0x173   : > { %s12724_s22 = scalar_lea.hbm %s17727_s13, %s10104_s12  ;;  %s12739_s12 = scalar_lea.sflag [#allocation5], %s854_s17 }
 0x174   : > { %s12083_s15 = scalar_lea.hbm %s12724_s22, 4096  ;;  %s12088_s24 = scalar_lea.hbm %s17727_s13, 8192 }
 0x175   : > { %p12084_p8 = scmp.ne.s32.totalorder %s12724_s22, %s12083_s15  ;;  %p12089_p1 = scmp.lt.u32.totalorder %s12724_s22, %s17727_s13 }
 0x176   : > { %p12090_p3 = scmp.lt.u32.totalorder %s12088_s24, %s12083_s15  ;;  %p12092_p12 = scmp.lt.u32.totalorder %s12083_s15, %s12724_s22 }
 0x177   : > { %p12086_p10 = pnand %p12085_p9, %p12084_p8 }
 0x178   : > { %p12091_p11 = por %p12090_p3, %p12089_p1 }
 0x179   : > { %p12087_p7 = pneg %p12086_p10 }
 0x17a   : > { %p12093_p5 = por %p12092_p12, %p12091_p11 }
 0x17c   : > { %p12094_p13 = pnand %p12093_p5, %p12087_p7 }
 0x17e   : > { %12097 = shalt.err (!%p12094_p13)
}
 0x17f   : > { %s12098_s17 = scalar_lea.vmem %s12729_s19, 4096  ;;  %s12221_s23 = smov [#allocation4]  }
 0x180   : > { %p12099_p0 = scmp.ne.s32.totalorder %s12729_s19, %s12098_s17  ;;  %s12103_s8 = sshll.u32 %s12221_s23, 4  ;;  %s12104_s8 = int_to_ptr.vmem [resolvable:$false] %s12103_s8 }
 0x181   : > { %s12105_s28 = scalar_lea.vmem %s12104_s8, 8192  ;;  %p12106_p10 = scmp.lt.s32.totalorder %s12729_s19, %s12104_s8 }
 0x182   : > { %p12101_p4 = pnand %p12099_p0, %p12085_p9  ;;  %p12107_p1 = scmp.lt.s32.totalorder %s12105_s28, %s12098_s17 }
 0x184   : > { %p12102_p8 = pneg %p12101_p4  ;;  %p12108_p3 = por %p12107_p1, %p12106_p10 }
 0x186   : > { %p12109_p11 = pnand %p12108_p3, %p12102_p8 }
 0x188   : > { %12112 = shalt.err (!%p12109_p11)
}
 0x189   : > { %10611 = dma.hbm_to_vmem [thread:$0]  (!%p12735_p6), %s12724_s22, 4096, %s12729_s19, %s12739_s12, %s17718_s26, %s17718_s26, %s17717_s21  }
 0x18a   : > { %p17729_p9 = scmp.ne.s32.totalorder %s17710_s2, 0 }
 0x18c   : > { %877 = sbr.rel (%p17729_p9) target bundleno = 4710 (0x1266), region = 124 }
 0x193   : > { %s879_s15 = sand.u32 1, %s12179_s3  }
 0x194   : > { %s9657_s24 = sshll.u32 %s879_s15, 8  ;;  %s880_s27 = scalar_lea.sflag [#allocation5], %s879_s15 }
 0x195   : > { %s12773_s17 = scalar_lea.vmem [#allocation4], %s9657_s24 }
 0x196   : > { %12146 = dma.done.wait (%p12711_p2), %s880_s27, 4096  }
 0x197   : > { %12148 = vsyncadd (%p12711_p2), %s880_s27, 4294963200  ;;  %p17730_p7 = scmp.ne.s32.totalorder %s17709_s30, 0 }
 0x199   : > { %12150 = dma.done.wait (%p17730_p7), [#allocation7], 928  }
 0x19a   : > { %12152 = vsyncadd (%p17730_p7), [#allocation7], 4294966368 }
 0x19b   : > { %12154 = dma.done.wait (%p17730_p7), [#allocation10], 64  }
 0x19c   : > { %12156 = vsyncadd (%p17730_p7), [#allocation10], 4294967232 }
 0x19d   : > { %12158 = dma.done.wait (%p17730_p7), [#allocation13], 64  }
 0x19e   : > { %12160 = vsyncadd (%p17730_p7), [#allocation13], 4294967232 }
 0x19f   : > { %12162 = dma.done.wait (%p17730_p7), [#allocation16], 4128  }
 0x1a0   : > { %12164 = vsyncadd (%p17730_p7), [#allocation16], 4294963168 }
 0x1a1   : > { %12166 = dma.done.wait (%p17730_p7), [#allocation19], 8192  }
 0x1a2   : > { %12168 = vsyncadd (%p17730_p7), [#allocation19], 4294959104 }
 0x1a3   : > { %12170 = dma.done.wait (%p17730_p7), [#allocation22], 32768  }
 0x1a4   : > { %12172 = vsyncadd (%p17730_p7), [#allocation22], 4294934528  ;;  %s17731_s2 = sld [smem:[#allocation31_spill]]  ;;  %s17732_s21 = sld [smem:[#allocation32_spill]] }
 0x1a5   : > { %s17733_s8 = sld [smem:[#allocation109_spill]]  ;;  %s17734_s24 = sld [smem:[#allocation131_spill]] }
 0x1aa   : > { %s9670_s26 = sshll.u32 %s17731_s2, 4  ;;  %p1014_p2 = scmp.lt.s32.totalorder %s17732_s21, 1 }
 0x1ab   : > { %p1016_p6 = scmp.lt.s32.totalorder %s9670_s26, 31  ;;  %p9676_p12 = scmp.ne.s32.totalorder %s17731_s2, 0 }
 0x1ac   : > { %s18157_s21 = smov (!%p1014_p2, %s17732_s21), 1 }
 0x1ad   : > { %s18159_s26 = smov (!%p1016_p6, %s9670_s26), 31  ;;  %s9671_s10 = sshll.u32 %s18157_s21, 5 }
 0x1ae   : > { %s1019_s22 = sadd.s32 %s9671_s10, %s18159_s26  ;;  %1037 = sbr.rel (%p9676_p12) target bundleno = 1172 (0x494), region = 180 }
 0x1af   : > { %s9672_s19 = sshll.u32 %s1019_s22, 2  ;;  %s9675_s9 = sshll.u32 %s1019_s22, 3 }
 0x1b0   : > { %s12809_s28 = scalar_lea.vmem %s17733_s8, %s9672_s19  ;;  %s12814_s27 = scalar_lea.vmem %s17734_s24, %s9675_s9 }
 0x1b5   : > { %v12818_v0 = vld [vmem:[%s12773_s17] sm:$0xff]  ;;  %v12821_v1 = vld [vmem:[%s12773_s17 + $0x8] sm:$0xff]  ;;  %v12824_v2 = vld [vmem:[%s12773_s17 + $0x10] sm:$0xff]  ;;  %s17816_s21 = sld [smem:[#allocation121_spill]] }
 0x1b6   : > { %v1070_v3 = vunpack.c.l.bf16 %v12818_v0  ;;  %v1071_v4 = vunpack.c.h.bf16 %v12818_v0  ;;  %v1072_v5 = vunpack.c.l.bf16 %v12821_v1  ;;  %v1073_v6 = vunpack.c.h.bf16 %v12821_v1  ;;  %v12831_v7 = vld [vmem:[%s12773_s17 + $0x18] sm:$0xff]  ;;  %v12838_v12 = vld [vmem:[%s12773_s17 + $0x20] sm:$0xff]  ;;  %v12845_v14 = vld [vmem:[%s12773_s17 + $0x28] sm:$0xff] }
 0x1b7   : > { %v1074_v8 = vunpack.c.l.bf16 %v12824_v2  ;;  %v1075_v9 = vunpack.c.h.bf16 %v12824_v2  ;;  %v1076_v10 = vunpack.c.l.bf16 %v12831_v7  ;;  %v1077_v11 = vunpack.c.h.bf16 %v12831_v7  ;;  %v12864_v22 = vld [vmem:[%s12773_s17 + $0x30] sm:$0xff]  ;;  %v12867_v23 = vld [vmem:[%s12773_s17 + $0x38] sm:$0xff]  ;;  %v12870_v24 = vld [vmem:[%s12773_s17 + $0x40] sm:$0xff] }
 0x1b8   : > { %v1136_v13 = vadd.f32 %v1071_v4, %v1070_v3  ;;  %v1139_v16 = vadd.f32 %v1073_v6, %v1072_v5  ;;  %v1078_v17 = vunpack.c.l.bf16 %v12838_v12  ;;  %v1079_v18 = vunpack.c.h.bf16 %v12838_v12  ;;  %v12879_v28 = vld [vmem:[%s12773_s17 + $0x48] sm:$0xff]  ;;  %v12888_v32 = vld [vmem:[%s12773_s17 + $0x50] sm:$0xff]  ;;  %v12897_v36 = vld [vmem:[%s12773_s17 + $0x58] sm:$0xff] }
 0x1b9   : > { %v1142_v15 = vadd.f32 %v1075_v9, %v1074_v8  ;;  %v1145_v19 = vadd.f32 %v1077_v11, %v1076_v10  ;;  %v1080_v20 = vunpack.c.l.bf16 %v12845_v14  ;;  %v1081_v21 = vunpack.c.h.bf16 %v12845_v14  ;;  %v12906_v40 = vld [vmem:[%s12773_s17 + $0x60] sm:$0xff]  ;;  %v12915_v44 = vld [vmem:[%s12773_s17 + $0x68] sm:$0xff]  ;;  %v12924_v48 = vld [vmem:[%s12773_s17 + $0x70] sm:$0xff] }
 0x1ba   : > { %1137 = vadd.xlane.f32.xlu0 %v1136_v13  ;;  %v1148_v25 = vadd.f32 %v1079_v18, %v1078_v17  ;;  %v1082_v26 = vunpack.c.l.bf16 %v12864_v22  ;;  %v1083_v27 = vunpack.c.h.bf16 %v12864_v22  ;;  %v1084_v30 = vunpack.c.l.bf16 %v12867_v23  ;;  %v12933_v52 = vld [vmem:[%s12773_s17 + $0x78] sm:$0xff]  ;;  %v12942_v56 = vld [vmem:[%s12773_s17 + $0x80] sm:$0xff]  ;;  %v12957_v63 = vld [vmem:[%s12773_s17 + $0x88] sm:$0xff] }
 0x1bb   : > { %1143 = vadd.xlane.f32.xlu1 %v1142_v15  ;;  %v1151_v29 = vadd.f32 %v1081_v21, %v1080_v20  ;;  %v1085_v31 = vunpack.c.h.bf16 %v12867_v23  ;;  %v1086_v34 = vunpack.c.l.bf16 %v12870_v24  ;;  %v1087_v35 = vunpack.c.h.bf16 %v12870_v24 }
 0x1bc   : > { %v1154_v33 = vadd.f32 %v1083_v27, %v1082_v26  ;;  %v1088_v38 = vunpack.c.l.bf16 %v12879_v28  ;;  %v17523_v39 = vunpack.c.h.bf16 %v12879_v28  ;;  %v17520_v42 = vunpack.c.l.bf16 %v12888_v32 }
 0x1bd   : > { %v1157_v37 = vadd.f32 %v1085_v31, %v1084_v30  ;;  %v1160_v41 = vadd.f32 %v1087_v35, %v1086_v34  ;;  %v17517_v43 = vunpack.c.h.bf16 %v12888_v32  ;;  %v17516_v46 = vunpack.c.l.bf16 %v12897_v36 }
 0x1be   : > { %1140 = vadd.xlane.f32.xlu0 %v1139_v16  ;;  %v1163_v45 = vadd.f32 %v17523_v39, %v1088_v38  ;;  %v17515_v47 = vunpack.c.h.bf16 %v12897_v36  ;;  %v17512_v50 = vunpack.c.l.bf16 %v12906_v40  ;;  %v17507_v51 = vunpack.c.h.bf16 %v12906_v40  ;;  %v10789_v39 = vld [vmem:[#allocation15 + $0xb0] ss:$8 sps:$4 sm:$0xff]  }
 0x1bf   : > { %1146 = vadd.xlane.f32.xlu1 %v1145_v19  ;;  %v1166_v49 = vadd.f32 %v17517_v43, %v17520_v42  ;;  %v17506_v54 = vunpack.c.l.bf16 %v12915_v44  ;;  %v17505_v55 = vunpack.c.h.bf16 %v12915_v44  ;;  %v17498_v58 = vunpack.c.l.bf16 %v12924_v48  ;;  %v10778_v43 = vld [vmem:[#allocation18 + $0x90] ss:$8 sps:$4 sm:$0xff]  }
 0x1c0   : > { %v1169_v53 = vadd.f32 %v17515_v47, %v17516_v46  ;;  %v1172_v57 = vadd.f32 %v17507_v51, %v17512_v50  ;;  %v17497_v59 = vunpack.c.h.bf16 %v12924_v48  ;;  %v17492_v61 = vunpack.c.l.bf16 %v12933_v52  ;;  %v10775_v47 = vld [vmem:[#allocation18 + $0x94] ss:$8 sps:$4 sm:$0xff]  }
 0x1c1   : > { %v1175_v60 = vadd.f32 %v17505_v55, %v17506_v54  ;;  %v17487_v62 = vunpack.c.h.bf16 %v12933_v52  ;;  %v17489_v15 = vunpack.c.l.bf16 %v12942_v56  ;;  %v17488_v16 = vunpack.c.h.bf16 %v12942_v56  ;;  %v10777_v46 = vld [vmem:[#allocation15 + $0x90] ss:$8 sps:$4 sm:$0xff]  }
 0x1c2   : > { %1149 = vadd.xlane.f32.xlu0 %v1148_v25  ;;  %v1178_v13 = vadd.f32 %v17497_v59, %v17498_v58  ;;  %v17491_v25 = vunpack.c.l.bf16 %v12957_v63  ;;  %v10725_v59 = vld [vmem:[#allocation15 + $0x14] ss:$8 sps:$4 sm:$0xff]  }
 0x1c3   : > { %1152 = vadd.xlane.f32.xlu1 %v1151_v29  ;;  %v1181_v19 = vadd.f32 %v17487_v62, %v17492_v61  ;;  %v17490_v29 = vunpack.c.h.bf16 %v12957_v63  ;;  %v12993_v62 = vld [vmem:[%s12773_s17 + $0xa8] sm:$0xff]  ;;  %v10727_v58 = vld [vmem:[#allocation18 + $0x14] ss:$8 sps:$4 sm:$0xff]  }
 0x1c4   : > { %v17501_v61 = vunpack.c.h.bf16 %v12993_v62 }
 0x1c6   : > { %1155 = vadd.xlane.f32.xlu0 %v1154_v33  ;;  %v12972_v33 = vld [vmem:[%s12773_s17 + $0x90] sm:$0xff] }
 0x1c7   : > { %1158 = vadd.xlane.f32.xlu1 %v1157_v37  ;;  %v12975_v37 = vld [vmem:[%s12773_s17 + $0x98] sm:$0xff] }
 0x1ca   : > { %1161 = vadd.xlane.f32.xlu0 %v1160_v41  ;;  %v1184_v41 = vadd.f32 %v17488_v16, %v17489_v15 }
 0x1cb   : > { %1164 = vadd.xlane.f32.xlu1 %v1163_v45  ;;  %v17496_v45 = vunpack.c.l.bf16 %v12972_v33 }
 0x1ce   : > { %1167 = vadd.xlane.f32.xlu0 %v1166_v49  ;;  %v17493_v49 = vunpack.c.h.bf16 %v12972_v33 }
 0x1cf   : > { %1170 = vadd.xlane.f32.xlu1 %v1169_v53  ;;  %v1187_v53 = vadd.f32 %v17490_v29, %v17491_v25  ;;  %v17502_v25 = vunpack.c.l.bf16 %v12993_v62 }
 0x1d0   : > { %v1190_v16 = vadd.f32 %v17493_v49, %v17496_v45  ;;  %v10719_v49 = vld [vmem:[#allocation15 + $0x4] ss:$8 sps:$4 sm:$0xff]  }
 0x1d1   : > { %v10724_v45 = vld [vmem:[#allocation18] ss:$8 sps:$4 sm:$0xff]   ;;  %2035 = vmatprep.subr.bf16.mxu0 %v10719_v49  ;;  %v10741_v49 = vld [vmem:[#allocation15 + $0x30] ss:$8 sps:$4 sm:$0xff]  }
 0x1d2   : > { %1173 = vadd.xlane.f32.xlu0 %v1172_v57  ;;  %v17495_v57 = vunpack.c.l.bf16 %v12975_v37 }
 0x1d3   : > { %1176 = vadd.xlane.f32.xlu1 %v1175_v60  ;;  %v17494_v60 = vunpack.c.h.bf16 %v12975_v37 }
 0x1d5   : > { %v1193_v29 = vadd.f32 %v17494_v60, %v17495_v57  ;;  %v10721_v60 = vld [vmem:[#allocation18 + $0x4] ss:$8 sps:$4 sm:$0xff]  }
 0x1d6   : > { %1179 = vadd.xlane.f32.xlu0 %v1178_v13  ;;  %v12990_v13 = vld [vmem:[%s12773_s17 + $0xa0] sm:$0xff]  ;;  %2432 = vmatprep.subr.bf16.mxu1 %v10721_v60  ;;  %v10742_v60 = vld [vmem:[#allocation18 + $0x30] ss:$8 sps:$4 sm:$0xff]  }
 0x1d7   : > { %1182 = vadd.xlane.f32.xlu1 %v1181_v19  ;;  %v17500_v19 = vunpack.c.l.bf16 %v12990_v13  ;;  %v17499_v15 = vunpack.c.h.bf16 %v12990_v13  ;;  %v10723_v57 = vld [vmem:[#allocation15] ss:$8 sps:$4 sm:$0xff]   ;;  %2433 = vmatpush1.bf16.msra.mxu1 %v10724_v45  ;;  %v10743_v45 = vld [vmem:[#allocation15 + $0x44] ss:$8 sps:$4 sm:$0xff]  }
 0x1d8   : > { %2036 = vmatpush1.bf16.msra.mxu0 %v10723_v57  ;;  %2434 = vmatprep.subr.bf16.mxu1 %v10727_v58  ;;  %v10745_v57 = vld [vmem:[#allocation18 + $0x44] ss:$8 sps:$4 sm:$0xff]  }
 0x1d9   : > { %2037 = vmatprep.subr.bf16.mxu0 %v10725_v59  ;;  %v10747_v58 = vld [vmem:[#allocation15 + $0x40] ss:$8 sps:$4 sm:$0xff]  }
 0x1da   : > { %1185 = vadd.xlane.f32.xlu0 %v1184_v41  ;;  %v1196_v41 = vadd.f32 %v17499_v15, %v17500_v19  ;;  %v10730_v15 = vld [vmem:[#allocation18 + $0x10] ss:$8 sps:$4 sm:$0xff]   ;;  %v10733_v19 = vld [vmem:[#allocation18 + $0x24] ss:$8 sps:$4 sm:$0xff]   ;;  %v10748_v59 = vld [vmem:[#allocation18 + $0x40] ss:$8 sps:$4 sm:$0xff]  }
 0x1db   : > { %1188 = vadd.xlane.f32.xlu1 %v1187_v53  ;;  %v1199_v53 = vadd.f32 %v17501_v61, %v17502_v25  ;;  %2435 = vmatpush1.bf16.msra.mxu1 %v10730_v15  ;;  %v10737_v61 = vld [vmem:[#allocation15 + $0x34] ss:$8 sps:$4 sm:$0xff]  }
 0x1dc   : > { %2436 = vmatprep.subr.bf16.mxu1 %v10733_v19  ;;  %v10739_v25 = vld [vmem:[#allocation18 + $0x34] ss:$8 sps:$4 sm:$0xff]  }
 0x1dd   : > { %v10749_v15 = vld [vmem:[#allocation15 + $0x54] ss:$8 sps:$4 sm:$0xff]   ;;  %v10753_v19 = vld [vmem:[#allocation15 + $0x50] ss:$8 sps:$4 sm:$0xff]  }
 0x1de   : > { %1191 = vadd.xlane.f32.xlu0 %v1190_v16  ;;  %v10729_v16 = vld [vmem:[#allocation15 + $0x10] ss:$8 sps:$4 sm:$0xff]  }
 0x1df   : > { %1194 = vadd.xlane.f32.xlu1 %v1193_v29  ;;  %v10731_v29 = vld [vmem:[#allocation15 + $0x24] ss:$8 sps:$4 sm:$0xff]   ;;  %2038 = vmatpush1.bf16.msra.mxu0 %v10729_v16  ;;  %v10751_v16 = vld [vmem:[#allocation18 + $0x54] ss:$8 sps:$4 sm:$0xff]  }
 0x1e0   : > { %2039 = vmatprep.subr.bf16.mxu0 %v10731_v29  ;;  %v10754_v29 = vld [vmem:[#allocation18 + $0x50] ss:$8 sps:$4 sm:$0xff]  }
 0x1e2   : > { %1197 = vadd.xlane.f32.xlu0 %v1196_v41  ;;  %v10735_v41 = vld [vmem:[#allocation15 + $0x20] ss:$8 sps:$4 sm:$0xff]  }
 0x1e3   : > { %1200 = vadd.xlane.f32.xlu1 %v1199_v53  ;;  %v10736_v53 = vld [vmem:[#allocation18 + $0x20] ss:$8 sps:$4 sm:$0xff]   ;;  %2040 = vmatpush1.bf16.msra.mxu0 %v10735_v41 }
 0x1e4   : > { %2437 = vmatpush1.bf16.msra.mxu1 %v10736_v53  ;;  %2041 = vmatprep.subr.bf16.mxu0 %v10737_v61  ;;  %v10755_v41 = vld [vmem:[#allocation15 + $0x64] ss:$8 sps:$4 sm:$0xff]   ;;  %v10759_v61 = vld [vmem:[#allocation15 + $0x60] ss:$8 sps:$4 sm:$0xff]  }
 0x1e5   : > { %2438 = vmatprep.subr.bf16.mxu1 %v10739_v25  ;;  %v10757_v53 = vld [vmem:[#allocation18 + $0x64] ss:$8 sps:$4 sm:$0xff]   ;;  %v10760_v25 = vld [vmem:[#allocation18 + $0x60] ss:$8 sps:$4 sm:$0xff]  }
 0x1e7   : > { %2042 = vmatpush1.bf16.msra.mxu0 %v10741_v49  ;;  %v10761_v49 = vld [vmem:[#allocation15 + $0x74] ss:$8 sps:$4 sm:$0xff]  }
 0x1e8   : > { %2439 = vmatpush1.bf16.msra.mxu1 %v10742_v60  ;;  %2043 = vmatprep.subr.bf16.mxu0 %v10743_v45  ;;  %v10763_v60 = vld [vmem:[#allocation18 + $0x74] ss:$8 sps:$4 sm:$0xff]  }
 0x1e9   : > { %2440 = vmatprep.subr.bf16.mxu1 %v10745_v57  ;;  %v10765_v45 = vld [vmem:[#allocation15 + $0x70] ss:$8 sps:$4 sm:$0xff]  }
 0x1ea   : > { %v10766_v57 = vld [vmem:[#allocation18 + $0x70] ss:$8 sps:$4 sm:$0xff]  }
 0x1eb   : > { %2044 = vmatpush1.bf16.msra.mxu0 %v10747_v58  ;;  %v10767_v58 = vld [vmem:[#allocation15 + $0x84] ss:$8 sps:$4 sm:$0xff]  }
 0x1ec   : > { %2441 = vmatpush1.bf16.msra.mxu1 %v10748_v59  ;;  %2045 = vmatprep.subr.bf16.mxu0 %v10749_v15  ;;  %v10769_v59 = vld [vmem:[#allocation18 + $0x84] ss:$8 sps:$4 sm:$0xff]  }
 0x1ed   : > { %2442 = vmatprep.subr.bf16.mxu1 %v10751_v16  ;;  %v10771_v15 = vld [vmem:[#allocation15 + $0x80] ss:$8 sps:$4 sm:$0xff]  }
 0x1ee   : > { %v10772_v16 = vld [vmem:[#allocation18 + $0x80] ss:$8 sps:$4 sm:$0xff]  }
 0x1ef   : > { %2046 = vmatpush1.bf16.msra.mxu0 %v10753_v19  ;;  %v13016_v19 = vld [vmem:[%s12773_s17 + $0xb0] sm:$0xff] }
 0x1f0   : > { %2443 = vmatpush1.bf16.msra.mxu1 %v10754_v29  ;;  %2047 = vmatprep.subr.bf16.mxu0 %v10755_v41 }
 0x1f1   : > { %2444 = vmatprep.subr.bf16.mxu1 %v10757_v53 }
 0x1f3   : > { %2048 = vmatpush1.bf16.msra.mxu0 %v10759_v61 }
 0x1f4   : > { %2445 = vmatpush1.bf16.msra.mxu1 %v10760_v25  ;;  %2049 = vmatprep.subr.bf16.mxu0 %v10761_v49  ;;  %v17504_v25 = vunpack.c.l.bf16 %v13016_v19  ;;  %v17503_v49 = vunpack.c.h.bf16 %v13016_v19 }
 0x1f5   : > { %2446 = vmatprep.subr.bf16.mxu1 %v10763_v60 }
 0x1f7   : > { %2050 = vmatpush1.bf16.msra.mxu0 %v10765_v45 }
 0x1f8   : > { %2447 = vmatpush1.bf16.msra.mxu1 %v10766_v57  ;;  %2051 = vmatprep.subr.bf16.mxu0 %v10767_v58 }
 0x1f9   : > { %2448 = vmatprep.subr.bf16.mxu1 %v10769_v59 }
 0x1fb   : > { %2052 = vmatpush1.bf16.msra.mxu0 %v10771_v15  ;;  %v13037_v15 = vld [vmem:[%s12773_s17 + $0xb8] sm:$0xff] }
 0x1fc   : > { %2449 = vmatpush1.bf16.msra.mxu1 %v10772_v16 }
 0x1fd   : > { %2450 = vmatprep.subr.bf16.mxu1 %v10775_v47 }
 0x200   : > { %2451 = vmatpush1.bf16.msra.mxu1 %v10778_v43 }
 0x247   : > { %v1138_v29 = vpop.xlane.xlu0 %1137 }
 0x248   : > { %v1233_v41 = vmul.f32 0.00390625, %v1138_v29  ;;  %v1144_v53 = vpop.xlane.xlu1 %1143 }
 0x249   : > { %v1235_v61 = vmul.f32 0.00390625, %v1144_v53  ;;  %v17511_v53 = vunpack.c.l.bf16 %v13037_v15 }
 0x24a   : > { %v13022_v60 = vsub.f32 %v1070_v3, %v1233_v41  ;;  %v13026_v45 = vsub.f32 %v1071_v4, %v1233_v41 }
 0x24b   : > { %v1141_v57 = vpop.xlane.xlu0 %1140  ;;  %v13030_v58 = vsub.f32 %v1074_v8, %v1235_v61  ;;  %v13034_v59 = vsub.f32 %v1075_v9, %v1235_v61  ;;  %v1202_v8 = vadd.f32 %v17503_v49, %v17504_v25  ;;  %v13066_v25 = vld [vmem:[%s12773_s17 + $0xc0] sm:$0xff] }
 0x24c   : > { %v1234_v16 = vmul.f32 0.00390625, %v1141_v57  ;;  %v1329_v3 = vmul.f32 %v13022_v60, %v13022_v60  ;;  %v1330_v0 = vmul.f32 %v13026_v45, %v13026_v45  ;;  %v1147_v4 = vpop.xlane.xlu1 %1146  ;;  %v17510_v55 = vunpack.c.l.bf16 %v13066_v25 }
 0x24d   : > { %v1236_v29 = vmul.f32 0.00390625, %v1147_v4  ;;  %v1333_v4 = vmul.f32 %v13030_v58, %v13030_v58  ;;  %v1334_v49 = vmul.f32 %v13034_v59, %v13034_v59  ;;  %v17509_v54 = vunpack.c.h.bf16 %v13066_v25 }
 0x24e   : > { %v13049_v2 = vsub.f32 %v1072_v5, %v1234_v16  ;;  %v13053_v9 = vsub.f32 %v1073_v6, %v1234_v16  ;;  %v1393_v41 = vadd.f32 %v1330_v0, %v1329_v3  ;;  %v17508_v5 = vunpack.c.h.bf16 %v13037_v15 }
 0x24f   : > { %v13058_v61 = vsub.f32 %v1076_v10, %v1236_v29  ;;  %v1150_v57 = vpop.xlane.xlu0 %1149  ;;  %v13070_v1 = vsub.f32 %v1077_v11, %v1236_v29  ;;  %v1399_v51 = vadd.f32 %v1334_v49, %v1333_v4 }
 0x250   : > { %1394 = vadd.xlane.f32.xlu0 %v1393_v41  ;;  %v1331_v6 = vmul.f32 %v13049_v2, %v13049_v2  ;;  %v1332_v10 = vmul.f32 %v13053_v9, %v13053_v9  ;;  %v1237_v16 = vmul.f32 0.00390625, %v1150_v57  ;;  %v1153_v3 = vpop.xlane.xlu1 %1152  ;;  %v1205_v7 = vadd.f32 %v17508_v5, %v17511_v53 }
 0x251   : > { %v1238_v11 = vmul.f32 0.00390625, %v1153_v3  ;;  %v1335_v29 = vmul.f32 %v13058_v61, %v13058_v61  ;;  %v1336_v4 = vmul.f32 %v13070_v1, %v13070_v1 }
 0x252   : > { %v1396_v0 = vadd.f32 %v1332_v10, %v1331_v6  ;;  %v13086_v57 = vsub.f32 %v1078_v17, %v1237_v16  ;;  %v13090_v49 = vsub.f32 %v1079_v18, %v1237_v16  ;;  %v13095_v6 = vld [vmem:[%s12773_s17 + $0xc8] sm:$0xff]  ;;  %v1208_v10 = vadd.f32 %v17509_v54, %v17510_v55  ;;  %v13112_v16 = vld [vmem:[%s12773_s17 + $0xd0] sm:$0xff] }
 0x253   : > { %v1156_v41 = vpop.xlane.xlu0 %1155  ;;  %v13103_v3 = vsub.f32 %v1080_v20, %v1238_v11  ;;  %v13107_v12 = vsub.f32 %v1081_v21, %v1238_v11  ;;  %v17514_v17 = vunpack.c.l.bf16 %v13095_v6  ;;  %v17513_v18 = vunpack.c.h.bf16 %v13095_v6 }
 0x254   : > { %1203 = vadd.xlane.f32.xlu0 %v1202_v8  ;;  %1397 = vadd.xlane.f32.xlu1 %v1396_v0  ;;  %v1159_v8 = vpop.xlane.xlu1 %1158  ;;  %v1402_v5 = vadd.f32 %v1336_v4, %v1335_v29  ;;  %v1239_v54 = vmul.f32 0.00390625, %v1156_v41  ;;  %v1337_v20 = vmul.f32 %v13086_v57, %v13086_v57  ;;  %v1338_v14 = vmul.f32 %v13090_v49, %v13090_v49 }
 0x255   : > { %v17519_v21 = vunpack.c.l.bf16 %v13112_v16  ;;  %v17518_v11 = vunpack.c.h.bf16 %v13112_v16  ;;  %v1339_v29 = vmul.f32 %v13103_v3, %v13103_v3  ;;  %v1340_v41 = vmul.f32 %v13107_v12, %v13107_v12 }
 0x256   : > { %v13132_v53 = vsub.f32 %v1082_v26, %v1239_v54  ;;  %v13136_v50 = vsub.f32 %v1083_v27, %v1239_v54 }
 0x257   : > { %v1162_v0 = vpop.xlane.xlu0 %1161 }
 0x258   : > { %1400 = vadd.xlane.f32.xlu0 %v1399_v51  ;;  %1206 = vadd.xlane.f32.xlu1 %v1205_v7  ;;  %v1165_v55 = vpop.xlane.xlu1 %1164  ;;  %v1211_v51 = vadd.f32 %v17513_v18, %v17514_v17  ;;  %v1240_v7 = vmul.f32 0.00390625, %v1159_v8  ;;  %v1405_v8 = vadd.f32 %v1338_v14, %v1337_v20  ;;  %v13139_v18 = vld [vmem:[%s12773_s17 + $0xd8] sm:$0xff]  ;;  %v13156_v20 = vld [vmem:[%s12773_s17 + $0xe0] sm:$0xff]  ;;  %v1241_v47 = vmul.f32 0.00390625, %v1162_v0  ;;  %v10781_v14 = vld [vmem:[#allocation18 + $0xa4] ss:$8 sps:$4 sm:$0xff]  }
 0x259   : > { %v10773_v17 = vld [vmem:[#allocation15 + $0x94] ss:$8 sps:$4 sm:$0xff]   ;;  %v17522_v27 = vunpack.c.l.bf16 %v13139_v18  ;;  %v17521_v54 = vunpack.c.h.bf16 %v13139_v18  ;;  %v1342_v23 = vmul.f32 %v13136_v50, %v13136_v50  ;;  %v17525_v42 = vunpack.c.l.bf16 %v13156_v20  ;;  %2452 = vmatprep.subr.bf16.mxu1 %v10781_v14 }
 0x25a   : > { %2053 = vmatprep.subr.bf16.mxu0 %v10773_v17  ;;  %v13147_v22 = vsub.f32 %v1084_v30, %v1240_v7  ;;  %v13151_v26 = vsub.f32 %v1085_v31, %v1240_v7  ;;  %v1408_v17 = vadd.f32 %v1340_v41, %v1339_v29  ;;  %v1341_v30 = vmul.f32 %v13132_v53, %v13132_v53  ;;  %v10779_v31 = vld [vmem:[#allocation15 + $0xa4] ss:$8 sps:$4 sm:$0xff]  }
 0x25b   : > { %v13128_v4 = vpop.xlane.xlu0 %1167  ;;  %2054 = vmatpush1.bf16.msra.mxu0 %v10777_v46  ;;  %v17524_v43 = vunpack.c.h.bf16 %v13156_v20  ;;  %v1217_v46 = vadd.f32 %v17521_v54, %v17522_v27  ;;  %v1242_v0 = vmul.f32 0.00390625, %v1165_v55  ;;  %v13174_v41 = vsub.f32 %v1086_v34, %v1241_v47  ;;  %v10785_v54 = vld [vmem:[#allocation15 + $0xb4] ss:$8 sps:$4 sm:$0xff]  }
 0x25c   : > { %1209 = vadd.xlane.f32.xlu0 %v1208_v10  ;;  %1403 = vadd.xlane.f32.xlu1 %v1402_v5  ;;  %v1214_v5 = vadd.f32 %v17518_v11, %v17519_v21  ;;  %v1171_v10 = vpop.xlane.xlu1 %1170  ;;  %17735 = vst [vmem:[#allocation33_spill] sm:$0xff] %v13147_v22  ;;  %v10783_v11 = vld [vmem:[#allocation15 + $0xa0] ss:$8 sps:$4 sm:$0xff]   ;;  %v1344_v29 = vmul.f32 %v13151_v26, %v13151_v26  ;;  %v17739_v34 = vunpack.c.h.bf16 %v12879_v28 }
 0x25d   : > { %v10784_v21 = vld [vmem:[#allocation18 + $0xa0] ss:$8 sps:$4 sm:$0xff]   ;;  %2055 = vmatprep.subr.bf16.mxu0 %v10779_v31  ;;  %17736 = vst [vmem:[#allocation34_spill] sm:$0xff] %v13174_v41  ;;  %v1411_v55 = vadd.f32 %v1342_v23, %v1341_v30  ;;  %v10787_v27 = vld [vmem:[#allocation18 + $0xb4] ss:$8 sps:$4 sm:$0xff]   ;;  %v13189_v24 = vsub.f32 %v1088_v38, %v1242_v0  ;;  %v1345_v38 = vmul.f32 %v13174_v41, %v13174_v41 }
 0x25e   : > { %2453 = vmatpush1.bf16.msra.mxu1 %v10784_v21  ;;  %v13181_v31 = vld [vmem:[%s12773_s17 + $0xe8] sm:$0xff]  ;;  %v1220_v21 = vadd.f32 %v17524_v43, %v17525_v42  ;;  %v17741_v42 = vunpack.c.l.bf16 %v12888_v32  ;;  %v13224_v41 = vld [vmem:[%s12773_s17 + $0xf8] sm:$0xff] }
 0x25f   : > { %v1174_v7 = vpop.xlane.xlu0 %1173  ;;  %2056 = vmatpush1.bf16.msra.mxu0 %v10783_v11  ;;  %v10790_v11 = vld [vmem:[#allocation18 + $0xb0] ss:$8 sps:$4 sm:$0xff]   ;;  %2454 = vmatprep.subr.bf16.mxu1 %v10787_v27  ;;  %17738 = vst [vmem:[#allocation36_spill] sm:$0xff] %v13189_v24  ;;  %v10791_v23 = vld [vmem:[#allocation15 + $0xc4] ss:$8 sps:$4 sm:$0xff]  }
 0x260   : > { %1212 = vadd.xlane.f32.xlu1 %v1211_v51  ;;  %1406 = vadd.xlane.f32.xlu0 %v1405_v8  ;;  %v1343_v51 = vmul.f32 %v13147_v22, %v13147_v22  ;;  %v13178_v8 = vsub.f32 %v1087_v35, %v1241_v47  ;;  %v1177_v14 = vpop.xlane.xlu1 %1176  ;;  %v13193_v35 = vsub.f32 %v17739_v34, %v1242_v0  ;;  %v13198_v47 = vld [vmem:[%s12773_s17 + $0xf0] sm:$0xff]  ;;  %v1244_v34 = vmul.f32 0.00390625, %v1171_v10 }
 0x261   : > { %2057 = vmatprep.subr.bf16.mxu0 %v10785_v54  ;;  %v1243_v54 = vmul.f32 0.00390625, %v13128_v4  ;;  %v10793_v0 = vld [vmem:[#allocation18 + $0xc4] ss:$8 sps:$4 sm:$0xff]  }
 0x262   : > { %17737 = vst [vmem:[#allocation35_spill] sm:$0xff] %v13178_v8  ;;  %17740 = vst [vmem:[#allocation37_spill] sm:$0xff] %v13193_v35  ;;  %2455 = vmatpush1.bf16.msra.mxu1 %v10790_v11  ;;  %v1414_v27 = vadd.f32 %v1344_v29, %v1343_v51  ;;  %v1346_v28 = vmul.f32 %v13178_v8, %v13178_v8  ;;  %v10796_v51 = vld [vmem:[#allocation18 + $0xc0] ss:$8 sps:$4 sm:$0xff]   ;;  %v1245_v29 = vmul.f32 0.00390625, %v1174_v7  ;;  %v17752_v8 = vunpack.c.h.bf16 %v12906_v40 }
 0x263   : > { %v1180_v30 = vpop.xlane.xlu0 %1179  ;;  %2058 = vmatpush1.bf16.msra.mxu0 %v10789_v39  ;;  %2456 = vmatprep.subr.bf16.mxu1 %v10793_v0  ;;  %v1348_v10 = vmul.f32 %v13193_v35, %v13193_v35  ;;  %v17743_v0 = vunpack.c.h.bf16 %v12888_v32  ;;  %v17748_v32 = vunpack.c.l.bf16 %v13198_v47  ;;  %v10802_v35 = vld [vmem:[#allocation18 + $0xd0] ss:$8 sps:$4 sm:$0xff]  }
 0x264   : > { %1409 = vadd.xlane.f32.xlu1 %v1408_v17  ;;  %1215 = vadd.xlane.f32.xlu0 %v1214_v5  ;;  %v17528_v5 = vunpack.c.l.bf16 %v13181_v31  ;;  %v17527_v17 = vunpack.c.h.bf16 %v13181_v31  ;;  %v1183_v11 = vpop.xlane.xlu1 %1182  ;;  %v1417_v43 = vadd.f32 %v1346_v28, %v1345_v38  ;;  %v1246_v28 = vmul.f32 0.00390625, %v1177_v14 }
 0x265   : > { %2059 = vmatprep.subr.bf16.mxu0 %v10791_v23  ;;  %v13217_v23 = vsub.f32 %v17741_v42, %v1243_v54  ;;  %v13221_v39 = vsub.f32 %v17743_v0, %v1243_v54  ;;  %v17749_v54 = vunpack.c.h.bf16 %v13198_v47  ;;  %v10801_v0 = vld [vmem:[#allocation15 + $0xd0] ss:$8 sps:$4 sm:$0xff]   ;;  %v1247_v22 = vmul.f32 0.00390625, %v1180_v30 }
 0x266   : > { %v1223_v4 = vadd.f32 %v17527_v17, %v17528_v5  ;;  %2457 = vmatpush1.bf16.msra.mxu1 %v10796_v51  ;;  %v10797_v17 = vld [vmem:[#allocation15 + $0xd4] ss:$8 sps:$4 sm:$0xff]   ;;  %v17537_v14 = vunpack.c.h.bf16 %v13224_v41  ;;  %v10805_v30 = vld [vmem:[#allocation18 + $0xe4] ss:$8 sps:$4 sm:$0xff]  }
 0x267   : > { %17742 = vst [vmem:[#allocation38_spill] sm:$0xff] %v13217_v23  ;;  %v1186_v7 = vpop.xlane.xlu0 %1185  ;;  %v10799_v5 = vld [vmem:[#allocation18 + $0xd4] ss:$8 sps:$4 sm:$0xff]   ;;  %v1226_v38 = vadd.f32 %v17749_v54, %v17748_v32  ;;  %v1350_v32 = vmul.f32 %v13221_v39, %v13221_v39 }
 0x268   : > { %1218 = vadd.xlane.f32.xlu1 %v1217_v46  ;;  %1412 = vadd.xlane.f32.xlu0 %v1411_v55  ;;  %v10795_v46 = vld [vmem:[#allocation15 + $0xc0] ss:$8 sps:$4 sm:$0xff]   ;;  %v1347_v55 = vmul.f32 %v13189_v24, %v13189_v24  ;;  %v17744_v24 = vunpack.c.l.bf16 %v12897_v36  ;;  %v1189_v54 = vpop.xlane.xlu1 %1188 }
 0x269   : > { %2060 = vmatpush1.bf16.msra.mxu0 %v10795_v46  ;;  %v17750_v46 = vunpack.c.l.bf16 %v12906_v40  ;;  %2458 = vmatprep.subr.bf16.mxu1 %v10799_v5  ;;  %v1248_v40 = vmul.f32 0.00390625, %v1183_v11  ;;  %v10808_v11 = vld [vmem:[#allocation18 + $0xe0] ss:$8 sps:$4 sm:$0xff]  }
 0x26a   : > { %2061 = vmatprep.subr.bf16.mxu0 %v10797_v17  ;;  %2459 = vmatpush1.bf16.msra.mxu1 %v10802_v35  ;;  %v17753_v17 = vunpack.c.l.bf16 %v12915_v44  ;;  %v17755_v35 = vunpack.c.l.bf16 %v12924_v48 }
 0x26b   : > { %v13240_v51 = vsub.f32 %v17750_v46, %v1245_v29  ;;  %2460 = vmatprep.subr.bf16.mxu1 %v10805_v30  ;;  %v1250_v30 = vmul.f32 0.00390625, %v1189_v54 }
 0x26c   : > { %1415 = vadd.xlane.f32.xlu1 %v1414_v27  ;;  %1221 = vadd.xlane.f32.xlu0 %v1220_v21  ;;  %v13228_v27 = vsub.f32 %v17744_v24, %v1244_v34  ;;  %v17746_v21 = vunpack.c.h.bf16 %v12897_v36  ;;  %v13244_v24 = vsub.f32 %v17752_v8, %v1245_v29  ;;  %v17538_v36 = vunpack.c.l.bf16 %v13224_v41  ;;  %v10803_v8 = vld [vmem:[#allocation15 + $0xe4] ss:$8 sps:$4 sm:$0xff]  }
 0x26d   : > { %17751 = vst [vmem:[#allocation41_spill] sm:$0xff] %v13240_v51  ;;  %2062 = vmatpush1.bf16.msra.mxu0 %v10801_v0  ;;  %v13254_v5 = vsub.f32 %v17753_v17, %v1246_v28  ;;  %v13266_v0 = vsub.f32 %v17755_v35, %v1247_v22  ;;  %v1353_v46 = vmul.f32 %v13240_v51, %v13240_v51  ;;  %v17756_v17 = vunpack.c.h.bf16 %v12924_v48 }
 0x26e   : > { %17745 = vst [vmem:[#allocation39_spill] sm:$0xff] %v13228_v27  ;;  %v13232_v42 = vsub.f32 %v17746_v21, %v1244_v34  ;;  %v1420_v34 = vadd.f32 %v1348_v10, %v1347_v55  ;;  %v1349_v21 = vmul.f32 %v13217_v23, %v13217_v23  ;;  %v1351_v29 = vmul.f32 %v13228_v27, %v13228_v27  ;;  %v10807_v10 = vld [vmem:[#allocation15 + $0xe0] ss:$8 sps:$4 sm:$0xff]  }
 0x26f   : > { %2063 = vmatprep.subr.bf16.mxu0 %v10803_v8  ;;  %v1229_v35 = vadd.f32 %v17537_v14, %v17538_v36  ;;  %v17757_v51 = vunpack.c.l.bf16 %v12933_v52  ;;  %2461 = vmatpush1.bf16.msra.mxu1 %v10808_v11  ;;  %v10809_v8 = vld [vmem:[#allocation15 + $0xf4] ss:$8 sps:$4 sm:$0xff]   ;;  %v1195_v14 = vpop.xlane.xlu1 %1194 }
 0x270   : > { %17747 = vst [vmem:[#allocation40_spill] sm:$0xff] %v13232_v42  ;;  %1224 = vadd.xlane.f32.xlu1 %v1223_v4  ;;  %1418 = vadd.xlane.f32.xlu0 %v1417_v43  ;;  %v17754_v43 = vunpack.c.h.bf16 %v12915_v44  ;;  %v1352_v55 = vmul.f32 %v13232_v42, %v13232_v42  ;;  %v1354_v44 = vmul.f32 %v13244_v24, %v13244_v24  ;;  %v1249_v42 = vmul.f32 0.00390625, %v1186_v7  ;;  %v10814_v7 = vld [vmem:[#allocation18 + $0xf0] ss:$8 sps:$4 sm:$0xff]  }
 0x271   : > { %v1423_v27 = vadd.f32 %v1350_v32, %v1349_v21  ;;  %v13282_v23 = vsub.f32 %v17757_v51, %v1248_v40  ;;  %2064 = vmatpush1.bf16.msra.mxu0 %v10807_v10  ;;  %v10813_v21 = vld [vmem:[#allocation15 + $0xf0] ss:$8 sps:$4 sm:$0xff]   ;;  %v1357_v10 = vmul.f32 %v13266_v0, %v13266_v0 }
 0x272   : > { %v13258_v4 = vsub.f32 %v17754_v43, %v1246_v28  ;;  %v1192_v28 = vpop.xlane.xlu0 %1191  ;;  %v13274_v43 = vsub.f32 %v17756_v17, %v1247_v22  ;;  %v1426_v22 = vadd.f32 %v1352_v55, %v1351_v29  ;;  %v1355_v17 = vmul.f32 %v13254_v5, %v13254_v5  ;;  %2065 = vmatprep.subr.bf16.mxu0 %v10809_v8 }
 0x273   : > { %v1429_v32 = vadd.f32 %v1354_v44, %v1353_v46  ;;  %v1251_v36 = vmul.f32 0.00390625, %v1192_v28  ;;  %v1359_v46 = vmul.f32 %v13282_v23, %v13282_v23  ;;  %v17761_v44 = vunpack.c.l.bf16 %v12957_v63 }
 0x274   : > { %1421 = vadd.xlane.f32.xlu1 %v1420_v34  ;;  %1227 = vadd.xlane.f32.xlu0 %v1226_v38  ;;  %v10811_v34 = vld [vmem:[#allocation18 + $0xf4] ss:$8 sps:$4 sm:$0xff]   ;;  %v17758_v38 = vunpack.c.h.bf16 %v12933_v52  ;;  %v1356_v51 = vmul.f32 %v13258_v4, %v13258_v4  ;;  %v17759_v52 = vunpack.c.l.bf16 %v12942_v56  ;;  %v1358_v55 = vmul.f32 %v13274_v43, %v13274_v43 }
 0x275   : > { %2462 = vmatprep.subr.bf16.mxu1 %v10811_v34  ;;  %2066 = vmatpush1.bf16.msra.mxu0 %v10813_v21  ;;  %v17762_v28 = vunpack.c.h.bf16 %v12957_v63  ;;  %v17763_v8 = vunpack.c.l.bf16 %v12972_v33 }
 0x276   : > { %v13286_v48 = vsub.f32 %v17758_v38, %v1248_v40  ;;  %v13296_v54 = vsub.f32 %v17759_v52, %v1249_v42  ;;  %v17760_v40 = vunpack.c.h.bf16 %v12942_v56  ;;  %v1198_v11 = vpop.xlane.xlu0 %1197  ;;  %2463 = vmatpush1.bf16.msra.mxu1 %v10814_v7  ;;  %v1252_v56 = vmul.f32 0.00390625, %v1195_v14 }
 0x277   : > { %v13318_v34 = vsub.f32 %v17763_v8, %v1251_v36  ;;  %v17764_v38 = vunpack.c.h.bf16 %v12972_v33  ;;  %v1432_v7 = vadd.f32 %v1356_v51, %v1355_v17  ;;  %v1435_v52 = vadd.f32 %v1358_v55, %v1357_v10 }
 0x278   : > { %1230 = vadd.xlane.f32.xlu1 %v1229_v35  ;;  %1424 = vadd.xlane.f32.xlu0 %v1423_v27  ;;  %v13300_v29 = vsub.f32 %v17760_v40, %v1249_v42  ;;  %v13308_v27 = vsub.f32 %v17761_v44, %v1250_v30  ;;  %v13312_v35 = vsub.f32 %v17762_v28, %v1250_v30  ;;  %v1253_v40 = vmul.f32 0.00390625, %v1198_v11  ;;  %v1201_v30 = vpop.xlane.xlu1 %1200 }
 0x279   : > { %v1360_v42 = vmul.f32 %v13286_v48, %v13286_v48  ;;  %v13322_v21 = vsub.f32 %v17764_v38, %v1251_v36  ;;  %v1361_v63 = vmul.f32 %v13296_v54, %v13296_v54  ;;  %v17765_v44 = vunpack.c.l.bf16 %v12975_v37 }
 0x27a   : > { %v1362_v14 = vmul.f32 %v13300_v29, %v13300_v29  ;;  %v1363_v33 = vmul.f32 %v13308_v27, %v13308_v27  ;;  %v1364_v36 = vmul.f32 %v13312_v35, %v13312_v35  ;;  %v1365_v51 = vmul.f32 %v13318_v34, %v13318_v34 }
 0x27b   : > { %v13330_v28 = vsub.f32 %v17765_v44, %v1252_v56  ;;  %v1438_v8 = vadd.f32 %v1360_v42, %v1359_v46  ;;  %v1366_v10 = vmul.f32 %v13322_v21, %v13322_v21  ;;  %v17767_v55 = vunpack.c.l.bf16 %v12990_v13 }
 0x27c   : > { %1427 = vadd.xlane.f32.xlu1 %v1426_v22  ;;  %1430 = vadd.xlane.f32.xlu0 %v1429_v32  ;;  %v17766_v22 = vunpack.c.h.bf16 %v12975_v37  ;;  %v1254_v32 = vmul.f32 0.00390625, %v1201_v30  ;;  %v17769_v46 = vunpack.c.h.bf16 %v12990_v13  ;;  %v1441_v37 = vadd.f32 %v1362_v14, %v1361_v63 }
 0x27d   : > { %v13346_v11 = vsub.f32 %v17767_v55, %v1253_v40  ;;  %v17770_v38 = vunpack.c.l.bf16 %v12993_v62  ;;  %v1447_v44 = vadd.f32 %v1366_v10, %v1365_v51  ;;  %v1650_v10 = vlaneseq }
 0x27e   : > { %v13338_v17 = vsub.f32 %v17766_v22, %v1252_v56  ;;  %v13350_v42 = vsub.f32 %v17769_v46, %v1253_v40  ;;  %v1444_v56 = vadd.f32 %v1364_v36, %v1363_v33  ;;  %v1367_v22 = vmul.f32 %v13330_v28, %v13330_v28 }
 0x27f   : > { %17768 = vst [vmem:[#allocation42_spill] sm:$0xff] %v13346_v11  ;;  %v13354_v30 = vsub.f32 %v17770_v38, %v1254_v32  ;;  %v1369_v40 = vmul.f32 %v13346_v11, %v13346_v11 }
 0x280   : > { %1433 = vadd.xlane.f32.xlu1 %v1432_v7  ;;  %1436 = vadd.xlane.f32.xlu0 %v1435_v52  ;;  %v1368_v7 = vmul.f32 %v13338_v17, %v13338_v17  ;;  %v17771_v52 = vunpack.c.h.bf16 %v12993_v62  ;;  %v1370_v63 = vmul.f32 %v13350_v42, %v13350_v42 }
 0x281   : > { %v1371_v36 = vmul.f32 %v13354_v30, %v13354_v30 }
 0x282   : > { %v13362_v13 = vsub.f32 %v17771_v52, %v1254_v32  ;;  %v1450_v14 = vadd.f32 %v1368_v7, %v1367_v22  ;;  %v1453_v33 = vadd.f32 %v1370_v63, %v1369_v40  ;;  %v17772_v7 = vunpack.c.l.bf16 %v13016_v19 }
 0x283   : > { %v17774_v40 = vunpack.c.h.bf16 %v13016_v19  ;;  %v17779_v19 = vunpack.c.h.bf16 %v13037_v15 }
 0x284   : > { %1439 = vadd.xlane.f32.xlu1 %v1438_v8  ;;  %1442 = vadd.xlane.f32.xlu0 %v1441_v37  ;;  %v1372_v8 = vmul.f32 %v13362_v13, %v13362_v13 }
 0x286   : > { %v1456_v62 = vadd.f32 %v1372_v8, %v1371_v36 }
 0x288   : > { %1445 = vadd.xlane.f32.xlu1 %v1444_v56  ;;  %1448 = vadd.xlane.f32.xlu0 %v1447_v44  ;;  %v1651_v44 = vshrl.u32 %v1650_v10, 7  ;;  %v17777_v10 = vunpack.c.l.bf16 %v13037_v15 }
 0x28c   : > { %1451 = vadd.xlane.f32.xlu1 %v1450_v14  ;;  %1454 = vadd.xlane.f32.xlu0 %v1453_v33 }
 0x290   : > { %1457 = vadd.xlane.f32.xlu1 %v1456_v62 }
 0x2dd   : > { %v1395_v32 = vpop.xlane.xlu0 %1394 }
 0x2de   : > { %v1489_v51 = vmul.f32 0.00390625, %v1395_v32 }
 0x2e0   : > { %v1521_v55 = vadd.f32 1e-05, %v1489_v51  ;;  %v13384_v51 = vsub.s32 1, %v1651_v44 }
 0x2e1   : > { %v1398_v46 = vpop.xlane.xlu1 %1397  ;;  %v1204_v37 = vpop.xlane.xlu0 %1203 }
 0x2e2   : > { %10815 = vrsqrt.f32 %v1521_v55  ;;  %v1490_v56 = vmul.f32 0.00390625, %v1398_v46  ;;  %v1255_v38 = vmul.f32 0.00390625, %v1204_v37  ;;  %17776 = vst [vmem:[#allocation45_spill] sm:$0xff] %v13384_v51 }
 0x2e4   : > { %v1522_v22 = vadd.f32 1e-05, %v1490_v56  ;;  %v13374_v52 = vsub.f32 %v17772_v7, %v1255_v38  ;;  %v13378_v63 = vsub.f32 %v17774_v40, %v1255_v38  ;;  %v1134_v56 = vld [vmem:[#allocation11] sm:$0x3]  ;;  %v13394_v38 = vsub.s32 0, %v1651_v44 }
 0x2e5   : > { %v1207_v14 = vpop.xlane.xlu1 %1206  ;;  %v1401_v33 = vpop.xlane.xlu0 %1400  ;;  %v13401_v15 = vrot.slane %v1134_v56, %v13384_v51  ;;  %v17782_v44 = vunpack.c.l.bf16 %v13066_v25 }
 0x2e6   : > { %17773 = vst [vmem:[#allocation43_spill] sm:$0xff] %v13374_v52  ;;  %17775 = vst [vmem:[#allocation44_spill] sm:$0xff] %v13378_v63  ;;  %10817 = vrsqrt.f32 %v1522_v22  ;;  %v1256_v36 = vmul.f32 0.00390625, %v1207_v14  ;;  %v1491_v8 = vmul.f32 0.00390625, %v1401_v33  ;;  %v1373_v62 = vmul.f32 %v13374_v52, %v13374_v52 }
 0x2e7   : > { %v1374_v32 = vmul.f32 %v13378_v63, %v13378_v63  ;;  %17781 = vst [vmem:[#allocation48_spill] sm:$0xff] %v13394_v38 }
 0x2e8   : > { %v13388_v55 = vsub.f32 %v17777_v10, %v1256_v36  ;;  %v13392_v46 = vsub.f32 %v17779_v19, %v1256_v36  ;;  %v1523_v37 = vadd.f32 1e-05, %v1491_v8 }
 0x2e9   : > { %v1404_v22 = vpop.xlane.xlu1 %1403  ;;  %v1210_v7 = vpop.xlane.xlu0 %1209  ;;  %v1459_v40 = vadd.f32 %v1374_v32, %v1373_v62  ;;  %v17784_v62 = vunpack.c.h.bf16 %v13066_v25 }
 0x2ea   : > { %17778 = vst [vmem:[#allocation46_spill] sm:$0xff] %v13388_v55  ;;  %17780 = vst [vmem:[#allocation47_spill] sm:$0xff] %v13392_v46  ;;  %10819 = vrsqrt.f32 %v1523_v37  ;;  %v1492_v14 = vmul.f32 0.00390625, %v1404_v22  ;;  %v1257_v33 = vmul.f32 0.00390625, %v1210_v7  ;;  %v1375_v52 = vmul.f32 %v13388_v55, %v13388_v55  ;;  %v1135_v37 = vld [vmem:[#allocation12] sm:$0x3] }
 0x2eb   : > { %1460 = vadd.xlane.f32.xlu0 %v1459_v40  ;;  %v1376_v10 = vmul.f32 %v13392_v46, %v13392_v46  ;;  %v13412_v22 = vrot.slane %v1134_v56, %v13394_v38 }
 0x2ec   : > { %v10816_v36 = vpop.eup %10815  ;;  %v1524_v8 = vadd.f32 1e-05, %v1492_v14  ;;  %v13405_v19 = vsub.f32 %v17782_v44, %v1257_v33  ;;  %v13409_v32 = vsub.f32 %v17784_v62, %v1257_v33  ;;  %v13422_v33 = vrot.slane %v1135_v37, %v13394_v38 }
 0x2ed   : > { %v1213_v7 = vpop.xlane.xlu1 %1212  ;;  %v1407_v40 = vpop.xlane.xlu0 %1406  ;;  %v1462_v55 = vadd.f32 %v1376_v10, %v1375_v52  ;;  %v1586_v46 = vmul.f32 %v10816_v36, %v13026_v45  ;;  %v1585_v63 = vmul.f32 %v10816_v36, %v13022_v60  ;;  %v13425_v52 = vrot.slane %v1135_v37, %v13384_v51 }
 0x2ee   : > { %17783 = vst [vmem:[#allocation49_spill] sm:$0xff] %v13405_v19  ;;  %10821 = vrsqrt.f32 %v1524_v8  ;;  %v1258_v14 = vmul.f32 0.00390625, %v1213_v7  ;;  %v1493_v11 = vmul.f32 0.00390625, %v1407_v40  ;;  %v1377_v44 = vmul.f32 %v13405_v19, %v13405_v19 }
 0x2ef   : > { %1463 = vadd.xlane.f32.xlu1 %v1462_v55  ;;  %v1378_v25 = vmul.f32 %v13409_v32, %v13409_v32  ;;  %v1661_v56 = vmul.f32 %v13401_v15, %v1586_v46  ;;  %v17785_v60 = vunpack.c.l.bf16 %v13095_v6  ;;  %v17787_v36 = vunpack.c.h.bf16 %v13095_v6 }
 0x2f0   : > { %v10818_v45 = vpop.eup %10817  ;;  %v1525_v55 = vadd.f32 1e-05, %v1493_v11  ;;  %v1660_v62 = vmul.f32 %v13412_v22, %v1585_v63 }
 0x2f1   : > { %v13429_v10 = vsub.f32 %v17785_v60, %v1258_v14  ;;  %v13433_v8 = vsub.f32 %v17787_v36, %v1258_v14  ;;  %v1410_v7 = vpop.xlane.xlu1 %1409  ;;  %v1216_v46 = vpop.xlane.xlu0 %1215  ;;  %v1465_v40 = vadd.f32 %v1378_v25, %v1377_v44  ;;  %v1588_v38 = vmul.f32 %v10818_v45, %v13053_v9 }
 0x2f2   : > { %v1587_v37 = vmul.f32 %v10818_v45, %v13049_v2  ;;  %10823 = vrsqrt.f32 %v1525_v55  ;;  %v1494_v51 = vmul.f32 0.00390625, %v1410_v7  ;;  %v1259_v19 = vmul.f32 0.00390625, %v1216_v46 }
 0x2f3   : > { %17786 = vst [vmem:[#allocation50_spill] sm:$0xff] %v13429_v10  ;;  %v1379_v60 = vmul.f32 %v13429_v10, %v13429_v10  ;;  %1466 = vadd.xlane.f32.xlu0 %v1465_v40  ;;  %v1380_v6 = vmul.f32 %v13433_v8, %v13433_v8  ;;  %v1663_v11 = vmul.f32 %v13401_v15, %v1588_v38  ;;  %v17788_v2 = vunpack.c.l.bf16 %v13112_v16 }
 0x2f4   : > { %v1736_v63 = vadd.f32 %v13425_v52, %v1661_v56  ;;  %v1662_v14 = vmul.f32 %v13412_v22, %v1587_v37  ;;  %v10820_v44 = vpop.eup %10819  ;;  %v1526_v9 = vadd.f32 1e-05, %v1494_v51  ;;  %v17789_v45 = vunpack.c.h.bf16 %v13112_v16 }
 0x2f5   : > { %v13447_v25 = vsub.f32 %v17788_v2, %v1259_v19  ;;  %v1735_v55 = vadd.f32 %v13422_v33, %v1660_v62  ;;  %v1219_v7 = vpop.xlane.xlu1 %1218  ;;  %v1413_v46 = vpop.xlane.xlu0 %1412  ;;  %v1468_v40 = vadd.f32 %v1380_v6, %v1379_v60  ;;  %v1738_v38 = vadd.f32 %v13425_v52, %v1663_v11 }
 0x2f6   : > { %v13451_v36 = vsub.f32 %v17789_v45, %v1259_v19  ;;  %v1737_v56 = vadd.f32 %v13422_v33, %v1662_v14  ;;  %v1590_v37 = vmul.f32 %v10820_v44, %v13034_v59  ;;  %10825 = vrsqrt.f32 %v1526_v9 }
 0x2f7   : > { %v1260_v51 = vmul.f32 0.00390625, %v1219_v7  ;;  %v1495_v10 = vmul.f32 0.00390625, %v1413_v46  ;;  %v1381_v2 = vmul.f32 %v13447_v25, %v13447_v25  ;;  %1469 = vadd.xlane.f32.xlu1 %v1468_v40  ;;  %v1800_v16 = vpack.c.bf16 %v1738_v38, %v1736_v63 }
 0x2f8   : > { %v1799_v19 = vpack.c.bf16 %v1737_v56, %v1735_v55  ;;  %v1382_v62 = vmul.f32 %v13451_v36, %v13451_v36  ;;  %v1665_v60 = vmul.f32 %v13401_v15, %v1590_v37  ;;  %v10822_v6 = vpop.eup %10821  ;;  %v17790_v11 = vunpack.c.l.bf16 %v13139_v18 }
 0x2f9   : > { %v17791_v59 = vunpack.c.h.bf16 %v13139_v18  ;;  %v1527_v45 = vadd.f32 1e-05, %v1495_v10  ;;  %v1589_v7 = vmul.f32 %v10820_v44, %v13030_v58  ;;  %v1416_v46 = vpop.xlane.xlu1 %1415  ;;  %2067 = vmatprep.mubr.bf16.mxu0 %v1800_v16  ;;  %2464 = vmatprep.mubr.bf16.mxu1 %v1800_v16  ;;  %v1222_v63 = vpop.xlane.xlu0 %1221  ;;  %v1592_v40 = vmul.f32 %v10822_v6, %v13070_v1 }
 0x2fa   : > { %v13464_v14 = vsub.f32 %v17790_v11, %v1260_v51  ;;  %v1471_v55 = vadd.f32 %v1382_v62, %v1381_v2  ;;  %v1496_v38 = vmul.f32 0.00390625, %v1416_v46  ;;  %v1261_v56 = vmul.f32 0.00390625, %v1222_v63  ;;  %2068 = vmatmul.mubr.bf16.vlgmr.msra.gmra.mrb[0].mxu0 %v1799_v19  ;;  %2465 = vmatmul.mubr.bf16.vlgmr.msra.gmra.mrb[0].mxu1 %v1799_v19 }
 0x2fb   : > { %v13468_v9 = vsub.f32 %v17791_v59, %v1260_v51  ;;  %v1740_v18 = vadd.f32 %v13425_v52, %v1665_v60  ;;  %v1667_v10 = vmul.f32 %v13401_v15, %v1592_v40  ;;  %v1591_v44 = vmul.f32 %v10822_v6, %v13058_v61 }
 0x2fc   : > { %v1383_v37 = vmul.f32 %v13464_v14, %v13464_v14  ;;  %1472 = vadd.xlane.f32.xlu0 %v1471_v55  ;;  %v1664_v51 = vmul.f32 %v13412_v22, %v1589_v7  ;;  %v10824_v1 = vpop.eup %10823  ;;  %10827 = vrsqrt.f32 %v1527_v45  ;;  %v1528_v2 = vadd.f32 1e-05, %v1496_v38 }
 0x2fd   : > { %v1384_v58 = vmul.f32 %v13468_v9, %v13468_v9  ;;  %v17792_v16 = vunpack.c.l.bf16 %v13156_v20  ;;  %v17793_v62 = vunpack.c.h.bf16 %v13156_v20  ;;  %v1225_v11 = vpop.xlane.xlu1 %1224  ;;  %v1419_v59 = vpop.xlane.xlu0 %1418  ;;  %v1742_v63 = vadd.f32 %v13425_v52, %v1667_v10 }
 0x2fe   : > { %v1666_v61 = vmul.f32 %v13412_v22, %v1591_v44  ;;  %v1739_v6 = vadd.f32 %v13422_v33, %v1664_v51  ;;  %10829 = vrsqrt.f32 %v1528_v2  ;;  %v1262_v45 = vmul.f32 0.00390625, %v1225_v11 }
 0x2ff   : > { %v13482_v19 = vsub.f32 %v17792_v16, %v1261_v56  ;;  %v13486_v60 = vsub.f32 %v17793_v62, %v1261_v56  ;;  %v1474_v46 = vadd.f32 %v1384_v58, %v1383_v37  ;;  %v1497_v7 = vmul.f32 0.00390625, %v1419_v59 }
 0x300   : > { %v1802_v40 = vpack.c.bf16 %v1742_v63, %v1740_v18  ;;  %v1741_v20 = vadd.f32 %v13422_v33, %v1666_v61  ;;  %v1594_v56 = vmul.f32 %v10824_v1, %v13090_v49  ;;  %v10826_v37 = vpop.eup %10825  ;;  %v17794_v58 = vunpack.c.l.bf16 %v13181_v31 }
 0x301   : > { %v1385_v55 = vmul.f32 %v13482_v19, %v13482_v19  ;;  %1475 = vadd.xlane.f32.xlu1 %v1474_v46  ;;  %v1386_v38 = vmul.f32 %v13486_v60, %v13486_v60  ;;  %v17795_v44 = vunpack.c.h.bf16 %v13181_v31  ;;  %v1529_v2 = vadd.f32 1e-05, %v1497_v7  ;;  %v1422_v18 = vpop.xlane.xlu1 %1421  ;;  %v1228_v62 = vpop.xlane.xlu0 %1227 }
 0x302   : > { %v13499_v10 = vsub.f32 %v17794_v58, %v1262_v45  ;;  %v1593_v16 = vmul.f32 %v10824_v1, %v13086_v57  ;;  %2077 = vmatprep.mubr.bf16.mxu0 %v1802_v40  ;;  %2474 = vmatprep.mubr.bf16.mxu1 %v1802_v40  ;;  %v1801_v11 = vpack.c.bf16 %v1741_v20, %v1739_v6  ;;  %v1498_v46 = vmul.f32 0.00390625, %v1422_v18 }
 0x303   : > { %v13503_v51 = vsub.f32 %v17795_v44, %v1262_v45  ;;  %v1477_v59 = vadd.f32 %v1386_v38, %v1385_v55  ;;  %v1596_v49 = vmul.f32 %v10826_v37, %v13107_v12  ;;  %10831 = vrsqrt.f32 %v1529_v2 }
 0x304   : > { %v1263_v63 = vmul.f32 0.00390625, %v1228_v62  ;;  %v1387_v61 = vmul.f32 %v13499_v10, %v13499_v10  ;;  %2078 = vmatmul.mubr.bf16.gmra.mrb[4].mxu0 %v1801_v11  ;;  %2475 = vmatmul.mubr.bf16.gmra.mrb[4].mxu1 %v1801_v11  ;;  %v1669_v57 = vmul.f32 %v13401_v15, %v1594_v56  ;;  %v1530_v45 = vadd.f32 1e-05, %v1498_v46 }
 0x305   : > { %v1388_v31 = vmul.f32 %v13503_v51, %v13503_v51  ;;  %v1671_v1 = vmul.f32 %v13401_v15, %v1596_v49  ;;  %v17796_v6 = vunpack.c.l.bf16 %v13198_v47  ;;  %v17797_v12 = vunpack.c.h.bf16 %v13198_v47  ;;  %1478 = vadd.xlane.f32.xlu0 %v1477_v59  ;;  %v1231_v20 = vpop.xlane.xlu1 %1230  ;;  %v1425_v38 = vpop.xlane.xlu0 %1424 }
 0x306   : > { %v1595_v40 = vmul.f32 %v10826_v37, %v13103_v3  ;;  %v1744_v44 = vadd.f32 %v13425_v52, %v1669_v57  ;;  %v1668_v2 = vmul.f32 %v13412_v22, %v1593_v16  ;;  %v10828_v18 = vpop.eup %10827  ;;  %10833 = vrsqrt.f32 %v1530_v45 }
 0x307   : > { %v13515_v7 = vsub.f32 %v17796_v6, %v1263_v63  ;;  %v13519_v55 = vsub.f32 %v17797_v12, %v1263_v63  ;;  %v1480_v58 = vadd.f32 %v1388_v31, %v1387_v61  ;;  %v1746_v56 = vadd.f32 %v13425_v52, %v1671_v1 }
 0x308   : > { %v1264_v62 = vmul.f32 0.00390625, %v1231_v20  ;;  %v1499_v11 = vmul.f32 0.00390625, %v1425_v38  ;;  %v1670_v47 = vmul.f32 %v13412_v22, %v1595_v40  ;;  %v1743_v59 = vadd.f32 %v13422_v33, %v1668_v2  ;;  %v10830_v46 = vpop.eup %10829 }
 0x309   : > { %1481 = vadd.xlane.f32.xlu1 %v1480_v58  ;;  %v1804_v49 = vpack.c.bf16 %v1746_v56, %v1744_v44  ;;  %v1389_v3 = vmul.f32 %v13515_v7, %v13515_v7  ;;  %v1390_v37 = vmul.f32 %v13519_v55, %v13519_v55  ;;  %v17798_v63 = vunpack.c.l.bf16 %v13224_v41  ;;  %v1428_v45 = vpop.xlane.xlu1 %1427  ;;  %v1431_v6 = vpop.xlane.xlu0 %1430 }
 0x30a   : > { %v17799_v61 = vunpack.c.h.bf16 %v13224_v41  ;;  %v1531_v57 = vadd.f32 1e-05, %v1499_v11  ;;  %v1745_v1 = vadd.f32 %v13422_v33, %v1670_v47  ;;  %v1598_v40 = vmul.f32 %v10828_v18, %v13136_v50 }
 0x30b   : > { %v13533_v16 = vsub.f32 %v17798_v63, %v1264_v62  ;;  %2087 = vmatprep.mubr.bf16.mxu0 %v1804_v49  ;;  %2484 = vmatprep.mubr.bf16.mxu1 %v1804_v49  ;;  %v1483_v12 = vadd.f32 %v1390_v37, %v1389_v3  ;;  %v1600_v20 = vmul.f32 %v10830_v46, %v13151_v26  ;;  %v1500_v38 = vmul.f32 0.00390625, %v1428_v45  ;;  %v17800_v49 = vld [vmem:[#allocation33_spill] sm:$0xff] }
 0x30c   : > { %v13537_v31 = vsub.f32 %v17799_v61, %v1264_v62  ;;  %10835 = vrsqrt.f32 %v1531_v57  ;;  %v1501_v58 = vmul.f32 0.00390625, %v1431_v6  ;;  %v1803_v44 = vpack.c.bf16 %v1745_v1, %v1743_v59  ;;  %v17801_v1 = vld [vmem:[#allocation35_spill] sm:$0xff] }
 0x30d   : > { %1484 = vadd.xlane.f32.xlu0 %v1483_v12  ;;  %v1391_v41 = vmul.f32 %v13533_v16, %v13533_v16  ;;  %v1673_v2 = vmul.f32 %v13401_v15, %v1598_v40  ;;  %v1675_v62 = vmul.f32 %v13401_v15, %v1600_v20  ;;  %v10832_v11 = vpop.eup %10831  ;;  %v1532_v47 = vadd.f32 1e-05, %v1500_v38  ;;  %v1434_v3 = vpop.xlane.xlu1 %1433 }
 0x30e   : > { %v1392_v56 = vmul.f32 %v13537_v31, %v13537_v31  ;;  %v1533_v50 = vadd.f32 1e-05, %v1501_v58  ;;  %2088 = vmatmul.mubr.bf16.gmra.mrb[8].mxu0 %v1803_v44  ;;  %2485 = vmatmul.mubr.bf16.gmra.mrb[8].mxu1 %v1803_v44  ;;  %v1597_v26 = vmul.f32 %v10828_v18, %v13132_v53  ;;  %v1599_v59 = vmul.f32 %v10830_v46, %v17800_v49  ;;  %v1437_v37 = vpop.xlane.xlu0 %1436  ;;  %v17802_v58 = vld [vmem:[#allocation34_spill] sm:$0xff] }
 0x30f   : > { %v1748_v61 = vadd.f32 %v13425_v52, %v1673_v2  ;;  %v1750_v57 = vadd.f32 %v13425_v52, %v1675_v62  ;;  %v1602_v45 = vmul.f32 %v10832_v11, %v17801_v1  ;;  %10837 = vrsqrt.f32 %v1532_v47  ;;  %v17803_v47 = vld [vmem:[#allocation37_spill] sm:$0xff] }
 0x310   : > { %v1486_v63 = vadd.f32 %v1392_v56, %v1391_v41  ;;  %v1502_v6 = vmul.f32 0.00390625, %v1434_v3  ;;  %v1503_v12 = vmul.f32 0.00390625, %v1437_v37  ;;  %v1672_v40 = vmul.f32 %v13412_v22, %v1597_v26  ;;  %v10834_v18 = vpop.eup %10833 }
 0x311   : > { %10839 = vrsqrt.f32 %v1533_v50  ;;  %v1806_v20 = vpack.c.bf16 %v1750_v57, %v1748_v61  ;;  %v1674_v53 = vmul.f32 %v13412_v22, %v1599_v59  ;;  %v1677_v38 = vmul.f32 %v13401_v15, %v1602_v45  ;;  %v1440_v56 = vpop.xlane.xlu1 %1439  ;;  %v17804_v59 = vld [vmem:[#allocation36_spill] sm:$0xff] }
 0x312   : > { %1487 = vadd.xlane.f32.xlu1 %v1486_v63  ;;  %v1534_v46 = vadd.f32 1e-05, %v1502_v6  ;;  %v1601_v44 = vmul.f32 %v10832_v11, %v17802_v58  ;;  %v1535_v41 = vadd.f32 1e-05, %v1503_v12  ;;  %v1747_v2 = vadd.f32 %v13422_v33, %v1672_v40  ;;  %v1443_v49 = vpop.xlane.xlu0 %1442 }
 0x313   : > { %2097 = vmatprep.mubr.bf16.mxu0 %v1806_v20  ;;  %2494 = vmatprep.mubr.bf16.mxu1 %v1806_v20  ;;  %v1749_v62 = vadd.f32 %v13422_v33, %v1674_v53  ;;  %v1604_v50 = vmul.f32 %v10834_v18, %v17803_v47  ;;  %v1504_v26 = vmul.f32 0.00390625, %v1440_v56  ;;  %v1603_v3 = vmul.f32 %v10834_v18, %v17804_v59 }
 0x314   : > { %10841 = vrsqrt.f32 %v1534_v46  ;;  %v1676_v11 = vmul.f32 %v13412_v22, %v1601_v44  ;;  %v1752_v1 = vadd.f32 %v13425_v52, %v1677_v38  ;;  %v1505_v6 = vmul.f32 0.00390625, %v1443_v49  ;;  %v17805_v44 = vld [vmem:[#allocation38_spill] sm:$0xff]  ;;  %v17806_v49 = vld [vmem:[#allocation40_spill] sm:$0xff] }
 0x315   : > { %v1805_v37 = vpack.c.bf16 %v1749_v62, %v1747_v2  ;;  %v1679_v63 = vmul.f32 %v13401_v15, %v1604_v50  ;;  %v1536_v57 = vadd.f32 1e-05, %v1504_v26  ;;  %v1678_v45 = vmul.f32 %v13412_v22, %v1603_v3  ;;  %v1446_v12 = vpop.xlane.xlu1 %1445  ;;  %v17807_v3 = vld [vmem:[#allocation39_spill] sm:$0xff] }
 0x316   : > { %v10836_v61 = vpop.eup %10835  ;;  %10843 = vrsqrt.f32 %v1535_v41  ;;  %v1506_v53 = vmul.f32 0.00390625, %v1446_v12  ;;  %v1751_v58 = vadd.f32 %v13422_v33, %v1676_v11  ;;  %v1537_v47 = vadd.f32 1e-05, %v1505_v6  ;;  %v1449_v50 = vpop.xlane.xlu0 %1448 }
 0x317   : > { %2098 = vmatmul.mubr.bf16.gmra.mrb[12].mxu0 %v1805_v37  ;;  %2495 = vmatmul.mubr.bf16.gmra.mrb[12].mxu1 %v1805_v37  ;;  %v1754_v40 = vadd.f32 %v13425_v52, %v1679_v63  ;;  %v1606_v20 = vmul.f32 %v10836_v61, %v13221_v39  ;;  %10845 = vrsqrt.f32 %v1536_v57  ;;  %v1753_v18 = vadd.f32 %v13422_v33, %v1678_v45 }
 0x318   : > { %v1605_v38 = vmul.f32 %v10836_v61, %v17805_v44  ;;  %v1538_v2 = vadd.f32 1e-05, %v1506_v53  ;;  %v1507_v6 = vmul.f32 0.00390625, %v1449_v50  ;;  %v17808_v50 = vld [vmem:[#allocation41_spill] sm:$0xff] }
 0x319   : > { %v1808_v46 = vpack.c.bf16 %v1754_v40, %v1752_v1  ;;  %v10838_v56 = vpop.eup %10837  ;;  %v1681_v41 = vmul.f32 %v13401_v15, %v1606_v20  ;;  %v1452_v26 = vpop.xlane.xlu1 %1451  ;;  %v1807_v39 = vpack.c.bf16 %v1753_v18, %v1751_v58 }
 0x31a   : > { %v1608_v59 = vmul.f32 %v10838_v56, %v17806_v49  ;;  %v1607_v37 = vmul.f32 %v10838_v56, %v17807_v3  ;;  %10847 = vrsqrt.f32 %v1538_v2  ;;  %v1680_v63 = vmul.f32 %v13412_v22, %v1605_v38  ;;  %v1455_v3 = vpop.xlane.xlu0 %1454 }
 0x31b   : > { %v10840_v62 = vpop.eup %10839  ;;  %2107 = vmatprep.mubr.bf16.mxu0 %v1808_v46  ;;  %2504 = vmatprep.mubr.bf16.mxu1 %v1808_v46  ;;  %v1508_v11 = vmul.f32 0.00390625, %v1452_v26  ;;  %v1756_v12 = vadd.f32 %v13425_v52, %v1681_v41  ;;  %10849 = vrsqrt.f32 %v1537_v47 }
 0x31c   : > { %v1683_v61 = vmul.f32 %v13401_v15, %v1608_v59  ;;  %v1682_v57 = vmul.f32 %v13412_v22, %v1607_v37  ;;  %v1610_v1 = vmul.f32 %v10840_v62, %v13244_v24  ;;  %v1755_v18 = vadd.f32 %v13422_v33, %v1680_v63 }
 0x31d   : > { %v1540_v44 = vadd.f32 1e-05, %v1508_v11  ;;  %v1458_v41 = vpop.xlane.xlu1 %1457  ;;  %v1609_v26 = vmul.f32 %v10840_v62, %v17808_v50 }
 0x31e   : > { %v10842_v45 = vpop.eup %10841  ;;  %v1758_v40 = vadd.f32 %v13425_v52, %v1683_v61  ;;  %v1757_v20 = vadd.f32 %v13422_v33, %v1682_v57  ;;  %v1685_v46 = vmul.f32 %v13401_v15, %v1610_v1  ;;  %v1510_v63 = vmul.f32 0.00390625, %v1458_v41 }
 0x31f   : > { %2108 = vmatmul.mubr.bf16.gmra.mrb[16].mxu0 %v1807_v39  ;;  %2505 = vmatmul.mubr.bf16.gmra.mrb[16].mxu1 %v1807_v39  ;;  %v1612_v53 = vmul.f32 %v10842_v45, %v13258_v4  ;;  %v1611_v56 = vmul.f32 %v10842_v45, %v13254_v5  ;;  %v1539_v39 = vadd.f32 1e-05, %v1507_v6  ;;  %10851 = vrsqrt.f32 %v1540_v44 }
 0x320   : > { %v10844_v58 = vpop.eup %10843  ;;  %v1810_v24 = vpack.c.bf16 %v1758_v40, %v1756_v12  ;;  %v1809_v47 = vpack.c.bf16 %v1757_v20, %v1755_v18  ;;  %v1760_v4 = vadd.f32 %v13425_v52, %v1685_v46  ;;  %v1509_v57 = vmul.f32 0.00390625, %v1455_v3 }
 0x321   : > { %v1687_v38 = vmul.f32 %v13401_v15, %v1612_v53  ;;  %v10846_v2 = vpop.eup %10845  ;;  %v1614_v37 = vmul.f32 %v10844_v58, %v13274_v43  ;;  %v1686_v11 = vmul.f32 %v13412_v22, %v1611_v56  ;;  %10853 = vrsqrt.f32 %v1539_v39 }
 0x322   : > { %2117 = vmatprep.mubr.bf16.mxu0 %v1810_v24  ;;  %2514 = vmatprep.mubr.bf16.mxu1 %v1810_v24  ;;  %v1616_v59 = vmul.f32 %v10846_v2, %v13286_v48  ;;  %v1684_v1 = vmul.f32 %v13412_v22, %v1609_v26  ;;  %v1542_v43 = vadd.f32 1e-05, %v1510_v63  ;;  %v1615_v12 = vmul.f32 %v10846_v2, %v13282_v23 }
 0x323   : > { %v1762_v49 = vadd.f32 %v13425_v52, %v1687_v38  ;;  %v1689_v48 = vmul.f32 %v13401_v15, %v1614_v37  ;;  %v1761_v6 = vadd.f32 %v13422_v33, %v1686_v11  ;;  %v1541_v53 = vadd.f32 1e-05, %v1509_v57 }
 0x324   : > { %v10848_v61 = vpop.eup %10847  ;;  %v1691_v62 = vmul.f32 %v13401_v15, %v1616_v59  ;;  %v1759_v18 = vadd.f32 %v13422_v33, %v1684_v1  ;;  %v1613_v46 = vmul.f32 %v10844_v58, %v13266_v0  ;;  %10855 = vrsqrt.f32 %v1542_v43 }
 0x325   : > { %v1812_v5 = vpack.c.bf16 %v1762_v49, %v1760_v4  ;;  %v10850_v45 = vpop.eup %10849  ;;  %v1620_v20 = vmul.f32 %v10848_v61, %v13312_v35  ;;  %v1764_v44 = vadd.f32 %v13425_v52, %v1689_v48  ;;  %v1690_v56 = vmul.f32 %v13412_v22, %v1615_v12 }
 0x326   : > { %v1766_v40 = vadd.f32 %v13425_v52, %v1691_v62  ;;  %v1618_v24 = vmul.f32 %v10850_v45, %v13300_v29  ;;  %v1811_v38 = vpack.c.bf16 %v1761_v6, %v1759_v18  ;;  %10857 = vrsqrt.f32 %v1541_v53 }
 0x327   : > { %2118 = vmatmul.mubr.bf16.gmra.mrb[20].mxu0 %v1809_v47  ;;  %2515 = vmatmul.mubr.bf16.gmra.mrb[20].mxu1 %v1809_v47  ;;  %v1695_v23 = vmul.f32 %v13401_v15, %v1620_v20  ;;  %v1688_v35 = vmul.f32 %v13412_v22, %v1613_v46  ;;  %v1765_v29 = vadd.f32 %v13422_v33, %v1690_v56  ;;  %v17809_v46 = vld [vmem:[#allocation42_spill] sm:$0xff] }
 0x328   : > { %2127 = vmatprep.mubr.bf16.mxu0 %v1812_v5  ;;  %2524 = vmatprep.mubr.bf16.mxu1 %v1812_v5  ;;  %v1814_v41 = vpack.c.bf16 %v1766_v40, %v1764_v44  ;;  %v1693_v0 = vmul.f32 %v13401_v15, %v1618_v24  ;;  %v1619_v47 = vmul.f32 %v10848_v61, %v13308_v27 }
 0x329   : > { %v10852_v2 = vpop.eup %10851  ;;  %v1770_v50 = vadd.f32 %v13425_v52, %v1695_v23  ;;  %v1763_v39 = vadd.f32 %v13422_v33, %v1688_v35  ;;  %v1617_v4 = vmul.f32 %v10850_v45, %v13296_v54 }
 0x32a   : > { %v1624_v26 = vmul.f32 %v10852_v2, %v13338_v17  ;;  %v1768_v49 = vadd.f32 %v13425_v52, %v1693_v0  ;;  %v1694_v37 = vmul.f32 %v13412_v22, %v1619_v47 }
 0x32b   : > { %v10854_v58 = vpop.eup %10853  ;;  %v1813_v3 = vpack.c.bf16 %v1765_v29, %v1763_v39  ;;  %v1692_v27 = vmul.f32 %v13412_v22, %v1617_v4 }
 0x32c   : > { %v1622_v59 = vmul.f32 %v10854_v58, %v13322_v21  ;;  %v1816_v63 = vpack.c.bf16 %v1770_v50, %v1768_v49  ;;  %v1699_v5 = vmul.f32 %v13401_v15, %v1624_v26  ;;  %v1769_v61 = vadd.f32 %v13422_v33, %v1694_v37 }
 0x32d   : > { %v1623_v21 = vmul.f32 %v10852_v2, %v13330_v28  ;;  %v1767_v1 = vadd.f32 %v13422_v33, %v1692_v27  ;;  %v1621_v48 = vmul.f32 %v10854_v58, %v13318_v34 }
 0x32e   : > { %v10856_v11 = vpop.eup %10855  ;;  %v1697_v17 = vmul.f32 %v13401_v15, %v1622_v59  ;;  %v1774_v62 = vadd.f32 %v13425_v52, %v1699_v5 }
 0x32f   : > { %2128 = vmatmul.mubr.bf16.gmra.mrb[24].mxu0 %v1811_v38  ;;  %2525 = vmatmul.mubr.bf16.gmra.mrb[24].mxu1 %v1811_v38  ;;  %v1628_v57 = vmul.f32 %v10856_v11, %v13362_v13  ;;  %v1815_v6 = vpack.c.bf16 %v1769_v61, %v1767_v1  ;;  %v1698_v12 = vmul.f32 %v13412_v22, %v1623_v21 }
 0x330   : > { %2137 = vmatprep.mubr.bf16.mxu0 %v1814_v41  ;;  %2534 = vmatprep.mubr.bf16.mxu1 %v1814_v41  ;;  %v10858_v54 = vpop.eup %10857  ;;  %v1772_v45 = vadd.f32 %v13425_v52, %v1697_v17  ;;  %v1696_v28 = vmul.f32 %v13412_v22, %v1621_v48  ;;  %v1627_v53 = vmul.f32 %v10856_v11, %v13354_v30  ;;  %v17810_v11 = vld [vmem:[#allocation44_spill] sm:$0xff]  ;;  %v17811_v17 = vld [vmem:[#allocation43_spill] sm:$0xff] }
 0x331   : > { %v1626_v43 = vmul.f32 %v10858_v54, %v13350_v42  ;;  %v1703_v20 = vmul.f32 %v13401_v15, %v1628_v57  ;;  %v1773_v34 = vadd.f32 %v13422_v33, %v1698_v12  ;;  %v1625_v44 = vmul.f32 %v10858_v54, %v17809_v46 }
 0x332   : > { %v1818_v40 = vpack.c.bf16 %v1774_v62, %v1772_v45  ;;  %v1771_v18 = vadd.f32 %v13422_v33, %v1696_v28  ;;  %v1702_v56 = vmul.f32 %v13412_v22, %v1627_v53  ;;  %v17812_v45 = vld [vmem:[#allocation47_spill] sm:$0xff] }
 0x333   : > { %v1701_v13 = vmul.f32 %v13401_v15, %v1626_v43  ;;  %v1778_v42 = vadd.f32 %v13425_v52, %v1703_v20  ;;  %v1700_v23 = vmul.f32 %v13412_v22, %v1625_v44 }
 0x334   : > { %v1817_v38 = vpack.c.bf16 %v1773_v34, %v1771_v18  ;;  %v1777_v30 = vadd.f32 %v13422_v33, %v1702_v56 }
 0x335   : > { %v1776_v24 = vadd.f32 %v13425_v52, %v1701_v13  ;;  %v1775_v2 = vadd.f32 %v13422_v33, %v1700_v23 }
 0x337   : > { %2138 = vmatmul.mubr.bf16.gmra.mrb[28].mxu0 %v1813_v3  ;;  %2535 = vmatmul.mubr.bf16.gmra.mrb[28].mxu1 %v1813_v3  ;;  %v1820_v41 = vpack.c.bf16 %v1778_v42, %v1776_v24  ;;  %v1819_v35 = vpack.c.bf16 %v1777_v30, %v1775_v2  ;;  %v17814_v24 = vld [vmem:[#allocation49_spill] sm:$0xff] }
 0x338   : > { %2147 = vmatprep.mubr.bf16.mxu0 %v1816_v63  ;;  %2544 = vmatprep.mubr.bf16.mxu1 %v1816_v63 }
 0x33f   : > { %2148 = vmatmul.mubr.bf16.gmra.mrb[32].mxu0 %v1815_v6  ;;  %2545 = vmatmul.mubr.bf16.gmra.mrb[32].mxu1 %v1815_v6  ;;  %v17813_v6 = vld [vmem:[#allocation46_spill] sm:$0xff] }
 0x340   : > { %2157 = vmatprep.mubr.bf16.mxu0 %v1818_v40  ;;  %2554 = vmatprep.mubr.bf16.mxu1 %v1818_v40 }
 0x347   : > { %2158 = vmatmul.mubr.bf16.gmra.mrb[36].mxu0 %v1817_v38  ;;  %2555 = vmatmul.mubr.bf16.gmra.mrb[36].mxu1 %v1817_v38 }
 0x348   : > { %2167 = vmatprep.mubr.bf16.mxu0 %v1820_v41  ;;  %2564 = vmatprep.mubr.bf16.mxu1 %v1820_v41 }
 0x34f   : > { %2168 = vmatmul.mubr.bf16.gmra.mrb[40].mxu0 %v1819_v35  ;;  %2565 = vmatmul.mubr.bf16.gmra.mrb[40].mxu1 %v1819_v35 }
 0x378   : > { %v1461_v0 = vpop.xlane.xlu0 %1460 }
 0x379   : > { %v1511_v58 = vmul.f32 0.00390625, %v1461_v0 }
 0x37b   : > { %v1543_v29 = vadd.f32 1e-05, %v1511_v58 }
 0x37c   : > { %v1464_v47 = vpop.xlane.xlu1 %1463 }
 0x37d   : > { %10859 = vrsqrt.f32 %v1543_v29  ;;  %v1512_v50 = vmul.f32 0.00390625, %v1464_v47 }
 0x37f   : > { %v1544_v26 = vadd.f32 1e-05, %v1512_v50  ;;  %v17815_v50 = vld [vmem:[#allocation50_spill] sm:$0xff] }
 0x380   : > { %v1467_v39 = vpop.xlane.xlu0 %1466 }
 0x381   : > { %10861 = vrsqrt.f32 %v1544_v26  ;;  %v1513_v4 = vmul.f32 0.00390625, %v1467_v39 }
 0x383   : > { %v1545_v49 = vadd.f32 1e-05, %v1513_v4 }
 0x384   : > { %v1470_v59 = vpop.xlane.xlu1 %1469 }
 0x385   : > { %10863 = vrsqrt.f32 %v1545_v49  ;;  %v1514_v3 = vmul.f32 0.00390625, %v1470_v59 }
 0x387   : > { %v10860_v37 = vpop.eup %10859  ;;  %v1546_v63 = vadd.f32 1e-05, %v1514_v3 }
 0x388   : > { %v1630_v27 = vmul.f32 %v10860_v37, %v17810_v11  ;;  %v1629_v54 = vmul.f32 %v10860_v37, %v17811_v17 }
 0x389   : > { %v1473_v5 = vpop.xlane.xlu0 %1472  ;;  %10865 = vrsqrt.f32 %v1546_v63 }
 0x38a   : > { %v1515_v61 = vmul.f32 0.00390625, %v1473_v5  ;;  %v1705_v57 = vmul.f32 %v13401_v15, %v1630_v27  ;;  %v1704_v1 = vmul.f32 %v13412_v22, %v1629_v54 }
 0x38b   : > { %v10862_v21 = vpop.eup %10861 }
 0x38c   : > { %v1547_v62 = vadd.f32 1e-05, %v1515_v61  ;;  %v1632_v43 = vmul.f32 %v10862_v21, %v17812_v45  ;;  %v1631_v12 = vmul.f32 %v10862_v21, %v17813_v6  ;;  %v1780_v53 = vadd.f32 %v13425_v52, %v1705_v57 }
 0x38d   : > { %v1779_v42 = vadd.f32 %v13422_v33, %v1704_v1 }
 0x38e   : > { %v1476_v48 = vpop.xlane.xlu1 %1475  ;;  %10867 = vrsqrt.f32 %v1547_v62  ;;  %v1707_v20 = vmul.f32 %v13401_v15, %v1632_v43  ;;  %v1706_v28 = vmul.f32 %v13412_v22, %v1631_v12 }
 0x38f   : > { %v1516_v40 = vmul.f32 0.00390625, %v1476_v48  ;;  %v10864_v13 = vpop.eup %10863 }
 0x390   : > { %v1782_v18 = vadd.f32 %v13425_v52, %v1707_v20  ;;  %v1781_v46 = vadd.f32 %v13422_v33, %v1706_v28  ;;  %v1634_v44 = vmul.f32 %v10864_v13, %v13409_v32  ;;  %v1633_v38 = vmul.f32 %v10864_v13, %v17814_v24 }
 0x391   : > { %v1548_v34 = vadd.f32 1e-05, %v1516_v40 }
 0x392   : > { %v1479_v56 = vpop.xlane.xlu0 %1478  ;;  %v1822_v23 = vpack.c.bf16 %v1782_v18, %v1780_v53  ;;  %v1821_v30 = vpack.c.bf16 %v1781_v46, %v1779_v42  ;;  %v1709_v35 = vmul.f32 %v13401_v15, %v1634_v44  ;;  %v1708_v0 = vmul.f32 %v13412_v22, %v1633_v38 }
 0x393   : > { %10869 = vrsqrt.f32 %v1548_v34  ;;  %v1517_v41 = vmul.f32 0.00390625, %v1479_v56  ;;  %v10866_v2 = vpop.eup %10865 }
 0x394   : > { %2177 = vmatprep.mubr.bf16.mxu0 %v1822_v23  ;;  %2574 = vmatprep.mubr.bf16.mxu1 %v1822_v23  ;;  %v1636_v47 = vmul.f32 %v10866_v2, %v13433_v8  ;;  %v1635_v32 = vmul.f32 %v10866_v2, %v17815_v50  ;;  %v1784_v3 = vadd.f32 %v13425_v52, %v1709_v35 }
 0x395   : > { %v1549_v58 = vadd.f32 1e-05, %v1517_v41  ;;  %2178 = vmatmul.mubr.bf16.gmra.mrb[44].mxu0 %v1821_v30  ;;  %2575 = vmatmul.mubr.bf16.gmra.mrb[44].mxu1 %v1821_v30  ;;  %v1783_v37 = vadd.f32 %v13422_v33, %v1708_v0 }
 0x396   : > { %v1482_v29 = vpop.xlane.xlu1 %1481  ;;  %v1711_v39 = vmul.f32 %v13401_v15, %v1636_v47  ;;  %v1710_v4 = vmul.f32 %v13412_v22, %v1635_v32 }
 0x397   : > { %v1518_v26 = vmul.f32 0.00390625, %v1482_v29  ;;  %10871 = vrsqrt.f32 %v1549_v58 }
 0x398   : > { %v10868_v49 = vpop.eup %10867  ;;  %v1786_v5 = vadd.f32 %v13425_v52, %v1711_v39  ;;  %v1785_v8 = vadd.f32 %v13422_v33, %v1710_v4 }
 0x399   : > { %v1550_v59 = vadd.f32 1e-05, %v1518_v26  ;;  %v1638_v11 = vmul.f32 %v10868_v49, %v13451_v36  ;;  %v1637_v27 = vmul.f32 %v10868_v49, %v13447_v25 }
 0x39a   : > { %v1485_v63 = vpop.xlane.xlu0 %1484  ;;  %v1824_v54 = vpack.c.bf16 %v1786_v5, %v1784_v3  ;;  %v1823_v61 = vpack.c.bf16 %v1785_v8, %v1783_v37 }
 0x39b   : > { %10873 = vrsqrt.f32 %v1550_v59  ;;  %v1519_v17 = vmul.f32 0.00390625, %v1485_v63  ;;  %v1713_v57 = vmul.f32 %v13401_v15, %v1638_v11  ;;  %v1712_v43 = vmul.f32 %v13412_v22, %v1637_v27 }
 0x39c   : > { %2187 = vmatprep.mubr.bf16.mxu0 %v1824_v54  ;;  %2584 = vmatprep.mubr.bf16.mxu1 %v1824_v54 }
 0x39d   : > { %v10870_v21 = vpop.eup %10869  ;;  %v1551_v62 = vadd.f32 1e-05, %v1519_v17  ;;  %2188 = vmatmul.mubr.bf16.gmra.mrb[48].mxu0 %v1823_v61  ;;  %2585 = vmatmul.mubr.bf16.gmra.mrb[48].mxu1 %v1823_v61  ;;  %v1788_v20 = vadd.f32 %v13425_v52, %v1713_v57 }
 0x39e   : > { %v1640_v48 = vmul.f32 %v10870_v21, %v13468_v9  ;;  %v1639_v45 = vmul.f32 %v10870_v21, %v13464_v14  ;;  %v1787_v9 = vadd.f32 %v13422_v33, %v1712_v43 }
 0x39f   : > { %v1488_v1 = vpop.xlane.xlu1 %1487  ;;  %10875 = vrsqrt.f32 %v1551_v62 }
 0x3a0   : > { %v1520_v36 = vmul.f32 0.00390625, %v1488_v1  ;;  %v1715_v25 = vmul.f32 %v13401_v15, %v1640_v48  ;;  %v1714_v6 = vmul.f32 %v13412_v22, %v1639_v45 }
 0x3a1   : > { %v10872_v40 = vpop.eup %10871 }
 0x3a2   : > { %v1552_v12 = vadd.f32 1e-05, %v1520_v36  ;;  %v1790_v28 = vadd.f32 %v13425_v52, %v1715_v25  ;;  %v1789_v14 = vadd.f32 %v13422_v33, %v1714_v6  ;;  %v1642_v13 = vmul.f32 %v10872_v40, %v13486_v60 }
 0x3a3   : > { %v1641_v34 = vmul.f32 %v10872_v40, %v13482_v19 }
 0x3a4   : > { %10877 = vrsqrt.f32 %v1552_v12  ;;  %v1826_v53 = vpack.c.bf16 %v1790_v28, %v1788_v20  ;;  %v1825_v42 = vpack.c.bf16 %v1789_v14, %v1787_v9  ;;  %v1717_v46 = vmul.f32 %v13401_v15, %v1642_v13 }
 0x3a5   : > { %v10874_v18 = vpop.eup %10873  ;;  %v1716_v44 = vmul.f32 %v13412_v22, %v1641_v34 }
 0x3a6   : > { %2197 = vmatprep.mubr.bf16.mxu0 %v1826_v53  ;;  %2594 = vmatprep.mubr.bf16.mxu1 %v1826_v53  ;;  %v1644_v24 = vmul.f32 %v10874_v18, %v13503_v51  ;;  %v1643_v38 = vmul.f32 %v10874_v18, %v13499_v10  ;;  %v1792_v41 = vadd.f32 %v13425_v52, %v1717_v46 }
 0x3a7   : > { %2198 = vmatmul.mubr.bf16.gmra.mrb[52].mxu0 %v1825_v42  ;;  %2595 = vmatmul.mubr.bf16.gmra.mrb[52].mxu1 %v1825_v42  ;;  %v1791_v23 = vadd.f32 %v13422_v33, %v1716_v44 }
 0x3a8   : > { %v1719_v56 = vmul.f32 %v13401_v15, %v1644_v24  ;;  %v1718_v60 = vmul.f32 %v13412_v22, %v1643_v38 }
 0x3a9   : > { %v10876_v19 = vpop.eup %10875 }
 0x3aa   : > { %v1794_v30 = vadd.f32 %v13425_v52, %v1719_v56  ;;  %v1793_v2 = vadd.f32 %v13422_v33, %v1718_v60  ;;  %v1646_v35 = vmul.f32 %v10876_v19, %v13519_v55  ;;  %v1645_v51 = vmul.f32 %v10876_v19, %v13515_v7 }
 0x3ac   : > { %v1828_v10 = vpack.c.bf16 %v1794_v30, %v1792_v41  ;;  %v1827_v0 = vpack.c.bf16 %v1793_v2, %v1791_v23  ;;  %v1721_v29 = vmul.f32 %v13401_v15, %v1646_v35  ;;  %v1720_v32 = vmul.f32 %v13412_v22, %v1645_v51 }
 0x3ae   : > { %v10878_v58 = vpop.eup %10877  ;;  %2207 = vmatprep.mubr.bf16.mxu0 %v1828_v10  ;;  %2604 = vmatprep.mubr.bf16.mxu1 %v1828_v10  ;;  %v1796_v7 = vadd.f32 %v13425_v52, %v1721_v29  ;;  %v1795_v4 = vadd.f32 %v13422_v33, %v1720_v32 }
 0x3af   : > { %v1648_v47 = vmul.f32 %v10878_v58, %v13537_v31  ;;  %v1647_v50 = vmul.f32 %v10878_v58, %v13533_v16  ;;  %2208 = vmatmul.mubr.bf16.gmra.mrb[56].mxu0 %v1827_v0  ;;  %2605 = vmatmul.mubr.bf16.gmra.mrb[56].mxu1 %v1827_v0  ;;  %v1863_v16 = vld [vmem:[#allocation17] sm:$0x3] }
 0x3b1   : > { %v1723_v26 = vmul.f32 %v13401_v15, %v1648_v47  ;;  %v1722_v55 = vmul.f32 %v13412_v22, %v1647_v50  ;;  %v2260_v15 = vld [vmem:[%s17816_s21] sm:$0x3]  ;;  %v17817_v22 = vld [vmem:[#allocation48_spill] sm:$0xff] }
 0x3b2   : > { %v13704_v3 = vrot.slane %v1863_v16, %v17817_v22 }
 0x3b3   : > { %v1798_v39 = vadd.f32 %v13425_v52, %v1723_v26  ;;  %v1797_v49 = vadd.f32 %v13422_v33, %v1722_v55  ;;  %v13707_v52 = vrot.slane %v2260_v15, %v17817_v22  ;;  %v17818_v33 = vld [vmem:[#allocation45_spill] sm:$0xff] }
 0x3b4   : > { %v13710_v5 = vrot.slane %v1863_v16, %v17818_v33  ;;  %v13713_v8 = vrot.slane %v2260_v15, %v17818_v33 }
 0x3b5   : > { %v1830_v59 = vpack.c.bf16 %v1798_v39, %v1796_v7  ;;  %v1829_v31 = vpack.c.bf16 %v1797_v49, %v1795_v4 }
 0x3b7   : > { %2217 = vmatprep.mubr.bf16.mxu0 %v1830_v59  ;;  %2614 = vmatprep.mubr.bf16.mxu1 %v1830_v59 }
 0x3b8   : > { %2218 = vmatmul.mubr.bf16.gmra.mrb[60].mxu0 %v1829_v31  ;;  %2615 = vmatmul.mubr.bf16.gmra.mrb[60].mxu1 %v1829_v31 }
 0x3cd   : > { %v2069_v37 = vpop.f32.mrb[0].mxu0  ;;  %v2466_v63 = vpop.f32.mrb[0].mxu1 }
 0x3ce   : > { %v2071_v11 = vpop.f32.mrb[1].mxu0  ;;  %v2468_v27 = vpop.f32.mrb[1].mxu1  ;;  %v2070_v61 = vadd.f32 %v2069_v37, %v13704_v3  ;;  %v2467_v21 = vadd.f32 %v2466_v63, %v13707_v52 }
 0x3cf   : > { %v2073_v17 = vpop.f32.mrb[2].mxu0  ;;  %v2470_v54 = vpop.f32.mrb[2].mxu1  ;;  %v2072_v45 = vadd.f32 %v2071_v11, %v13710_v5  ;;  %v2469_v43 = vadd.f32 %v2468_v27, %v13713_v8 }
 0x3d0   : > { %v2074_v62 = vadd.f32 %v2073_v17, %v13704_v3  ;;  %v2471_v57 = vadd.f32 %v2470_v54, %v13707_v52  ;;  %v2075_v1 = vpop.f32.mrb[3].mxu0  ;;  %v2472_v48 = vpop.f32.mrb[3].mxu1 }
 0x3d1   : > { %v2076_v36 = vadd.f32 %v2075_v1, %v13710_v5  ;;  %v2473_v25 = vadd.f32 %v2472_v48, %v13713_v8 }
 0x3d2   : > { %v2625_v6 = vpack.c.bf16 %v2074_v62, %v2070_v61  ;;  %v2689_v12 = vpack.c.bf16 %v2471_v57, %v2467_v21 }
 0x3d3   : > { %v2626_v40 = vpack.c.bf16 %v2076_v36, %v2072_v45  ;;  %v2690_v20 = vpack.c.bf16 %v2473_v25, %v2469_v43 }
 0x3d4   : > { %2657 = vst [vmem:[#allocation2] sm:$0xff] %v2625_v6  ;;  %2721 = vst [vmem:[#allocation3] sm:$0xff] %v2689_v12 }
 0x3d5   : > { %2658 = vst [vmem:[#allocation2 + $0x8] sm:$0xff] %v2626_v40  ;;  %2722 = vst [vmem:[#allocation3 + $0x8] sm:$0xff] %v2690_v20 }
 0x3d7   : > { %v2079_v28 = vpop.f32.mrb[4].mxu0  ;;  %v2476_v9 = vpop.f32.mrb[4].mxu1 }
 0x3d8   : > { %v2081_v14 = vpop.f32.mrb[5].mxu0  ;;  %v2478_v13 = vpop.f32.mrb[5].mxu1  ;;  %v2080_v42 = vadd.f32 %v2079_v28, %v13704_v3  ;;  %v2477_v18 = vadd.f32 %v2476_v9, %v13707_v52 }
 0x3d9   : > { %v2083_v34 = vpop.f32.mrb[6].mxu0  ;;  %v2480_v53 = vpop.f32.mrb[6].mxu1  ;;  %v2082_v56 = vadd.f32 %v2081_v14, %v13710_v5  ;;  %v2479_v60 = vadd.f32 %v2478_v13, %v13713_v8 }
 0x3da   : > { %v2084_v46 = vadd.f32 %v2083_v34, %v13704_v3  ;;  %v2481_v44 = vadd.f32 %v2480_v53, %v13707_v52  ;;  %v2085_v24 = vpop.f32.mrb[7].mxu0  ;;  %v2482_v38 = vpop.f32.mrb[7].mxu1 }
 0x3db   : > { %v2086_v19 = vadd.f32 %v2085_v24, %v13710_v5  ;;  %v2483_v41 = vadd.f32 %v2482_v38, %v13713_v8 }
 0x3dc   : > { %v2627_v23 = vpack.c.bf16 %v2084_v46, %v2080_v42  ;;  %v2691_v30 = vpack.c.bf16 %v2481_v44, %v2477_v18 }
 0x3dd   : > { %v2628_v2 = vpack.c.bf16 %v2086_v19, %v2082_v56  ;;  %v2692_v35 = vpack.c.bf16 %v2483_v41, %v2479_v60 }
 0x3de   : > { %2659 = vst [vmem:[#allocation2 + $0x10] sm:$0xff] %v2627_v23  ;;  %2723 = vst [vmem:[#allocation3 + $0x10] sm:$0xff] %v2691_v30 }
 0x3df   : > { %2660 = vst [vmem:[#allocation2 + $0x18] sm:$0xff] %v2628_v2  ;;  %2724 = vst [vmem:[#allocation3 + $0x18] sm:$0xff] %v2692_v35 }
 0x3e1   : > { %v2089_v51 = vpop.f32.mrb[8].mxu0  ;;  %v2486_v10 = vpop.f32.mrb[8].mxu1 }
 0x3e2   : > { %v2091_v0 = vpop.f32.mrb[9].mxu0  ;;  %v2488_v58 = vpop.f32.mrb[9].mxu1  ;;  %v2090_v50 = vadd.f32 %v2089_v51, %v13704_v3  ;;  %v2487_v32 = vadd.f32 %v2486_v10, %v13707_v52 }
 0x3e3   : > { %v2093_v29 = vpop.f32.mrb[10].mxu0  ;;  %v2490_v47 = vpop.f32.mrb[10].mxu1  ;;  %v2092_v4 = vadd.f32 %v2091_v0, %v13710_v5  ;;  %v2489_v49 = vadd.f32 %v2488_v58, %v13713_v8 }
 0x3e4   : > { %v2094_v26 = vadd.f32 %v2093_v29, %v13704_v3  ;;  %v2491_v55 = vadd.f32 %v2490_v47, %v13707_v52  ;;  %v2095_v7 = vpop.f32.mrb[11].mxu0  ;;  %v2492_v39 = vpop.f32.mrb[11].mxu1 }
 0x3e5   : > { %v2096_v59 = vadd.f32 %v2095_v7, %v13710_v5  ;;  %v2493_v31 = vadd.f32 %v2492_v39, %v13713_v8 }
 0x3e6   : > { %v2629_v16 = vpack.c.bf16 %v2094_v26, %v2090_v50  ;;  %v2693_v15 = vpack.c.bf16 %v2491_v55, %v2487_v32 }
 0x3e7   : > { %v2630_v22 = vpack.c.bf16 %v2096_v59, %v2092_v4  ;;  %v2694_v37 = vpack.c.bf16 %v2493_v31, %v2489_v49 }
 0x3e8   : > { %2661 = vst [vmem:[#allocation2 + $0x20] sm:$0xff] %v2629_v16  ;;  %2725 = vst [vmem:[#allocation3 + $0x20] sm:$0xff] %v2693_v15 }
 0x3e9   : > { %2662 = vst [vmem:[#allocation2 + $0x28] sm:$0xff] %v2630_v22  ;;  %2726 = vst [vmem:[#allocation3 + $0x28] sm:$0xff] %v2694_v37 }
 0x3ea   : > { %v2099_v63 = vpop.f32.mrb[12].mxu0  ;;  %v2496_v33 = vpop.f32.mrb[12].mxu1 }
 0x3eb   : > { %v2101_v11 = vpop.f32.mrb[13].mxu0  ;;  %v2498_v27 = vpop.f32.mrb[13].mxu1  ;;  %v2100_v61 = vadd.f32 %v2099_v63, %v13704_v3  ;;  %v2497_v21 = vadd.f32 %v2496_v33, %v13707_v52 }
 0x3ec   : > { %v2103_v17 = vpop.f32.mrb[14].mxu0  ;;  %v2500_v54 = vpop.f32.mrb[14].mxu1  ;;  %v2102_v45 = vadd.f32 %v2101_v11, %v13710_v5  ;;  %v2499_v43 = vadd.f32 %v2498_v27, %v13713_v8 }
 0x3ed   : > { %v2104_v62 = vadd.f32 %v2103_v17, %v13704_v3  ;;  %v2501_v57 = vadd.f32 %v2500_v54, %v13707_v52  ;;  %v2105_v1 = vpop.f32.mrb[15].mxu0  ;;  %v2502_v48 = vpop.f32.mrb[15].mxu1 }
 0x3ee   : > { %v2106_v36 = vadd.f32 %v2105_v1, %v13710_v5  ;;  %v2503_v25 = vadd.f32 %v2502_v48, %v13713_v8 }
 0x3ef   : > { %v2631_v6 = vpack.c.bf16 %v2104_v62, %v2100_v61  ;;  %v2695_v12 = vpack.c.bf16 %v2501_v57, %v2497_v21 }
 0x3f0   : > { %v2632_v40 = vpack.c.bf16 %v2106_v36, %v2102_v45  ;;  %v2696_v20 = vpack.c.bf16 %v2503_v25, %v2499_v43 }
 0x3f1   : > { %2663 = vst [vmem:[#allocation2 + $0x30] sm:$0xff] %v2631_v6  ;;  %2727 = vst [vmem:[#allocation3 + $0x30] sm:$0xff] %v2695_v12 }
 0x3f2   : > { %2664 = vst [vmem:[#allocation2 + $0x38] sm:$0xff] %v2632_v40  ;;  %2728 = vst [vmem:[#allocation3 + $0x38] sm:$0xff] %v2696_v20  ;;  %v2109_v28 = vpop.f32.mrb[16].mxu0  ;;  %v2506_v9 = vpop.f32.mrb[16].mxu1 }
 0x3f3   : > { %v2111_v14 = vpop.f32.mrb[17].mxu0  ;;  %v2508_v13 = vpop.f32.mrb[17].mxu1  ;;  %v2110_v42 = vadd.f32 %v2109_v28, %v13704_v3  ;;  %v2507_v18 = vadd.f32 %v2506_v9, %v13707_v52 }
 0x3f4   : > { %v2113_v34 = vpop.f32.mrb[18].mxu0  ;;  %v2510_v53 = vpop.f32.mrb[18].mxu1  ;;  %v2112_v56 = vadd.f32 %v2111_v14, %v13710_v5  ;;  %v2509_v60 = vadd.f32 %v2508_v13, %v13713_v8 }
 0x3f5   : > { %v2114_v46 = vadd.f32 %v2113_v34, %v13704_v3  ;;  %v2511_v44 = vadd.f32 %v2510_v53, %v13707_v52  ;;  %v2115_v24 = vpop.f32.mrb[19].mxu0  ;;  %v2512_v38 = vpop.f32.mrb[19].mxu1 }
 0x3f6   : > { %v2116_v19 = vadd.f32 %v2115_v24, %v13710_v5  ;;  %v2513_v41 = vadd.f32 %v2512_v38, %v13713_v8 }
 0x3f7   : > { %v2633_v23 = vpack.c.bf16 %v2114_v46, %v2110_v42  ;;  %v2697_v30 = vpack.c.bf16 %v2511_v44, %v2507_v18 }
 0x3f8   : > { %v2634_v2 = vpack.c.bf16 %v2116_v19, %v2112_v56  ;;  %v2698_v35 = vpack.c.bf16 %v2513_v41, %v2509_v60 }
 0x3f9   : > { %2665 = vst [vmem:[#allocation2 + $0x40] sm:$0xff] %v2633_v23  ;;  %2729 = vst [vmem:[#allocation3 + $0x40] sm:$0xff] %v2697_v30 }
 0x3fa   : > { %2666 = vst [vmem:[#allocation2 + $0x48] sm:$0xff] %v2634_v2  ;;  %2730 = vst [vmem:[#allocation3 + $0x48] sm:$0xff] %v2698_v35  ;;  %v2119_v51 = vpop.f32.mrb[20].mxu0  ;;  %v2516_v10 = vpop.f32.mrb[20].mxu1 }
 0x3fb   : > { %v2121_v0 = vpop.f32.mrb[21].mxu0  ;;  %v2518_v58 = vpop.f32.mrb[21].mxu1  ;;  %v2120_v50 = vadd.f32 %v2119_v51, %v13704_v3  ;;  %v2517_v32 = vadd.f32 %v2516_v10, %v13707_v52 }
 0x3fc   : > { %v2123_v29 = vpop.f32.mrb[22].mxu0  ;;  %v2520_v47 = vpop.f32.mrb[22].mxu1  ;;  %v2122_v4 = vadd.f32 %v2121_v0, %v13710_v5  ;;  %v2519_v49 = vadd.f32 %v2518_v58, %v13713_v8 }
 0x3fd   : > { %v2124_v26 = vadd.f32 %v2123_v29, %v13704_v3  ;;  %v2521_v55 = vadd.f32 %v2520_v47, %v13707_v52  ;;  %v2125_v7 = vpop.f32.mrb[23].mxu0  ;;  %v2522_v39 = vpop.f32.mrb[23].mxu1 }
 0x3fe   : > { %v2126_v59 = vadd.f32 %v2125_v7, %v13710_v5  ;;  %v2523_v31 = vadd.f32 %v2522_v39, %v13713_v8 }
 0x3ff   : > { %v2635_v16 = vpack.c.bf16 %v2124_v26, %v2120_v50  ;;  %v2699_v15 = vpack.c.bf16 %v2521_v55, %v2517_v32 }
 0x400   : > { %v2636_v22 = vpack.c.bf16 %v2126_v59, %v2122_v4  ;;  %v2700_v37 = vpack.c.bf16 %v2523_v31, %v2519_v49 }
 0x401   : > { %2667 = vst [vmem:[#allocation2 + $0x50] sm:$0xff] %v2635_v16  ;;  %2731 = vst [vmem:[#allocation3 + $0x50] sm:$0xff] %v2699_v15 }
 0x402   : > { %2668 = vst [vmem:[#allocation2 + $0x58] sm:$0xff] %v2636_v22  ;;  %2732 = vst [vmem:[#allocation3 + $0x58] sm:$0xff] %v2700_v37  ;;  %v2129_v63 = vpop.f32.mrb[24].mxu0  ;;  %v2526_v33 = vpop.f32.mrb[24].mxu1 }
 0x403   : > { %v2131_v11 = vpop.f32.mrb[25].mxu0  ;;  %v2528_v27 = vpop.f32.mrb[25].mxu1  ;;  %v2130_v61 = vadd.f32 %v2129_v63, %v13704_v3  ;;  %v2527_v21 = vadd.f32 %v2526_v33, %v13707_v52 }
 0x404   : > { %v2133_v17 = vpop.f32.mrb[26].mxu0  ;;  %v2530_v54 = vpop.f32.mrb[26].mxu1  ;;  %v2132_v45 = vadd.f32 %v2131_v11, %v13710_v5  ;;  %v2529_v43 = vadd.f32 %v2528_v27, %v13713_v8 }
 0x405   : > { %v2134_v62 = vadd.f32 %v2133_v17, %v13704_v3  ;;  %v2531_v57 = vadd.f32 %v2530_v54, %v13707_v52  ;;  %v2135_v1 = vpop.f32.mrb[27].mxu0  ;;  %v2532_v48 = vpop.f32.mrb[27].mxu1 }
 0x406   : > { %v2136_v36 = vadd.f32 %v2135_v1, %v13710_v5  ;;  %v2533_v25 = vadd.f32 %v2532_v48, %v13713_v8 }
 0x407   : > { %v2637_v6 = vpack.c.bf16 %v2134_v62, %v2130_v61  ;;  %v2701_v12 = vpack.c.bf16 %v2531_v57, %v2527_v21 }
 0x408   : > { %v2638_v40 = vpack.c.bf16 %v2136_v36, %v2132_v45  ;;  %v2702_v20 = vpack.c.bf16 %v2533_v25, %v2529_v43 }
 0x409   : > { %2669 = vst [vmem:[#allocation2 + $0x60] sm:$0xff] %v2637_v6  ;;  %2733 = vst [vmem:[#allocation3 + $0x60] sm:$0xff] %v2701_v12 }
 0x40a   : > { %2670 = vst [vmem:[#allocation2 + $0x68] sm:$0xff] %v2638_v40  ;;  %2734 = vst [vmem:[#allocation3 + $0x68] sm:$0xff] %v2702_v20  ;;  %v2139_v28 = vpop.f32.mrb[28].mxu0  ;;  %v2536_v9 = vpop.f32.mrb[28].mxu1 }
 0x40b   : > { %v2141_v14 = vpop.f32.mrb[29].mxu0  ;;  %v2538_v13 = vpop.f32.mrb[29].mxu1  ;;  %v2140_v42 = vadd.f32 %v2139_v28, %v13704_v3  ;;  %v2537_v18 = vadd.f32 %v2536_v9, %v13707_v52 }
 0x40c   : > { %v2143_v34 = vpop.f32.mrb[30].mxu0  ;;  %v2540_v53 = vpop.f32.mrb[30].mxu1  ;;  %v2142_v56 = vadd.f32 %v2141_v14, %v13710_v5  ;;  %v2539_v60 = vadd.f32 %v2538_v13, %v13713_v8 }
 0x40d   : > { %v2144_v46 = vadd.f32 %v2143_v34, %v13704_v3  ;;  %v2541_v44 = vadd.f32 %v2540_v53, %v13707_v52  ;;  %v2145_v24 = vpop.f32.mrb[31].mxu0  ;;  %v2542_v38 = vpop.f32.mrb[31].mxu1 }
 0x40e   : > { %v2146_v19 = vadd.f32 %v2145_v24, %v13710_v5  ;;  %v2543_v41 = vadd.f32 %v2542_v38, %v13713_v8 }
 0x40f   : > { %v2639_v23 = vpack.c.bf16 %v2144_v46, %v2140_v42  ;;  %v2703_v30 = vpack.c.bf16 %v2541_v44, %v2537_v18 }
 0x410   : > { %v2640_v2 = vpack.c.bf16 %v2146_v19, %v2142_v56  ;;  %v2704_v35 = vpack.c.bf16 %v2543_v41, %v2539_v60 }
 0x411   : > { %2671 = vst [vmem:[#allocation2 + $0x70] sm:$0xff] %v2639_v23  ;;  %2735 = vst [vmem:[#allocation3 + $0x70] sm:$0xff] %v2703_v30 }
 0x412   : > { %2672 = vst [vmem:[#allocation2 + $0x78] sm:$0xff] %v2640_v2  ;;  %2736 = vst [vmem:[#allocation3 + $0x78] sm:$0xff] %v2704_v35  ;;  %v2149_v51 = vpop.f32.mrb[32].mxu0  ;;  %v2546_v10 = vpop.f32.mrb[32].mxu1 }
 0x413   : > { %v2151_v0 = vpop.f32.mrb[33].mxu0  ;;  %v2548_v58 = vpop.f32.mrb[33].mxu1  ;;  %v2150_v50 = vadd.f32 %v2149_v51, %v13704_v3  ;;  %v2547_v32 = vadd.f32 %v2546_v10, %v13707_v52 }
 0x414   : > { %v2153_v29 = vpop.f32.mrb[34].mxu0  ;;  %v2550_v47 = vpop.f32.mrb[34].mxu1  ;;  %v2152_v4 = vadd.f32 %v2151_v0, %v13710_v5  ;;  %v2549_v49 = vadd.f32 %v2548_v58, %v13713_v8 }
 0x415   : > { %v2154_v26 = vadd.f32 %v2153_v29, %v13704_v3  ;;  %v2551_v55 = vadd.f32 %v2550_v47, %v13707_v52  ;;  %v2155_v7 = vpop.f32.mrb[35].mxu0  ;;  %v2552_v39 = vpop.f32.mrb[35].mxu1 }
 0x416   : > { %v2156_v59 = vadd.f32 %v2155_v7, %v13710_v5  ;;  %v2553_v31 = vadd.f32 %v2552_v39, %v13713_v8 }
 0x417   : > { %v2641_v16 = vpack.c.bf16 %v2154_v26, %v2150_v50  ;;  %v2705_v15 = vpack.c.bf16 %v2551_v55, %v2547_v32 }
 0x418   : > { %v2642_v22 = vpack.c.bf16 %v2156_v59, %v2152_v4  ;;  %v2706_v37 = vpack.c.bf16 %v2553_v31, %v2549_v49 }
 0x419   : > { %2673 = vst [vmem:[#allocation2 + $0x80] sm:$0xff] %v2641_v16  ;;  %2737 = vst [vmem:[#allocation3 + $0x80] sm:$0xff] %v2705_v15 }
 0x41a   : > { %2674 = vst [vmem:[#allocation2 + $0x88] sm:$0xff] %v2642_v22  ;;  %2738 = vst [vmem:[#allocation3 + $0x88] sm:$0xff] %v2706_v37  ;;  %v2159_v63 = vpop.f32.mrb[36].mxu0  ;;  %v2556_v33 = vpop.f32.mrb[36].mxu1 }
 0x41b   : > { %v2161_v11 = vpop.f32.mrb[37].mxu0  ;;  %v2558_v27 = vpop.f32.mrb[37].mxu1  ;;  %v2160_v61 = vadd.f32 %v2159_v63, %v13704_v3  ;;  %v2557_v21 = vadd.f32 %v2556_v33, %v13707_v52 }
 0x41c   : > { %v2163_v17 = vpop.f32.mrb[38].mxu0  ;;  %v2560_v54 = vpop.f32.mrb[38].mxu1  ;;  %v2162_v45 = vadd.f32 %v2161_v11, %v13710_v5  ;;  %v2559_v43 = vadd.f32 %v2558_v27, %v13713_v8 }
 0x41d   : > { %v2164_v62 = vadd.f32 %v2163_v17, %v13704_v3  ;;  %v2561_v57 = vadd.f32 %v2560_v54, %v13707_v52  ;;  %v2165_v1 = vpop.f32.mrb[39].mxu0  ;;  %v2562_v48 = vpop.f32.mrb[39].mxu1 }
 0x41e   : > { %v2166_v36 = vadd.f32 %v2165_v1, %v13710_v5  ;;  %v2563_v25 = vadd.f32 %v2562_v48, %v13713_v8 }
 0x41f   : > { %v2643_v6 = vpack.c.bf16 %v2164_v62, %v2160_v61  ;;  %v2707_v12 = vpack.c.bf16 %v2561_v57, %v2557_v21 }
 0x420   : > { %v2644_v40 = vpack.c.bf16 %v2166_v36, %v2162_v45  ;;  %v2708_v20 = vpack.c.bf16 %v2563_v25, %v2559_v43 }
 0x421   : > { %2675 = vst [vmem:[#allocation2 + $0x90] sm:$0xff] %v2643_v6  ;;  %2739 = vst [vmem:[#allocation3 + $0x90] sm:$0xff] %v2707_v12 }
 0x422   : > { %2676 = vst [vmem:[#allocation2 + $0x98] sm:$0xff] %v2644_v40  ;;  %2740 = vst [vmem:[#allocation3 + $0x98] sm:$0xff] %v2708_v20  ;;  %v2169_v28 = vpop.f32.mrb[40].mxu0  ;;  %v2566_v9 = vpop.f32.mrb[40].mxu1 }
 0x423   : > { %v2171_v14 = vpop.f32.mrb[41].mxu0  ;;  %v2568_v13 = vpop.f32.mrb[41].mxu1  ;;  %v2170_v42 = vadd.f32 %v2169_v28, %v13704_v3  ;;  %v2567_v18 = vadd.f32 %v2566_v9, %v13707_v52 }
 0x424   : > { %v2173_v34 = vpop.f32.mrb[42].mxu0  ;;  %v2570_v53 = vpop.f32.mrb[42].mxu1  ;;  %v2172_v56 = vadd.f32 %v2171_v14, %v13710_v5  ;;  %v2569_v60 = vadd.f32 %v2568_v13, %v13713_v8 }
 0x425   : > { %v2174_v46 = vadd.f32 %v2173_v34, %v13704_v3  ;;  %v2571_v44 = vadd.f32 %v2570_v53, %v13707_v52  ;;  %v2175_v24 = vpop.f32.mrb[43].mxu0  ;;  %v2572_v38 = vpop.f32.mrb[43].mxu1 }
 0x426   : > { %v2176_v19 = vadd.f32 %v2175_v24, %v13710_v5  ;;  %v2573_v41 = vadd.f32 %v2572_v38, %v13713_v8 }
 0x427   : > { %v2645_v23 = vpack.c.bf16 %v2174_v46, %v2170_v42  ;;  %v2709_v30 = vpack.c.bf16 %v2571_v44, %v2567_v18 }
 0x428   : > { %v2646_v2 = vpack.c.bf16 %v2176_v19, %v2172_v56  ;;  %v2710_v35 = vpack.c.bf16 %v2573_v41, %v2569_v60 }
 0x429   : > { %2677 = vst [vmem:[#allocation2 + $0xa0] sm:$0xff] %v2645_v23  ;;  %2741 = vst [vmem:[#allocation3 + $0xa0] sm:$0xff] %v2709_v30 }
 0x42a   : > { %2678 = vst [vmem:[#allocation2 + $0xa8] sm:$0xff] %v2646_v2  ;;  %2742 = vst [vmem:[#allocation3 + $0xa8] sm:$0xff] %v2710_v35 }
 0x468   : > { %v2179_v51 = vpop.f32.mrb[44].mxu0  ;;  %v2576_v10 = vpop.f32.mrb[44].mxu1 }
 0x469   : > { %v2181_v0 = vpop.f32.mrb[45].mxu0  ;;  %v2578_v58 = vpop.f32.mrb[45].mxu1  ;;  %v2180_v50 = vadd.f32 %v2179_v51, %v13704_v3  ;;  %v2577_v32 = vadd.f32 %v2576_v10, %v13707_v52 }
 0x46a   : > { %v2183_v29 = vpop.f32.mrb[46].mxu0  ;;  %v2580_v47 = vpop.f32.mrb[46].mxu1  ;;  %v2182_v4 = vadd.f32 %v2181_v0, %v13710_v5  ;;  %v2579_v49 = vadd.f32 %v2578_v58, %v13713_v8 }
 0x46b   : > { %v2184_v26 = vadd.f32 %v2183_v29, %v13704_v3  ;;  %v2581_v55 = vadd.f32 %v2580_v47, %v13707_v52  ;;  %v2185_v7 = vpop.f32.mrb[47].mxu0  ;;  %v2582_v39 = vpop.f32.mrb[47].mxu1 }
 0x46c   : > { %v2186_v59 = vadd.f32 %v2185_v7, %v13710_v5  ;;  %v2583_v31 = vadd.f32 %v2582_v39, %v13713_v8 }
 0x46d   : > { %v2647_v16 = vpack.c.bf16 %v2184_v26, %v2180_v50  ;;  %v2711_v15 = vpack.c.bf16 %v2581_v55, %v2577_v32 }
 0x46e   : > { %v2648_v22 = vpack.c.bf16 %v2186_v59, %v2182_v4  ;;  %v2712_v37 = vpack.c.bf16 %v2583_v31, %v2579_v49 }
 0x46f   : > { %2679 = vst [vmem:[#allocation2 + $0xb0] sm:$0xff] %v2647_v16  ;;  %2743 = vst [vmem:[#allocation3 + $0xb0] sm:$0xff] %v2711_v15 }
 0x470   : > { %2680 = vst [vmem:[#allocation2 + $0xb8] sm:$0xff] %v2648_v22  ;;  %2744 = vst [vmem:[#allocation3 + $0xb8] sm:$0xff] %v2712_v37  ;;  %v2189_v63 = vpop.f32.mrb[48].mxu0  ;;  %v2586_v33 = vpop.f32.mrb[48].mxu1 }
 0x471   : > { %v2191_v11 = vpop.f32.mrb[49].mxu0  ;;  %v2588_v27 = vpop.f32.mrb[49].mxu1  ;;  %v2190_v61 = vadd.f32 %v2189_v63, %v13704_v3  ;;  %v2587_v21 = vadd.f32 %v2586_v33, %v13707_v52 }
 0x472   : > { %v2193_v17 = vpop.f32.mrb[50].mxu0  ;;  %v2590_v54 = vpop.f32.mrb[50].mxu1  ;;  %v2192_v45 = vadd.f32 %v2191_v11, %v13710_v5  ;;  %v2589_v43 = vadd.f32 %v2588_v27, %v13713_v8 }
 0x473   : > { %v2194_v62 = vadd.f32 %v2193_v17, %v13704_v3  ;;  %v2591_v57 = vadd.f32 %v2590_v54, %v13707_v52  ;;  %v2195_v1 = vpop.f32.mrb[51].mxu0  ;;  %v2592_v48 = vpop.f32.mrb[51].mxu1 }
 0x474   : > { %v2196_v36 = vadd.f32 %v2195_v1, %v13710_v5  ;;  %v2593_v25 = vadd.f32 %v2592_v48, %v13713_v8 }
 0x475   : > { %v2649_v6 = vpack.c.bf16 %v2194_v62, %v2190_v61  ;;  %v2713_v12 = vpack.c.bf16 %v2591_v57, %v2587_v21 }
 0x476   : > { %v2650_v40 = vpack.c.bf16 %v2196_v36, %v2192_v45  ;;  %v2714_v20 = vpack.c.bf16 %v2593_v25, %v2589_v43 }
 0x477   : > { %2681 = vst [vmem:[#allocation2 + $0xc0] sm:$0xff] %v2649_v6  ;;  %2745 = vst [vmem:[#allocation3 + $0xc0] sm:$0xff] %v2713_v12 }
 0x478   : > { %2682 = vst [vmem:[#allocation2 + $0xc8] sm:$0xff] %v2650_v40  ;;  %2746 = vst [vmem:[#allocation3 + $0xc8] sm:$0xff] %v2714_v20 }
 0x47a   : > { %v2199_v28 = vpop.f32.mrb[52].mxu0  ;;  %v2596_v9 = vpop.f32.mrb[52].mxu1 }
 0x47b   : > { %v2201_v14 = vpop.f32.mrb[53].mxu0  ;;  %v2598_v13 = vpop.f32.mrb[53].mxu1  ;;  %v2200_v42 = vadd.f32 %v2199_v28, %v13704_v3  ;;  %v2597_v18 = vadd.f32 %v2596_v9, %v13707_v52 }
 0x47c   : > { %v2203_v34 = vpop.f32.mrb[54].mxu0  ;;  %v2600_v53 = vpop.f32.mrb[54].mxu1  ;;  %v2202_v56 = vadd.f32 %v2201_v14, %v13710_v5  ;;  %v2599_v60 = vadd.f32 %v2598_v13, %v13713_v8 }
 0x47d   : > { %v2204_v46 = vadd.f32 %v2203_v34, %v13704_v3  ;;  %v2601_v44 = vadd.f32 %v2600_v53, %v13707_v52  ;;  %v2205_v24 = vpop.f32.mrb[55].mxu0  ;;  %v2602_v38 = vpop.f32.mrb[55].mxu1 }
 0x47e   : > { %v2206_v19 = vadd.f32 %v2205_v24, %v13710_v5  ;;  %v2603_v41 = vadd.f32 %v2602_v38, %v13713_v8 }
 0x47f   : > { %v2651_v23 = vpack.c.bf16 %v2204_v46, %v2200_v42  ;;  %v2715_v30 = vpack.c.bf16 %v2601_v44, %v2597_v18 }
 0x480   : > { %v2652_v2 = vpack.c.bf16 %v2206_v19, %v2202_v56  ;;  %v2716_v35 = vpack.c.bf16 %v2603_v41, %v2599_v60 }
 0x481   : > { %2683 = vst [vmem:[#allocation2 + $0xd0] sm:$0xff] %v2651_v23  ;;  %2747 = vst [vmem:[#allocation3 + $0xd0] sm:$0xff] %v2715_v30 }
 0x482   : > { %2684 = vst [vmem:[#allocation2 + $0xd8] sm:$0xff] %v2652_v2  ;;  %2748 = vst [vmem:[#allocation3 + $0xd8] sm:$0xff] %v2716_v35  ;;  %v2209_v51 = vpop.f32.mrb[56].mxu0  ;;  %v2606_v10 = vpop.f32.mrb[56].mxu1 }
 0x483   : > { %v2211_v0 = vpop.f32.mrb[57].mxu0  ;;  %v2608_v58 = vpop.f32.mrb[57].mxu1  ;;  %v2210_v50 = vadd.f32 %v2209_v51, %v13704_v3  ;;  %v2607_v32 = vadd.f32 %v2606_v10, %v13707_v52 }
 0x484   : > { %v2213_v29 = vpop.f32.mrb[58].mxu0  ;;  %v2610_v47 = vpop.f32.mrb[58].mxu1  ;;  %v2212_v4 = vadd.f32 %v2211_v0, %v13710_v5  ;;  %v2609_v49 = vadd.f32 %v2608_v58, %v13713_v8 }
 0x485   : > { %v2214_v26 = vadd.f32 %v2213_v29, %v13704_v3  ;;  %v2611_v55 = vadd.f32 %v2610_v47, %v13707_v52  ;;  %v2215_v7 = vpop.f32.mrb[59].mxu0  ;;  %v2612_v39 = vpop.f32.mrb[59].mxu1 }
 0x486   : > { %v2216_v59 = vadd.f32 %v2215_v7, %v13710_v5  ;;  %v2613_v31 = vadd.f32 %v2612_v39, %v13713_v8 }
 0x487   : > { %v2653_v16 = vpack.c.bf16 %v2214_v26, %v2210_v50  ;;  %v2717_v15 = vpack.c.bf16 %v2611_v55, %v2607_v32 }
 0x488   : > { %v2654_v22 = vpack.c.bf16 %v2216_v59, %v2212_v4  ;;  %v2718_v37 = vpack.c.bf16 %v2613_v31, %v2609_v49 }
 0x489   : > { %2685 = vst [vmem:[#allocation2 + $0xe0] sm:$0xff] %v2653_v16  ;;  %2749 = vst [vmem:[#allocation3 + $0xe0] sm:$0xff] %v2717_v15 }
 0x48a   : > { %2686 = vst [vmem:[#allocation2 + $0xe8] sm:$0xff] %v2654_v22  ;;  %2750 = vst [vmem:[#allocation3 + $0xe8] sm:$0xff] %v2718_v37 }
 0x48b   : > { %v2219_v63 = vpop.f32.mrb[60].mxu0  ;;  %v2616_v33 = vpop.f32.mrb[60].mxu1 }
 0x48c   : > { %v2221_v11 = vpop.f32.mrb[61].mxu0  ;;  %v2618_v27 = vpop.f32.mrb[61].mxu1  ;;  %v2220_v61 = vadd.f32 %v2219_v63, %v13704_v3  ;;  %v2617_v21 = vadd.f32 %v2616_v33, %v13707_v52 }
 0x48d   : > { %v2223_v17 = vpop.f32.mrb[62].mxu0  ;;  %v2620_v54 = vpop.f32.mrb[62].mxu1  ;;  %v2222_v45 = vadd.f32 %v2221_v11, %v13710_v5  ;;  %v2619_v43 = vadd.f32 %v2618_v27, %v13713_v8 }
 0x48e   : > { %v2224_v62 = vadd.f32 %v2223_v17, %v13704_v3  ;;  %v2621_v57 = vadd.f32 %v2620_v54, %v13707_v52  ;;  %v2225_v1 = vpop.f32.mrb[63].mxu0  ;;  %v2622_v48 = vpop.f32.mrb[63].mxu1 }
 0x48f   : > { %v2226_v36 = vadd.f32 %v2225_v1, %v13710_v5  ;;  %v2623_v25 = vadd.f32 %v2622_v48, %v13713_v8 }
 0x490   : > { %v2655_v6 = vpack.c.bf16 %v2224_v62, %v2220_v61  ;;  %v2719_v12 = vpack.c.bf16 %v2621_v57, %v2617_v21 }
 0x491   : > { %v2656_v40 = vpack.c.bf16 %v2226_v36, %v2222_v45  ;;  %v2720_v20 = vpack.c.bf16 %v2623_v25, %v2619_v43 }
 0x492   : > { %2687 = vst [vmem:[#allocation2 + $0xf0] sm:$0xff] %v2655_v6  ;;  %2751 = vst [vmem:[#allocation3 + $0xf0] sm:$0xff] %v2719_v12 }
 0x493   : > { %2688 = vst [vmem:[#allocation2 + $0xf8] sm:$0xff] %v2656_v40  ;;  %2752 = vst [vmem:[#allocation3 + $0xf8] sm:$0xff] %v2720_v20 }
 0x494 PF: > { %v10879_v3 = vld [vmem:[#allocation6 + $0x4] ss:$8 sps:$4 sm:$0xff]   ;;  %vm2888_vm0 = vcmask 1040384   ;;  %v10881_v52 = vld [vmem:[#allocation6] ss:$8 sps:$4 sm:$0xff]   ;;  %vm2889_vm1 = vcmask 1041408   ;;  %v2778_v35 = vlaneseq }
 0x495   : > { %2898 = vmatprep.subr.bf16.mxu0 %v10879_v3  ;;  %v10882_v28 = vld [vmem:[#allocation6 + $0x14] ss:$8 sps:$4 sm:$0xff]   ;;  %v12222_v9 = vmov 65535   ;;  %v17550_v5 = vmov 0   ;;  %v10884_v8 = vld [vmem:[#allocation6 + $0x10] ss:$8 sps:$4 sm:$0xff]  }
 0x496   : > { %v2890_v14 = vsel %vm2888_vm0, 4294967295, %v12222_v9  ;;  %2930 = vmatprep.mubr.bf16.mxu0 %v17550_v5  ;;  %2899 = vmatpush1.bf16.msra.mxu0 %v10881_v52  ;;  %v10885_v13 = vld [vmem:[#allocation6 + $0x24] ss:$8 sps:$4 sm:$0xff]   ;;  %v2775_v34 = vld [vmem:[#allocation6 + $0x30] sm:$0x33]  ;;  %vm2863_vm2 = vcmask 416768  }
 0x497   : > { %2900 = vmatprep.subr.bf16.mxu0 %v10882_v28  ;;  %v9756_v53 = vcombine.high %v2775_v34, %v2775_v34  ;;  %v2891_v42 = vsel %vm2889_vm1, %v2890_v14, 0  ;;  %v10887_v18 = vld [vmem:[#allocation6 + $0x20] ss:$8 sps:$4 sm:$0xff]   ;;  %v9755_v46 = vcombine.low %v2775_v34, %v2775_v34  ;;  %v10892_v60 = vld [vmem:[%s12809_s28 + $0x10] sm:$0xff]   ;;  %v10893_v19 = vld [vmem:[%s12809_s28 + $0x18] sm:$0xff]   ;;  %v13867_v51 = vshrl.u32 %v2778_v35, 7 }
 0x498   : > { %v10890_v38 = vld [vmem:[%s12809_s28] sm:$0xff]   ;;  %v10891_v56 = vld [vmem:[%s12809_s28 + $0x8] sm:$0xff]   ;;  %v10896_v30 = vld [vmem:[%s12809_s28 + $0x30] sm:$0xff]   ;;  %s17821_s22 = sld [smem:[#allocation112_spill]]  ;;  %s17855_s12 = sld [smem:[#allocation117_spill]]  ;;  %vm9393_vm3 = vcmask 31744  }
 0x499   : > { %v2896_v44 = vand.u32 %v9756_v53, %v2891_v42  ;;  %v2893_v24 = vand.u32 %v9755_v46, %v2891_v42  ;;  %v10894_v41 = vld [vmem:[%s12809_s28 + $0x20] sm:$0xff]   ;;  %v10895_v23 = vld [vmem:[%s12809_s28 + $0x28] sm:$0xff]   ;;  %v10897_v2 = vld [vmem:[%s12809_s28 + $0x38] sm:$0xff]   ;;  %17819 = vst [vmem:[#allocation51_spill] sm:$0xff] %v13867_v51  ;;  %v13870_v10 = vsub.s32 0, %v13867_v51  ;;  %v13876_v58 = vsub.s32 1, %v13867_v51 }
 0x49a   : > { %2901 = vmatpush1.bf16.msra.mxu0 %v10884_v8  ;;  %s17928_s21 = sld [smem:[#allocation122_spill]]  ;;  %s17996_s23 = sld [smem:[#allocation124_spill]] }
 0x49b   : > { %2902 = vmatprep.subr.bf16.mxu0 %v10885_v13  ;;  %17820 = vst [vmem:[#allocation52_spill] sm:$0xff] %v13870_v10  ;;  %17822 = vst [vmem:[#allocation53_spill] sm:$0xff] %v13876_v58  ;;  %s17999_s15 = sld [smem:[#allocation125_spill]]  ;;  %s18140_s2 = sld [smem:[#allocation127_spill]] }
 0x49c   : > { %s18141_s10 = sld [smem:[#allocation128_spill]] }
 0x49e   : > { %2903 = vmatpush1.bf16.msra.mxu0 %v10887_v18  ;;  %v2776_v0 = vld [vmem:[%s17821_s22] sm:$0x3]  ;;  %s17995_s22 = sld [smem:[#allocation123_spill]] }
 0x49f   : > { %2904 = vmatprep.subr.bf16.mxu0 %v2896_v44  ;;  %v13879_v29 = vrot.slane %v2776_v0, %v13870_v10  ;;  %v13882_v47 = vrot.slane %v2776_v0, %v13876_v58 }
 0x4a2   : > { %2905 = vmatpush1.bf16.msra.mxu0 %v2893_v24 }
 0x4a5   : > { %9757 = vmatmul.mubr.msk.bf16.vlgmr.msra.gmra.mrb[0].mxu0 %vm2863_vm2, %v10890_v38 }
 0x4a6   : > { %2940 = vmatprep.mubr.bf16.mxu0 %v17550_v5 }
 0x4ad   : > { %9758 = vmatmul.mubr.msk.bf16.gmra.mrb[4].mxu0 %vm2863_vm2, %v10891_v56 }
 0x4ae   : > { %2950 = vmatprep.mubr.bf16.mxu0 %v17550_v5 }
 0x4b5   : > { %9759 = vmatmul.mubr.msk.bf16.gmra.mrb[8].mxu0 %vm2863_vm2, %v10892_v60 }
 0x4b6   : > { %2960 = vmatprep.mubr.bf16.mxu0 %v17550_v5 }
 0x4bd   : > { %9760 = vmatmul.mubr.msk.bf16.gmra.mrb[12].mxu0 %vm2863_vm2, %v10893_v19 }
 0x4be   : > { %2970 = vmatprep.mubr.bf16.mxu0 %v17550_v5 }
 0x4c5   : > { %9761 = vmatmul.mubr.msk.bf16.gmra.mrb[16].mxu0 %vm2863_vm2, %v10894_v41 }
 0x4c6   : > { %2980 = vmatprep.mubr.bf16.mxu0 %v17550_v5 }
 0x4cd   : > { %9762 = vmatmul.mubr.msk.bf16.gmra.mrb[20].mxu0 %vm2863_vm2, %v10895_v23 }
 0x4ce   : > { %2990 = vmatprep.mubr.bf16.mxu0 %v17550_v5 }
 0x4d5   : > { %9763 = vmatmul.mubr.msk.bf16.gmra.mrb[24].mxu0 %vm2863_vm2, %v10896_v30 }
 0x4d6   : > { %3000 = vmatprep.mubr.bf16.mxu0 %v17550_v5 }
 0x4dd   : > { %9764 = vmatmul.mubr.msk.bf16.gmra.mrb[28].mxu0 %vm2863_vm2, %v10897_v2 }
 0x578   : > { %v2932_v50 = vpop.f32.mrb[0].mxu0 }
 0x579   : > { %v13885_v32 = vadd.f32 %v2932_v50, %v13879_v29  ;;  %v2934_v26 = vpop.f32.mrb[1].mxu0 }
 0x57a   : > { %v13888_v55 = vadd.f32 %v2934_v26, %v13882_v47  ;;  %v2936_v7 = vpop.f32.mrb[2].mxu0 }
 0x57b   : > { %17823 = vst [vmem:[#allocation54_spill] sm:$0xff] %v13885_v32  ;;  %v2938_v39 = vpop.f32.mrb[3].mxu0  ;;  %v13891_v4 = vadd.f32 %v2936_v7, %v13879_v29 }
 0x57c   : > { %17824 = vst [vmem:[#allocation55_spill] sm:$0xff] %v13888_v55  ;;  %v13894_v49 = vadd.f32 %v2938_v39, %v13882_v47  ;;  %v3013_v59 = vadd.f32 %v13888_v55, %v13885_v32 }
 0x57d   : > { %17825 = vst [vmem:[#allocation56_spill] sm:$0xff] %v13891_v4 }
 0x57e   : > { %17826 = vst [vmem:[#allocation57_spill] sm:$0xff] %v13894_v49  ;;  %3014 = vadd.xlane.f32.xlu0 %v3013_v59  ;;  %v3016_v16 = vadd.f32 %v13894_v49, %v13891_v4 }
 0x580   : > { %v2942_v31 = vpop.f32.mrb[4].mxu0 }
 0x581   : > { %v13901_v15 = vadd.f32 %v2942_v31, %v13879_v29  ;;  %v2944_v22 = vpop.f32.mrb[5].mxu0 }
 0x582   : > { %v13904_v37 = vadd.f32 %v2944_v22, %v13882_v47  ;;  %v2946_v63 = vpop.f32.mrb[6].mxu0  ;;  %3017 = vadd.xlane.f32.xlu0 %v3016_v16 }
 0x583   : > { %17827 = vst [vmem:[#allocation58_spill] sm:$0xff] %v13901_v15  ;;  %v2948_v33 = vpop.f32.mrb[7].mxu0  ;;  %v13907_v11 = vadd.f32 %v2946_v63, %v13879_v29 }
 0x584   : > { %17828 = vst [vmem:[#allocation59_spill] sm:$0xff] %v13904_v37  ;;  %v13910_v27 = vadd.f32 %v2948_v33, %v13882_v47  ;;  %v3019_v17 = vadd.f32 %v13904_v37, %v13901_v15 }
 0x585   : > { %17829 = vst [vmem:[#allocation60_spill] sm:$0xff] %v13907_v11 }
 0x586   : > { %17830 = vst [vmem:[#allocation61_spill] sm:$0xff] %v13910_v27  ;;  %3020 = vadd.xlane.f32.xlu1 %v3019_v17  ;;  %v3022_v61 = vadd.f32 %v13910_v27, %v13907_v11 }
 0x588   : > { %v2952_v54 = vpop.f32.mrb[8].mxu0 }
 0x589   : > { %v13917_v21 = vadd.f32 %v2952_v54, %v13879_v29  ;;  %v2954_v62 = vpop.f32.mrb[9].mxu0 }
 0x58a   : > { %v13920_v57 = vadd.f32 %v2954_v62, %v13882_v47  ;;  %v2956_v1 = vpop.f32.mrb[10].mxu0  ;;  %3023 = vadd.xlane.f32.xlu1 %v3022_v61 }
 0x58b   : > { %17831 = vst [vmem:[#allocation62_spill] sm:$0xff] %v13917_v21  ;;  %v13923_v48 = vadd.f32 %v2956_v1, %v13879_v29  ;;  %v2958_v45 = vpop.f32.mrb[11].mxu0 }
 0x58c   : > { %17832 = vst [vmem:[#allocation63_spill] sm:$0xff] %v13920_v57  ;;  %v13926_v43 = vadd.f32 %v2958_v45, %v13882_v47  ;;  %v3025_v36 = vadd.f32 %v13920_v57, %v13917_v21 }
 0x58d   : > { %17833 = vst [vmem:[#allocation64_spill] sm:$0xff] %v13923_v48 }
 0x58e   : > { %17834 = vst [vmem:[#allocation65_spill] sm:$0xff] %v13926_v43  ;;  %3026 = vadd.xlane.f32.xlu0 %v3025_v36  ;;  %v3028_v25 = vadd.f32 %v13926_v43, %v13923_v48 }
 0x590   : > { %v2962_v6 = vpop.f32.mrb[12].mxu0  ;;  %3029 = vadd.xlane.f32.xlu1 %v3028_v25 }
 0x591   : > { %v13933_v12 = vadd.f32 %v2962_v6, %v13879_v29  ;;  %v2964_v40 = vpop.f32.mrb[13].mxu0 }
 0x592   : > { %v13936_v20 = vadd.f32 %v2964_v40, %v13882_v47  ;;  %v2966_v3 = vpop.f32.mrb[14].mxu0 }
 0x593   : > { %17835 = vst [vmem:[#allocation66_spill] sm:$0xff] %v13933_v12  ;;  %v13939_v52 = vadd.f32 %v2966_v3, %v13879_v29  ;;  %v2968_v28 = vpop.f32.mrb[15].mxu0 }
 0x594   : > { %17836 = vst [vmem:[#allocation67_spill] sm:$0xff] %v13936_v20  ;;  %v13942_v9 = vadd.f32 %v2968_v28, %v13882_v47  ;;  %v3031_v14 = vadd.f32 %v13936_v20, %v13933_v12 }
 0x595   : > { %17837 = vst [vmem:[#allocation68_spill] sm:$0xff] %v13939_v52 }
 0x596   : > { %17838 = vst [vmem:[#allocation69_spill] sm:$0xff] %v13942_v9  ;;  %3032 = vadd.xlane.f32.xlu0 %v3031_v14  ;;  %v3034_v8 = vadd.f32 %v13942_v9, %v13939_v52  ;;  %v10898_v14 = vld [vmem:[%s17855_s12 + $0x4] ss:$8 sps:$4 sm:$0xff]  }
 0x597   : > { %3576 = vmatprep.subr.bf16.mxu1 %v10898_v14 }
 0x598   : > { %v2972_v13 = vpop.f32.mrb[16].mxu0  ;;  %3035 = vadd.xlane.f32.xlu1 %v3034_v8  ;;  %v10903_v8 = vld [vmem:[%s17855_s12 + $0x10] ss:$8 sps:$4 sm:$0xff]  }
 0x599   : > { %v13949_v34 = vadd.f32 %v2972_v13, %v13879_v29  ;;  %v2974_v53 = vpop.f32.mrb[17].mxu0  ;;  %v10904_v13 = vld [vmem:[%s17855_s12 + $0x24] ss:$8 sps:$4 sm:$0xff]  }
 0x59a   : > { %v13952_v42 = vadd.f32 %v2974_v53, %v13882_v47  ;;  %v2976_v18 = vpop.f32.mrb[18].mxu0  ;;  %v10906_v53 = vld [vmem:[%s17855_s12 + $0x20] ss:$8 sps:$4 sm:$0xff]  }
 0x59b   : > { %17839 = vst [vmem:[#allocation70_spill] sm:$0xff] %v13949_v34  ;;  %v13955_v46 = vadd.f32 %v2976_v18, %v13879_v29  ;;  %v2978_v44 = vpop.f32.mrb[19].mxu0  ;;  %v10907_v18 = vld [vmem:[%s17855_s12 + $0x34] ss:$8 sps:$4 sm:$0xff]  }
 0x59c   : > { %17840 = vst [vmem:[#allocation71_spill] sm:$0xff] %v13952_v42  ;;  %v13958_v24 = vadd.f32 %v2978_v44, %v13882_v47  ;;  %v3037_v38 = vadd.f32 %v13952_v42, %v13949_v34  ;;  %v10909_v44 = vld [vmem:[%s17855_s12 + $0x30] ss:$8 sps:$4 sm:$0xff]  }
 0x59d   : > { %17841 = vst [vmem:[#allocation72_spill] sm:$0xff] %v13955_v46 }
 0x59e   : > { %17842 = vst [vmem:[#allocation73_spill] sm:$0xff] %v13958_v24  ;;  %3038 = vadd.xlane.f32.xlu0 %v3037_v38  ;;  %v3040_v56 = vadd.f32 %v13958_v24, %v13955_v46  ;;  %v10910_v38 = vld [vmem:[%s17855_s12 + $0x44] ss:$8 sps:$4 sm:$0xff]  }
 0x5a0   : > { %v2982_v60 = vpop.f32.mrb[20].mxu0  ;;  %3041 = vadd.xlane.f32.xlu1 %v3040_v56  ;;  %v10912_v56 = vld [vmem:[%s17855_s12 + $0x40] ss:$8 sps:$4 sm:$0xff]  }
 0x5a1   : > { %v13965_v19 = vadd.f32 %v2982_v60, %v13879_v29  ;;  %v2984_v41 = vpop.f32.mrb[21].mxu0  ;;  %v10913_v60 = vld [vmem:[%s17855_s12 + $0x54] ss:$8 sps:$4 sm:$0xff]  }
 0x5a2   : > { %v13968_v23 = vadd.f32 %v2984_v41, %v13882_v47  ;;  %v2986_v30 = vpop.f32.mrb[22].mxu0  ;;  %v10915_v41 = vld [vmem:[%s17855_s12 + $0x50] ss:$8 sps:$4 sm:$0xff]  }
 0x5a3   : > { %17843 = vst [vmem:[#allocation74_spill] sm:$0xff] %v13965_v19  ;;  %v13971_v2 = vadd.f32 %v2986_v30, %v13879_v29  ;;  %v2988_v35 = vpop.f32.mrb[23].mxu0  ;;  %v10916_v30 = vld [vmem:[%s17855_s12 + $0x64] ss:$8 sps:$4 sm:$0xff]  }
 0x5a4   : > { %17844 = vst [vmem:[#allocation75_spill] sm:$0xff] %v13968_v23  ;;  %v13974_v0 = vadd.f32 %v2988_v35, %v13882_v47  ;;  %v3043_v50 = vadd.f32 %v13968_v23, %v13965_v19  ;;  %v10918_v35 = vld [vmem:[%s17855_s12 + $0x60] ss:$8 sps:$4 sm:$0xff]  }
 0x5a5   : > { %17845 = vst [vmem:[#allocation76_spill] sm:$0xff] %v13971_v2 }
 0x5a6   : > { %17846 = vst [vmem:[#allocation77_spill] sm:$0xff] %v13974_v0  ;;  %3044 = vadd.xlane.f32.xlu0 %v3043_v50  ;;  %v3046_v26 = vadd.f32 %v13974_v0, %v13971_v2  ;;  %v10919_v50 = vld [vmem:[%s17855_s12 + $0x74] ss:$8 sps:$4 sm:$0xff]  }
 0x5a8   : > { %v2992_v7 = vpop.f32.mrb[24].mxu0  ;;  %3047 = vadd.xlane.f32.xlu1 %v3046_v26  ;;  %v10921_v26 = vld [vmem:[%s17855_s12 + $0x70] ss:$8 sps:$4 sm:$0xff]  }
 0x5a9   : > { %v13981_v39 = vadd.f32 %v2992_v7, %v13879_v29  ;;  %v2994_v59 = vpop.f32.mrb[25].mxu0  ;;  %v10922_v7 = vld [vmem:[%s17855_s12 + $0x84] ss:$8 sps:$4 sm:$0xff]  }
 0x5aa   : > { %v13984_v31 = vadd.f32 %v2994_v59, %v13882_v47  ;;  %v2996_v16 = vpop.f32.mrb[26].mxu0  ;;  %v10924_v59 = vld [vmem:[%s17855_s12 + $0x80] ss:$8 sps:$4 sm:$0xff]  }
 0x5ab   : > { %17847 = vst [vmem:[#allocation78_spill] sm:$0xff] %v13981_v39  ;;  %v13987_v22 = vadd.f32 %v2996_v16, %v13879_v29  ;;  %v2998_v63 = vpop.f32.mrb[27].mxu0 }
 0x5ac   : > { %17848 = vst [vmem:[#allocation79_spill] sm:$0xff] %v13984_v31  ;;  %v13990_v33 = vadd.f32 %v2998_v63, %v13882_v47  ;;  %v3049_v17 = vadd.f32 %v13984_v31, %v13981_v39 }
 0x5ad   : > { %17849 = vst [vmem:[#allocation80_spill] sm:$0xff] %v13987_v22 }
 0x5ae   : > { %17850 = vst [vmem:[#allocation81_spill] sm:$0xff] %v13990_v33  ;;  %3050 = vadd.xlane.f32.xlu0 %v3049_v17  ;;  %v3052_v54 = vadd.f32 %v13990_v33, %v13987_v22 }
 0x5b0   : > { %v3002_v61 = vpop.f32.mrb[28].mxu0  ;;  %3053 = vadd.xlane.f32.xlu1 %v3052_v54 }
 0x5b1   : > { %v13997_v62 = vadd.f32 %v3002_v61, %v13879_v29  ;;  %v3004_v1 = vpop.f32.mrb[29].mxu0 }
 0x5b2   : > { %v14000_v45 = vadd.f32 %v3004_v1, %v13882_v47  ;;  %v3006_v36 = vpop.f32.mrb[30].mxu0 }
 0x5b3   : > { %17851 = vst [vmem:[#allocation82_spill] sm:$0xff] %v13997_v62  ;;  %v14003_v25 = vadd.f32 %v3006_v36, %v13879_v29  ;;  %v3008_v6 = vpop.f32.mrb[31].mxu0  ;;  %v10900_v29 = vld [vmem:[%s17855_s12] ss:$8 sps:$4 sm:$0xff]  }
 0x5b4   : > { %17852 = vst [vmem:[#allocation83_spill] sm:$0xff] %v14000_v45  ;;  %v14006_v40 = vadd.f32 %v3008_v6, %v13882_v47  ;;  %v3055_v3 = vadd.f32 %v14000_v45, %v13997_v62  ;;  %v10901_v47 = vld [vmem:[%s17855_s12 + $0x14] ss:$8 sps:$4 sm:$0xff]   ;;  %3577 = vmatpush1.bf16.msra.mxu1 %v10900_v29 }
 0x5b5   : > { %17853 = vst [vmem:[#allocation84_spill] sm:$0xff] %v14003_v25  ;;  %3578 = vmatprep.subr.bf16.mxu1 %v10901_v47 }
 0x5b6   : > { %17854 = vst [vmem:[#allocation85_spill] sm:$0xff] %v14006_v40  ;;  %3056 = vadd.xlane.f32.xlu0 %v3055_v3  ;;  %v3058_v28 = vadd.f32 %v14006_v40, %v14003_v25 }
 0x5b8   : > { %3059 = vadd.xlane.f32.xlu1 %v3058_v28  ;;  %3579 = vmatpush1.bf16.msra.mxu1 %v10903_v8 }
 0x5b9   : > { %3580 = vmatprep.subr.bf16.mxu1 %v10904_v13 }
 0x5bc   : > { %3581 = vmatpush1.bf16.msra.mxu1 %v10906_v53 }
 0x5bd   : > { %3582 = vmatprep.subr.bf16.mxu1 %v10907_v18 }
 0x5c0   : > { %3583 = vmatpush1.bf16.msra.mxu1 %v10909_v44 }
 0x5c1   : > { %3584 = vmatprep.subr.bf16.mxu1 %v10910_v38 }
 0x5c4   : > { %3585 = vmatpush1.bf16.msra.mxu1 %v10912_v56 }
 0x5c5   : > { %3586 = vmatprep.subr.bf16.mxu1 %v10913_v60 }
 0x5c8   : > { %3587 = vmatpush1.bf16.msra.mxu1 %v10915_v41 }
 0x5c9   : > { %3588 = vmatprep.subr.bf16.mxu1 %v10916_v30 }
 0x5cc   : > { %3589 = vmatpush1.bf16.msra.mxu1 %v10918_v35 }
 0x5cd   : > { %3590 = vmatprep.subr.bf16.mxu1 %v10919_v50 }
 0x5d0   : > { %3591 = vmatpush1.bf16.msra.mxu1 %v10921_v26 }
 0x5d1   : > { %3592 = vmatprep.subr.bf16.mxu1 %v10922_v7 }
 0x5d4   : > { %3593 = vmatpush1.bf16.msra.mxu1 %v10924_v59 }
 0x60b   : > { %v3015_v16 = vpop.xlane.xlu0 %3014 }
 0x60c   : > { %v3062_v63 = vmul.f32 0.00390625, %v3015_v16 }
 0x60e   : > { %v14067_v17 = vsub.f32 %v13885_v32, %v3062_v63  ;;  %v14070_v54 = vsub.f32 %v13888_v55, %v3062_v63 }
 0x60f   : > { %v3018_v61 = vpop.xlane.xlu0 %3017 }
 0x610   : > { %v3063_v1 = vmul.f32 0.00390625, %v3018_v61  ;;  %v3110_v36 = vmul.f32 %v14067_v17, %v14067_v17  ;;  %v3111_v6 = vmul.f32 %v14070_v54, %v14070_v54 }
 0x612   : > { %v14077_v3 = vsub.f32 %v13891_v4, %v3063_v1  ;;  %v14080_v28 = vsub.f32 %v13894_v49, %v3063_v1  ;;  %v3142_v14 = vadd.f32 %v3111_v6, %v3110_v36 }
 0x613   : > { %v3021_v29 = vpop.xlane.xlu1 %3020 }
 0x614   : > { %v3064_v47 = vmul.f32 0.00390625, %v3021_v29  ;;  %3143 = vadd.xlane.f32.xlu0 %v3142_v14  ;;  %v3112_v8 = vmul.f32 %v14077_v3, %v14077_v3  ;;  %v3113_v13 = vmul.f32 %v14080_v28, %v14080_v28 }
 0x616   : > { %v14087_v53 = vsub.f32 %v13901_v15, %v3064_v47  ;;  %v14090_v18 = vsub.f32 %v13904_v37, %v3064_v47  ;;  %v3145_v44 = vadd.f32 %v3113_v13, %v3112_v8  ;;  %v10925_v13 = vld [vmem:[%s17855_s12 + $0x94] ss:$8 sps:$4 sm:$0xff]  }
 0x617   : > { %v3024_v38 = vpop.xlane.xlu1 %3023  ;;  %3594 = vmatprep.subr.bf16.mxu1 %v10925_v13 }
 0x618   : > { %v3065_v56 = vmul.f32 0.00390625, %v3024_v38  ;;  %3146 = vadd.xlane.f32.xlu1 %v3145_v44  ;;  %v3114_v60 = vmul.f32 %v14087_v53, %v14087_v53  ;;  %v3115_v41 = vmul.f32 %v14090_v18, %v14090_v18  ;;  %v10927_v44 = vld [vmem:[%s17855_s12 + $0x90] ss:$8 sps:$4 sm:$0xff]  }
 0x619   : > { %3595 = vmatpush1.bf16.msra.mxu1 %v10927_v44 }
 0x61a   : > { %v14097_v30 = vsub.f32 %v13907_v11, %v3065_v56  ;;  %v14100_v35 = vsub.f32 %v13910_v27, %v3065_v56  ;;  %v3148_v50 = vadd.f32 %v3115_v41, %v3114_v60 }
 0x61b   : > { %v3027_v26 = vpop.xlane.xlu0 %3026 }
 0x61c   : > { %v3066_v7 = vmul.f32 0.00390625, %v3027_v26  ;;  %3149 = vadd.xlane.f32.xlu0 %v3148_v50  ;;  %v3116_v59 = vmul.f32 %v14097_v30, %v14097_v30  ;;  %v3117_v16 = vmul.f32 %v14100_v35, %v14100_v35 }
 0x61d   : > { %v3030_v63 = vpop.xlane.xlu1 %3029 }
 0x61e   : > { %v14107_v61 = vsub.f32 %v13917_v21, %v3066_v7  ;;  %v14110_v1 = vsub.f32 %v13920_v57, %v3066_v7  ;;  %v3067_v36 = vmul.f32 0.00390625, %v3030_v63  ;;  %v3151_v6 = vadd.f32 %v3117_v16, %v3116_v59  ;;  %v10928_v7 = vld [vmem:[%s17855_s12 + $0xa4] ss:$8 sps:$4 sm:$0xff]   ;;  %v10930_v16 = vld [vmem:[%s17855_s12 + $0xa0] ss:$8 sps:$4 sm:$0xff]  }
 0x61f   : > { %3596 = vmatprep.subr.bf16.mxu1 %v10928_v7 }
 0x620   : > { %v14113_v14 = vsub.f32 %v13923_v48, %v3067_v36  ;;  %v14116_v29 = vsub.f32 %v13926_v43, %v3067_v36  ;;  %3152 = vadd.xlane.f32.xlu1 %v3151_v6  ;;  %v3118_v47 = vmul.f32 %v14107_v61, %v14107_v61  ;;  %v3119_v8 = vmul.f32 %v14110_v1, %v14110_v1  ;;  %v3705_v48 = vld [vmem:[#allocation2] sm:$0xff] }
 0x621   : > { %3597 = vmatpush1.bf16.msra.mxu1 %v10930_v16  ;;  %v10934_v16 = vld [vmem:[%s17855_s12 + $0xc4] ss:$8 sps:$4 sm:$0xff]  }
 0x622   : > { %v3154_v38 = vadd.f32 %v3119_v8, %v3118_v47  ;;  %v3120_v56 = vmul.f32 %v14113_v14, %v14113_v14  ;;  %v3121_v60 = vmul.f32 %v14116_v29, %v14116_v29 }
 0x623   : > { %v3033_v41 = vpop.xlane.xlu0 %3032 }
 0x624   : > { %v3068_v50 = vmul.f32 0.00390625, %v3033_v41  ;;  %3155 = vadd.xlane.f32.xlu0 %v3154_v38  ;;  %v3157_v26 = vadd.f32 %v3121_v60, %v3120_v56  ;;  %v10931_v38 = vld [vmem:[%s17855_s12 + $0xb4] ss:$8 sps:$4 sm:$0xff]   ;;  %v10933_v56 = vld [vmem:[%s17855_s12 + $0xb0] ss:$8 sps:$4 sm:$0xff]  }
 0x625   : > { %v3036_v59 = vpop.xlane.xlu1 %3035  ;;  %3598 = vmatprep.subr.bf16.mxu1 %v10931_v38 }
 0x626   : > { %v14139_v63 = vsub.f32 %v13933_v12, %v3068_v50  ;;  %v14142_v36 = vsub.f32 %v13936_v20, %v3068_v50  ;;  %v3069_v6 = vmul.f32 0.00390625, %v3036_v59  ;;  %3158 = vadd.xlane.f32.xlu1 %v3157_v26  ;;  %3599 = vmatpush1.bf16.msra.mxu1 %v10933_v56  ;;  %v3012_v20 = vld [vmem:[#allocation9] sm:$0x3] }
 0x627   : > { %3600 = vmatprep.subr.bf16.mxu1 %v10934_v16 }
 0x628   : > { %v14145_v47 = vsub.f32 %v13939_v52, %v3069_v6  ;;  %v14148_v8 = vsub.f32 %v13942_v9, %v3069_v6  ;;  %v3122_v13 = vmul.f32 %v14139_v63, %v14139_v63  ;;  %v3123_v44 = vmul.f32 %v14142_v36, %v14142_v36 }
 0x62a   : > { %v3160_v60 = vadd.f32 %v3123_v44, %v3122_v13  ;;  %v3124_v41 = vmul.f32 %v14145_v47, %v14145_v47  ;;  %v3125_v50 = vmul.f32 %v14148_v8, %v14148_v8  ;;  %v10936_v13 = vld [vmem:[%s17855_s12 + $0xc0] ss:$8 sps:$4 sm:$0xff]  }
 0x62b   : > { %v3039_v26 = vpop.xlane.xlu0 %3038  ;;  %3601 = vmatpush1.bf16.msra.mxu1 %v10936_v13 }
 0x62c   : > { %v3070_v7 = vmul.f32 0.00390625, %v3039_v26  ;;  %3161 = vadd.xlane.f32.xlu0 %v3160_v60  ;;  %v3163_v59 = vadd.f32 %v3125_v50, %v3124_v41  ;;  %v10937_v26 = vld [vmem:[%s17855_s12 + $0xd4] ss:$8 sps:$4 sm:$0xff]  }
 0x62d   : > { %v3042_v6 = vpop.xlane.xlu1 %3041  ;;  %3602 = vmatprep.subr.bf16.mxu1 %v10937_v26 }
 0x62e   : > { %v14171_v44 = vsub.f32 %v13949_v34, %v3070_v7  ;;  %v14174_v5 = vsub.f32 %v13952_v42, %v3070_v7  ;;  %v3071_v38 = vmul.f32 0.00390625, %v3042_v6  ;;  %3164 = vadd.xlane.f32.xlu1 %v3163_v59  ;;  %v10939_v7 = vld [vmem:[%s17855_s12 + $0xd0] ss:$8 sps:$4 sm:$0xff]  }
 0x62f   : > { %3603 = vmatpush1.bf16.msra.mxu1 %v10939_v7 }
 0x630   : > { %v14177_v56 = vsub.f32 %v13955_v46, %v3071_v38  ;;  %v14180_v60 = vsub.f32 %v13958_v24, %v3071_v38  ;;  %v3126_v41 = vmul.f32 %v14171_v44, %v14171_v44  ;;  %v3127_v50 = vmul.f32 %v14174_v5, %v14174_v5  ;;  %v10940_v24 = vld [vmem:[%s17855_s12 + $0xe4] ss:$8 sps:$4 sm:$0xff]  }
 0x631   : > { %3604 = vmatprep.subr.bf16.mxu1 %v10940_v24 }
 0x632   : > { %v3166_v59 = vadd.f32 %v3127_v50, %v3126_v41  ;;  %v3128_v16 = vmul.f32 %v14177_v56, %v14177_v56  ;;  %v3129_v6 = vmul.f32 %v14180_v60, %v14180_v60  ;;  %v10942_v41 = vld [vmem:[%s17855_s12 + $0xe0] ss:$8 sps:$4 sm:$0xff]  }
 0x633   : > { %v3045_v13 = vpop.xlane.xlu0 %3044  ;;  %3605 = vmatpush1.bf16.msra.mxu1 %v10942_v41 }
 0x634   : > { %v3072_v38 = vmul.f32 0.00390625, %v3045_v13  ;;  %3167 = vadd.xlane.f32.xlu0 %v3166_v59  ;;  %v3169_v51 = vadd.f32 %v3129_v6, %v3128_v16  ;;  %v10943_v13 = vld [vmem:[%s17855_s12 + $0xf4] ss:$8 sps:$4 sm:$0xff]  }
 0x635   : > { %v3048_v46 = vpop.xlane.xlu1 %3047  ;;  %3606 = vmatprep.subr.bf16.mxu1 %v10943_v13 }
 0x636   : > { %v14203_v50 = vsub.f32 %v13965_v19, %v3072_v38  ;;  %v14206_v42 = vsub.f32 %v13968_v23, %v3072_v38  ;;  %v3073_v26 = vmul.f32 0.00390625, %v3048_v46  ;;  %3170 = vadd.xlane.f32.xlu1 %v3169_v51  ;;  %v10945_v51 = vld [vmem:[%s17855_s12 + $0xf0] ss:$8 sps:$4 sm:$0xff]  }
 0x637   : > { %3607 = vmatpush1.bf16.msra.mxu1 %v10945_v51 }
 0x638   : > { %v14209_v7 = vsub.f32 %v13971_v2, %v3073_v26  ;;  %v14212_v59 = vsub.f32 %v13974_v0, %v3073_v26  ;;  %v3130_v16 = vmul.f32 %v14203_v50, %v14203_v50  ;;  %v3131_v6 = vmul.f32 %v14206_v42, %v14206_v42 }
 0x63a   : > { %v3172_v46 = vadd.f32 %v3131_v6, %v3130_v16  ;;  %v3132_v24 = vmul.f32 %v14209_v7, %v14209_v7  ;;  %v3133_v38 = vmul.f32 %v14212_v59, %v14212_v59 }
 0x63b   : > { %v3051_v41 = vpop.xlane.xlu0 %3050 }
 0x63c   : > { %v3074_v26 = vmul.f32 0.00390625, %v3051_v41  ;;  %3173 = vadd.xlane.f32.xlu0 %v3172_v46  ;;  %v3175_v0 = vadd.f32 %v3133_v38, %v3132_v24 }
 0x63d   : > { %v3054_v2 = vpop.xlane.xlu1 %3053 }
 0x63e   : > { %v14229_v23 = vsub.f32 %v13981_v39, %v3074_v26  ;;  %v14232_v19 = vsub.f32 %v13984_v31, %v3074_v26  ;;  %v3075_v16 = vmul.f32 0.00390625, %v3054_v2  ;;  %3176 = vadd.xlane.f32.xlu1 %v3175_v0  ;;  %v3712_v31 = vld [vmem:[#allocation2 + $0x38] sm:$0xff] }
 0x640   : > { %v14235_v6 = vsub.f32 %v13987_v22, %v3075_v16  ;;  %v14238_v34 = vsub.f32 %v13990_v33, %v3075_v16  ;;  %v3134_v13 = vmul.f32 %v14229_v23, %v14229_v23  ;;  %v3135_v51 = vmul.f32 %v14232_v19, %v14232_v19 }
 0x642   : > { %v3178_v46 = vadd.f32 %v3135_v51, %v3134_v13  ;;  %v3136_v24 = vmul.f32 %v14235_v6, %v14235_v6  ;;  %v3137_v2 = vmul.f32 %v14238_v34, %v14238_v34 }
 0x643   : > { %v3057_v0 = vpop.xlane.xlu0 %3056 }
 0x644   : > { %v3076_v38 = vmul.f32 0.00390625, %v3057_v0  ;;  %3179 = vadd.xlane.f32.xlu0 %v3178_v46  ;;  %v3181_v41 = vadd.f32 %v3137_v2, %v3136_v24 }
 0x645   : > { %v3060_v26 = vpop.xlane.xlu1 %3059 }
 0x646   : > { %v14249_v16 = vsub.f32 %v13997_v62, %v3076_v38  ;;  %v14252_v33 = vsub.f32 %v14000_v45, %v3076_v38  ;;  %v3077_v22 = vmul.f32 0.00390625, %v3060_v26  ;;  %3182 = vadd.xlane.f32.xlu1 %v3181_v41  ;;  %v3721_v26 = vld [vmem:[#allocation2 + $0x80] sm:$0xff]  ;;  %v3708_v45 = vld [vmem:[#allocation2 + $0x18] sm:$0xff]  ;;  %v3726_v62 = vld [vmem:[#allocation2 + $0xa8] sm:$0xff] }
 0x647   : > { %10105 = vmatprep.subr.bf16.mxu1 %v3721_v26 }
 0x648   : > { %v14255_v13 = vsub.f32 %v14003_v25, %v3077_v22  ;;  %v14258_v51 = vsub.f32 %v14006_v40, %v3077_v22  ;;  %v3138_v0 = vmul.f32 %v14249_v16, %v14249_v16  ;;  %v3139_v46 = vmul.f32 %v14252_v33, %v14252_v33  ;;  %v3722_v25 = vld [vmem:[#allocation2 + $0x88] sm:$0xff]  ;;  %v3724_v40 = vld [vmem:[#allocation2 + $0x98] sm:$0xff] }
 0x649   : > { %10201 = vmatprep.subr.bf16.mxu0 %v3722_v25  ;;  %v3706_v22 = vld [vmem:[#allocation2 + $0x8] sm:$0xff]  ;;  %v3716_v25 = vld [vmem:[#allocation2 + $0x58] sm:$0xff] }
 0x64a   : > { %v3184_v24 = vadd.f32 %v3139_v46, %v3138_v0  ;;  %v3140_v2 = vmul.f32 %v14255_v13, %v14255_v13  ;;  %v3141_v38 = vmul.f32 %v14258_v51, %v14258_v51  ;;  %10202 = vmatpush3.bf16.xpose.msra.mxu0 %v3706_v22  ;;  %v3710_v0 = vld [vmem:[#allocation2 + $0x28] sm:$0xff]  ;;  %v3728_v46 = vld [vmem:[#allocation2 + $0xb8] sm:$0xff] }
 0x64b   : > { %10203 = vmatprep.subr.bf16.mxu0 %v3724_v40  ;;  %v3718_v22 = vld [vmem:[#allocation2 + $0x68] sm:$0xff] }
 0x64c   : > { %3185 = vadd.xlane.f32.xlu0 %v3184_v24  ;;  %v3187_v41 = vadd.f32 %v3141_v38, %v3140_v2  ;;  %v3730_v24 = vld [vmem:[#allocation2 + $0xc8] sm:$0xff]  ;;  %v3732_v38 = vld [vmem:[#allocation2 + $0xd8] sm:$0xff] }
 0x64d   : > { %v3714_v2 = vld [vmem:[#allocation2 + $0x48] sm:$0xff] }
 0x64e   : > { %3188 = vadd.xlane.f32.xlu1 %v3187_v41  ;;  %v3734_v41 = vld [vmem:[#allocation2 + $0xe8] sm:$0xff] }
 0x652   : > { %10204 = vmatpush3.bf16.xpose.msra.mxu0 %v3708_v45 }
 0x653   : > { %10205 = vmatprep.subr.bf16.mxu0 %v3726_v62 }
 0x65a   : > { %10206 = vmatpush3.bf16.xpose.msra.mxu0 %v3710_v0 }
 0x65b   : > { %10207 = vmatprep.subr.bf16.mxu0 %v3728_v46 }
 0x662   : > { %10208 = vmatpush3.bf16.xpose.msra.mxu0 %v3712_v31 }
 0x663   : > { %10209 = vmatprep.subr.bf16.mxu0 %v3730_v24 }
 0x66a   : > { %10210 = vmatpush3.bf16.xpose.msra.mxu0 %v3714_v2  ;;  %v3011_v2 = vld [vmem:[#allocation8] sm:$0x3] }
 0x66b   : > { %10211 = vmatprep.subr.bf16.mxu0 %v3732_v38 }
 0x672   : > { %10212 = vmatpush3.bf16.xpose.msra.mxu0 %v3716_v25 }
 0x673   : > { %10213 = vmatprep.subr.bf16.mxu0 %v3734_v41  ;;  %v14269_v41 = vrot.slane %v3011_v2, %v13870_v10 }
 0x67a   : > { %10214 = vmatpush3.bf16.xpose.msra.mxu0 %v3718_v22 }
 0x6a1   : > { %v3144_v40 = vpop.xlane.xlu0 %3143 }
 0x6a2   : > { %v3190_v26 = vmul.f32 0.00390625, %v3144_v40  ;;  %v14272_v40 = vrot.slane %v3011_v2, %v13876_v58 }
 0x6a4   : > { %v3206_v45 = vadd.f32 1e-05, %v3190_v26 }
 0x6a5   : > { %v3147_v62 = vpop.xlane.xlu1 %3146 }
 0x6a6   : > { %11202 = vrsqrt.f32 %v3206_v45  ;;  %v3191_v0 = vmul.f32 0.00390625, %v3147_v62 }
 0x6a8   : > { %v3207_v46 = vadd.f32 1e-05, %v3191_v0  ;;  %v14277_v0 = vrot.slane %v3012_v20, %v13870_v10 }
 0x6a9   : > { %v3150_v39 = vpop.xlane.xlu0 %3149 }
 0x6aa   : > { %11204 = vrsqrt.f32 %v3207_v46  ;;  %v3192_v31 = vmul.f32 0.00390625, %v3150_v39 }
 0x6ac   : > { %v3208_v24 = vadd.f32 1e-05, %v3192_v31 }
 0x6ad   : > { %v3153_v9 = vpop.xlane.xlu1 %3152 }
 0x6ae   : > { %11206 = vrsqrt.f32 %v3208_v24  ;;  %v3193_v38 = vmul.f32 0.00390625, %v3153_v9  ;;  %v14280_v9 = vrot.slane %v3012_v20, %v13876_v58 }
 0x6b0   : > { %v11203_v52 = vpop.eup %11202  ;;  %v3209_v25 = vadd.f32 1e-05, %v3193_v38 }
 0x6b1   : > { %v3156_v26 = vpop.xlane.xlu0 %3155  ;;  %v3239_v45 = vmul.f32 %v11203_v52, %v14070_v54  ;;  %v3238_v62 = vmul.f32 %v11203_v52, %v14067_v17 }
 0x6b2   : > { %11208 = vrsqrt.f32 %v3209_v25  ;;  %v3194_v39 = vmul.f32 0.00390625, %v3156_v26 }
 0x6b3   : > { %v3159_v22 = vpop.xlane.xlu1 %3158  ;;  %v3282_v2 = vmul.f32 %v14272_v40, %v3239_v45  ;;  %v3281_v38 = vmul.f32 %v14269_v41, %v3238_v62 }
 0x6b4   : > { %v11205_v46 = vpop.eup %11204  ;;  %v3210_v31 = vadd.f32 1e-05, %v3194_v39  ;;  %v3195_v24 = vmul.f32 0.00390625, %v3159_v22 }
 0x6b5   : > { %v3241_v54 = vmul.f32 %v11205_v46, %v14080_v28  ;;  %v3240_v52 = vmul.f32 %v11205_v46, %v14077_v3  ;;  %v3325_v20 = vadd.f32 %v14280_v9, %v3282_v2  ;;  %v3324_v39 = vadd.f32 %v14277_v0, %v3281_v38 }
 0x6b6   : > { %11210 = vrsqrt.f32 %v3210_v31  ;;  %v3211_v17 = vadd.f32 1e-05, %v3195_v24 }
 0x6b7   : > { %v3284_v25 = vmul.f32 %v14272_v40, %v3241_v54  ;;  %v3283_v26 = vmul.f32 %v14269_v41, %v3240_v52 }
 0x6b8   : > { %v11207_v12 = vpop.eup %11206  ;;  %11212 = vrsqrt.f32 %v3211_v17 }
 0x6b9   : > { %v3162_v22 = vpop.xlane.xlu0 %3161  ;;  %v3327_v45 = vadd.f32 %v14280_v9, %v3284_v25  ;;  %v3326_v62 = vadd.f32 %v14277_v0, %v3283_v26  ;;  %v3243_v28 = vmul.f32 %v11207_v12, %v14090_v18  ;;  %v3242_v3 = vmul.f32 %v11207_v12, %v14087_v53  ;;  %v3723_v18 = vld [vmem:[#allocation2 + $0x90] sm:$0xff] }
 0x6ba   : > { %v3196_v46 = vmul.f32 0.00390625, %v3162_v22 }
 0x6bb   : > { %v3165_v31 = vpop.xlane.xlu1 %3164  ;;  %v3357_v24 = vpack.c.bf16 %v3327_v45, %v3325_v20  ;;  %v3356_v54 = vpack.c.bf16 %v3326_v62, %v3324_v39  ;;  %v3286_v2 = vmul.f32 %v14272_v40, %v3243_v28  ;;  %v3285_v26 = vmul.f32 %v14269_v41, %v3242_v3 }
 0x6bc   : > { %v11209_v52 = vpop.eup %11208  ;;  %v3212_v43 = vadd.f32 1e-05, %v3196_v46  ;;  %v3197_v17 = vmul.f32 0.00390625, %v3165_v31 }
 0x6bd   : > { %3608 = vmatprep.mubr.bf16.mxu1 %v3357_v24  ;;  %v3245_v38 = vmul.f32 %v11209_v52, %v14100_v35  ;;  %v3244_v25 = vmul.f32 %v11209_v52, %v14097_v30  ;;  %v3329_v22 = vadd.f32 %v14280_v9, %v3286_v2  ;;  %v3328_v30 = vadd.f32 %v14277_v0, %v3285_v26 }
 0x6be   : > { %11214 = vrsqrt.f32 %v3212_v43  ;;  %v3213_v12 = vadd.f32 1e-05, %v3197_v17  ;;  %3609 = vmatmul.mubr.bf16.vlgmr.msra.gmra.mrb[0].mxu1 %v3356_v54 }
 0x6bf   : > { %v3288_v53 = vmul.f32 %v14272_v40, %v3245_v38  ;;  %v3287_v20 = vmul.f32 %v14269_v41, %v3244_v25  ;;  %10106 = vmatpush3.bf16.xpose.msra.mxu1 %v3705_v48  ;;  %v3707_v25 = vld [vmem:[#allocation2 + $0x10] sm:$0xff] }
 0x6c0   : > { %v11211_v39 = vpop.eup %11210  ;;  %11216 = vrsqrt.f32 %v3213_v12  ;;  %10107 = vmatprep.subr.bf16.mxu1 %v3723_v18 }
 0x6c1   : > { %v3168_v45 = vpop.xlane.xlu0 %3167  ;;  %v3331_v35 = vadd.f32 %v14280_v9, %v3288_v53  ;;  %v3330_v62 = vadd.f32 %v14277_v0, %v3287_v20  ;;  %v3247_v43 = vmul.f32 %v11211_v39, %v14110_v1  ;;  %v3246_v46 = vmul.f32 %v11211_v39, %v14107_v61  ;;  %v3725_v1 = vld [vmem:[#allocation2 + $0xa0] sm:$0xff] }
 0x6c2   : > { %v11213_v28 = vpop.eup %11212  ;;  %v3198_v3 = vmul.f32 0.00390625, %v3168_v45 }
 0x6c3   : > { %v3171_v31 = vpop.xlane.xlu1 %3170  ;;  %v3359_v48 = vpack.c.bf16 %v3331_v35, %v3329_v22  ;;  %v3358_v24 = vpack.c.bf16 %v3330_v62, %v3328_v30  ;;  %v3249_v54 = vmul.f32 %v11213_v28, %v14116_v29  ;;  %v3290_v52 = vmul.f32 %v14272_v40, %v3247_v43 }
 0x6c4   : > { %v3214_v17 = vadd.f32 1e-05, %v3198_v3  ;;  %v3199_v2 = vmul.f32 0.00390625, %v3171_v31  ;;  %v3248_v38 = vmul.f32 %v11213_v28, %v14113_v14  ;;  %v3289_v61 = vmul.f32 %v14269_v41, %v3246_v46 }
 0x6c5   : > { %3618 = vmatprep.mubr.bf16.mxu1 %v3359_v48  ;;  %v3292_v26 = vmul.f32 %v14272_v40, %v3249_v54  ;;  %v3333_v29 = vadd.f32 %v14280_v9, %v3290_v52  ;;  %v3709_v52 = vld [vmem:[#allocation2 + $0x20] sm:$0xff] }
 0x6c6   : > { %11218 = vrsqrt.f32 %v3214_v17  ;;  %v3215_v18 = vadd.f32 1e-05, %v3199_v2  ;;  %3619 = vmatmul.mubr.bf16.gmra.mrb[4].mxu1 %v3358_v24  ;;  %v3291_v12 = vmul.f32 %v14269_v41, %v3248_v38  ;;  %v3332_v62 = vadd.f32 %v14277_v0, %v3289_v61  ;;  %v3727_v2 = vld [vmem:[#allocation2 + $0xb0] sm:$0xff] }
 0x6c7   : > { %v3335_v53 = vadd.f32 %v14280_v9, %v3292_v26  ;;  %10108 = vmatpush3.bf16.xpose.msra.mxu1 %v3707_v25 }
 0x6c8   : > { %v11215_v20 = vpop.eup %11214  ;;  %11220 = vrsqrt.f32 %v3215_v18  ;;  %v3334_v14 = vadd.f32 %v14277_v0, %v3291_v12  ;;  %10109 = vmatprep.subr.bf16.mxu1 %v3725_v1 }
 0x6c9   : > { %v3174_v39 = vpop.xlane.xlu0 %3173  ;;  %v3361_v22 = vpack.c.bf16 %v3335_v53, %v3333_v29  ;;  %v3251_v45 = vmul.f32 %v11215_v20, %v14142_v36  ;;  %v3250_v43 = vmul.f32 %v11215_v20, %v14139_v63 }
 0x6ca   : > { %v11217_v35 = vpop.eup %11216  ;;  %v3200_v30 = vmul.f32 0.00390625, %v3174_v39  ;;  %v3360_v54 = vpack.c.bf16 %v3334_v14, %v3332_v62 }
 0x6cb   : > { %v3177_v28 = vpop.xlane.xlu1 %3176  ;;  %3628 = vmatprep.mubr.bf16.mxu1 %v3361_v22  ;;  %v3253_v3 = vmul.f32 %v11217_v35, %v14148_v8  ;;  %v3294_v46 = vmul.f32 %v14272_v40, %v3251_v45  ;;  %v3252_v31 = vmul.f32 %v11217_v35, %v14145_v47  ;;  %v3293_v63 = vmul.f32 %v14269_v41, %v3250_v43  ;;  %v3711_v43 = vld [vmem:[#allocation2 + $0x30] sm:$0xff] }
 0x6cc   : > { %v3216_v48 = vadd.f32 1e-05, %v3200_v30  ;;  %v3201_v24 = vmul.f32 0.00390625, %v3177_v28 }
 0x6cd   : > { %v3296_v36 = vmul.f32 %v14272_v40, %v3253_v3  ;;  %v3295_v17 = vmul.f32 %v14269_v41, %v3252_v31  ;;  %v3337_v8 = vadd.f32 %v14280_v9, %v3294_v46  ;;  %v3336_v53 = vadd.f32 %v14277_v0, %v3293_v63  ;;  %v3729_v3 = vld [vmem:[#allocation2 + $0xc0] sm:$0xff] }
 0x6ce   : > { %11222 = vrsqrt.f32 %v3216_v48  ;;  %v3217_v38 = vadd.f32 1e-05, %v3201_v24  ;;  %3629 = vmatmul.mubr.bf16.gmra.mrb[8].mxu1 %v3360_v54 }
 0x6cf   : > { %v3339_v25 = vadd.f32 %v14280_v9, %v3296_v36  ;;  %10110 = vmatpush3.bf16.xpose.msra.mxu1 %v3709_v52  ;;  %v3338_v26 = vadd.f32 %v14277_v0, %v3295_v17 }
 0x6d0   : > { %v11219_v47 = vpop.eup %11218  ;;  %11224 = vrsqrt.f32 %v3217_v38  ;;  %10111 = vmatprep.subr.bf16.mxu1 %v3727_v2 }
 0x6d1   : > { %v3180_v1 = vpop.xlane.xlu0 %3179  ;;  %v3363_v18 = vpack.c.bf16 %v3339_v25, %v3337_v8  ;;  %v3255_v61 = vmul.f32 %v11219_v47, %v14174_v5  ;;  %v3254_v20 = vmul.f32 %v11219_v47, %v14171_v44  ;;  %v3362_v62 = vpack.c.bf16 %v3338_v26, %v3336_v53 }
 0x6d2   : > { %v11221_v12 = vpop.eup %11220  ;;  %v3202_v29 = vmul.f32 0.00390625, %v3180_v1 }
 0x6d3   : > { %v3183_v14 = vpop.xlane.xlu1 %3182  ;;  %3638 = vmatprep.mubr.bf16.mxu1 %v3363_v18  ;;  %v3257_v39 = vmul.f32 %v11221_v12, %v14180_v60  ;;  %v3298_v22 = vmul.f32 %v14272_v40, %v3255_v61  ;;  %v3256_v45 = vmul.f32 %v11221_v12, %v14177_v56  ;;  %v3297_v44 = vmul.f32 %v14269_v41, %v3254_v20  ;;  %v3713_v61 = vld [vmem:[#allocation2 + $0x40] sm:$0xff] }
 0x6d4   : > { %v3218_v35 = vadd.f32 1e-05, %v3202_v29  ;;  %v3203_v30 = vmul.f32 0.00390625, %v3183_v14  ;;  %v3731_v29 = vld [vmem:[#allocation2 + $0xd0] sm:$0xff] }
 0x6d5   : > { %v3300_v5 = vmul.f32 %v14272_v40, %v3257_v39  ;;  %v3299_v28 = vmul.f32 %v14269_v41, %v3256_v45  ;;  %v3341_v60 = vadd.f32 %v14280_v9, %v3298_v22  ;;  %v3340_v2 = vadd.f32 %v14277_v0, %v3297_v44 }
 0x6d6   : > { %11226 = vrsqrt.f32 %v3218_v35  ;;  %v3219_v46 = vadd.f32 1e-05, %v3203_v30  ;;  %3639 = vmatmul.mubr.bf16.gmra.mrb[12].mxu1 %v3362_v62 }
 0x6d7   : > { %v3343_v31 = vadd.f32 %v14280_v9, %v3300_v5  ;;  %10112 = vmatpush3.bf16.xpose.msra.mxu1 %v3711_v43  ;;  %v3342_v48 = vadd.f32 %v14277_v0, %v3299_v28 }
 0x6d8   : > { %v11223_v56 = vpop.eup %11222  ;;  %11228 = vrsqrt.f32 %v3219_v46  ;;  %10113 = vmatprep.subr.bf16.mxu1 %v3729_v3  ;;  %v3715_v3 = vld [vmem:[#allocation2 + $0x50] sm:$0xff] }
 0x6d9   : > { %v3186_v24 = vpop.xlane.xlu0 %3185  ;;  %v3365_v54 = vpack.c.bf16 %v3343_v31, %v3341_v60  ;;  %v3259_v52 = vmul.f32 %v11223_v56, %v14206_v42  ;;  %v3258_v38 = vmul.f32 %v11223_v56, %v14203_v50  ;;  %v3364_v18 = vpack.c.bf16 %v3342_v48, %v3340_v2  ;;  %v3733_v60 = vld [vmem:[#allocation2 + $0xe0] sm:$0xff] }
 0x6da   : > { %v11225_v36 = vpop.eup %11224  ;;  %v3204_v17 = vmul.f32 0.00390625, %v3186_v24 }
 0x6db   : > { %v3189_v63 = vpop.xlane.xlu1 %3188  ;;  %3648 = vmatprep.mubr.bf16.mxu1 %v3365_v54  ;;  %v3261_v8 = vmul.f32 %v11225_v36, %v14212_v59  ;;  %v3302_v25 = vmul.f32 %v14272_v40, %v3259_v52  ;;  %v3260_v47 = vmul.f32 %v11225_v36, %v14209_v7  ;;  %v3301_v50 = vmul.f32 %v14269_v41, %v3258_v38 }
 0x6dc   : > { %v3220_v26 = vadd.f32 1e-05, %v3204_v17  ;;  %v3205_v1 = vmul.f32 0.00390625, %v3189_v63  ;;  %v3717_v63 = vld [vmem:[#allocation2 + $0x60] sm:$0xff] }
 0x6dd   : > { %v3304_v42 = vmul.f32 %v14272_v40, %v3261_v8  ;;  %v3303_v12 = vmul.f32 %v14269_v41, %v3260_v47  ;;  %v3345_v59 = vadd.f32 %v14280_v9, %v3302_v25  ;;  %v3344_v35 = vadd.f32 %v14277_v0, %v3301_v50  ;;  %v3735_v47 = vld [vmem:[#allocation2 + $0xf0] sm:$0xff] }
 0x6de   : > { %11230 = vrsqrt.f32 %v3220_v26  ;;  %v3221_v53 = vadd.f32 1e-05, %v3205_v1  ;;  %3649 = vmatmul.mubr.bf16.gmra.mrb[16].mxu1 %v3364_v18 }
 0x6df   : > { %v3347_v20 = vadd.f32 %v14280_v9, %v3304_v42  ;;  %10114 = vmatpush3.bf16.xpose.msra.mxu1 %v3713_v61  ;;  %v3346_v14 = vadd.f32 %v14277_v0, %v3303_v12  ;;  %v3736_v61 = vld [vmem:[#allocation2 + $0xf8] sm:$0xff] }
 0x6e0   : > { %v11227_v7 = vpop.eup %11226  ;;  %11232 = vrsqrt.f32 %v3221_v53  ;;  %10115 = vmatprep.subr.bf16.mxu1 %v3731_v29  ;;  %10215 = vmatprep.subr.bf16.mxu0 %v3736_v61  ;;  %v3720_v42 = vld [vmem:[#allocation2 + $0x78] sm:$0xff] }
 0x6e1   : > { %v3367_v39 = vpack.c.bf16 %v3347_v20, %v3345_v59  ;;  %v3263_v22 = vmul.f32 %v11227_v7, %v14232_v19  ;;  %v3262_v30 = vmul.f32 %v11227_v7, %v14229_v23  ;;  %v3366_v28 = vpack.c.bf16 %v3346_v14, %v3344_v35  ;;  %10216 = vmatpush3.bf16.xpose.msra.mxu0 %v3720_v42 }
 0x6e2   : > { %v11229_v45 = vpop.eup %11228 }
 0x6e3   : > { %3658 = vmatprep.mubr.bf16.mxu1 %v3367_v39  ;;  %v3265_v62 = vmul.f32 %v11229_v45, %v14238_v34  ;;  %v3306_v43 = vmul.f32 %v14272_v40, %v3263_v22  ;;  %v3264_v5 = vmul.f32 %v11229_v45, %v14235_v6  ;;  %v3305_v19 = vmul.f32 %v14269_v41, %v3262_v30 }
 0x6e5   : > { %v3308_v46 = vmul.f32 %v14272_v40, %v3265_v62  ;;  %v3307_v44 = vmul.f32 %v14269_v41, %v3264_v5  ;;  %v3349_v31 = vadd.f32 %v14280_v9, %v3306_v43  ;;  %v3348_v54 = vadd.f32 %v14277_v0, %v3305_v19 }
 0x6e6   : > { %3659 = vmatmul.mubr.bf16.gmra.mrb[20].mxu1 %v3366_v28 }
 0x6e7   : > { %v3351_v23 = vadd.f32 %v14280_v9, %v3308_v46  ;;  %10116 = vmatpush3.bf16.xpose.msra.mxu1 %v3715_v3  ;;  %v3350_v56 = vadd.f32 %v14277_v0, %v3307_v44 }
 0x6e8   : > { %v11231_v34 = vpop.eup %11230  ;;  %10117 = vmatprep.subr.bf16.mxu1 %v3733_v60 }
 0x6e9   : > { %v3369_v6 = vpack.c.bf16 %v3351_v23, %v3349_v31  ;;  %v3267_v48 = vmul.f32 %v11231_v34, %v14252_v33  ;;  %v3266_v52 = vmul.f32 %v11231_v34, %v14249_v16  ;;  %v3368_v38 = vpack.c.bf16 %v3350_v56, %v3348_v54 }
 0x6ea   : > { %v11233_v24 = vpop.eup %11232 }
 0x6eb   : > { %3668 = vmatprep.mubr.bf16.mxu1 %v3369_v6  ;;  %v3269_v36 = vmul.f32 %v11233_v24, %v14258_v51  ;;  %v3310_v17 = vmul.f32 %v14272_v40, %v3267_v48  ;;  %v3268_v2 = vmul.f32 %v11233_v24, %v14255_v13  ;;  %v3309_v33 = vmul.f32 %v14269_v41, %v3266_v52 }
 0x6ed   : > { %v3312_v8 = vmul.f32 %v14272_v40, %v3269_v36  ;;  %v3311_v25 = vmul.f32 %v14269_v41, %v3268_v2  ;;  %v3353_v26 = vadd.f32 %v14280_v9, %v3310_v17  ;;  %v3352_v13 = vadd.f32 %v14277_v0, %v3309_v33  ;;  %v3719_v40 = vld [vmem:[#allocation2 + $0x70] sm:$0xff]  ;;  %v3404_v41 = vld [vmem:[#allocation14] sm:$0x3] }
 0x6ee   : > { %3669 = vmatmul.mubr.bf16.gmra.mrb[24].mxu1 %v3368_v38  ;;  %v14377_v12 = vrot.slane %v3404_v41, %v13870_v10  ;;  %v14380_v29 = vrot.slane %v3404_v41, %v13876_v58 }
 0x6ef   : > { %v3355_v16 = vadd.f32 %v14280_v9, %v3312_v8  ;;  %10118 = vmatpush3.bf16.xpose.msra.mxu1 %v3717_v63  ;;  %v3354_v51 = vadd.f32 %v14277_v0, %v3311_v25 }
 0x6f0   : > { %10119 = vmatprep.subr.bf16.mxu1 %v3735_v47 }
 0x6f1   : > { %v3371_v1 = vpack.c.bf16 %v3355_v16, %v3353_v26  ;;  %v3370_v18 = vpack.c.bf16 %v3354_v51, %v3352_v13 }
 0x6f3   : > { %3678 = vmatprep.mubr.bf16.mxu1 %v3371_v1 }
 0x6f6   : > { %3679 = vmatmul.mubr.bf16.gmra.mrb[28].mxu1 %v3370_v18 }
 0x6f7   : > { %10120 = vmatpush3.bf16.xpose.msra.mxu1 %v3719_v40 }
 0x791   : > { %v3610_v9 = vpop.f32.mrb[0].mxu1 }
 0x792   : > { %v3612_v53 = vpop.f32.mrb[1].mxu1  ;;  %v3611_v0 = vadd.f32 %v3610_v9, %v14377_v12 }
 0x793   : > { %v3614_v50 = vpop.f32.mrb[2].mxu1  ;;  %v3613_v7 = vadd.f32 %v3612_v53, %v14380_v29 }
 0x794   : > { %v3615_v59 = vadd.f32 %v3614_v50, %v14377_v12  ;;  %v3616_v20 = vpop.f32.mrb[3].mxu1 }
 0x795   : > { %v3617_v14 = vadd.f32 %v3616_v20, %v14380_v29 }
 0x796   : > { %v3689_v39 = vpack.c.bf16 %v3615_v59, %v3611_v0 }
 0x797   : > { %v3690_v22 = vpack.c.bf16 %v3617_v14, %v3613_v7 }
 0x798   : > { %10121 = vmatprep.mubr.bf16.mxu1 %v3689_v39 }
 0x799   : > { %v3620_v45 = vpop.f32.mrb[4].mxu1  ;;  %10122 = vmatmul.mubr.bf16.vlgmr.msra.gmra.mrb[32].mxu1 %v3689_v39  ;;  %10217 = vmatprep.mubr.bf16.mxu0 %v3690_v22 }
 0x79a   : > { %v3622_v35 = vpop.f32.mrb[5].mxu1  ;;  %10218 = vmatmul.mubr.bf16.vlgmr.msra.gmra.mrb[32].mxu0 %v3690_v22  ;;  %v3621_v62 = vadd.f32 %v3620_v45, %v14377_v12 }
 0x79b   : > { %v3624_v30 = vpop.f32.mrb[6].mxu1  ;;  %v3623_v28 = vadd.f32 %v3622_v35, %v14380_v29 }
 0x79c   : > { %v3625_v43 = vadd.f32 %v3624_v30, %v14377_v12  ;;  %v3626_v5 = vpop.f32.mrb[7].mxu1 }
 0x79d   : > { %v3627_v3 = vadd.f32 %v3626_v5, %v14380_v29 }
 0x79e   : > { %v3691_v46 = vpack.c.bf16 %v3625_v43, %v3621_v62 }
 0x79f   : > { %v3692_v44 = vpack.c.bf16 %v3627_v3, %v3623_v28 }
 0x7a0   : > { %10123 = vmatprep.mubr.bf16.mxu1 %v3691_v46 }
 0x7a1   : > { %v3630_v60 = vpop.f32.mrb[8].mxu1  ;;  %10124 = vmatmul.mubr.bf16.gmra.mrb[36].mxu1 %v3691_v46  ;;  %10219 = vmatprep.mubr.bf16.mxu0 %v3692_v44 }
 0x7a2   : > { %v3632_v19 = vpop.f32.mrb[9].mxu1  ;;  %10220 = vmatmul.mubr.bf16.gmra.mrb[36].mxu0 %v3692_v44  ;;  %v3631_v23 = vadd.f32 %v3630_v60, %v14377_v12 }
 0x7a3   : > { %v3634_v31 = vpop.f32.mrb[10].mxu1  ;;  %v3633_v6 = vadd.f32 %v3632_v19, %v14380_v29 }
 0x7a4   : > { %v3635_v34 = vadd.f32 %v3634_v31, %v14377_v12  ;;  %v3636_v56 = vpop.f32.mrb[11].mxu1 }
 0x7a5   : > { %v3637_v48 = vadd.f32 %v3636_v56, %v14380_v29 }
 0x7a6   : > { %v3693_v24 = vpack.c.bf16 %v3635_v34, %v3631_v23 }
 0x7a7   : > { %v3694_v54 = vpack.c.bf16 %v3637_v48, %v3633_v6 }
 0x7a8   : > { %10125 = vmatprep.mubr.bf16.mxu1 %v3693_v24 }
 0x7a9   : > { %v3640_v52 = vpop.f32.mrb[12].mxu1  ;;  %10126 = vmatmul.mubr.bf16.gmra.mrb[40].mxu1 %v3693_v24  ;;  %10221 = vmatprep.mubr.bf16.mxu0 %v3694_v54 }
 0x7aa   : > { %v3642_v36 = vpop.f32.mrb[13].mxu1  ;;  %10222 = vmatmul.mubr.bf16.gmra.mrb[40].mxu0 %v3694_v54  ;;  %v3641_v2 = vadd.f32 %v3640_v52, %v14377_v12  ;;  %v17856_v52 = vmov 0  }
 0x7ab   : > { %v3644_v17 = vpop.f32.mrb[14].mxu1  ;;  %v3643_v8 = vadd.f32 %v3642_v36, %v14380_v29 }
 0x7ac   : > { %v3645_v38 = vadd.f32 %v3644_v17, %v14377_v12  ;;  %v3646_v63 = vpop.f32.mrb[15].mxu1 }
 0x7ad   : > { %v3647_v25 = vadd.f32 %v3646_v63, %v14380_v29 }
 0x7ae   : > { %v3695_v47 = vpack.c.bf16 %v3645_v38, %v3641_v2 }
 0x7af   : > { %v3696_v33 = vpack.c.bf16 %v3647_v25, %v3643_v8 }
 0x7b0   : > { %10127 = vmatprep.mubr.bf16.mxu1 %v3695_v47 }
 0x7b1   : > { %v3650_v26 = vpop.f32.mrb[16].mxu1  ;;  %10128 = vmatmul.mubr.bf16.gmra.mrb[44].mxu1 %v3695_v47  ;;  %10223 = vmatprep.mubr.bf16.mxu0 %v3696_v33 }
 0x7b2   : > { %v3652_v16 = vpop.f32.mrb[17].mxu1  ;;  %10224 = vmatmul.mubr.bf16.gmra.mrb[44].mxu0 %v3696_v33  ;;  %v3651_v1 = vadd.f32 %v3650_v26, %v14377_v12 }
 0x7b3   : > { %v3654_v51 = vpop.f32.mrb[18].mxu1  ;;  %v3653_v40 = vadd.f32 %v3652_v16, %v14380_v29 }
 0x7b4   : > { %v3655_v13 = vadd.f32 %v3654_v51, %v14377_v12  ;;  %v3656_v18 = vpop.f32.mrb[19].mxu1 }
 0x7b5   : > { %v3657_v61 = vadd.f32 %v3656_v18, %v14380_v29 }
 0x7b6   : > { %v3697_v42 = vpack.c.bf16 %v3655_v13, %v3651_v1 }
 0x7b7   : > { %v3698_v41 = vpack.c.bf16 %v3657_v61, %v3653_v40 }
 0x7b8   : > { %10129 = vmatprep.mubr.bf16.mxu1 %v3697_v42 }
 0x7b9   : > { %v3660_v9 = vpop.f32.mrb[20].mxu1  ;;  %10130 = vmatmul.mubr.bf16.gmra.mrb[48].mxu1 %v3697_v42  ;;  %10225 = vmatprep.mubr.bf16.mxu0 %v3698_v41 }
 0x7ba   : > { %v3662_v53 = vpop.f32.mrb[21].mxu1  ;;  %10226 = vmatmul.mubr.bf16.gmra.mrb[48].mxu0 %v3698_v41  ;;  %v3661_v0 = vadd.f32 %v3660_v9, %v14377_v12 }
 0x7bb   : > { %v3664_v50 = vpop.f32.mrb[22].mxu1  ;;  %v3663_v7 = vadd.f32 %v3662_v53, %v14380_v29 }
 0x7bc   : > { %v3665_v59 = vadd.f32 %v3664_v50, %v14377_v12  ;;  %v3666_v20 = vpop.f32.mrb[23].mxu1 }
 0x7bd   : > { %v3667_v14 = vadd.f32 %v3666_v20, %v14380_v29 }
 0x7be   : > { %v3699_v39 = vpack.c.bf16 %v3665_v59, %v3661_v0 }
 0x7bf   : > { %v3700_v22 = vpack.c.bf16 %v3667_v14, %v3663_v7 }
 0x7c0   : > { %10131 = vmatprep.mubr.bf16.mxu1 %v3699_v39 }
 0x7c1   : > { %v3670_v45 = vpop.f32.mrb[24].mxu1  ;;  %10132 = vmatmul.mubr.bf16.gmra.mrb[52].mxu1 %v3699_v39  ;;  %10227 = vmatprep.mubr.bf16.mxu0 %v3700_v22 }
 0x7c2   : > { %v3672_v35 = vpop.f32.mrb[25].mxu1  ;;  %10228 = vmatmul.mubr.bf16.gmra.mrb[52].mxu0 %v3700_v22  ;;  %v3671_v62 = vadd.f32 %v3670_v45, %v14377_v12 }
 0x7c3   : > { %v3674_v30 = vpop.f32.mrb[26].mxu1  ;;  %v3673_v28 = vadd.f32 %v3672_v35, %v14380_v29 }
 0x7c4   : > { %v3675_v43 = vadd.f32 %v3674_v30, %v14377_v12  ;;  %v3676_v5 = vpop.f32.mrb[27].mxu1 }
 0x7c5   : > { %v3677_v3 = vadd.f32 %v3676_v5, %v14380_v29 }
 0x7c6   : > { %v3701_v46 = vpack.c.bf16 %v3675_v43, %v3671_v62 }
 0x7c7   : > { %v3702_v44 = vpack.c.bf16 %v3677_v3, %v3673_v28 }
 0x7c8   : > { %10133 = vmatprep.mubr.bf16.mxu1 %v3701_v46 }
 0x7c9   : > { %v3680_v60 = vpop.f32.mrb[28].mxu1  ;;  %10134 = vmatmul.mubr.bf16.gmra.mrb[56].mxu1 %v3701_v46  ;;  %10229 = vmatprep.mubr.bf16.mxu0 %v3702_v44 }
 0x7ca   : > { %v3682_v19 = vpop.f32.mrb[29].mxu1  ;;  %10230 = vmatmul.mubr.bf16.gmra.mrb[56].mxu0 %v3702_v44  ;;  %v3681_v23 = vadd.f32 %v3680_v60, %v14377_v12 }
 0x7cb   : > { %v3684_v31 = vpop.f32.mrb[30].mxu1  ;;  %v3683_v6 = vadd.f32 %v3682_v19, %v14380_v29 }
 0x7cc   : > { %v3685_v34 = vadd.f32 %v3684_v31, %v14377_v12  ;;  %v3686_v56 = vpop.f32.mrb[31].mxu1 }
 0x7cd   : > { %v3687_v48 = vadd.f32 %v3686_v56, %v14380_v29 }
 0x7ce   : > { %v3703_v24 = vpack.c.bf16 %v3685_v34, %v3681_v23 }
 0x7cf   : > { %v3704_v54 = vpack.c.bf16 %v3687_v48, %v3683_v6 }
 0x7d0   : > { %10135 = vmatprep.mubr.bf16.mxu1 %v3703_v24 }
 0x7d1   : > { %10136 = vmatmul.mubr.bf16.gmra.mrb[60].mxu1 %v3703_v24  ;;  %10231 = vmatprep.mubr.bf16.mxu0 %v3704_v54 }
 0x7d2   : > { %10232 = vmatmul.mubr.bf16.gmra.mrb[60].mxu0 %v3704_v54 }
 0x7d3   : > { %4861 = vmatprep.mubr.bf16.mxu0 %v17856_v52 }
 0x86c   : > { %v14415_v36 = vpop.f32.mrb[32].mxu1 }
 0x86d   : > { %v14417_v17 = vpop.f32.mrb[33].mxu1  ;;  %v14419_v2 = vpop.f32.mrb[32].mxu0 }
 0x86e   : > { %v14421_v12 = vpop.f32.mrb[34].mxu1  ;;  %v14423_v38 = vpop.f32.mrb[33].mxu0  ;;  %v3882_v29 = vmax.f32 %v14415_v36, %v14417_v17 }
 0x86f   : > { %v14427_v63 = vpop.f32.mrb[35].mxu1  ;;  %v14429_v8 = vpop.f32.mrb[34].mxu0 }
 0x870   : > { %v14433_v47 = vpop.f32.mrb[35].mxu0  ;;  %3883 = vmax.xlane.f32.xlu0 %v3882_v29  ;;  %v3885_v33 = vmax.f32 %v14421_v12, %v14427_v63 }
 0x872   : > { %3886 = vmax.xlane.f32.xlu1 %v3885_v33 }
 0x874   : > { %v14439_v16 = vpop.f32.mrb[36].mxu1 }
 0x875   : > { %v14441_v51 = vpop.f32.mrb[37].mxu1  ;;  %v14443_v1 = vpop.f32.mrb[36].mxu0 }
 0x876   : > { %v14445_v13 = vpop.f32.mrb[38].mxu1  ;;  %v14447_v18 = vpop.f32.mrb[37].mxu0  ;;  %v3888_v40 = vmax.f32 %v14439_v16, %v14441_v51 }
 0x877   : > { %17857 = vst [vmem:[#allocation86_spill] sm:$0xff] %v14447_v18  ;;  %v14451_v61 = vpop.f32.mrb[39].mxu1  ;;  %v14453_v42 = vpop.f32.mrb[38].mxu0 }
 0x878   : > { %v14457_v9 = vpop.f32.mrb[39].mxu0  ;;  %3889 = vmax.xlane.f32.xlu0 %v3888_v40  ;;  %v3891_v53 = vmax.f32 %v14445_v13, %v14451_v61 }
 0x879   : > { %17858 = vst [vmem:[#allocation87_spill] sm:$0xff] %v14457_v9 }
 0x87a   : > { %3892 = vmax.xlane.f32.xlu1 %v3891_v53 }
 0x87c   : > { %v14463_v0 = vpop.f32.mrb[40].mxu1 }
 0x87d   : > { %v14465_v59 = vpop.f32.mrb[41].mxu1  ;;  %v14467_v20 = vpop.f32.mrb[40].mxu0 }
 0x87e   : > { %v14469_v7 = vpop.f32.mrb[42].mxu1  ;;  %v14471_v14 = vpop.f32.mrb[41].mxu0  ;;  %v3894_v39 = vmax.f32 %v14463_v0, %v14465_v59 }
 0x87f   : > { %v14475_v22 = vpop.f32.mrb[43].mxu1  ;;  %v14477_v45 = vpop.f32.mrb[42].mxu0 }
 0x880   : > { %v14481_v30 = vpop.f32.mrb[43].mxu0  ;;  %3895 = vmax.xlane.f32.xlu0 %v3894_v39  ;;  %v3897_v62 = vmax.f32 %v14469_v7, %v14475_v22 }
 0x881   : > { %17859 = vst [vmem:[#allocation88_spill] sm:$0xff] %v14481_v30 }
 0x882   : > { %3898 = vmax.xlane.f32.xlu1 %v3897_v62 }
 0x884   : > { %v14487_v5 = vpop.f32.mrb[44].mxu1 }
 0x885   : > { %v14489_v28 = vpop.f32.mrb[45].mxu1  ;;  %v14491_v3 = vpop.f32.mrb[44].mxu0 }
 0x886   : > { %17860 = vst [vmem:[#allocation89_spill] sm:$0xff] %v14491_v3  ;;  %v14493_v46 = vpop.f32.mrb[46].mxu1  ;;  %v14495_v44 = vpop.f32.mrb[45].mxu0  ;;  %v3900_v60 = vmax.f32 %v14487_v5, %v14489_v28 }
 0x887   : > { %17861 = vst [vmem:[#allocation90_spill] sm:$0xff] %v14495_v44  ;;  %v14499_v19 = vpop.f32.mrb[47].mxu1  ;;  %v14501_v31 = vpop.f32.mrb[46].mxu0 }
 0x888   : > { %17862 = vst [vmem:[#allocation91_spill] sm:$0xff] %v14501_v31  ;;  %v14505_v34 = vpop.f32.mrb[47].mxu0  ;;  %3901 = vmax.xlane.f32.xlu0 %v3900_v60  ;;  %v3903_v56 = vmax.f32 %v14493_v46, %v14499_v19 }
 0x889   : > { %17863 = vst [vmem:[#allocation92_spill] sm:$0xff] %v14505_v34 }
 0x88a   : > { %3904 = vmax.xlane.f32.xlu1 %v3903_v56 }
 0x88c   : > { %v14511_v48 = vpop.f32.mrb[48].mxu1 }
 0x88d   : > { %v14513_v24 = vpop.f32.mrb[49].mxu1  ;;  %v14515_v54 = vpop.f32.mrb[48].mxu0 }
 0x88e   : > { %v14517_v29 = vpop.f32.mrb[50].mxu1  ;;  %v14519_v33 = vpop.f32.mrb[49].mxu0  ;;  %v3906_v40 = vmax.f32 %v14511_v48, %v14513_v24 }
 0x88f   : > { %v14523_v53 = vpop.f32.mrb[51].mxu1  ;;  %v14525_v39 = vpop.f32.mrb[50].mxu0 }
 0x890   : > { %v14529_v60 = vpop.f32.mrb[51].mxu0  ;;  %3907 = vmax.xlane.f32.xlu0 %v3906_v40  ;;  %v3909_v56 = vmax.f32 %v14517_v29, %v14523_v53 }
 0x892   : > { %3910 = vmax.xlane.f32.xlu1 %v3909_v56 }
 0x894   : > { %v14535_v23 = vpop.f32.mrb[52].mxu1 }
 0x895   : > { %v14537_v43 = vpop.f32.mrb[53].mxu1  ;;  %v14539_v35 = vpop.f32.mrb[52].mxu0 }
 0x896   : > { %v14541_v50 = vpop.f32.mrb[54].mxu1  ;;  %v14543_v41 = vpop.f32.mrb[53].mxu0  ;;  %v3912_v40 = vmax.f32 %v14535_v23, %v14537_v43 }
 0x897   : > { %v14547_v62 = vpop.f32.mrb[55].mxu1  ;;  %v14549_v26 = vpop.f32.mrb[54].mxu0 }
 0x898   : > { %v14553_v6 = vpop.f32.mrb[55].mxu0  ;;  %3913 = vmax.xlane.f32.xlu0 %v3912_v40  ;;  %v3915_v25 = vmax.f32 %v14541_v50, %v14547_v62 }
 0x89a   : > { %3916 = vmax.xlane.f32.xlu1 %v3915_v25 }
 0x89c   : > { %v14559_v21 = vpop.f32.mrb[56].mxu1 }
 0x89d   : > { %17864 = vst [vmem:[#allocation93_spill] sm:$0xff] %v14559_v21  ;;  %v14561_v27 = vpop.f32.mrb[57].mxu1  ;;  %v14563_v11 = vpop.f32.mrb[56].mxu0 }
 0x89e   : > { %17865 = vst [vmem:[#allocation94_spill] sm:$0xff] %v14561_v27  ;;  %v14565_v37 = vpop.f32.mrb[58].mxu1  ;;  %v14567_v15 = vpop.f32.mrb[57].mxu0  ;;  %v3918_v40 = vmax.f32 %v14559_v21, %v14561_v27  ;;  %v17874_v21 = vmax.f32 %v14467_v20, %v14471_v14 }
 0x89f   : > { %17866 = vst [vmem:[#allocation95_spill] sm:$0xff] %v14565_v37  ;;  %v14571_v56 = vpop.f32.mrb[59].mxu1  ;;  %v14573_v49 = vpop.f32.mrb[58].mxu0 }
 0x8a0   : > { %17867 = vst [vmem:[#allocation96_spill] sm:$0xff] %v14571_v56  ;;  %v14577_v57 = vpop.f32.mrb[59].mxu0  ;;  %3919 = vmax.xlane.f32.xlu0 %v3918_v40  ;;  %v3921_v4 = vmax.f32 %v14565_v37, %v14571_v56 }
 0x8a2   : > { %3922 = vmax.xlane.f32.xlu1 %v3921_v4  ;;  %v17872_v4 = vmax.f32 %v14443_v1, %v14447_v18  ;;  %v3737_v18 = vld [vmem:[#allocation3] sm:$0xff] }
 0x8a4   : > { %v14583_v32 = vpop.f32.mrb[60].mxu1 }
 0x8a5   : > { %17868 = vst [vmem:[#allocation97_spill] sm:$0xff] %v14583_v32  ;;  %v14585_v58 = vpop.f32.mrb[61].mxu1  ;;  %v14587_v10 = vpop.f32.mrb[60].mxu0 }
 0x8a6   : > { %17869 = vst [vmem:[#allocation98_spill] sm:$0xff] %v14585_v58  ;;  %v14589_v52 = vpop.f32.mrb[62].mxu1  ;;  %v14591_v27 = vpop.f32.mrb[61].mxu0  ;;  %v3924_v40 = vmax.f32 %v14583_v32, %v14585_v58  ;;  %v17870_v58 = vmax.f32 %v14419_v2, %v14423_v38  ;;  %v17871_v32 = vmax.f32 %v14429_v8, %v14433_v47 }
 0x8a7   : > { %v14595_v25 = vpop.f32.mrb[63].mxu1  ;;  %v14597_v56 = vpop.f32.mrb[62].mxu0 }
 0x8a8   : > { %v14601_v55 = vpop.f32.mrb[63].mxu0  ;;  %3925 = vmax.xlane.f32.xlu0 %v3924_v40  ;;  %v3927_v37 = vmax.f32 %v14589_v52, %v14595_v25  ;;  %v17873_v40 = vmax.f32 %v14453_v42, %v14457_v9  ;;  %v3755_v9 = vld [vmem:[#allocation3 + $0x90] sm:$0xff] }
 0x8aa   : > { %3928 = vmax.xlane.f32.xlu1 %v3927_v37  ;;  %v17875_v37 = vmax.f32 %v14477_v45, %v14481_v30  ;;  %v3741_v30 = vld [vmem:[#allocation3 + $0x20] sm:$0xff] }
 0x8ac   : > { %4373 = vmax.xlane.f32.xlu0 %v17870_v58  ;;  %v17876_v58 = vmax.f32 %v14491_v3, %v14495_v44  ;;  %v3743_v44 = vld [vmem:[#allocation3 + $0x30] sm:$0xff] }
 0x8ae   : > { %4376 = vmax.xlane.f32.xlu1 %v17871_v32  ;;  %v17877_v32 = vmax.f32 %v14501_v31, %v14505_v34 }
 0x8b0   : > { %4379 = vmax.xlane.f32.xlu0 %v17872_v4  ;;  %v3753_v4 = vld [vmem:[#allocation3 + $0x80] sm:$0xff] }
 0x8b1   : > { %10137 = vmatprep.subr.bf16.mxu1 %v3753_v4 }
 0x8b2   : > { %4382 = vmax.xlane.f32.xlu1 %v17873_v40  ;;  %10138 = vmatpush3.bf16.msra.mxu1 %v3737_v18  ;;  %v3739_v40 = vld [vmem:[#allocation3 + $0x10] sm:$0xff] }
 0x8b3   : > { %10139 = vmatprep.subr.bf16.mxu1 %v3755_v9 }
 0x8b4   : > { %4385 = vmax.xlane.f32.xlu0 %v17874_v21  ;;  %v3757_v21 = vld [vmem:[#allocation3 + $0xa0] sm:$0xff] }
 0x8b6   : > { %4388 = vmax.xlane.f32.xlu1 %v17875_v37  ;;  %10140 = vmatpush3.bf16.msra.mxu1 %v3739_v40  ;;  %v3759_v37 = vld [vmem:[#allocation3 + $0xb0] sm:$0xff] }
 0x8b7   : > { %10141 = vmatprep.subr.bf16.mxu1 %v3757_v21 }
 0x8b8   : > { %4391 = vmax.xlane.f32.xlu0 %v17876_v58 }
 0x8ba   : > { %4394 = vmax.xlane.f32.xlu1 %v17877_v32  ;;  %10142 = vmatpush3.bf16.msra.mxu1 %v3741_v30 }
 0x8bb   : > { %10143 = vmatprep.subr.bf16.mxu1 %v3759_v37 }
 0x8be   : > { %10144 = vmatpush3.bf16.msra.mxu1 %v3743_v44 }
 0x8fd   : > { %v3884_v58 = vpop.xlane.xlu0 %3883 }
 0x8fe   : > { %v3930_v34 = vsub.f32 %v14415_v36, %v3884_v58  ;;  %v3931_v32 = vsub.f32 %v14417_v17, %v3884_v58 }
 0x8ff   : > { %v3887_v31 = vpop.xlane.xlu1 %3886 }
 0x900   : > { %v3962_v3 = vmul.f32 1.442695, %v3930_v34  ;;  %v3964_v4 = vmul.f32 1.442695, %v3931_v32  ;;  %v3932_v18 = vsub.f32 %v14421_v12, %v3887_v31  ;;  %v3933_v9 = vsub.f32 %v14427_v63, %v3887_v31 }
 0x902   : > { %11234 = vpow2.f32 %v3962_v3  ;;  %v3966_v40 = vmul.f32 1.442695, %v3932_v18  ;;  %v3968_v21 = vmul.f32 1.442695, %v3933_v9 }
 0x903   : > { %11236 = vpow2.f32 %v3964_v4 }
 0x904   : > { %11238 = vpow2.f32 %v3966_v40 }
 0x905   : > { %11240 = vpow2.f32 %v3968_v21  ;;  %v3890_v30 = vpop.xlane.xlu0 %3889 }
 0x906   : > { %v3934_v44 = vsub.f32 %v14439_v16, %v3890_v30  ;;  %v3935_v36 = vsub.f32 %v14441_v51, %v3890_v30 }
 0x907   : > { %v3893_v37 = vpop.xlane.xlu1 %3892 }
 0x908   : > { %v3970_v17 = vmul.f32 1.442695, %v3934_v44  ;;  %v3972_v58 = vmul.f32 1.442695, %v3935_v36  ;;  %v3936_v34 = vsub.f32 %v14445_v13, %v3893_v37  ;;  %v3937_v12 = vsub.f32 %v14451_v61, %v3893_v37 }
 0x90a   : > { %11242 = vpow2.f32 %v3970_v17  ;;  %v3974_v63 = vmul.f32 1.442695, %v3936_v34  ;;  %v3976_v3 = vmul.f32 1.442695, %v3937_v12  ;;  %v17878_v17 = vmax.f32 %v14515_v54, %v14519_v33 }
 0x90b   : > { %11244 = vpow2.f32 %v3972_v58 }
 0x90c   : > { %v14639_v31 = vpop.eup %11234  ;;  %11246 = vpow2.f32 %v3974_v63 }
 0x90d   : > { %v14641_v32 = vpop.eup %11236  ;;  %11248 = vpow2.f32 %v3976_v3  ;;  %v3896_v16 = vpop.xlane.xlu0 %3895 }
 0x90e   : > { %v14643_v4 = vpop.eup %11238  ;;  %v3938_v51 = vsub.f32 %v14463_v0, %v3896_v16  ;;  %v3939_v18 = vsub.f32 %v14465_v59, %v3896_v16  ;;  %v4026_v13 = vadd.f32 %v14641_v32, %v14639_v31  ;;  %v17879_v16 = vmax.f32 %v14525_v39, %v14529_v60 }
 0x90f   : > { %v14649_v61 = vpop.eup %11240  ;;  %v3899_v9 = vpop.xlane.xlu1 %3898 }
 0x910   : > { %v3978_v40 = vmul.f32 1.442695, %v3938_v51  ;;  %v3980_v21 = vmul.f32 1.442695, %v3939_v18  ;;  %v3940_v30 = vsub.f32 %v14469_v7, %v3899_v9  ;;  %v3941_v44 = vsub.f32 %v14475_v22, %v3899_v9  ;;  %4027 = vadd.xlane.f32.xlu0 %v4026_v13 }
 0x911   : > { %v4029_v36 = vadd.f32 %v14649_v61, %v14643_v4 }
 0x912   : > { %11250 = vpow2.f32 %v3978_v40  ;;  %v3982_v0 = vmul.f32 1.442695, %v3940_v30  ;;  %v3984_v37 = vmul.f32 1.442695, %v3941_v44  ;;  %v17880_v44 = vmax.f32 %v14539_v35, %v14543_v41 }
 0x913   : > { %11252 = vpow2.f32 %v3980_v21  ;;  %4030 = vadd.xlane.f32.xlu1 %v4029_v36 }
 0x914   : > { %v14655_v59 = vpop.eup %11242  ;;  %11254 = vpow2.f32 %v3982_v0  ;;  %4397 = vmax.xlane.f32.xlu0 %v17878_v17 }
 0x915   : > { %v14660_v58 = vpop.eup %11244  ;;  %11256 = vpow2.f32 %v3984_v37  ;;  %v3902_v7 = vpop.xlane.xlu0 %3901 }
 0x916   : > { %v14662_v22 = vpop.eup %11246  ;;  %v3942_v34 = vsub.f32 %v14487_v5, %v3902_v7  ;;  %v3943_v12 = vsub.f32 %v14489_v28, %v3902_v7  ;;  %v4032_v63 = vadd.f32 %v14660_v58, %v14655_v59 }
 0x917   : > { %v14668_v3 = vpop.eup %11248  ;;  %4400 = vmax.xlane.f32.xlu1 %v17879_v16  ;;  %v3905_v51 = vpop.xlane.xlu1 %3904 }
 0x918   : > { %v3986_v18 = vmul.f32 1.442695, %v3942_v34  ;;  %v3988_v13 = vmul.f32 1.442695, %v3943_v12  ;;  %v3944_v9 = vsub.f32 %v14493_v46, %v3905_v51  ;;  %v3945_v40 = vsub.f32 %v14499_v19, %v3905_v51  ;;  %4033 = vadd.xlane.f32.xlu0 %v4032_v63 }
 0x919   : > { %v4035_v5 = vadd.f32 %v14668_v3, %v14662_v22  ;;  %v17881_v34 = vmax.f32 %v14549_v26, %v14553_v6 }
 0x91a   : > { %11258 = vpow2.f32 %v3986_v18  ;;  %v3990_v28 = vmul.f32 1.442695, %v3944_v9  ;;  %v3992_v21 = vmul.f32 1.442695, %v3945_v40 }
 0x91b   : > { %11260 = vpow2.f32 %v3988_v13  ;;  %4036 = vadd.xlane.f32.xlu1 %v4035_v5  ;;  %v3745_v13 = vld [vmem:[#allocation3 + $0x40] sm:$0xff] }
 0x91c   : > { %v14677_v30 = vpop.eup %11250  ;;  %11262 = vpow2.f32 %v3990_v28  ;;  %4403 = vmax.xlane.f32.xlu0 %v17880_v44 }
 0x91d   : > { %v14682_v36 = vpop.eup %11252  ;;  %11264 = vpow2.f32 %v3992_v21  ;;  %v3908_v46 = vpop.xlane.xlu0 %3907  ;;  %v3763_v21 = vld [vmem:[#allocation3 + $0xd0] sm:$0xff] }
 0x91e   : > { %v14684_v19 = vpop.eup %11254  ;;  %v3946_v0 = vsub.f32 %v14511_v48, %v3908_v46  ;;  %v3947_v37 = vsub.f32 %v14513_v24, %v3908_v46  ;;  %v4038_v17 = vadd.f32 %v14682_v36, %v14677_v30  ;;  %v3761_v48 = vld [vmem:[#allocation3 + $0xc0] sm:$0xff] }
 0x91f   : > { %v14690_v7 = vpop.eup %11256  ;;  %4406 = vmax.xlane.f32.xlu1 %v17881_v34  ;;  %v3911_v12 = vpop.xlane.xlu1 %3910  ;;  %10145 = vmatprep.subr.bf16.mxu1 %v3761_v48 }
 0x920   : > { %v3994_v63 = vmul.f32 1.442695, %v3946_v0  ;;  %v3996_v16 = vmul.f32 1.442695, %v3947_v37  ;;  %v3948_v51 = vsub.f32 %v14517_v29, %v3911_v12  ;;  %v3949_v18 = vsub.f32 %v14523_v53, %v3911_v12  ;;  %4039 = vadd.xlane.f32.xlu0 %v4038_v17  ;;  %10146 = vmatpush3.bf16.msra.mxu1 %v3745_v13  ;;  %v3747_v17 = vld [vmem:[#allocation3 + $0x50] sm:$0xff]  ;;  %v3765_v13 = vld [vmem:[#allocation3 + $0xe0] sm:$0xff] }
 0x921   : > { %v4041_v24 = vadd.f32 %v14690_v7, %v14684_v19  ;;  %v17882_v29 = vmax.f32 %v14563_v11, %v14567_v15  ;;  %10147 = vmatprep.subr.bf16.mxu1 %v3763_v21  ;;  %v17883_v12 = vmax.f32 %v14573_v49, %v14577_v57  ;;  %v17885_v21 = vld [vmem:[#allocation93_spill] sm:$0xff] }
 0x922   : > { %11266 = vpow2.f32 %v3994_v63  ;;  %v3998_v9 = vmul.f32 1.442695, %v3948_v51  ;;  %v4000_v40 = vmul.f32 1.442695, %v3949_v18 }
 0x923   : > { %11268 = vpow2.f32 %v3996_v16  ;;  %4042 = vadd.xlane.f32.xlu1 %v4041_v24 }
 0x924   : > { %v14699_v5 = vpop.eup %11258  ;;  %11270 = vpow2.f32 %v3998_v9  ;;  %4409 = vmax.xlane.f32.xlu0 %v17882_v29  ;;  %10148 = vmatpush3.bf16.msra.mxu1 %v3747_v17  ;;  %v3749_v9 = vld [vmem:[#allocation3 + $0x60] sm:$0xff] }
 0x925   : > { %v14704_v53 = vpop.eup %11260  ;;  %11272 = vpow2.f32 %v4000_v40  ;;  %v3914_v28 = vpop.xlane.xlu0 %3913  ;;  %10149 = vmatprep.subr.bf16.mxu1 %v3765_v13  ;;  %v17889_v13 = vld [vmem:[#allocation96_spill] sm:$0xff] }
 0x926   : > { %v14706_v44 = vpop.eup %11262  ;;  %v3950_v46 = vsub.f32 %v14535_v23, %v3914_v28  ;;  %v3951_v0 = vsub.f32 %v14537_v43, %v3914_v28  ;;  %v4044_v37 = vadd.f32 %v14704_v53, %v14699_v5 }
 0x927   : > { %v14712_v34 = vpop.eup %11264  ;;  %4412 = vmax.xlane.f32.xlu1 %v17883_v12  ;;  %v3917_v63 = vpop.xlane.xlu1 %3916  ;;  %v3767_v12 = vld [vmem:[#allocation3 + $0xf0] sm:$0xff] }
 0x928   : > { %v4002_v16 = vmul.f32 1.442695, %v3950_v46  ;;  %v4004_v51 = vmul.f32 1.442695, %v3951_v0  ;;  %v3952_v18 = vsub.f32 %v14541_v50, %v3917_v63  ;;  %v3953_v23 = vsub.f32 %v14547_v62, %v3917_v63  ;;  %4045 = vadd.xlane.f32.xlu0 %v4044_v37  ;;  %10150 = vmatpush3.bf16.msra.mxu1 %v3749_v9  ;;  %v17886_v0 = vld [vmem:[#allocation94_spill] sm:$0xff] }
 0x929   : > { %v4047_v43 = vadd.f32 %v14712_v34, %v14706_v44  ;;  %v17884_v50 = vmax.f32 %v14587_v10, %v14591_v27  ;;  %10151 = vmatprep.subr.bf16.mxu1 %v3767_v12 }
 0x92a   : > { %11274 = vpow2.f32 %v4002_v16  ;;  %v4006_v48 = vmul.f32 1.442695, %v3952_v18  ;;  %v4008_v24 = vmul.f32 1.442695, %v3953_v23  ;;  %v17887_v16 = vmax.f32 %v14597_v56, %v14601_v55  ;;  %v3751_v18 = vld [vmem:[#allocation3 + $0x70] sm:$0xff] }
 0x92b   : > { %11276 = vpow2.f32 %v4004_v51  ;;  %4048 = vadd.xlane.f32.xlu1 %v4047_v43 }
 0x92c   : > { %v14721_v40 = vpop.eup %11266  ;;  %11278 = vpow2.f32 %v4006_v48  ;;  %4415 = vmax.xlane.f32.xlu0 %v17884_v50  ;;  %v17888_v48 = vld [vmem:[#allocation95_spill] sm:$0xff]  ;;  %10152 = vmatpush3.bf16.msra.mxu1 %v3751_v18 }
 0x92d   : > { %v14726_v62 = vpop.eup %11268  ;;  %11280 = vpow2.f32 %v4008_v24  ;;  %v3920_v29 = vpop.xlane.xlu0 %3919 }
 0x92e   : > { %v14728_v28 = vpop.eup %11270  ;;  %v3954_v46 = vsub.f32 %v17885_v21, %v3920_v29  ;;  %v3955_v37 = vsub.f32 %v17886_v0, %v3920_v29  ;;  %v4050_v17 = vadd.f32 %v14726_v62, %v14721_v40 }
 0x92f   : > { %v14734_v63 = vpop.eup %11272  ;;  %4418 = vmax.xlane.f32.xlu1 %v17887_v16  ;;  %v3923_v51 = vpop.xlane.xlu1 %3922  ;;  %v17891_v16 = vld [vmem:[#allocation97_spill] sm:$0xff] }
 0x930   : > { %v4010_v23 = vmul.f32 1.442695, %v3954_v46  ;;  %v4012_v43 = vmul.f32 1.442695, %v3955_v37  ;;  %v3956_v24 = vsub.f32 %v17888_v48, %v3923_v51  ;;  %v3957_v9 = vsub.f32 %v17889_v13, %v3923_v51  ;;  %4051 = vadd.xlane.f32.xlu0 %v4050_v17  ;;  %v17892_v51 = vld [vmem:[#allocation98_spill] sm:$0xff] }
 0x931   : > { %v4053_v50 = vadd.f32 %v14734_v63, %v14728_v28 }
 0x932   : > { %11282 = vpow2.f32 %v4010_v23  ;;  %v4014_v29 = vmul.f32 1.442695, %v3956_v24  ;;  %v4016_v21 = vmul.f32 1.442695, %v3957_v9 }
 0x933   : > { %11284 = vpow2.f32 %v4012_v43  ;;  %4054 = vadd.xlane.f32.xlu1 %v4053_v50 }
 0x934   : > { %v14743_v0 = vpop.eup %11274  ;;  %11286 = vpow2.f32 %v4014_v29 }
 0x935   : > { %17890 = vst [vmem:[#allocation93_spill] sm:$0xff] %v14743_v0  ;;  %v14745_v12 = vpop.eup %11276  ;;  %11288 = vpow2.f32 %v4016_v21  ;;  %v3926_v46 = vpop.xlane.xlu0 %3925 }
 0x936   : > { %v14747_v37 = vpop.eup %11278  ;;  %v3958_v17 = vsub.f32 %v17891_v16, %v3926_v46  ;;  %v3959_v18 = vsub.f32 %v17892_v51, %v3926_v46  ;;  %v4056_v23 = vadd.f32 %v14745_v12, %v14743_v0 }
 0x937   : > { %v14753_v48 = vpop.eup %11280  ;;  %v3929_v43 = vpop.xlane.xlu1 %3928 }
 0x938   : > { %v4018_v24 = vmul.f32 1.442695, %v3958_v17  ;;  %v4020_v13 = vmul.f32 1.442695, %v3959_v18  ;;  %4057 = vadd.xlane.f32.xlu0 %v4056_v23  ;;  %v3960_v9 = vsub.f32 %v14589_v52, %v3929_v43  ;;  %v3961_v50 = vsub.f32 %v14595_v25, %v3929_v43 }
 0x939   : > { %v4374_v29 = vpop.xlane.xlu0 %4373  ;;  %v4059_v21 = vadd.f32 %v14753_v48, %v14747_v37 }
 0x93a   : > { %11290 = vpow2.f32 %v4018_v24  ;;  %v4022_v16 = vmul.f32 1.442695, %v3960_v9  ;;  %v4024_v46 = vmul.f32 1.442695, %v3961_v50  ;;  %v4420_v51 = vsub.f32 %v14419_v2, %v4374_v29 }
 0x93b   : > { %11292 = vpow2.f32 %v4020_v13  ;;  %v4421_v0 = vsub.f32 %v14423_v38, %v4374_v29  ;;  %4060 = vadd.xlane.f32.xlu1 %v4059_v21  ;;  %v4377_v17 = vpop.xlane.xlu1 %4376  ;;  %v17893_v21 = vld [vmem:[#allocation86_spill] sm:$0xff] }
 0x93c   : > { %v14761_v18 = vpop.eup %11282  ;;  %11294 = vpow2.f32 %v4022_v16  ;;  %v4452_v52 = vmul.f32 1.442695, %v4420_v51  ;;  %v4422_v25 = vsub.f32 %v14429_v8, %v4377_v17  ;;  %v4423_v23 = vsub.f32 %v14433_v47, %v4377_v17  ;;  %v17894_v51 = vld [vmem:[#allocation87_spill] sm:$0xff] }
 0x93d   : > { %v14765_v43 = vpop.eup %11284  ;;  %11296 = vpow2.f32 %v4024_v46  ;;  %v4454_v24 = vmul.f32 1.442695, %v4421_v0  ;;  %v4380_v9 = vpop.xlane.xlu0 %4379 }
 0x93e   : > { %v14767_v50 = vpop.eup %11286  ;;  %11298 = vpow2.f32 %v4452_v52  ;;  %v4456_v2 = vmul.f32 1.442695, %v4422_v25  ;;  %v4458_v38 = vmul.f32 1.442695, %v4423_v23  ;;  %v4424_v13 = vsub.f32 %v14443_v1, %v4380_v9 }
 0x93f   : > { %v14770_v29 = vpop.eup %11288  ;;  %11300 = vpow2.f32 %v4454_v24  ;;  %v4425_v16 = vsub.f32 %v17893_v21, %v4380_v9  ;;  %v4062_v8 = vadd.f32 %v14765_v43, %v14761_v18  ;;  %v4383_v47 = vpop.xlane.xlu1 %4382 }
 0x940   : > { %11302 = vpow2.f32 %v4456_v2  ;;  %v4460_v46 = vmul.f32 1.442695, %v4424_v13  ;;  %v4426_v0 = vsub.f32 %v14453_v42, %v4383_v47  ;;  %v4427_v17 = vsub.f32 %v17894_v51, %v4383_v47 }
 0x941   : > { %11304 = vpow2.f32 %v4458_v38  ;;  %v4462_v52 = vmul.f32 1.442695, %v4425_v16  ;;  %4063 = vadd.xlane.f32.xlu0 %v4062_v8  ;;  %v4386_v25 = vpop.xlane.xlu0 %4385  ;;  %v4065_v1 = vadd.f32 %v14770_v29, %v14767_v50  ;;  %v17896_v16 = vld [vmem:[#allocation88_spill] sm:$0xff] }
 0x942   : > { %11306 = vpow2.f32 %v4460_v46  ;;  %v4464_v23 = vmul.f32 1.442695, %v4426_v0  ;;  %v4466_v24 = vmul.f32 1.442695, %v4427_v17  ;;  %v4428_v9 = vsub.f32 %v14467_v20, %v4386_v25  ;;  %v17897_v17 = vld [vmem:[#allocation89_spill] sm:$0xff] }
 0x943   : > { %11308 = vpow2.f32 %v4462_v52  ;;  %v4429_v2 = vsub.f32 %v14471_v14, %v4386_v25  ;;  %4066 = vadd.xlane.f32.xlu1 %v4065_v1  ;;  %v4389_v13 = vpop.xlane.xlu1 %4388  ;;  %v17898_v1 = vld [vmem:[#allocation90_spill] sm:$0xff] }
 0x944   : > { %v14781_v42 = vpop.eup %11290  ;;  %11310 = vpow2.f32 %v4464_v23  ;;  %v4468_v38 = vmul.f32 1.442695, %v4428_v9  ;;  %v4430_v21 = vsub.f32 %v14477_v45, %v4389_v13  ;;  %v4431_v8 = vsub.f32 %v17896_v16, %v4389_v13 }
 0x945   : > { %17895 = vst [vmem:[#allocation94_spill] sm:$0xff] %v14781_v42  ;;  %v14785_v47 = vpop.eup %11292  ;;  %11312 = vpow2.f32 %v4466_v24  ;;  %v4470_v46 = vmul.f32 1.442695, %v4429_v2  ;;  %v4392_v0 = vpop.xlane.xlu0 %4391  ;;  %v17900_v2 = vld [vmem:[#allocation91_spill] sm:$0xff] }
 0x946   : > { %v14787_v51 = vpop.eup %11294  ;;  %11314 = vpow2.f32 %v4468_v38  ;;  %v4472_v20 = vmul.f32 1.442695, %v4430_v21  ;;  %v4474_v14 = vmul.f32 1.442695, %v4431_v8  ;;  %v4432_v52 = vsub.f32 %v17897_v17, %v4392_v0  ;;  %v17901_v38 = vld [vmem:[#allocation92_spill] sm:$0xff] }
 0x947   : > { %v14790_v25 = vpop.eup %11296  ;;  %11316 = vpow2.f32 %v4470_v46  ;;  %v4433_v23 = vsub.f32 %v17898_v1, %v4392_v0  ;;  %v4068_v45 = vadd.f32 %v14785_v47, %v14781_v42  ;;  %v4395_v9 = vpop.xlane.xlu1 %4394 }
 0x948   : > { %v14795_v13 = vpop.eup %11298  ;;  %11318 = vpow2.f32 %v4472_v20  ;;  %v4476_v24 = vmul.f32 1.442695, %v4432_v52  ;;  %v4434_v16 = vsub.f32 %v17900_v2, %v4395_v9  ;;  %v4435_v21 = vsub.f32 %v17901_v38, %v4395_v9 }
 0x949   : > { %17899 = vst [vmem:[#allocation95_spill] sm:$0xff] %v14795_v13  ;;  %v14799_v8 = vpop.eup %11300  ;;  %11320 = vpow2.f32 %v4474_v14  ;;  %v4478_v17 = vmul.f32 1.442695, %v4433_v23  ;;  %4069 = vadd.xlane.f32.xlu0 %v4068_v45  ;;  %v4071_v46 = vadd.f32 %v14790_v25, %v14787_v51 }
 0x94a   : > { %v14803_v0 = vpop.eup %11302  ;;  %11322 = vpow2.f32 %v4476_v24  ;;  %v4480_v1 = vmul.f32 1.442695, %v4434_v16  ;;  %v4482_v42 = vmul.f32 1.442695, %v4435_v21  ;;  %v4516_v20 = vadd.f32 %v14799_v8, %v14795_v13 }
 0x94b   : > { %v14807_v52 = vpop.eup %11304  ;;  %11324 = vpow2.f32 %v4478_v17  ;;  %4072 = vadd.xlane.f32.xlu1 %v4071_v46  ;;  %v3754_v46 = vld [vmem:[#allocation3 + $0x88] sm:$0xff] }
 0x94c   : > { %v14809_v9 = vpop.eup %11306  ;;  %11326 = vpow2.f32 %v4480_v1  ;;  %v4519_v14 = vadd.f32 %v14807_v52, %v14803_v0  ;;  %10233 = vmatprep.subr.bf16.mxu1 %v3754_v46 }
 0x94d   : > { %17902 = vst [vmem:[#allocation96_spill] sm:$0xff] %v14809_v9  ;;  %v14813_v23 = vpop.eup %11308  ;;  %11328 = vpow2.f32 %v4482_v42  ;;  %4517 = vadd.xlane.f32.xlu0 %v4516_v20 }
 0x94e   : > { %17903 = vst [vmem:[#allocation97_spill] sm:$0xff] %v14813_v23  ;;  %v14815_v45 = vpop.eup %11310  ;;  %v4522_v24 = vadd.f32 %v14813_v23, %v14809_v9 }
 0x94f   : > { %17904 = vst [vmem:[#allocation98_spill] sm:$0xff] %v14815_v45  ;;  %v14819_v2 = vpop.eup %11312  ;;  %4520 = vadd.xlane.f32.xlu1 %v4519_v14 }
 0x950   : > { %17905 = vst [vmem:[#allocation86_spill] sm:$0xff] %v14819_v2  ;;  %v14821_v16 = vpop.eup %11314  ;;  %v4525_v38 = vadd.f32 %v14819_v2, %v14815_v45 }
 0x951   : > { %17906 = vst [vmem:[#allocation87_spill] sm:$0xff] %v14821_v16  ;;  %v14825_v21 = vpop.eup %11316  ;;  %4523 = vadd.xlane.f32.xlu0 %v4522_v24 }
 0x952   : > { %17907 = vst [vmem:[#allocation88_spill] sm:$0xff] %v14825_v21  ;;  %v14827_v17 = vpop.eup %11318  ;;  %v4528_v42 = vadd.f32 %v14825_v21, %v14821_v16 }
 0x953   : > { %17908 = vst [vmem:[#allocation89_spill] sm:$0xff] %v14827_v17  ;;  %v14831_v1 = vpop.eup %11320  ;;  %4526 = vadd.xlane.f32.xlu1 %v4525_v38 }
 0x954   : > { %17909 = vst [vmem:[#allocation90_spill] sm:$0xff] %v14831_v1  ;;  %v14833_v20 = vpop.eup %11322  ;;  %v4531_v14 = vadd.f32 %v14831_v1, %v14827_v17 }
 0x955   : > { %17910 = vst [vmem:[#allocation91_spill] sm:$0xff] %v14833_v20  ;;  %v14837_v9 = vpop.eup %11324  ;;  %4529 = vadd.xlane.f32.xlu0 %v4528_v42 }
 0x956   : > { %17911 = vst [vmem:[#allocation92_spill] sm:$0xff] %v14837_v9  ;;  %v14839_v45 = vpop.eup %11326  ;;  %v4534_v24 = vadd.f32 %v14837_v9, %v14833_v20 }
 0x957   : > { %17912 = vst [vmem:[#allocation99_spill] sm:$0xff] %v14839_v45  ;;  %v14843_v23 = vpop.eup %11328  ;;  %4532 = vadd.xlane.f32.xlu1 %v4531_v14 }
 0x958   : > { %v4537_v38 = vadd.f32 %v14843_v23, %v14839_v45 }
 0x959   : > { %4535 = vadd.xlane.f32.xlu0 %v4534_v24 }
 0x95b   : > { %4538 = vadd.xlane.f32.xlu1 %v4537_v38 }
 0x99d   : > { %v4028_v46 = vpop.xlane.xlu0 %4027 }
 0x99e   : > { %11330 = vrcp.f32 %v4028_v46 }
 0x9a0   : > { %v4031_v16 = vpop.xlane.xlu1 %4030 }
 0x9a1   : > { %11332 = vrcp.f32 %v4031_v16  ;;  %v4398_v17 = vpop.xlane.xlu0 %4397 }
 0x9a2   : > { %v4436_v42 = vsub.f32 %v14515_v54, %v4398_v17  ;;  %v4437_v21 = vsub.f32 %v14519_v33, %v4398_v17 }
 0x9a4   : > { %v4484_v1 = vmul.f32 1.442695, %v4436_v42  ;;  %v4486_v13 = vmul.f32 1.442695, %v4437_v21  ;;  %v4401_v20 = vpop.xlane.xlu1 %4400 }
 0x9a5   : > { %v4438_v9 = vsub.f32 %v14525_v39, %v4401_v20  ;;  %v4439_v14 = vsub.f32 %v14529_v60, %v4401_v20  ;;  %v4034_v2 = vpop.xlane.xlu0 %4033 }
 0x9a6   : > { %11334 = vpow2.f32 %v4484_v1 }
 0x9a7   : > { %11336 = vpow2.f32 %v4486_v13  ;;  %v4488_v24 = vmul.f32 1.442695, %v4438_v9  ;;  %v4490_v38 = vmul.f32 1.442695, %v4439_v14 }
 0x9a8   : > { %v11331_v46 = vpop.eup %11330  ;;  %11338 = vrcp.f32 %v4034_v2  ;;  %v4037_v16 = vpop.xlane.xlu1 %4036 }
 0x9a9   : > { %11340 = vpow2.f32 %v4488_v24  ;;  %v4404_v45 = vpop.xlane.xlu0 %4403  ;;  %v4090_v39 = vmul.f32 %v11331_v46, %v14639_v31  ;;  %v4091_v60 = vmul.f32 %v11331_v46, %v14641_v32  ;;  %v3738_v24 = vld [vmem:[#allocation3 + $0x8] sm:$0xff] }
 0x9aa   : > { %11342 = vpow2.f32 %v4490_v38  ;;  %v4440_v54 = vsub.f32 %v14539_v35, %v4404_v45  ;;  %v4441_v33 = vsub.f32 %v14543_v41, %v4404_v45  ;;  %v3756_v38 = vld [vmem:[#allocation3 + $0x98] sm:$0xff] }
 0x9ab   : > { %v11333_v21 = vpop.eup %11332  ;;  %11344 = vrcp.f32 %v4037_v16 }
 0x9ac   : > { %v4092_v13 = vmul.f32 %v11333_v21, %v14643_v4  ;;  %v4492_v9 = vmul.f32 1.442695, %v4440_v54  ;;  %v4494_v17 = vmul.f32 1.442695, %v4441_v33  ;;  %v4407_v1 = vpop.xlane.xlu1 %4406  ;;  %v4093_v2 = vmul.f32 %v11333_v21, %v14649_v61  ;;  %v3740_v21 = vld [vmem:[#allocation3 + $0x18] sm:$0xff] }
 0x9ad   : > { %v4442_v20 = vsub.f32 %v14549_v26, %v4407_v1  ;;  %v4443_v42 = vsub.f32 %v14553_v6, %v4407_v1  ;;  %v4040_v35 = vpop.xlane.xlu0 %4039 }
 0x9ae   : > { %11346 = vpow2.f32 %v4492_v9  ;;  %v4123_v41 = vpack.c.bf16 %v4093_v2, %v4091_v60  ;;  %v4122_v45 = vpack.c.bf16 %v4092_v13, %v4090_v39 }
 0x9af   : > { %11348 = vpow2.f32 %v4494_v17  ;;  %v4496_v31 = vmul.f32 1.442695, %v4442_v20  ;;  %v4498_v14 = vmul.f32 1.442695, %v4443_v42  ;;  %v3758_v17 = vld [vmem:[#allocation3 + $0xa8] sm:$0xff] }
 0x9b0   : > { %v14859_v32 = vpop.eup %11334  ;;  %11350 = vrcp.f32 %v4040_v35  ;;  %4170 = vmatprep.mubr.bf16.mxu1 %v4123_v41  ;;  %v4043_v4 = vpop.xlane.xlu1 %4042 }
 0x9b1   : > { %v14861_v46 = vpop.eup %11336  ;;  %11352 = vpow2.f32 %v4496_v31  ;;  %4171 = vmatmul.mubr.bf16.vlgmr.msra.gmra.mrb[64].mxu1 %v4122_v45  ;;  %v4410_v26 = vpop.xlane.xlu0 %4409 }
 0x9b2   : > { %v11339_v6 = vpop.eup %11338  ;;  %11354 = vpow2.f32 %v4498_v14  ;;  %v4444_v61 = vsub.f32 %v14563_v11, %v4410_v26  ;;  %v4445_v16 = vsub.f32 %v14567_v15, %v4410_v26  ;;  %v4540_v54 = vadd.f32 %v14861_v46, %v14859_v32  ;;  %10234 = vmatpush3.bf16.msra.mxu1 %v3738_v24 }
 0x9b3   : > { %v14867_v33 = vpop.eup %11340  ;;  %11356 = vrcp.f32 %v4043_v4  ;;  %10235 = vmatprep.subr.bf16.mxu1 %v3756_v38  ;;  %v4095_v42 = vmul.f32 %v11339_v6, %v14660_v58  ;;  %v4094_v41 = vmul.f32 %v11339_v6, %v14655_v59  ;;  %v3760_v38 = vld [vmem:[#allocation3 + $0xb8] sm:$0xff] }
 0x9b4   : > { %v14869_v39 = vpop.eup %11342  ;;  %v4500_v60 = vmul.f32 1.442695, %v4444_v61  ;;  %v4502_v13 = vmul.f32 1.442695, %v4445_v16  ;;  %4541 = vadd.xlane.f32.xlu0 %v4540_v54  ;;  %v4413_v9 = vpop.xlane.xlu1 %4412  ;;  %v3744_v54 = vld [vmem:[#allocation3 + $0x38] sm:$0xff] }
 0x9b5   : > { %v11345_v1 = vpop.eup %11344  ;;  %v4446_v11 = vsub.f32 %v14573_v49, %v4413_v9  ;;  %v4447_v15 = vsub.f32 %v14577_v57, %v4413_v9  ;;  %v4046_v2 = vpop.xlane.xlu0 %4045  ;;  %v4543_v20 = vadd.f32 %v14869_v39, %v14867_v33  ;;  %v3742_v49 = vld [vmem:[#allocation3 + $0x28] sm:$0xff] }
 0x9b6   : > { %11358 = vpow2.f32 %v4500_v60  ;;  %v4097_v35 = vmul.f32 %v11345_v1, %v14668_v3  ;;  %v4096_v45 = vmul.f32 %v11345_v1, %v14662_v22  ;;  %10236 = vmatpush3.bf16.msra.mxu1 %v3740_v21 }
 0x9b7   : > { %11360 = vpow2.f32 %v4502_v13  ;;  %v4504_v31 = vmul.f32 1.442695, %v4446_v11  ;;  %v4506_v14 = vmul.f32 1.442695, %v4447_v15  ;;  %4544 = vadd.xlane.f32.xlu1 %v4543_v20  ;;  %10237 = vmatprep.subr.bf16.mxu1 %v3758_v17  ;;  %v3762_v17 = vld [vmem:[#allocation3 + $0xc8] sm:$0xff] }
 0x9b8   : > { %v14879_v57 = vpop.eup %11346  ;;  %11362 = vrcp.f32 %v4046_v2  ;;  %v4125_v24 = vpack.c.bf16 %v4097_v35, %v4095_v42  ;;  %v4049_v4 = vpop.xlane.xlu1 %4048  ;;  %v4124_v58 = vpack.c.bf16 %v4096_v45, %v4094_v41 }
 0x9b9   : > { %v14881_v26 = vpop.eup %11348  ;;  %11364 = vpow2.f32 %v4504_v31  ;;  %v4416_v59 = vpop.xlane.xlu0 %4415 }
 0x9ba   : > { %v11351_v3 = vpop.eup %11350  ;;  %11366 = vpow2.f32 %v4506_v14  ;;  %4178 = vmatprep.mubr.bf16.mxu1 %v4125_v24  ;;  %v4448_v22 = vsub.f32 %v14587_v10, %v4416_v59  ;;  %v4449_v6 = vsub.f32 %v14591_v27, %v4416_v59  ;;  %v4546_v61 = vadd.f32 %v14881_v26, %v14879_v57  ;;  %10238 = vmatpush3.bf16.msra.mxu1 %v3742_v49  ;;  %v3764_v49 = vld [vmem:[#allocation3 + $0xd8] sm:$0xff] }
 0x9bb   : > { %v14887_v16 = vpop.eup %11352  ;;  %11368 = vrcp.f32 %v4049_v4  ;;  %4179 = vmatmul.mubr.bf16.gmra.mrb[68].mxu1 %v4124_v58  ;;  %10239 = vmatprep.subr.bf16.mxu1 %v3760_v38  ;;  %v4099_v2 = vmul.f32 %v11351_v3, %v14682_v36  ;;  %v4098_v42 = vmul.f32 %v11351_v3, %v14677_v30  ;;  %v3748_v4 = vld [vmem:[#allocation3 + $0x58] sm:$0xff]  ;;  %v3766_v38 = vld [vmem:[#allocation3 + $0xe8] sm:$0xff] }
 0x9bc   : > { %v14889_v21 = vpop.eup %11354  ;;  %v4508_v60 = vmul.f32 1.442695, %v4448_v22  ;;  %v4510_v13 = vmul.f32 1.442695, %v4449_v6  ;;  %4547 = vadd.xlane.f32.xlu0 %v4546_v61  ;;  %v4419_v9 = vpop.xlane.xlu1 %4418 }
 0x9bd   : > { %v11357_v10 = vpop.eup %11356  ;;  %v4450_v27 = vsub.f32 %v14597_v56, %v4419_v9  ;;  %v4451_v1 = vsub.f32 %v14601_v55, %v4419_v9  ;;  %v4052_v11 = vpop.xlane.xlu0 %4051  ;;  %v4549_v15 = vadd.f32 %v14889_v21, %v14887_v16  ;;  %v3746_v55 = vld [vmem:[#allocation3 + $0x48] sm:$0xff] }
 0x9be   : > { %11370 = vpow2.f32 %v4508_v60  ;;  %v4101_v20 = vmul.f32 %v11357_v10, %v14690_v7  ;;  %v4100_v35 = vmul.f32 %v11357_v10, %v14684_v19  ;;  %10240 = vmatpush3.bf16.msra.mxu1 %v3744_v54 }
 0x9bf   : > { %11372 = vpow2.f32 %v4510_v13  ;;  %v4512_v41 = vmul.f32 1.442695, %v4450_v27  ;;  %v4514_v45 = vmul.f32 1.442695, %v4451_v1  ;;  %4550 = vadd.xlane.f32.xlu1 %v4549_v15  ;;  %10241 = vmatprep.subr.bf16.mxu1 %v3762_v17  ;;  %v3750_v13 = vld [vmem:[#allocation3 + $0x68] sm:$0xff]  ;;  %v3768_v1 = vld [vmem:[#allocation3 + $0xf8] sm:$0xff] }
 0x9c0   : > { %v14899_v56 = vpop.eup %11358  ;;  %11374 = vrcp.f32 %v4052_v11  ;;  %v4127_v31 = vpack.c.bf16 %v4101_v20, %v4099_v2  ;;  %v4055_v14 = vpop.xlane.xlu1 %4054  ;;  %v4126_v36 = vpack.c.bf16 %v4100_v35, %v4098_v42 }
 0x9c1   : > { %v14901_v24 = vpop.eup %11360  ;;  %11376 = vpow2.f32 %v4512_v41 }
 0x9c2   : > { %v11363_v30 = vpop.eup %11362  ;;  %11378 = vpow2.f32 %v4514_v45  ;;  %4186 = vmatprep.mubr.bf16.mxu1 %v4127_v31  ;;  %v4552_v19 = vadd.f32 %v14901_v24, %v14899_v56  ;;  %10242 = vmatpush3.bf16.msra.mxu1 %v3746_v55 }
 0x9c3   : > { %v14905_v7 = vpop.eup %11364  ;;  %11380 = vrcp.f32 %v4055_v14  ;;  %4187 = vmatmul.mubr.bf16.gmra.mrb[72].mxu1 %v4126_v36  ;;  %10243 = vmatprep.subr.bf16.mxu1 %v3764_v49  ;;  %v4103_v6 = vmul.f32 %v11363_v30, %v14704_v53  ;;  %v4102_v54 = vmul.f32 %v11363_v30, %v14699_v5 }
 0x9c4   : > { %v14907_v58 = vpop.eup %11366  ;;  %4553 = vadd.xlane.f32.xlu0 %v4552_v19 }
 0x9c5   : > { %v11369_v59 = vpop.eup %11368  ;;  %v4058_v3 = vpop.xlane.xlu0 %4057  ;;  %v4555_v22 = vadd.f32 %v14907_v58, %v14905_v7 }
 0x9c6   : > { %v4105_v61 = vmul.f32 %v11369_v59, %v14712_v34  ;;  %v4104_v60 = vmul.f32 %v11369_v59, %v14706_v44  ;;  %10244 = vmatpush3.bf16.msra.mxu1 %v3748_v4  ;;  %11382 = vrcp.f32 %v4058_v3  ;;  %v3752_v34 = vld [vmem:[#allocation3 + $0x78] sm:$0xff] }
 0x9c7   : > { %4556 = vadd.xlane.f32.xlu1 %v4555_v22  ;;  %10245 = vmatprep.subr.bf16.mxu1 %v3766_v38 }
 0x9c8   : > { %v14915_v9 = vpop.eup %11370  ;;  %v4129_v17 = vpack.c.bf16 %v4105_v61, %v4103_v6  ;;  %v4061_v10 = vpop.xlane.xlu1 %4060  ;;  %v4128_v27 = vpack.c.bf16 %v4104_v60, %v4102_v54 }
 0x9c9   : > { %v14917_v11 = vpop.eup %11372  ;;  %11384 = vrcp.f32 %v4061_v10 }
 0x9ca   : > { %v11375_v53 = vpop.eup %11374  ;;  %4194 = vmatprep.mubr.bf16.mxu1 %v4129_v17  ;;  %v4558_v5 = vadd.f32 %v14917_v11, %v14915_v9  ;;  %10246 = vmatpush3.bf16.msra.mxu1 %v3750_v13 }
 0x9cb   : > { %v14921_v44 = vpop.eup %11376  ;;  %4195 = vmatmul.mubr.bf16.gmra.mrb[76].mxu1 %v4128_v27  ;;  %10247 = vmatprep.subr.bf16.mxu1 %v3768_v1  ;;  %v4107_v35 = vmul.f32 %v11375_v53, %v14726_v62  ;;  %v4106_v45 = vmul.f32 %v11375_v53, %v14721_v40  ;;  %v17913_v40 = vld [vmem:[#allocation93_spill] sm:$0xff] }
 0x9cc   : > { %v14923_v15 = vpop.eup %11378  ;;  %4559 = vadd.xlane.f32.xlu0 %v4558_v5 }
 0x9cd   : > { %v11381_v2 = vpop.eup %11380  ;;  %v4561_v20 = vadd.f32 %v14923_v15, %v14921_v44 }
 0x9ce   : > { %v4064_v42 = vpop.xlane.xlu0 %4063  ;;  %v4109_v41 = vmul.f32 %v11381_v2, %v14734_v63  ;;  %v4108_v55 = vmul.f32 %v11381_v2, %v14728_v28  ;;  %10248 = vmatpush3.bf16.msra.mxu1 %v3752_v34  ;;  %v17914_v34 = vld [vmem:[#allocation94_spill] sm:$0xff] }
 0x9cf   : > { %11386 = vrcp.f32 %v4064_v42  ;;  %4562 = vadd.xlane.f32.xlu1 %v4561_v20 }
 0x9d0   : > { %v4131_v31 = vpack.c.bf16 %v4109_v41, %v4107_v35  ;;  %v4067_v14 = vpop.xlane.xlu1 %4066  ;;  %v4130_v36 = vpack.c.bf16 %v4108_v55, %v4106_v45  ;;  %v11383_v49 = vpop.eup %11382 }
 0x9d1   : > { %11388 = vrcp.f32 %v4067_v14  ;;  %v4111_v19 = vmul.f32 %v11383_v49, %v14745_v12  ;;  %v4110_v4 = vmul.f32 %v11383_v49, %v17913_v40 }
 0x9d2   : > { %4202 = vmatprep.mubr.bf16.mxu1 %v4131_v31 }
 0x9d3   : > { %v11385_v30 = vpop.eup %11384  ;;  %4203 = vmatmul.mubr.bf16.gmra.mrb[80].mxu1 %v4130_v36  ;;  %v17915_v36 = vld [vmem:[#allocation86_spill] sm:$0xff] }
 0x9d4   : > { %v4113_v62 = vmul.f32 %v11385_v30, %v14753_v48  ;;  %v4112_v63 = vmul.f32 %v11385_v30, %v14747_v37  ;;  %v17916_v30 = vld [vmem:[#allocation95_spill] sm:$0xff] }
 0x9d6   : > { %v4070_v28 = vpop.xlane.xlu0 %4069  ;;  %v4133_v38 = vpack.c.bf16 %v4113_v62, %v4111_v19  ;;  %v4132_v59 = vpack.c.bf16 %v4112_v63, %v4110_v4  ;;  %v17917_v63 = vld [vmem:[#allocation97_spill] sm:$0xff] }
 0x9d7   : > { %11390 = vrcp.f32 %v4070_v28 }
 0x9d8   : > { %4210 = vmatprep.mubr.bf16.mxu1 %v4133_v38  ;;  %v4073_v3 = vpop.xlane.xlu1 %4072  ;;  %v17918_v38 = vld [vmem:[#allocation98_spill] sm:$0xff] }
 0x9d9   : > { %v11387_v22 = vpop.eup %11386  ;;  %11392 = vrcp.f32 %v4073_v3  ;;  %v17919_v3 = vld [vmem:[#allocation90_spill] sm:$0xff] }
 0x9da   : > { %v4518_v6 = vpop.xlane.xlu0 %4517  ;;  %v4115_v12 = vmul.f32 %v11387_v22, %v14765_v43  ;;  %v4114_v60 = vmul.f32 %v11387_v22, %v14761_v18  ;;  %v17920_v22 = vld [vmem:[#allocation96_spill] sm:$0xff] }
 0x9db   : > { %v11389_v61 = vpop.eup %11388  ;;  %4211 = vmatmul.mubr.bf16.gmra.mrb[84].mxu1 %v4132_v59  ;;  %11394 = vrcp.f32 %v4518_v6 }
 0x9dc   : > { %v4521_v54 = vpop.xlane.xlu1 %4520  ;;  %v4117_v48 = vmul.f32 %v11389_v61, %v14770_v29  ;;  %v4116_v37 = vmul.f32 %v11389_v61, %v14767_v50  ;;  %v17921_v61 = vld [vmem:[#allocation88_spill] sm:$0xff] }
 0x9dd   : > { %11396 = vrcp.f32 %v4521_v54 }
 0x9de   : > { %v4135_v13 = vpack.c.bf16 %v4117_v48, %v4115_v12  ;;  %v4134_v17 = vpack.c.bf16 %v4116_v37, %v4114_v60  ;;  %v4524_v10 = vpop.xlane.xlu0 %4523 }
 0x9e0   : > { %4218 = vmatprep.mubr.bf16.mxu1 %v4135_v13  ;;  %v4527_v27 = vpop.xlane.xlu1 %4526  ;;  %v17922_v13 = vld [vmem:[#allocation89_spill] sm:$0xff] }
 0x9e1   : > { %v11391_v1 = vpop.eup %11390  ;;  %11398 = vrcp.f32 %v4527_v27  ;;  %v17923_v27 = vld [vmem:[#allocation87_spill] sm:$0xff] }
 0x9e2   : > { %11400 = vrcp.f32 %v4524_v10  ;;  %v4119_v5 = vmul.f32 %v11391_v1, %v14785_v47  ;;  %v4118_v2 = vmul.f32 %v11391_v1, %v17914_v34  ;;  %v4530_v41 = vpop.xlane.xlu0 %4529 }
 0x9e3   : > { %v11393_v53 = vpop.eup %11392  ;;  %4219 = vmatmul.mubr.bf16.gmra.mrb[88].mxu1 %v4134_v17 }
 0x9e4   : > { %v4121_v43 = vmul.f32 %v11393_v53, %v14790_v25  ;;  %v4120_v29 = vmul.f32 %v11393_v53, %v14787_v51  ;;  %v4533_v18 = vpop.xlane.xlu1 %4532  ;;  %v17924_v53 = vld [vmem:[#allocation92_spill] sm:$0xff] }
 0x9e5   : > { %v11395_v50 = vpop.eup %11394  ;;  %11402 = vrcp.f32 %v4533_v18 }
 0x9e6   : > { %v4137_v20 = vpack.c.bf16 %v4121_v43, %v4119_v5  ;;  %v4136_v35 = vpack.c.bf16 %v4120_v29, %v4118_v2  ;;  %v4581_v45 = vmul.f32 %v11395_v50, %v14799_v8  ;;  %11404 = vrcp.f32 %v4530_v41  ;;  %v4536_v62 = vpop.xlane.xlu0 %4535  ;;  %v17926_v2 = vld [vmem:[#allocation91_spill] sm:$0xff]  ;;  %v10951_v41 = vld [vmem:[#allocation20 + $0x94] ss:$8 sps:$4 sm:$0xff]  }
 0x9e7   : > { %v11397_v42 = vpop.eup %11396  ;;  %v4580_v19 = vmul.f32 %v11395_v50, %v17916_v30  ;;  %v17925_v50 = vld [vmem:[#allocation99_spill] sm:$0xff] }
 0x9e8   : > { %4226 = vmatprep.mubr.bf16.mxu1 %v4137_v20  ;;  %v4583_v55 = vmul.f32 %v11397_v42, %v14807_v52  ;;  %v4582_v25 = vmul.f32 %v11397_v42, %v14803_v0  ;;  %v4539_v14 = vpop.xlane.xlu1 %4538  ;;  %v10948_v42 = vld [vmem:[#allocation20 + $0x84] ss:$8 sps:$4 sm:$0xff]  }
 0x9e9   : > { %11406 = vrcp.f32 %v4539_v14  ;;  %4829 = vmatprep.subr.bf16.mxu0 %v10948_v42  ;;  %v10963_v14 = vld [vmem:[#allocation20 + $0xd4] ss:$8 sps:$4 sm:$0xff]  }
 0x9ea   : > { %v4613_v31 = vpack.c.bf16 %v4583_v55, %v4581_v45  ;;  %v4612_v8 = vpack.c.bf16 %v4582_v25, %v4580_v19  ;;  %11408 = vrcp.f32 %v4536_v62  ;;  %v10954_v45 = vld [vmem:[#allocation20 + $0xa4] ss:$8 sps:$4 sm:$0xff]   ;;  %v10952_v55 = vld [vmem:[#allocation20 + $0xa0] ss:$8 sps:$4 sm:$0xff]  }
 0x9eb   : > { %v11399_v47 = vpop.eup %11398  ;;  %4227 = vmatmul.mubr.bf16.gmra.mrb[92].mxu1 %v4136_v35  ;;  %v10946_v35 = vld [vmem:[#allocation20 + $0x80] ss:$8 sps:$4 sm:$0xff]   ;;  %v10966_v19 = vld [vmem:[#allocation20 + $0xe4] ss:$8 sps:$4 sm:$0xff]  }
 0x9ec   : > { %4660 = vmatprep.mubr.bf16.mxu1 %v4613_v31  ;;  %v11401_v51 = vpop.eup %11400  ;;  %v4587_v49 = vmul.f32 %v11399_v47, %v17915_v36  ;;  %v4586_v59 = vmul.f32 %v11399_v47, %v17918_v38  ;;  %4830 = vmatpush1.bf16.msra.mxu0 %v10946_v35  ;;  %v10957_v31 = vld [vmem:[#allocation20 + $0xb4] ss:$8 sps:$4 sm:$0xff]   ;;  %v10955_v47 = vld [vmem:[#allocation20 + $0xb0] ss:$8 sps:$4 sm:$0xff]   ;;  %v10958_v25 = vld [vmem:[#allocation20 + $0xc0] ss:$8 sps:$4 sm:$0xff]  }
 0x9ed   : > { %v4585_v40 = vmul.f32 %v11401_v51, %v17917_v63  ;;  %v4584_v6 = vmul.f32 %v11401_v51, %v17920_v22  ;;  %4831 = vmatprep.subr.bf16.mxu0 %v10951_v41  ;;  %v10960_v51 = vld [vmem:[#allocation20 + $0xc4] ss:$8 sps:$4 sm:$0xff]   ;;  %v10964_v62 = vld [vmem:[#allocation20 + $0xe0] ss:$8 sps:$4 sm:$0xff]   ;;  %v10969_v63 = vld [vmem:[#allocation20 + $0xf4] ss:$8 sps:$4 sm:$0xff]  }
 0x9ef   : > { %v4615_v52 = vpack.c.bf16 %v4587_v49, %v4585_v40  ;;  %v11403_v4 = vpop.eup %11402  ;;  %v4614_v12 = vpack.c.bf16 %v4586_v59, %v4584_v6  ;;  %v10961_v49 = vld [vmem:[#allocation20 + $0xd0] ss:$8 sps:$4 sm:$0xff]  }
 0x9f0   : > { %v11405_v28 = vpop.eup %11404  ;;  %v4591_v0 = vmul.f32 %v11403_v4, %v17919_v3  ;;  %v4590_v17 = vmul.f32 %v11403_v4, %v17922_v13 }
 0x9f1   : > { %v4589_v54 = vmul.f32 %v11405_v28, %v17921_v61  ;;  %v4588_v1 = vmul.f32 %v11405_v28, %v17923_v27 }
 0x9f3   : > { %4661 = vmatmul.mubr.bf16.vlgmr.msra.gmra.mrb[96].mxu1 %v4612_v8  ;;  %v4617_v48 = vpack.c.bf16 %v4591_v0, %v4589_v54  ;;  %v11407_v37 = vpop.eup %11406  ;;  %v4616_v43 = vpack.c.bf16 %v4590_v17, %v4588_v1  ;;  %v10967_v8 = vld [vmem:[#allocation20 + $0xf0] ss:$8 sps:$4 sm:$0xff]  }
 0x9f4   : > { %4668 = vmatprep.mubr.bf16.mxu1 %v4615_v52  ;;  %v11409_v60 = vpop.eup %11408  ;;  %v4595_v10 = vmul.f32 %v11407_v37, %v14843_v23  ;;  %v4594_v34 = vmul.f32 %v11407_v37, %v17925_v50  ;;  %v10949_v23 = vld [vmem:[#allocation20 + $0x90] ss:$8 sps:$4 sm:$0xff]  }
 0x9f5   : > { %v4593_v5 = vmul.f32 %v11409_v60, %v17924_v53  ;;  %v4592_v18 = vmul.f32 %v11409_v60, %v17926_v2  ;;  %4832 = vmatpush1.bf16.msra.mxu0 %v10949_v23 }
 0x9f6   : > { %4833 = vmatprep.subr.bf16.mxu0 %v10954_v45 }
 0x9f7   : > { %v4619_v29 = vpack.c.bf16 %v4595_v10, %v4593_v5  ;;  %v4618_v20 = vpack.c.bf16 %v4594_v34, %v4592_v18 }
 0x9f9   : > { %4834 = vmatpush1.bf16.msra.mxu0 %v10952_v55 }
 0x9fa   : > { %4835 = vmatprep.subr.bf16.mxu0 %v10957_v31 }
 0x9fb   : > { %4669 = vmatmul.mubr.bf16.gmra.mrb[100].mxu1 %v4614_v12 }
 0x9fc   : > { %4676 = vmatprep.mubr.bf16.mxu1 %v4617_v48 }
 0x9fd   : > { %4836 = vmatpush1.bf16.msra.mxu0 %v10955_v47 }
 0x9fe   : > { %4837 = vmatprep.subr.bf16.mxu0 %v10960_v51 }
 0xa01   : > { %4838 = vmatpush1.bf16.msra.mxu0 %v10958_v25 }
 0xa02   : > { %4839 = vmatprep.subr.bf16.mxu0 %v10963_v14 }
 0xa03   : > { %4677 = vmatmul.mubr.bf16.gmra.mrb[104].mxu1 %v4616_v43  ;;  %v10972_v43 = vld [vmem:[#allocation20 + $0x4] ss:$8 sps:$4 sm:$0xff]  }
 0xa04   : > { %4684 = vmatprep.mubr.bf16.mxu1 %v4619_v29 }
 0xa05   : > { %4840 = vmatpush1.bf16.msra.mxu0 %v10961_v49 }
 0xa06   : > { %4841 = vmatprep.subr.bf16.mxu0 %v10966_v19 }
 0xa09   : > { %4842 = vmatpush1.bf16.msra.mxu0 %v10964_v62 }
 0xa0a   : > { %4843 = vmatprep.subr.bf16.mxu0 %v10969_v63 }
 0xa0b   : > { %4685 = vmatmul.mubr.bf16.gmra.mrb[108].mxu1 %v4618_v20 }
 0xa0d   : > { %4844 = vmatpush1.bf16.msra.mxu0 %v10967_v8 }
 0xa0e   : > { %5022 = vmatprep.subr.bf16.mxu0 %v10972_v43 }
 0xa41   : > { %v4542_v36 = vpop.xlane.xlu0 %4541 }
 0xa42   : > { %11410 = vrcp.f32 %v4542_v36 }
 0xa44   : > { %v4545_v30 = vpop.xlane.xlu1 %4544 }
 0xa45   : > { %11412 = vrcp.f32 %v4545_v30 }
 0xa49   : > { %v4548_v40 = vpop.xlane.xlu0 %4547 }
 0xa4a   : > { %11414 = vrcp.f32 %v4548_v40 }
 0xa4c   : > { %v4551_v52 = vpop.xlane.xlu1 %4550  ;;  %v11411_v4 = vpop.eup %11410 }
 0xa4d   : > { %11416 = vrcp.f32 %v4551_v52  ;;  %v4597_v38 = vmul.f32 %v11411_v4, %v14861_v46  ;;  %v4596_v3 = vmul.f32 %v11411_v4, %v14859_v32 }
 0xa4f   : > { %v11413_v28 = vpop.eup %11412 }
 0xa50   : > { %v4599_v59 = vmul.f32 %v11413_v28, %v14869_v39  ;;  %v4598_v0 = vmul.f32 %v11413_v28, %v14867_v33 }
 0xa51   : > { %v4554_v22 = vpop.xlane.xlu0 %4553 }
 0xa52   : > { %v4621_v6 = vpack.c.bf16 %v4599_v59, %v4597_v38  ;;  %v4620_v61 = vpack.c.bf16 %v4598_v0, %v4596_v3  ;;  %11418 = vrcp.f32 %v4554_v22 }
 0xa54   : > { %4692 = vmatprep.mubr.bf16.mxu1 %v4621_v6  ;;  %v4557_v54 = vpop.xlane.xlu1 %4556  ;;  %v11415_v12 = vpop.eup %11414 }
 0xa55   : > { %11420 = vrcp.f32 %v4557_v54  ;;  %4693 = vmatmul.mubr.bf16.gmra.mrb[112].mxu1 %v4620_v61  ;;  %v4601_v37 = vmul.f32 %v11415_v12, %v14881_v26  ;;  %v4600_v39 = vmul.f32 %v11415_v12, %v14879_v57 }
 0xa57   : > { %v11417_v48 = vpop.eup %11416 }
 0xa58   : > { %v4603_v46 = vmul.f32 %v11417_v48, %v14889_v21  ;;  %v4602_v32 = vmul.f32 %v11417_v48, %v14887_v16 }
 0xa59   : > { %v4560_v60 = vpop.xlane.xlu0 %4559 }
 0xa5a   : > { %v4623_v33 = vpack.c.bf16 %v4603_v46, %v4601_v37  ;;  %v4622_v13 = vpack.c.bf16 %v4602_v32, %v4600_v39  ;;  %11422 = vrcp.f32 %v4560_v60 }
 0xa5c   : > { %4700 = vmatprep.mubr.bf16.mxu1 %v4623_v33  ;;  %v4563_v17 = vpop.xlane.xlu1 %4562  ;;  %v11419_v10 = vpop.eup %11418 }
 0xa5d   : > { %11424 = vrcp.f32 %v4563_v17  ;;  %4701 = vmatmul.mubr.bf16.gmra.mrb[116].mxu1 %v4622_v13  ;;  %v4605_v1 = vmul.f32 %v11419_v10, %v14901_v24  ;;  %v4604_v21 = vmul.f32 %v11419_v10, %v14899_v56 }
 0xa5f   : > { %v11421_v27 = vpop.eup %11420 }
 0xa60   : > { %v4607_v26 = vmul.f32 %v11421_v27, %v14907_v58  ;;  %v4606_v57 = vmul.f32 %v11421_v27, %v14905_v7 }
 0xa62   : > { %v4625_v53 = vpack.c.bf16 %v4607_v26, %v4605_v1  ;;  %v4624_v16 = vpack.c.bf16 %v4606_v57, %v4604_v21 }
 0xa64   : > { %4708 = vmatprep.mubr.bf16.mxu1 %v4625_v53  ;;  %v11423_v5 = vpop.eup %11422 }
 0xa65   : > { %4709 = vmatmul.mubr.bf16.gmra.mrb[120].mxu1 %v4624_v16  ;;  %v4609_v50 = vmul.f32 %v11423_v5, %v14917_v11  ;;  %v4608_v2 = vmul.f32 %v11423_v5, %v14915_v9 }
 0xa67   : > { %v11425_v29 = vpop.eup %11424 }
 0xa68   : > { %v4611_v34 = vmul.f32 %v11425_v29, %v14923_v15  ;;  %v4610_v24 = vmul.f32 %v11425_v29, %v14921_v44 }
 0xa6a   : > { %v4627_v58 = vpack.c.bf16 %v4611_v34, %v4609_v50  ;;  %v4626_v56 = vpack.c.bf16 %v4610_v24, %v4608_v2 }
 0xa6c   : > { %4716 = vmatprep.mubr.bf16.mxu1 %v4627_v58  ;;  %v10970_v58 = vld [vmem:[#allocation20] ss:$8 sps:$4 sm:$0xff]  }
 0xa6d   : > { %4717 = vmatmul.mubr.bf16.gmra.mrb[124].mxu1 %v4626_v56 }
 0xa84   : > { %v10153_v7 = vpop.f32.mrb[64].mxu1 }
 0xa85   : > { %v10154_v18 = vpop.f32.mrb[65].mxu1 }
 0xa86   : > { %v14975_v20 = vadd.f32 %v10154_v18, %v10153_v7  ;;  %v10156_v42 = vpop.f32.mrb[66].mxu1  ;;  %v10975_v7 = vld [vmem:[#allocation20 + $0x14] ss:$8 sps:$4 sm:$0xff]  }
 0xa87   : > { %v10157_v35 = vpop.f32.mrb[67].mxu1 }
 0xa88   : > { %v14977_v41 = vadd.f32 %v10157_v35, %v10156_v42  ;;  %v17927_v35 = vmov 0  }
 0xa8a   : > { %v4235_v11 = vpack.c.bf16 %v14977_v41, %v14975_v20  ;;  %v5135_v20 = vld [vmem:[%s17928_s21] sm:$0x3]  ;;  %v17929_v41 = vld [vmem:[#allocation52_spill] sm:$0xff]  ;;  %s18104_s21 = sld [smem:[#allocation126_spill]] }
 0xa8e   : > { %v10159_v15 = vpop.f32.mrb[68].mxu1 }
 0xa8f   : > { %v10160_v9 = vpop.f32.mrb[69].mxu1 }
 0xa90   : > { %v14981_v23 = vadd.f32 %v10160_v9, %v10159_v15  ;;  %v10162_v44 = vpop.f32.mrb[70].mxu1  ;;  %v10973_v15 = vld [vmem:[#allocation20 + $0x10] ss:$8 sps:$4 sm:$0xff]  }
 0xa91   : > { %v10163_v45 = vpop.f32.mrb[71].mxu1 }
 0xa92   : > { %v14983_v55 = vadd.f32 %v10163_v45, %v10162_v44  ;;  %v10978_v45 = vld [vmem:[#allocation20 + $0x24] ss:$8 sps:$4 sm:$0xff]  }
 0xa94   : > { %v4236_v31 = vpack.c.bf16 %v14983_v55, %v14981_v23  ;;  %v17930_v23 = vld [vmem:[#allocation53_spill] sm:$0xff] }
 0xa95   : > { %v15069_v55 = vrot.slane %v5135_v20, %v17930_v23 }
 0xa96   : > { %v10165_v47 = vpop.f32.mrb[72].mxu1 }
 0xa97   : > { %v10166_v51 = vpop.f32.mrb[73].mxu1 }
 0xa98   : > { %v14987_v25 = vadd.f32 %v10166_v51, %v10165_v47  ;;  %v10168_v14 = vpop.f32.mrb[74].mxu1 }
 0xa99   : > { %v10169_v36 = vpop.f32.mrb[75].mxu1 }
 0xa9a   : > { %v14989_v49 = vadd.f32 %v10169_v36, %v10168_v14  ;;  %v10976_v14 = vld [vmem:[#allocation20 + $0x20] ss:$8 sps:$4 sm:$0xff]  }
 0xa9c   : > { %v4237_v30 = vpack.c.bf16 %v14989_v49, %v14987_v25 }
 0xa9e   : > { %v10171_v19 = vpop.f32.mrb[76].mxu1 }
 0xa9f   : > { %v10172_v62 = vpop.f32.mrb[77].mxu1 }
 0xaa0   : > { %v14993_v63 = vadd.f32 %v10172_v62, %v10171_v19  ;;  %v10174_v40 = vpop.f32.mrb[78].mxu1  ;;  %v10981_v19 = vld [vmem:[#allocation20 + $0x34] ss:$8 sps:$4 sm:$0xff]  }
 0xaa1   : > { %v10175_v8 = vpop.f32.mrb[79].mxu1 }
 0xaa2   : > { %v14995_v52 = vadd.f32 %v10175_v8, %v10174_v40  ;;  %v10979_v8 = vld [vmem:[#allocation20 + $0x30] ss:$8 sps:$4 sm:$0xff]  }
 0xaa4   : > { %v4238_v4 = vpack.c.bf16 %v14995_v52, %v14993_v63  ;;  %v17931_v52 = vld [vmem:[#allocation54_spill] sm:$0xff] }
 0xaa6   : > { %v10177_v28 = vpop.f32.mrb[80].mxu1 }
 0xaa7   : > { %v10178_v38 = vpop.f32.mrb[81].mxu1 }
 0xaa8   : > { %v14999_v59 = vadd.f32 %v10178_v38, %v10177_v28  ;;  %v10180_v3 = vpop.f32.mrb[82].mxu1 }
 0xaa9   : > { %v10181_v0 = vpop.f32.mrb[83].mxu1 }
 0xaaa   : > { %v15001_v22 = vadd.f32 %v10181_v0, %v10180_v3  ;;  %v10984_v3 = vld [vmem:[#allocation20 + $0x44] ss:$8 sps:$4 sm:$0xff]  }
 0xaac   : > { %v4239_v6 = vpack.c.bf16 %v15001_v22, %v14999_v59 }
 0xaae   : > { %v10183_v61 = vpop.f32.mrb[84].mxu1 }
 0xaaf   : > { %v10184_v54 = vpop.f32.mrb[85].mxu1 }
 0xab0   : > { %v15005_v12 = vadd.f32 %v10184_v54, %v10183_v61  ;;  %v10186_v48 = vpop.f32.mrb[86].mxu1  ;;  %v10982_v54 = vld [vmem:[#allocation20 + $0x40] ss:$8 sps:$4 sm:$0xff]  }
 0xab1   : > { %v10187_v37 = vpop.f32.mrb[87].mxu1 }
 0xab2   : > { %v15007_v46 = vadd.f32 %v10187_v37, %v10186_v48  ;;  %v10987_v37 = vld [vmem:[#allocation20 + $0x54] ss:$8 sps:$4 sm:$0xff]  }
 0xab4   : > { %v4240_v39 = vpack.c.bf16 %v15007_v46, %v15005_v12 }
 0xab6   : > { %v10189_v32 = vpop.f32.mrb[88].mxu1 }
 0xab7   : > { %v10190_v60 = vpop.f32.mrb[89].mxu1 }
 0xab8   : > { %v15011_v33 = vadd.f32 %v10190_v60, %v10189_v32  ;;  %v10192_v13 = vpop.f32.mrb[90].mxu1 }
 0xab9   : > { %v10193_v17 = vpop.f32.mrb[91].mxu1 }
 0xaba   : > { %v15013_v10 = vadd.f32 %v10193_v17, %v10192_v13  ;;  %v10985_v13 = vld [vmem:[#allocation20 + $0x50] ss:$8 sps:$4 sm:$0xff]  }
 0xabc   : > { %v4241_v27 = vpack.c.bf16 %v15013_v10, %v15011_v33  ;;  %v17937_v10 = vld [vmem:[#allocation57_spill] sm:$0xff] }
 0xabe   : > { %v10195_v1 = vpop.f32.mrb[92].mxu1 }
 0xabf   : > { %v10196_v26 = vpop.f32.mrb[93].mxu1 }
 0xac0   : > { %v15017_v21 = vadd.f32 %v10196_v26, %v10195_v1  ;;  %v10198_v57 = vpop.f32.mrb[94].mxu1  ;;  %v10990_v26 = vld [vmem:[#allocation20 + $0x64] ss:$8 sps:$4 sm:$0xff]  }
 0xac1   : > { %v10199_v53 = vpop.f32.mrb[95].mxu1 }
 0xac2   : > { %v15019_v16 = vadd.f32 %v10199_v53, %v10198_v57 }
 0xac4   : > { %v4242_v5 = vpack.c.bf16 %v15019_v16, %v15017_v21 }
 0xac6   : > { %v10249_v43 = vpop.f32.mrb[96].mxu1 }
 0xac7   : > { %v10250_v29 = vpop.f32.mrb[97].mxu1 }
 0xac8   : > { %v10251_v50 = vadd.f32 %v10250_v29, %v10249_v43  ;;  %v10252_v34 = vpop.f32.mrb[98].mxu1  ;;  %v10988_v43 = vld [vmem:[#allocation20 + $0x60] ss:$8 sps:$4 sm:$0xff]  }
 0xac9   : > { %v10253_v2 = vpop.f32.mrb[99].mxu1 }
 0xaca   : > { %v10254_v24 = vadd.f32 %v10253_v2, %v10252_v34  ;;  %v10991_v34 = vld [vmem:[#allocation20 + $0x70] ss:$8 sps:$4 sm:$0xff]  }
 0xacc   : > { %v4725_v56 = vpack.c.bf16 %v10254_v24, %v10251_v50  ;;  %v10993_v50 = vld [vmem:[#allocation20 + $0x74] ss:$8 sps:$4 sm:$0xff]  }
 0xace   : > { %v10255_v18 = vpop.f32.mrb[100].mxu1  ;;  %4862 = vmatmul.mubr.bf16.vlgmr.msra.gmra.mrb[64].mxu0 %v4725_v56 }
 0xacf   : > { %v10256_v42 = vpop.f32.mrb[101].mxu1  ;;  %4871 = vmatprep.mubr.bf16.mxu0 %v17927_v35  ;;  %5023 = vmatpush1.bf16.msra.mxu0 %v10970_v58 }
 0xad0   : > { %v10257_v9 = vadd.f32 %v10256_v42, %v10255_v18  ;;  %v10258_v44 = vpop.f32.mrb[102].mxu1  ;;  %5024 = vmatprep.subr.bf16.mxu0 %v10975_v7 }
 0xad1   : > { %v10259_v47 = vpop.f32.mrb[103].mxu1 }
 0xad2   : > { %v10260_v51 = vadd.f32 %v10259_v47, %v10258_v44 }
 0xad3   : > { %5025 = vmatpush1.bf16.msra.mxu0 %v10973_v15 }
 0xad4   : > { %v4726_v36 = vpack.c.bf16 %v10260_v51, %v10257_v9  ;;  %5026 = vmatprep.subr.bf16.mxu0 %v10978_v45 }
 0xad6   : > { %v10261_v62 = vpop.f32.mrb[104].mxu1  ;;  %4872 = vmatmul.mubr.bf16.gmra.mrb[68].mxu0 %v4726_v36 }
 0xad7   : > { %v10262_v40 = vpop.f32.mrb[105].mxu1  ;;  %4881 = vmatprep.mubr.bf16.mxu0 %v17927_v35  ;;  %5027 = vmatpush1.bf16.msra.mxu0 %v10976_v14 }
 0xad8   : > { %v10263_v28 = vadd.f32 %v10262_v40, %v10261_v62  ;;  %v10264_v38 = vpop.f32.mrb[106].mxu1  ;;  %5028 = vmatprep.subr.bf16.mxu0 %v10981_v19 }
 0xad9   : > { %v10265_v0 = vpop.f32.mrb[107].mxu1 }
 0xada   : > { %v10266_v61 = vadd.f32 %v10265_v0, %v10264_v38 }
 0xadb   : > { %5029 = vmatpush1.bf16.msra.mxu0 %v10979_v8 }
 0xadc   : > { %v4727_v48 = vpack.c.bf16 %v10266_v61, %v10263_v28  ;;  %5030 = vmatprep.subr.bf16.mxu0 %v10984_v3 }
 0xade   : > { %v10267_v32 = vpop.f32.mrb[108].mxu1  ;;  %4882 = vmatmul.mubr.bf16.gmra.mrb[72].mxu0 %v4727_v48 }
 0xadf   : > { %v10268_v60 = vpop.f32.mrb[109].mxu1  ;;  %4891 = vmatprep.mubr.bf16.mxu0 %v17927_v35  ;;  %5031 = vmatpush1.bf16.msra.mxu0 %v10982_v54 }
 0xae0   : > { %v10269_v17 = vadd.f32 %v10268_v60, %v10267_v32  ;;  %v10270_v1 = vpop.f32.mrb[110].mxu1  ;;  %5032 = vmatprep.subr.bf16.mxu0 %v10987_v37 }
 0xae1   : > { %v10271_v57 = vpop.f32.mrb[111].mxu1 }
 0xae2   : > { %v10272_v53 = vadd.f32 %v10271_v57, %v10270_v1  ;;  %v17939_v1 = vld [vmem:[#allocation58_spill] sm:$0xff] }
 0xae3   : > { %5033 = vmatpush1.bf16.msra.mxu0 %v10985_v13 }
 0xae4   : > { %v4728_v29 = vpack.c.bf16 %v10272_v53, %v10269_v17  ;;  %5034 = vmatprep.subr.bf16.mxu0 %v10990_v26 }
 0xae6   : > { %4892 = vmatmul.mubr.bf16.gmra.mrb[76].mxu0 %v4728_v29 }
 0xae7   : > { %4901 = vmatprep.mubr.bf16.mxu0 %v17927_v35  ;;  %5035 = vmatpush1.bf16.msra.mxu0 %v10988_v43  ;;  %v17941_v43 = vld [vmem:[#allocation59_spill] sm:$0xff] }
 0xae8   : > { %5036 = vmatprep.subr.bf16.mxu0 %v10993_v50 }
 0xaeb   : > { %5037 = vmatpush1.bf16.msra.mxu0 %v10991_v34  ;;  %v17943_v34 = vld [vmem:[#allocation60_spill] sm:$0xff] }
 0xb28   : > { %v10273_v2 = vpop.f32.mrb[112].mxu1 }
 0xb29   : > { %v10274_v24 = vpop.f32.mrb[113].mxu1 }
 0xb2a   : > { %v10275_v58 = vadd.f32 %v10274_v24, %v10273_v2  ;;  %v10276_v56 = vpop.f32.mrb[114].mxu1  ;;  %v17945_v24 = vld [vmem:[#allocation61_spill] sm:$0xff] }
 0xb2b   : > { %v10277_v7 = vpop.f32.mrb[115].mxu1 }
 0xb2c   : > { %v10278_v18 = vadd.f32 %v10277_v7, %v10276_v56 }
 0xb2e   : > { %v4729_v42 = vpack.c.bf16 %v10278_v18, %v10275_v58 }
 0xb30   : > { %v10279_v15 = vpop.f32.mrb[116].mxu1  ;;  %4902 = vmatmul.mubr.bf16.gmra.mrb[80].mxu0 %v4729_v42 }
 0xb31   : > { %v10280_v9 = vpop.f32.mrb[117].mxu1  ;;  %4911 = vmatprep.mubr.bf16.mxu0 %v17927_v35 }
 0xb32   : > { %v10281_v44 = vadd.f32 %v10280_v9, %v10279_v15  ;;  %v10282_v45 = vpop.f32.mrb[118].mxu1 }
 0xb33   : > { %v10283_v47 = vpop.f32.mrb[119].mxu1 }
 0xb34   : > { %v10284_v51 = vadd.f32 %v10283_v47, %v10282_v45  ;;  %v17947_v45 = vld [vmem:[#allocation62_spill] sm:$0xff] }
 0xb36   : > { %v4730_v14 = vpack.c.bf16 %v10284_v51, %v10281_v44 }
 0xb38   : > { %v10285_v36 = vpop.f32.mrb[120].mxu1  ;;  %4912 = vmatmul.mubr.bf16.gmra.mrb[84].mxu0 %v4730_v14 }
 0xb39   : > { %v10286_v19 = vpop.f32.mrb[121].mxu1  ;;  %4921 = vmatprep.mubr.bf16.mxu0 %v17927_v35 }
 0xb3a   : > { %v10287_v62 = vadd.f32 %v10286_v19, %v10285_v36  ;;  %v10288_v40 = vpop.f32.mrb[122].mxu1  ;;  %v17949_v36 = vld [vmem:[#allocation63_spill] sm:$0xff] }
 0xb3b   : > { %v10289_v8 = vpop.f32.mrb[123].mxu1 }
 0xb3c   : > { %v10290_v28 = vadd.f32 %v10289_v8, %v10288_v40  ;;  %v17951_v40 = vld [vmem:[#allocation64_spill] sm:$0xff] }
 0xb3e   : > { %v4731_v38 = vpack.c.bf16 %v10290_v28, %v10287_v62  ;;  %v17953_v28 = vld [vmem:[#allocation65_spill] sm:$0xff] }
 0xb40   : > { %v10291_v3 = vpop.f32.mrb[124].mxu1  ;;  %4922 = vmatmul.mubr.bf16.gmra.mrb[88].mxu0 %v4731_v38 }
 0xb41   : > { %v10292_v0 = vpop.f32.mrb[125].mxu1  ;;  %4931 = vmatprep.mubr.bf16.mxu0 %v17927_v35 }
 0xb42   : > { %v10293_v61 = vadd.f32 %v10292_v0, %v10291_v3  ;;  %v10294_v54 = vpop.f32.mrb[126].mxu1 }
 0xb43   : > { %v10295_v48 = vpop.f32.mrb[127].mxu1 }
 0xb44   : > { %v10296_v37 = vadd.f32 %v10295_v48, %v10294_v54 }
 0xb46   : > { %v4732_v32 = vpack.c.bf16 %v10296_v37, %v10293_v61 }
 0xb48   : > { %4932 = vmatmul.mubr.bf16.gmra.mrb[92].mxu0 %v4732_v32 }
 0xb49   : > { %5054 = vmatprep.mubr.bf16.mxu0 %v17927_v35 }
 0xb50   : > { %5055 = vmatmul.mubr.bf16.vlgmr.msra.gmra.mrb[64].mxu0 %v4235_v11  ;;  %v15066_v11 = vrot.slane %v5135_v20, %v17929_v41  ;;  %v17955_v20 = vld [vmem:[#allocation66_spill] sm:$0xff] }
 0xb51   : > { %5064 = vmatprep.mubr.bf16.mxu0 %v17927_v35 }
 0xb58   : > { %5065 = vmatmul.mubr.bf16.gmra.mrb[68].mxu0 %v4236_v31 }
 0xb59   : > { %5074 = vmatprep.mubr.bf16.mxu0 %v17927_v35 }
 0xb60   : > { %5075 = vmatmul.mubr.bf16.gmra.mrb[72].mxu0 %v4237_v30 }
 0xb61   : > { %5084 = vmatprep.mubr.bf16.mxu0 %v17927_v35 }
 0xb68   : > { %5085 = vmatmul.mubr.bf16.gmra.mrb[76].mxu0 %v4238_v4 }
 0xb69   : > { %5094 = vmatprep.mubr.bf16.mxu0 %v17927_v35 }
 0xb70   : > { %5095 = vmatmul.mubr.bf16.gmra.mrb[80].mxu0 %v4239_v6  ;;  %v17933_v6 = vld [vmem:[#allocation55_spill] sm:$0xff] }
 0xb71   : > { %5104 = vmatprep.mubr.bf16.mxu0 %v17927_v35 }
 0xb78   : > { %5105 = vmatmul.mubr.bf16.gmra.mrb[84].mxu0 %v4240_v39  ;;  %v17935_v39 = vld [vmem:[#allocation56_spill] sm:$0xff] }
 0xb79   : > { %5114 = vmatprep.mubr.bf16.mxu0 %v17927_v35 }
 0xb80   : > { %5115 = vmatmul.mubr.bf16.gmra.mrb[88].mxu0 %v4241_v27 }
 0xb81   : > { %5124 = vmatprep.mubr.bf16.mxu0 %v17927_v35 }
 0xb88   : > { %5125 = vmatmul.mubr.bf16.gmra.mrb[92].mxu0 %v4242_v5 }
 0xc23   : > { %v5056_v31 = vpop.f32.mrb[64].mxu0 }
 0xc24   : > { %v5147_v25 = vadd.f32 %v15066_v11, %v5056_v31  ;;  %v5058_v49 = vpop.f32.mrb[65].mxu0 }
 0xc25   : > { %v5148_v30 = vadd.f32 %v15069_v55, %v5058_v49  ;;  %v5060_v63 = vpop.f32.mrb[66].mxu0 }
 0xc26   : > { %v15074_v4 = vadd.f32 %v5147_v25, %v17931_v52  ;;  %v5149_v59 = vadd.f32 %v15066_v11, %v5060_v63  ;;  %v5062_v22 = vpop.f32.mrb[67].mxu0 }
 0xc27   : > { %v15078_v12 = vadd.f32 %v5148_v30, %v17933_v6  ;;  %v5150_v46 = vadd.f32 %v15069_v55, %v5062_v22  ;;  %v17957_v30 = vld [vmem:[#allocation67_spill] sm:$0xff]  ;;  %v17961_v6 = vld [vmem:[#allocation69_spill] sm:$0xff] }
 0xc28   : > { %17932 = vst [vmem:[#allocation93_spill] sm:$0xff] %v15074_v4  ;;  %v15082_v33 = vadd.f32 %v5149_v59, %v17935_v39  ;;  %v17959_v59 = vld [vmem:[#allocation68_spill] sm:$0xff] }
 0xc29   : > { %17934 = vst [vmem:[#allocation94_spill] sm:$0xff] %v15078_v12  ;;  %v15085_v27 = vadd.f32 %v5150_v46, %v17937_v10  ;;  %v5213_v21 = vadd.f32 %v15078_v12, %v15074_v4 }
 0xc2a   : > { %17936 = vst [vmem:[#allocation86_spill] sm:$0xff] %v15082_v33 }
 0xc2b   : > { %17938 = vst [vmem:[#allocation95_spill] sm:$0xff] %v15085_v27  ;;  %5214 = vadd.xlane.f32.xlu0 %v5213_v21  ;;  %v5066_v16 = vpop.f32.mrb[68].mxu0  ;;  %v5216_v5 = vadd.f32 %v15085_v27, %v15082_v33 }
 0xc2c   : > { %v5151_v35 = vadd.f32 %v15066_v11, %v5066_v16  ;;  %v5068_v60 = vpop.f32.mrb[69].mxu0 }
 0xc2d   : > { %v5152_v13 = vadd.f32 %v15069_v55, %v5068_v60  ;;  %5217 = vadd.xlane.f32.xlu1 %v5216_v5  ;;  %v5070_v17 = vpop.f32.mrb[70].mxu0 }
 0xc2e   : > { %v15094_v26 = vadd.f32 %v5151_v35, %v17939_v1  ;;  %v5153_v57 = vadd.f32 %v15066_v11, %v5070_v17  ;;  %v5072_v53 = vpop.f32.mrb[71].mxu0 }
 0xc2f   : > { %v15098_v29 = vadd.f32 %v5152_v13, %v17941_v43  ;;  %v5154_v50 = vadd.f32 %v15069_v55, %v5072_v53  ;;  %v17963_v13 = vld [vmem:[#allocation70_spill] sm:$0xff]  ;;  %v17965_v53 = vld [vmem:[#allocation71_spill] sm:$0xff] }
 0xc30   : > { %17940 = vst [vmem:[#allocation97_spill] sm:$0xff] %v15094_v26  ;;  %v15102_v2 = vadd.f32 %v5153_v57, %v17943_v34  ;;  %v17967_v34 = vld [vmem:[#allocation72_spill] sm:$0xff] }
 0xc31   : > { %17942 = vst [vmem:[#allocation98_spill] sm:$0xff] %v15098_v29  ;;  %v15105_v58 = vadd.f32 %v5154_v50, %v17945_v24  ;;  %v5219_v56 = vadd.f32 %v15098_v29, %v15094_v26 }
 0xc32   : > { %17944 = vst [vmem:[#allocation90_spill] sm:$0xff] %v15102_v2 }
 0xc33   : > { %17946 = vst [vmem:[#allocation96_spill] sm:$0xff] %v15105_v58  ;;  %5220 = vadd.xlane.f32.xlu0 %v5219_v56  ;;  %v5076_v7 = vpop.f32.mrb[72].mxu0  ;;  %v5222_v18 = vadd.f32 %v15105_v58, %v15102_v2  ;;  %v17969_v56 = vld [vmem:[#allocation73_spill] sm:$0xff] }
 0xc34   : > { %v5155_v42 = vadd.f32 %v15066_v11, %v5076_v7  ;;  %v5078_v15 = vpop.f32.mrb[73].mxu0 }
 0xc35   : > { %v5156_v9 = vadd.f32 %v15069_v55, %v5078_v15  ;;  %5223 = vadd.xlane.f32.xlu1 %v5222_v18  ;;  %v5080_v44 = vpop.f32.mrb[74].mxu0 }
 0xc36   : > { %v15114_v47 = vadd.f32 %v5155_v42, %v17947_v45  ;;  %v5157_v51 = vadd.f32 %v15066_v11, %v5080_v44  ;;  %v5082_v14 = vpop.f32.mrb[75].mxu0 }
 0xc37   : > { %v15118_v19 = vadd.f32 %v5156_v9, %v17949_v36  ;;  %v5158_v62 = vadd.f32 %v15069_v55, %v5082_v14  ;;  %v17971_v14 = vld [vmem:[#allocation74_spill] sm:$0xff] }
 0xc38   : > { %17948 = vst [vmem:[#allocation88_spill] sm:$0xff] %v15114_v47  ;;  %v15122_v8 = vadd.f32 %v5157_v51, %v17951_v40 }
 0xc39   : > { %17950 = vst [vmem:[#allocation89_spill] sm:$0xff] %v15118_v19  ;;  %v15125_v38 = vadd.f32 %v5158_v62, %v17953_v28  ;;  %v5225_v3 = vadd.f32 %v15118_v19, %v15114_v47  ;;  %v17973_v28 = vld [vmem:[#allocation75_spill] sm:$0xff] }
 0xc3a   : > { %17952 = vst [vmem:[#allocation87_spill] sm:$0xff] %v15122_v8 }
 0xc3b   : > { %17954 = vst [vmem:[#allocation92_spill] sm:$0xff] %v15125_v38  ;;  %5226 = vadd.xlane.f32.xlu0 %v5225_v3  ;;  %v5086_v0 = vpop.f32.mrb[76].mxu0  ;;  %v5228_v61 = vadd.f32 %v15125_v38, %v15122_v8 }
 0xc3c   : > { %v5159_v54 = vadd.f32 %v15066_v11, %v5086_v0  ;;  %v5088_v48 = vpop.f32.mrb[77].mxu0 }
 0xc3d   : > { %v5160_v37 = vadd.f32 %v15069_v55, %v5088_v48  ;;  %5229 = vadd.xlane.f32.xlu1 %v5228_v61  ;;  %v5090_v32 = vpop.f32.mrb[78].mxu0  ;;  %v17975_v61 = vld [vmem:[#allocation76_spill] sm:$0xff]  ;;  %v17977_v48 = vld [vmem:[#allocation77_spill] sm:$0xff] }
 0xc3e   : > { %v15134_v31 = vadd.f32 %v5159_v54, %v17955_v20  ;;  %v5161_v25 = vadd.f32 %v15066_v11, %v5090_v32  ;;  %v5092_v49 = vpop.f32.mrb[79].mxu0 }
 0xc3f   : > { %v15138_v63 = vadd.f32 %v5160_v37, %v17957_v30  ;;  %v5162_v52 = vadd.f32 %v15069_v55, %v5092_v49 }
 0xc40   : > { %17956 = vst [vmem:[#allocation99_spill] sm:$0xff] %v15134_v31  ;;  %v15142_v22 = vadd.f32 %v5161_v25, %v17959_v59 }
 0xc41   : > { %17958 = vst [vmem:[#allocation91_spill] sm:$0xff] %v15138_v63  ;;  %v15145_v46 = vadd.f32 %v5162_v52, %v17961_v6  ;;  %v5231_v39 = vadd.f32 %v15138_v63, %v15134_v31  ;;  %v17979_v6 = vld [vmem:[#allocation78_spill] sm:$0xff] }
 0xc42   : > { %17960 = vst [vmem:[#allocation54_spill] sm:$0xff] %v15142_v22 }
 0xc43   : > { %17962 = vst [vmem:[#allocation55_spill] sm:$0xff] %v15145_v46  ;;  %5232 = vadd.xlane.f32.xlu0 %v5231_v39  ;;  %v5096_v10 = vpop.f32.mrb[80].mxu0  ;;  %v5234_v21 = vadd.f32 %v15145_v46, %v15142_v22 }
 0xc44   : > { %v5163_v16 = vadd.f32 %v15066_v11, %v5096_v10  ;;  %v5098_v5 = vpop.f32.mrb[81].mxu0 }
 0xc45   : > { %v5164_v35 = vadd.f32 %v15069_v55, %v5098_v5  ;;  %5235 = vadd.xlane.f32.xlu1 %v5234_v21  ;;  %v5100_v60 = vpop.f32.mrb[82].mxu0 }
 0xc46   : > { %v15154_v17 = vadd.f32 %v5163_v16, %v17963_v13  ;;  %v5165_v1 = vadd.f32 %v15066_v11, %v5100_v60  ;;  %v5102_v57 = vpop.f32.mrb[83].mxu0  ;;  %v17981_v16 = vld [vmem:[#allocation79_spill] sm:$0xff]  ;;  %v17983_v60 = vld [vmem:[#allocation80_spill] sm:$0xff] }
 0xc47   : > { %v15158_v43 = vadd.f32 %v5164_v35, %v17965_v53  ;;  %v5166_v50 = vadd.f32 %v15069_v55, %v5102_v57 }
 0xc48   : > { %17964 = vst [vmem:[#allocation56_spill] sm:$0xff] %v15154_v17  ;;  %v15162_v24 = vadd.f32 %v5165_v1, %v17967_v34  ;;  %v17985_v1 = vld [vmem:[#allocation81_spill] sm:$0xff] }
 0xc49   : > { %17966 = vst [vmem:[#allocation57_spill] sm:$0xff] %v15158_v43  ;;  %v15165_v7 = vadd.f32 %v5166_v50, %v17969_v56  ;;  %v5237_v18 = vadd.f32 %v15158_v43, %v15154_v17 }
 0xc4a   : > { %17968 = vst [vmem:[#allocation58_spill] sm:$0xff] %v15162_v24 }
 0xc4b   : > { %17970 = vst [vmem:[#allocation59_spill] sm:$0xff] %v15165_v7  ;;  %5238 = vadd.xlane.f32.xlu0 %v5237_v18  ;;  %v5106_v42 = vpop.f32.mrb[84].mxu0  ;;  %v5240_v15 = vadd.f32 %v15165_v7, %v15162_v24 }
 0xc4c   : > { %v5167_v9 = vadd.f32 %v15066_v11, %v5106_v42  ;;  %v5108_v44 = vpop.f32.mrb[85].mxu0 }
 0xc4d   : > { %v5168_v45 = vadd.f32 %v15069_v55, %v5108_v44  ;;  %5241 = vadd.xlane.f32.xlu1 %v5240_v15  ;;  %v5110_v51 = vpop.f32.mrb[86].mxu0 }
 0xc4e   : > { %v15174_v36 = vadd.f32 %v5167_v9, %v17971_v14  ;;  %v5169_v62 = vadd.f32 %v15066_v11, %v5110_v51  ;;  %v5112_v40 = vpop.f32.mrb[87].mxu0  ;;  %v17987_v9 = vld [vmem:[#allocation82_spill] sm:$0xff]  ;;  %v17989_v14 = vld [vmem:[#allocation83_spill] sm:$0xff] }
 0xc4f   : > { %v15178_v3 = vadd.f32 %v5168_v45, %v17973_v28  ;;  %v5170_v0 = vadd.f32 %v15069_v55, %v5112_v40  ;;  %v17991_v28 = vld [vmem:[#allocation84_spill] sm:$0xff] }
 0xc50   : > { %17972 = vst [vmem:[#allocation60_spill] sm:$0xff] %v15174_v36  ;;  %v15182_v54 = vadd.f32 %v5169_v62, %v17975_v61  ;;  %v17993_v61 = vld [vmem:[#allocation85_spill] sm:$0xff] }
 0xc51   : > { %17974 = vst [vmem:[#allocation61_spill] sm:$0xff] %v15178_v3  ;;  %v15185_v37 = vadd.f32 %v5170_v0, %v17977_v48  ;;  %v5243_v32 = vadd.f32 %v15178_v3, %v15174_v36 }
 0xc52   : > { %17976 = vst [vmem:[#allocation62_spill] sm:$0xff] %v15182_v54 }
 0xc53   : > { %17978 = vst [vmem:[#allocation63_spill] sm:$0xff] %v15185_v37  ;;  %5244 = vadd.xlane.f32.xlu0 %v5243_v32  ;;  %v5116_v20 = vpop.f32.mrb[88].mxu0  ;;  %v5246_v25 = vadd.f32 %v15185_v37, %v15182_v54 }
 0xc54   : > { %v5171_v49 = vadd.f32 %v15066_v11, %v5116_v20  ;;  %v5118_v30 = vpop.f32.mrb[89].mxu0 }
 0xc55   : > { %v5172_v52 = vadd.f32 %v15069_v55, %v5118_v30  ;;  %5247 = vadd.xlane.f32.xlu1 %v5246_v25  ;;  %v5120_v59 = vpop.f32.mrb[90].mxu0  ;;  %v5575_v25 = vld [vmem:[#allocation21 + $0x20] sm:$0xff] }
 0xc56   : > { %v15194_v39 = vadd.f32 %v5171_v49, %v17979_v6  ;;  %v5173_v10 = vadd.f32 %v15066_v11, %v5120_v59  ;;  %v5122_v21 = vpop.f32.mrb[91].mxu0  ;;  %v5573_v49 = vld [vmem:[#allocation21 + $0x10] sm:$0xff]  ;;  %v5579_v59 = vld [vmem:[#allocation21 + $0x40] sm:$0xff] }
 0xc57   : > { %v15198_v5 = vadd.f32 %v5172_v52, %v17981_v16  ;;  %v5174_v35 = vadd.f32 %v15069_v55, %v5122_v21  ;;  %v5583_v6 = vld [vmem:[#allocation21 + $0x60] sm:$0xff] }
 0xc58   : > { %17980 = vst [vmem:[#allocation64_spill] sm:$0xff] %v15194_v39  ;;  %v15202_v13 = vadd.f32 %v5173_v10, %v17983_v60  ;;  %v9838_v16 = vcombine.high %v5579_v59, %v5583_v6  ;;  %v5585_v60 = vld [vmem:[#allocation21 + $0x70] sm:$0xff] }
 0xc59   : > { %17982 = vst [vmem:[#allocation65_spill] sm:$0xff] %v15198_v5  ;;  %v15205_v57 = vadd.f32 %v5174_v35, %v17985_v1  ;;  %v5249_v53 = vadd.f32 %v15198_v5, %v15194_v39  ;;  %v5581_v35 = vld [vmem:[#allocation21 + $0x50] sm:$0xff]  ;;  %v5587_v1 = vld [vmem:[#allocation21 + $0x80] sm:$0xff] }
 0xc5a   : > { %17984 = vst [vmem:[#allocation66_spill] sm:$0xff] %v15202_v13 }
 0xc5b   : > { %17986 = vst [vmem:[#allocation67_spill] sm:$0xff] %v15205_v57  ;;  %5250 = vadd.xlane.f32.xlu0 %v5249_v53  ;;  %v5126_v50 = vpop.f32.mrb[92].mxu0  ;;  %v5252_v34 = vadd.f32 %v15205_v57, %v15202_v13  ;;  %v9842_v53 = vcombine.high %v5581_v35, %v5585_v60 }
 0xc5c   : > { %v5175_v56 = vadd.f32 %v15066_v11, %v5126_v50  ;;  %v5128_v18 = vpop.f32.mrb[93].mxu0  ;;  %v5591_v50 = vld [vmem:[#allocation21 + $0xa0] sm:$0xff] }
 0xc5d   : > { %v5176_v42 = vadd.f32 %v15069_v55, %v5128_v18  ;;  %5253 = vadd.xlane.f32.xlu1 %v5252_v34  ;;  %v5130_v15 = vpop.f32.mrb[94].mxu0  ;;  %v5589_v34 = vld [vmem:[#allocation21 + $0x90] sm:$0xff]  ;;  %v9837_v18 = vcombine.low %v5579_v59, %v5583_v6 }
 0xc5e   : > { %v15214_v44 = vadd.f32 %v5175_v56, %v17987_v9  ;;  %v5177_v45 = vadd.f32 %v15066_v11, %v5130_v15  ;;  %v5132_v51 = vpop.f32.mrb[95].mxu0  ;;  %v5571_v11 = vld [vmem:[#allocation21] sm:$0xff]  ;;  %v5593_v56 = vld [vmem:[#allocation21 + $0xb0] sm:$0xff]  ;;  %v9846_v15 = vcombine.high %v5587_v1, %v5591_v50 }
 0xc5f   : > { %v15218_v62 = vadd.f32 %v5176_v42, %v17989_v14  ;;  %v5178_v40 = vadd.f32 %v15069_v55, %v5132_v51  ;;  %v9829_v30 = vcombine.low %v5571_v11, %v5575_v25  ;;  %v9830_v52 = vcombine.high %v5571_v11, %v5575_v25  ;;  %v5577_v55 = vld [vmem:[#allocation21 + $0x30] sm:$0xff]  ;;  %v5599_v51 = vld [vmem:[#allocation21 + $0xe0] sm:$0xff] }
 0xc60   : > { %17988 = vst [vmem:[#allocation68_spill] sm:$0xff] %v15214_v44  ;;  %v15222_v0 = vadd.f32 %v5177_v45, %v17991_v28  ;;  %v9833_v10 = vcombine.low %v5573_v49, %v5577_v55  ;;  %v9834_v21 = vcombine.high %v5573_v49, %v5577_v55  ;;  %v9841_v42 = vcombine.low %v5581_v35, %v5585_v60  ;;  %v5595_v45 = vld [vmem:[#allocation21 + $0xc0] sm:$0xff]  ;;  %v5597_v14 = vld [vmem:[#allocation21 + $0xd0] sm:$0xff] }
 0xc61   : > { %17990 = vst [vmem:[#allocation69_spill] sm:$0xff] %v15218_v62  ;;  %v15225_v48 = vadd.f32 %v5178_v40, %v17993_v61  ;;  %v5255_v32 = vadd.f32 %v15218_v62, %v15214_v44  ;;  %6381 = vmatprep.subr.bf16.mxu1 %v9830_v52  ;;  %v9850_v9 = vcombine.high %v5589_v34, %v5593_v56  ;;  %v5601_v40 = vld [vmem:[#allocation21 + $0xf0] sm:$0xff]  ;;  %v5603_v11 = vld [vmem:[#allocation21 + $0x100] sm:$0xff] }
 0xc62   : > { %17992 = vst [vmem:[#allocation70_spill] sm:$0xff] %v15222_v0  ;;  %6382 = vmatpush1.bf16.msra.mxu1 %v9829_v30  ;;  %6607 = vmatprep.subr.bf16.mxu0 %v9834_v21  ;;  %v9845_v28 = vcombine.low %v5587_v1, %v5591_v50  ;;  %v9849_v61 = vcombine.low %v5589_v34, %v5593_v56  ;;  %v5607_v25 = vld [vmem:[#allocation21 + $0x120] sm:$0xff]  ;;  %v5605_v49 = vld [vmem:[#allocation21 + $0x110] sm:$0xff] }
 0xc63   : > { %17994 = vst [vmem:[#allocation71_spill] sm:$0xff] %v15225_v48  ;;  %5256 = vadd.xlane.f32.xlu0 %v5255_v32  ;;  %v5258_v20 = vadd.f32 %v15225_v48, %v15222_v0  ;;  %6608 = vmatpush1.bf16.msra.mxu0 %v9833_v10  ;;  %v9854_v32 = vcombine.high %v5595_v45, %v5599_v51  ;;  %v5609_v30 = vld [vmem:[#allocation21 + $0x130] sm:$0xff]  ;;  %v5611_v10 = vld [vmem:[#allocation21 + $0x140] sm:$0xff] }
 0xc64   : > { %6383 = vmatprep.subr.bf16.mxu1 %v9838_v16  ;;  %6609 = vmatprep.subr.bf16.mxu0 %v9842_v53  ;;  %v9853_v52 = vcombine.low %v5595_v45, %v5599_v51  ;;  %v9857_v55 = vcombine.low %v5597_v14, %v5601_v40  ;;  %v9862_v59 = vcombine.high %v5603_v11, %v5607_v25  ;;  %v5615_v21 = vld [vmem:[#allocation21 + $0x160] sm:$0xff]  ;;  %v5613_v16 = vld [vmem:[#allocation21 + $0x150] sm:$0xff] }
 0xc65   : > { %5259 = vadd.xlane.f32.xlu1 %v5258_v20  ;;  %v9858_v20 = vcombine.high %v5597_v14, %v5601_v40  ;;  %v9866_v6 = vcombine.high %v5605_v49, %v5609_v30  ;;  %v5617_v35 = vld [vmem:[#allocation21 + $0x170] sm:$0xff]  ;;  %v9861_v60 = vcombine.low %v5603_v11, %v5607_v25  ;;  %v9865_v1 = vcombine.low %v5605_v49, %v5609_v30  ;;  %v5619_v34 = vld [vmem:[#allocation21 + $0x180] sm:$0xff] }
 0xc66   : > { %6384 = vmatpush1.bf16.msra.mxu1 %v9837_v18  ;;  %v9870_v53 = vcombine.high %v5611_v10, %v5615_v21  ;;  %v9874_v50 = vcombine.high %v5613_v16, %v5617_v35  ;;  %v5623_v56 = vld [vmem:[#allocation21 + $0x1a0] sm:$0xff]  ;;  %v5621_v18 = vld [vmem:[#allocation21 + $0x190] sm:$0xff] }
 0xc67   : > { %6610 = vmatpush1.bf16.msra.mxu0 %v9841_v42  ;;  %6385 = vmatprep.subr.bf16.mxu1 %v9846_v15  ;;  %v5625_v42 = vld [vmem:[#allocation21 + $0x1b0] sm:$0xff]  ;;  %v9869_v15 = vcombine.low %v5611_v10, %v5615_v21  ;;  %v9878_v45 = vcombine.high %v5619_v34, %v5623_v56  ;;  %v5627_v14 = vld [vmem:[#allocation21 + $0x1c0] sm:$0xff] }
 0xc68   : > { %6611 = vmatprep.subr.bf16.mxu0 %v9850_v9  ;;  %v9873_v9 = vcombine.low %v5613_v16, %v5617_v35  ;;  %v9882_v51 = vcombine.high %v5621_v18, %v5625_v42  ;;  %v5631_v40 = vld [vmem:[#allocation21 + $0x1e0] sm:$0xff] }
 0xc69   : > { %v9886_v11 = vcombine.high %v5627_v14, %v5631_v40  ;;  %v5635_v49 = vld [vmem:[#allocation21 + $0x200] sm:$0xff] }
 0xc6a   : > { %6386 = vmatpush1.bf16.msra.mxu1 %v9845_v28  ;;  %v5629_v28 = vld [vmem:[#allocation21 + $0x1d0] sm:$0xff]  ;;  %v5639_v30 = vld [vmem:[#allocation21 + $0x220] sm:$0xff] }
 0xc6b   : > { %6612 = vmatpush1.bf16.msra.mxu0 %v9849_v61  ;;  %6387 = vmatprep.subr.bf16.mxu1 %v9854_v32  ;;  %v5633_v61 = vld [vmem:[#allocation21 + $0x1f0] sm:$0xff]  ;;  %v9877_v32 = vcombine.low %v5619_v34, %v5623_v56  ;;  %v9894_v10 = vcombine.high %v5635_v49, %v5639_v30  ;;  %v5643_v16 = vld [vmem:[#allocation21 + $0x240] sm:$0xff] }
 0xc6c   : > { %6613 = vmatprep.subr.bf16.mxu0 %v9858_v20  ;;  %v9881_v20 = vcombine.low %v5621_v18, %v5625_v42  ;;  %v9890_v25 = vcombine.high %v5629_v28, %v5633_v61  ;;  %v5647_v35 = vld [vmem:[#allocation21 + $0x260] sm:$0xff] }
 0xc6d   : > { %v9902_v34 = vcombine.high %v5643_v16, %v5647_v35  ;;  %v9901_v18 = vcombine.low %v5643_v16, %v5647_v35 }
 0xc6e   : > { %6388 = vmatpush1.bf16.msra.mxu1 %v9853_v52  ;;  %v5637_v52 = vld [vmem:[#allocation21 + $0x210] sm:$0xff] }
 0xc6f   : > { %6614 = vmatpush1.bf16.msra.mxu0 %v9857_v55  ;;  %6389 = vmatprep.subr.bf16.mxu1 %v9862_v59  ;;  %v5641_v55 = vld [vmem:[#allocation21 + $0x230] sm:$0xff]  ;;  %v9885_v59 = vcombine.low %v5627_v14, %v5631_v40 }
 0xc70   : > { %6615 = vmatprep.subr.bf16.mxu0 %v9866_v6  ;;  %v9889_v6 = vcombine.low %v5629_v28, %v5633_v61  ;;  %v9898_v21 = vcombine.high %v5637_v52, %v5641_v55 }
 0xc72   : > { %6390 = vmatpush1.bf16.msra.mxu1 %v9861_v60  ;;  %v5645_v60 = vld [vmem:[#allocation21 + $0x250] sm:$0xff] }
 0xc73   : > { %6616 = vmatpush1.bf16.msra.mxu0 %v9865_v1  ;;  %6391 = vmatprep.subr.bf16.mxu1 %v9870_v53  ;;  %v5649_v1 = vld [vmem:[#allocation21 + $0x270] sm:$0xff]  ;;  %v9893_v53 = vcombine.low %v5635_v49, %v5639_v30 }
 0xc74   : > { %6617 = vmatprep.subr.bf16.mxu0 %v9874_v50  ;;  %v9897_v50 = vcombine.low %v5637_v52, %v5641_v55  ;;  %v9906_v56 = vcombine.high %v5645_v60, %v5649_v1  ;;  %v9905_v42 = vcombine.low %v5645_v60, %v5649_v1 }
 0xc76   : > { %6392 = vmatpush1.bf16.msra.mxu1 %v9869_v15 }
 0xc77   : > { %6618 = vmatpush1.bf16.msra.mxu0 %v9873_v9  ;;  %6393 = vmatprep.subr.bf16.mxu1 %v9878_v45 }
 0xc78   : > { %6619 = vmatprep.subr.bf16.mxu0 %v9882_v51 }
 0xc7a   : > { %6394 = vmatpush1.bf16.msra.mxu1 %v9877_v32 }
 0xc7b   : > { %6620 = vmatpush1.bf16.msra.mxu0 %v9881_v20  ;;  %6395 = vmatprep.subr.bf16.mxu1 %v9886_v11 }
 0xc7c   : > { %6621 = vmatprep.subr.bf16.mxu0 %v9890_v25 }
 0xc7e   : > { %6396 = vmatpush1.bf16.msra.mxu1 %v9885_v59 }
 0xc7f   : > { %6622 = vmatpush1.bf16.msra.mxu0 %v9889_v6  ;;  %6397 = vmatprep.subr.bf16.mxu1 %v9894_v10 }
 0xc80   : > { %6623 = vmatprep.subr.bf16.mxu0 %v9898_v21 }
 0xc82   : > { %6398 = vmatpush1.bf16.msra.mxu1 %v9893_v53 }
 0xc83   : > { %6624 = vmatpush1.bf16.msra.mxu0 %v9897_v50  ;;  %6399 = vmatprep.subr.bf16.mxu1 %v9902_v34 }
 0xc84   : > { %6625 = vmatprep.subr.bf16.mxu0 %v9906_v56 }
 0xc86   : > { %6400 = vmatpush1.bf16.msra.mxu1 %v9901_v18 }
 0xc87   : > { %6626 = vmatpush1.bf16.msra.mxu0 %v9905_v42 }
 0xcb8   : > { %v5215_v15 = vpop.xlane.xlu0 %5214 }
 0xcb9   : > { %v5261_v9 = vmul.f32 0.00390625, %v5215_v15 }
 0xcba   : > { %v5218_v45 = vpop.xlane.xlu1 %5217 }
 0xcbb   : > { %v15232_v51 = vsub.f32 %v15074_v4, %v5261_v9  ;;  %v15235_v14 = vsub.f32 %v15078_v12, %v5261_v9  ;;  %v5262_v40 = vmul.f32 0.00390625, %v5218_v45 }
 0xcbd   : > { %v5309_v28 = vmul.f32 %v15232_v51, %v15232_v51  ;;  %v5310_v61 = vmul.f32 %v15235_v14, %v15235_v14  ;;  %v15242_v32 = vsub.f32 %v15082_v33, %v5262_v40  ;;  %v15245_v20 = vsub.f32 %v15085_v27, %v5262_v40 }
 0xcbf   : > { %v5311_v11 = vmul.f32 %v15242_v32, %v15242_v32  ;;  %v5312_v25 = vmul.f32 %v15245_v20, %v15245_v20  ;;  %v5341_v49 = vadd.f32 %v5310_v61, %v5309_v28 }
 0xcc0   : > { %v5221_v30 = vpop.xlane.xlu0 %5220 }
 0xcc1   : > { %v5263_v52 = vmul.f32 0.00390625, %v5221_v30  ;;  %5342 = vadd.xlane.f32.xlu0 %v5341_v49  ;;  %v5344_v55 = vadd.f32 %v5312_v25, %v5311_v11 }
 0xcc2   : > { %v5224_v59 = vpop.xlane.xlu1 %5223 }
 0xcc3   : > { %v15252_v6 = vsub.f32 %v15094_v26, %v5263_v52  ;;  %v15255_v10 = vsub.f32 %v15098_v29, %v5263_v52  ;;  %v5264_v21 = vmul.f32 0.00390625, %v5224_v59  ;;  %5345 = vadd.xlane.f32.xlu1 %v5344_v55  ;;  %v5651_v55 = vld [vmem:[#allocation21 + $0x280] sm:$0xff] }
 0xcc4   : > { %v5655_v59 = vld [vmem:[#allocation21 + $0x2a0] sm:$0xff] }
 0xcc5   : > { %v5313_v16 = vmul.f32 %v15252_v6, %v15252_v6  ;;  %v5314_v35 = vmul.f32 %v15255_v10, %v15255_v10  ;;  %v15262_v60 = vsub.f32 %v15102_v2, %v5264_v21  ;;  %v15265_v1 = vsub.f32 %v15105_v58, %v5264_v21  ;;  %v5653_v21 = vld [vmem:[#allocation21 + $0x290] sm:$0xff] }
 0xcc7   : > { %v5315_v53 = vmul.f32 %v15262_v60, %v15262_v60  ;;  %v5316_v50 = vmul.f32 %v15265_v1, %v15265_v1  ;;  %v5347_v34 = vadd.f32 %v5314_v35, %v5313_v16  ;;  %v9910_v35 = vcombine.high %v5651_v55, %v5655_v59 }
 0xcc8   : > { %v5227_v56 = vpop.xlane.xlu0 %5226 }
 0xcc9   : > { %v5265_v18 = vmul.f32 0.00390625, %v5227_v56  ;;  %5348 = vadd.xlane.f32.xlu0 %v5347_v34  ;;  %v5350_v42 = vadd.f32 %v5316_v50, %v5315_v53  ;;  %v5657_v53 = vld [vmem:[#allocation21 + $0x2b0] sm:$0xff]  ;;  %v9909_v56 = vcombine.low %v5651_v55, %v5655_v59  ;;  %6401 = vmatprep.subr.bf16.mxu1 %v9910_v35 }
 0xcca   : > { %v5230_v15 = vpop.xlane.xlu1 %5229 }
 0xccb   : > { %v15272_v9 = vsub.f32 %v15114_v47, %v5265_v18  ;;  %v15275_v45 = vsub.f32 %v15118_v19, %v5265_v18  ;;  %v5266_v40 = vmul.f32 0.00390625, %v5230_v15  ;;  %5351 = vadd.xlane.f32.xlu1 %v5350_v42  ;;  %v9913_v18 = vcombine.low %v5653_v21, %v5657_v53  ;;  %6402 = vmatpush1.bf16.msra.mxu1 %v9909_v56  ;;  %v5661_v19 = vld [vmem:[#allocation21 + $0x2d0] sm:$0xff] }
 0xccc   : > { %v9914_v15 = vcombine.high %v5653_v21, %v5657_v53  ;;  %v5677_v47 = vld [vmem:[#allocation21 + $0x350] sm:$0xff] }
 0xccd   : > { %v5317_v28 = vmul.f32 %v15272_v9, %v15272_v9  ;;  %v5318_v61 = vmul.f32 %v15275_v45, %v15275_v45  ;;  %v15282_v11 = vsub.f32 %v15122_v8, %v5266_v40  ;;  %v15285_v25 = vsub.f32 %v15125_v38, %v5266_v40  ;;  %v5663_v8 = vld [vmem:[#allocation21 + $0x2e0] sm:$0xff] }
 0xcce   : > { %6627 = vmatprep.subr.bf16.mxu0 %v9914_v15  ;;  %v5671_v15 = vld [vmem:[#allocation21 + $0x320] sm:$0xff] }
 0xccf   : > { %v5319_v49 = vmul.f32 %v15282_v11, %v15282_v11  ;;  %v5320_v30 = vmul.f32 %v15285_v25, %v15285_v25  ;;  %v5353_v52 = vadd.f32 %v5318_v61, %v5317_v28  ;;  %v5659_v61 = vld [vmem:[#allocation21 + $0x2c0] sm:$0xff]  ;;  %6628 = vmatpush1.bf16.msra.mxu0 %v9913_v18 }
 0xcd0   : > { %v5233_v16 = vpop.xlane.xlu0 %5232 }
 0xcd1   : > { %v5267_v50 = vmul.f32 0.00390625, %v5233_v16  ;;  %5354 = vadd.xlane.f32.xlu0 %v5353_v52  ;;  %v5356_v34 = vadd.f32 %v5320_v30, %v5319_v49  ;;  %v9918_v52 = vcombine.high %v5659_v61, %v5663_v8  ;;  %v5665_v49 = vld [vmem:[#allocation21 + $0x2f0] sm:$0xff]  ;;  %v9917_v16 = vcombine.low %v5659_v61, %v5663_v8 }
 0xcd2   : > { %v5236_v42 = vpop.xlane.xlu1 %5235  ;;  %v9921_v35 = vcombine.low %v5661_v19, %v5665_v49  ;;  %v9922_v53 = vcombine.high %v5661_v19, %v5665_v49 }
 0xcd3   : > { %v15292_v40 = vsub.f32 %v15134_v31, %v5267_v50  ;;  %v15295_v38 = vsub.f32 %v15138_v63, %v5267_v50  ;;  %v5268_v28 = vmul.f32 0.00390625, %v5236_v42  ;;  %5357 = vadd.xlane.f32.xlu1 %v5356_v34  ;;  %6403 = vmatprep.subr.bf16.mxu1 %v9918_v52  ;;  %v5667_v42 = vld [vmem:[#allocation21 + $0x300] sm:$0xff]  ;;  %v5669_v63 = vld [vmem:[#allocation21 + $0x310] sm:$0xff] }
 0xcd4   : > { %6404 = vmatpush1.bf16.msra.mxu1 %v9917_v16  ;;  %6629 = vmatprep.subr.bf16.mxu0 %v9922_v53  ;;  %v9925_v19 = vcombine.low %v5667_v42, %v5671_v15  ;;  %v5675_v16 = vld [vmem:[#allocation21 + $0x340] sm:$0xff] }
 0xcd5   : > { %v5321_v30 = vmul.f32 %v15292_v40, %v15292_v40  ;;  %v5322_v55 = vmul.f32 %v15295_v38, %v15295_v38  ;;  %v15302_v59 = vsub.f32 %v15142_v22, %v5268_v28  ;;  %v15305_v21 = vsub.f32 %v15145_v46, %v5268_v28  ;;  %v5673_v46 = vld [vmem:[#allocation21 + $0x330] sm:$0xff]  ;;  %6630 = vmatpush1.bf16.msra.mxu0 %v9921_v35  ;;  %v5679_v53 = vld [vmem:[#allocation21 + $0x360] sm:$0xff] }
 0xcd6   : > { %v9926_v28 = vcombine.high %v5667_v42, %v5671_v15  ;;  %v9929_v61 = vcombine.low %v5669_v63, %v5673_v46  ;;  %v9930_v49 = vcombine.high %v5669_v63, %v5673_v46  ;;  %v5681_v35 = vld [vmem:[#allocation21 + $0x370] sm:$0xff] }
 0xcd7   : > { %v5323_v50 = vmul.f32 %v15302_v59, %v15302_v59  ;;  %v5324_v34 = vmul.f32 %v15305_v21, %v15305_v21  ;;  %v5359_v56 = vadd.f32 %v5322_v55, %v5321_v30  ;;  %v9937_v42 = vcombine.low %v5677_v47, %v5681_v35 }
 0xcd8   : > { %v5239_v22 = vpop.xlane.xlu0 %5238  ;;  %6405 = vmatprep.subr.bf16.mxu1 %v9926_v28  ;;  %6631 = vmatprep.subr.bf16.mxu0 %v9930_v49  ;;  %v9938_v15 = vcombine.high %v5677_v47, %v5681_v35  ;;  %v5685_v49 = vld [vmem:[#allocation21 + $0x390] sm:$0xff] }
 0xcd9   : > { %v5269_v18 = vmul.f32 0.00390625, %v5239_v22  ;;  %5360 = vadd.xlane.f32.xlu0 %v5359_v56  ;;  %v5362_v8 = vadd.f32 %v5324_v34, %v5323_v50  ;;  %6406 = vmatpush1.bf16.msra.mxu1 %v9925_v19  ;;  %v9934_v22 = vcombine.high %v5675_v16, %v5679_v53  ;;  %v9933_v56 = vcombine.low %v5675_v16, %v5679_v53  ;;  %v5683_v19 = vld [vmem:[#allocation21 + $0x380] sm:$0xff] }
 0xcda   : > { %v5242_v52 = vpop.xlane.xlu1 %5241  ;;  %6632 = vmatpush1.bf16.msra.mxu0 %v9929_v61 }
 0xcdb   : > { %v15312_v31 = vsub.f32 %v15154_v17, %v5269_v18  ;;  %v15315_v30 = vsub.f32 %v15158_v43, %v5269_v18  ;;  %v5270_v55 = vmul.f32 0.00390625, %v5242_v52  ;;  %5363 = vadd.xlane.f32.xlu1 %v5362_v8  ;;  %6407 = vmatprep.subr.bf16.mxu1 %v9934_v22  ;;  %v5687_v52 = vld [vmem:[#allocation21 + $0x3a0] sm:$0xff]  ;;  %v5693_v17 = vld [vmem:[#allocation21 + $0x3d0] sm:$0xff] }
 0xcdc   : > { %6633 = vmatprep.subr.bf16.mxu0 %v9938_v15  ;;  %v9941_v47 = vcombine.low %v5683_v19, %v5687_v52  ;;  %v5695_v15 = vld [vmem:[#allocation21 + $0x3e0] sm:$0xff] }
 0xcdd   : > { %v5325_v50 = vmul.f32 %v15312_v31, %v15312_v31  ;;  %v5326_v63 = vmul.f32 %v15315_v30, %v15315_v30  ;;  %v15322_v46 = vsub.f32 %v15162_v24, %v5270_v55  ;;  %v15325_v34 = vsub.f32 %v15165_v7, %v5270_v55  ;;  %6408 = vmatpush1.bf16.msra.mxu1 %v9933_v56  ;;  %v5689_v7 = vld [vmem:[#allocation21 + $0x3b0] sm:$0xff]  ;;  %v5691_v56 = vld [vmem:[#allocation21 + $0x3c0] sm:$0xff] }
 0xcde   : > { %v9942_v55 = vcombine.high %v5683_v19, %v5687_v52  ;;  %6634 = vmatpush1.bf16.msra.mxu0 %v9937_v42  ;;  %v9945_v53 = vcombine.low %v5685_v49, %v5689_v7  ;;  %v9946_v35 = vcombine.high %v5685_v49, %v5689_v7  ;;  %v5697_v42 = vld [vmem:[#allocation21 + $0x3f0] sm:$0xff]  ;;  %v9949_v19 = vcombine.low %v5691_v56, %v5695_v15 }
 0xcdf   : > { %v5327_v28 = vmul.f32 %v15322_v46, %v15322_v46  ;;  %v5328_v18 = vmul.f32 %v15325_v34, %v15325_v34  ;;  %v5365_v8 = vadd.f32 %v5326_v63, %v5325_v50  ;;  %v9953_v52 = vcombine.low %v5693_v17, %v5697_v42 }
 0xce0   : > { %v5245_v24 = vpop.xlane.xlu0 %5244  ;;  %6409 = vmatprep.subr.bf16.mxu1 %v9942_v55  ;;  %6635 = vmatprep.subr.bf16.mxu0 %v9946_v35  ;;  %v9954_v49 = vcombine.high %v5693_v17, %v5697_v42 }
 0xce1   : > { %v5271_v61 = vmul.f32 0.00390625, %v5245_v24  ;;  %5366 = vadd.xlane.f32.xlu0 %v5365_v8  ;;  %v5368_v16 = vadd.f32 %v5328_v18, %v5327_v28  ;;  %6410 = vmatpush1.bf16.msra.mxu1 %v9941_v47  ;;  %v9950_v24 = vcombine.high %v5691_v56, %v5695_v15  ;;  %v15351_v47 = vld [vmem:[#allocation21 + $0x8] sm:$0xff] }
 0xce2   : > { %v5248_v22 = vpop.xlane.xlu1 %5247  ;;  %6636 = vmatpush1.bf16.msra.mxu0 %v9945_v53 }
 0xce3   : > { %v15332_v43 = vsub.f32 %v15174_v36, %v5271_v61  ;;  %v15335_v50 = vsub.f32 %v15178_v3, %v5271_v61  ;;  %v5272_v63 = vmul.f32 0.00390625, %v5248_v22  ;;  %5369 = vadd.xlane.f32.xlu1 %v5368_v16  ;;  %6411 = vmatprep.subr.bf16.mxu1 %v9950_v24  ;;  %v15353_v22 = vld [vmem:[#allocation21 + $0x28] sm:$0xff] }
 0xce4   : > { %6637 = vmatprep.subr.bf16.mxu0 %v9954_v49  ;;  %v9832_v53 = vcombine.high %v15351_v47, %v15353_v22  ;;  %v5596_v36 = vld [vmem:[#allocation21 + $0xc8] sm:$0xff] }
 0xce5   : > { %v5329_v28 = vmul.f32 %v15332_v43, %v15332_v43  ;;  %v5330_v7 = vmul.f32 %v15335_v50, %v15335_v50  ;;  %v15342_v18 = vsub.f32 %v15182_v54, %v5272_v63  ;;  %v15345_v8 = vsub.f32 %v15185_v37, %v5272_v63  ;;  %6412 = vmatpush1.bf16.msra.mxu1 %v9949_v19 }
 0xce6   : > { %6638 = vmatpush1.bf16.msra.mxu0 %v9953_v52  ;;  %6494 = vmatprep.subr.bf16.mxu1 %v9832_v53 }
 0xce7   : > { %v5331_v55 = vmul.f32 %v15342_v18, %v15342_v18  ;;  %v5332_v61 = vmul.f32 %v15345_v8, %v15345_v8  ;;  %v5371_v16 = vadd.f32 %v5330_v7, %v5329_v28 }
 0xce8   : > { %v5251_v35 = vpop.xlane.xlu0 %5250 }
 0xce9   : > { %v5273_v63 = vmul.f32 0.00390625, %v5251_v35  ;;  %5372 = vadd.xlane.f32.xlu0 %v5371_v16  ;;  %v5374_v17 = vadd.f32 %v5332_v61, %v5331_v55 }
 0xcea   : > { %v5254_v15 = vpop.xlane.xlu1 %5253 }
 0xceb   : > { %v15360_v24 = vsub.f32 %v15194_v39, %v5273_v63  ;;  %v15363_v42 = vsub.f32 %v15198_v5, %v5273_v63  ;;  %v5274_v28 = vmul.f32 0.00390625, %v5254_v15  ;;  %5375 = vadd.xlane.f32.xlu1 %v5374_v17  ;;  %v5211_v39 = vld [vmem:[%s17995_s22] sm:$0x3]  ;;  %s18139_s22 = sld [smem:[#allocation129_spill]] }
 0xced   : > { %v5333_v7 = vmul.f32 %v15360_v24, %v15360_v24  ;;  %v5334_v19 = vmul.f32 %v15363_v42, %v15363_v42  ;;  %v15370_v52 = vsub.f32 %v15202_v13, %v5274_v28  ;;  %v15373_v49 = vsub.f32 %v15205_v57, %v5274_v28 }
 0xcef   : > { %v5335_v55 = vmul.f32 %v15370_v52, %v15370_v52  ;;  %v5336_v61 = vmul.f32 %v15373_v49, %v15373_v49  ;;  %v5377_v16 = vadd.f32 %v5334_v19, %v5333_v7 }
 0xcf0   : > { %v5257_v35 = vpop.xlane.xlu0 %5256 }
 0xcf1   : > { %v5275_v53 = vmul.f32 0.00390625, %v5257_v35  ;;  %5378 = vadd.xlane.f32.xlu0 %v5377_v16  ;;  %v5380_v63 = vadd.f32 %v5336_v61, %v5335_v55 }
 0xcf2   : > { %v5260_v17 = vpop.xlane.xlu1 %5259 }
 0xcf3   : > { %v15380_v15 = vsub.f32 %v15214_v44, %v5275_v53  ;;  %v15383_v56 = vsub.f32 %v15218_v62, %v5275_v53  ;;  %v5276_v28 = vmul.f32 0.00390625, %v5260_v17  ;;  %5381 = vadd.xlane.f32.xlu1 %v5380_v63 }
 0xcf5   : > { %v5337_v57 = vmul.f32 %v15380_v15, %v15380_v15  ;;  %v5338_v13 = vmul.f32 %v15383_v56, %v15383_v56  ;;  %v15390_v7 = vsub.f32 %v15222_v0, %v5276_v28  ;;  %v15393_v19 = vsub.f32 %v15225_v48, %v5276_v28 }
 0xcf7   : > { %v5339_v55 = vmul.f32 %v15390_v7, %v15390_v7  ;;  %v5340_v61 = vmul.f32 %v15393_v19, %v15393_v19  ;;  %v5383_v16 = vadd.f32 %v5338_v13, %v5337_v57 }
 0xcf9   : > { %5384 = vadd.xlane.f32.xlu0 %v5383_v16  ;;  %v5386_v35 = vadd.f32 %v5340_v61, %v5339_v55  ;;  %v15403_v55 = vrot.slane %v5211_v39, %v17929_v41 }
 0xcfb   : > { %5387 = vadd.xlane.f32.xlu1 %v5386_v35 }
 0xd4e   : > { %v5343_v53 = vpop.xlane.xlu0 %5342 }
 0xd4f   : > { %v5389_v63 = vmul.f32 0.00390625, %v5343_v53 }
 0xd50   : > { %v5346_v17 = vpop.xlane.xlu1 %5345 }
 0xd51   : > { %v5405_v62 = vadd.f32 1e-05, %v5389_v63  ;;  %v5390_v44 = vmul.f32 0.00390625, %v5346_v17 }
 0xd53   : > { %11426 = vrsqrt.f32 %v5405_v62  ;;  %v5406_v0 = vadd.f32 1e-05, %v5390_v44  ;;  %v5212_v62 = vld [vmem:[%s17996_s23] sm:$0x3]  ;;  %v15409_v44 = vrot.slane %v5211_v39, %v17930_v23  ;;  %s18142_s23 = sld [smem:[#allocation130_spill]] }
 0xd54   : > { %v15414_v35 = vrot.slane %v5212_v62, %v17929_v41  ;;  %v15417_v53 = vrot.slane %v5212_v62, %v17930_v23 }
 0xd55   : > { %11428 = vrsqrt.f32 %v5406_v0 }
 0xd56   : > { %v5349_v28 = vpop.xlane.xlu0 %5348 }
 0xd57   : > { %v5391_v48 = vmul.f32 0.00390625, %v5349_v28 }
 0xd58   : > { %v5352_v5 = vpop.xlane.xlu1 %5351 }
 0xd59   : > { %v5407_v37 = vadd.f32 1e-05, %v5391_v48  ;;  %v5392_v13 = vmul.f32 0.00390625, %v5352_v5 }
 0xd5b   : > { %11430 = vrsqrt.f32 %v5407_v37  ;;  %v5408_v57 = vadd.f32 1e-05, %v5392_v13 }
 0xd5d   : > { %v11427_v0 = vpop.eup %11426  ;;  %11432 = vrsqrt.f32 %v5408_v57 }
 0xd5e   : > { %v5437_v61 = vmul.f32 %v11427_v0, %v15232_v51  ;;  %v5438_v16 = vmul.f32 %v11427_v0, %v15235_v14  ;;  %v5355_v48 = vpop.xlane.xlu0 %5354 }
 0xd5f   : > { %v11429_v5 = vpop.eup %11428  ;;  %v5393_v37 = vmul.f32 0.00390625, %v5355_v48 }
 0xd60   : > { %v5480_v63 = vmul.f32 %v15403_v55, %v5437_v61  ;;  %v5439_v39 = vmul.f32 %v11429_v5, %v15242_v32  ;;  %v5440_v17 = vmul.f32 %v11429_v5, %v15245_v20  ;;  %v5358_v28 = vpop.xlane.xlu1 %5357  ;;  %v5481_v51 = vmul.f32 %v15409_v44, %v5438_v16  ;;  %v5580_v20 = vld [vmem:[#allocation21 + $0x48] sm:$0xff] }
 0xd61   : > { %v5409_v13 = vadd.f32 1e-05, %v5393_v37  ;;  %v5394_v14 = vmul.f32 0.00390625, %v5358_v28  ;;  %v5584_v5 = vld [vmem:[#allocation21 + $0x68] sm:$0xff] }
 0xd62   : > { %v5482_v57 = vmul.f32 %v15403_v55, %v5439_v39  ;;  %v5483_v0 = vmul.f32 %v15409_v44, %v5440_v17  ;;  %v5524_v62 = vadd.f32 %v15417_v53, %v5481_v51  ;;  %v5523_v61 = vadd.f32 %v15414_v35, %v5480_v63 }
 0xd63   : > { %11434 = vrsqrt.f32 %v5409_v13  ;;  %v5410_v48 = vadd.f32 1e-05, %v5394_v14  ;;  %v9840_v14 = vcombine.high %v5580_v20, %v5584_v5 }
 0xd64   : > { %v5526_v54 = vadd.f32 %v15417_v53, %v5483_v0  ;;  %v5525_v32 = vadd.f32 %v15414_v35, %v5482_v57 }
 0xd65   : > { %v11431_v3 = vpop.eup %11430  ;;  %11436 = vrsqrt.f32 %v5410_v48 }
 0xd66   : > { %v5441_v16 = vmul.f32 %v11431_v3, %v15252_v6  ;;  %v5442_v37 = vmul.f32 %v11431_v3, %v15255_v10  ;;  %v5361_v39 = vpop.xlane.xlu0 %5360  ;;  %v15431_v17 = vpack.c.bf16 %v5526_v54, %v5524_v62  ;;  %v15433_v28 = vpack.c.bf16 %v5525_v32, %v5523_v61  ;;  %v5588_v3 = vld [vmem:[#allocation21 + $0x88] sm:$0xff] }
 0xd67   : > { %v11433_v51 = vpop.eup %11432  ;;  %v5395_v13 = vmul.f32 0.00390625, %v5361_v39  ;;  %v5592_v10 = vld [vmem:[#allocation21 + $0xa8] sm:$0xff] }
 0xd68   : > { %v5443_v63 = vmul.f32 %v11433_v51, %v15262_v60  ;;  %v5444_v57 = vmul.f32 %v11433_v51, %v15265_v1  ;;  %6413 = vmatprep.mubr.bf16.mxu1 %v15431_v17  ;;  %6639 = vmatprep.mubr.bf16.mxu0 %v15431_v17  ;;  %v5364_v0 = vpop.xlane.xlu1 %5363  ;;  %v5485_v6 = vmul.f32 %v15409_v44, %v5442_v37 }
 0xd69   : > { %v5411_v54 = vadd.f32 1e-05, %v5395_v13  ;;  %v5396_v48 = vmul.f32 0.00390625, %v5364_v0  ;;  %6414 = vmatmul.mubr.bf16.vlgmr.msra.gmra.mrb[128].mxu1 %v15433_v28  ;;  %6640 = vmatmul.mubr.bf16.vlgmr.msra.gmra.mrb[96].mxu0 %v15433_v28  ;;  %v5484_v62 = vmul.f32 %v15403_v55, %v5441_v16  ;;  %v17997_v60 = vcombine.low %v15351_v47, %v15353_v22  ;;  %v5600_v47 = vld [vmem:[#allocation21 + $0xe8] sm:$0xff] }
 0xd6a   : > { %v9839_v1 = vcombine.low %v5580_v20, %v5584_v5  ;;  %v5487_v61 = vmul.f32 %v15409_v44, %v5444_v57  ;;  %v5486_v32 = vmul.f32 %v15403_v55, %v5443_v63  ;;  %v9848_v39 = vcombine.high %v5588_v3, %v5592_v10 }
 0xd6b   : > { %6495 = vmatpush1.bf16.msra.mxu1 %v17997_v60  ;;  %11438 = vrsqrt.f32 %v5411_v54  ;;  %v5412_v37 = vadd.f32 1e-05, %v5396_v48  ;;  %v5528_v51 = vadd.f32 %v15417_v53, %v5485_v6  ;;  %v5527_v0 = vadd.f32 %v15414_v35, %v5484_v62 }
 0xd6c   : > { %6496 = vmatprep.subr.bf16.mxu1 %v9840_v14  ;;  %v5530_v13 = vadd.f32 %v15417_v53, %v5487_v61  ;;  %v5529_v16 = vadd.f32 %v15414_v35, %v5486_v32  ;;  %v9847_v20 = vcombine.low %v5588_v3, %v5592_v10  ;;  %v9856_v62 = vcombine.high %v5596_v36, %v5600_v47  ;;  %v5604_v3 = vld [vmem:[#allocation21 + $0x108] sm:$0xff] }
 0xd6d   : > { %v11435_v22 = vpop.eup %11434  ;;  %11440 = vrsqrt.f32 %v5412_v37  ;;  %v5608_v10 = vld [vmem:[#allocation21 + $0x128] sm:$0xff] }
 0xd6e   : > { %v5445_v5 = vmul.f32 %v11435_v22, %v15272_v9  ;;  %v5446_v63 = vmul.f32 %v11435_v22, %v15275_v45  ;;  %v5367_v14 = vpop.xlane.xlu0 %5366  ;;  %v15454_v57 = vpack.c.bf16 %v5530_v13, %v5528_v51  ;;  %v15456_v6 = vpack.c.bf16 %v5529_v16, %v5527_v0 }
 0xd6f   : > { %6497 = vmatpush1.bf16.msra.mxu1 %v9839_v1  ;;  %v11437_v54 = vpop.eup %11436  ;;  %v5397_v48 = vmul.f32 0.00390625, %v5367_v14  ;;  %v9864_v13 = vcombine.high %v5604_v3, %v5608_v10  ;;  %v5612_v14 = vld [vmem:[#allocation21 + $0x148] sm:$0xff] }
 0xd70   : > { %6498 = vmatprep.subr.bf16.mxu1 %v9848_v39  ;;  %v5447_v60 = vmul.f32 %v11437_v54, %v15282_v11  ;;  %v5448_v61 = vmul.f32 %v11437_v54, %v15285_v25  ;;  %6423 = vmatprep.mubr.bf16.mxu1 %v15454_v57  ;;  %v5370_v9 = vpop.xlane.xlu1 %5369  ;;  %v5489_v45 = vmul.f32 %v15409_v44, %v5446_v63 }
 0xd71   : > { %6649 = vmatprep.mubr.bf16.mxu0 %v15454_v57  ;;  %v5413_v1 = vadd.f32 1e-05, %v5397_v48  ;;  %v5398_v32 = vmul.f32 0.00390625, %v5370_v9  ;;  %6424 = vmatmul.mubr.bf16.gmra.mrb[132].mxu1 %v15456_v6  ;;  %v5488_v37 = vmul.f32 %v15403_v55, %v5445_v5  ;;  %v9855_v11 = vcombine.low %v5596_v36, %v5600_v47  ;;  %v5616_v5 = vld [vmem:[#allocation21 + $0x168] sm:$0xff] }
 0xd72   : > { %6650 = vmatmul.mubr.bf16.gmra.mrb[100].mxu0 %v15456_v6  ;;  %v5491_v25 = vmul.f32 %v15409_v44, %v5448_v61  ;;  %v5490_v39 = vmul.f32 %v15403_v55, %v5447_v60  ;;  %v5532_v0 = vadd.f32 %v15417_v53, %v5489_v45  ;;  %v9863_v36 = vcombine.low %v5604_v3, %v5608_v10  ;;  %v5620_v3 = vld [vmem:[#allocation21 + $0x188] sm:$0xff] }
 0xd73   : > { %6499 = vmatpush1.bf16.msra.mxu1 %v9847_v20  ;;  %11442 = vrsqrt.f32 %v5413_v1  ;;  %v5414_v51 = vadd.f32 1e-05, %v5398_v32  ;;  %v5531_v22 = vadd.f32 %v15414_v35, %v5488_v37  ;;  %v9872_v45 = vcombine.high %v5612_v14, %v5616_v5  ;;  %v5624_v10 = vld [vmem:[#allocation21 + $0x1a8] sm:$0xff] }
 0xd74   : > { %6500 = vmatprep.subr.bf16.mxu1 %v9856_v62  ;;  %v5534_v16 = vadd.f32 %v15417_v53, %v5491_v25  ;;  %v5533_v63 = vadd.f32 %v15414_v35, %v5490_v39 }
 0xd75   : > { %v11439_v20 = vpop.eup %11438  ;;  %11444 = vrsqrt.f32 %v5414_v51 }
 0xd76   : > { %v5449_v47 = vmul.f32 %v11439_v20, %v15292_v40  ;;  %v5450_v54 = vmul.f32 %v11439_v20, %v15295_v38  ;;  %v5373_v48 = vpop.xlane.xlu0 %5372  ;;  %v15474_v62 = vpack.c.bf16 %v5534_v16, %v5532_v0  ;;  %v15476_v60 = vpack.c.bf16 %v5533_v63, %v5531_v22  ;;  %v5628_v20 = vld [vmem:[#allocation21 + $0x1c8] sm:$0xff] }
 0xd77   : > { %6501 = vmatpush1.bf16.msra.mxu1 %v9855_v11  ;;  %v11441_v61 = vpop.eup %11440  ;;  %v5399_v9 = vmul.f32 0.00390625, %v5373_v48 }
 0xd78   : > { %6502 = vmatprep.subr.bf16.mxu1 %v9864_v13  ;;  %v5451_v1 = vmul.f32 %v11441_v61, %v15302_v59  ;;  %v5452_v32 = vmul.f32 %v11441_v61, %v15305_v21  ;;  %6433 = vmatprep.mubr.bf16.mxu1 %v15474_v62  ;;  %v5376_v40 = vpop.xlane.xlu1 %5375  ;;  %v5493_v38 = vmul.f32 %v15409_v44, %v5450_v54 }
 0xd79   : > { %6659 = vmatprep.mubr.bf16.mxu0 %v15474_v62  ;;  %v5415_v37 = vadd.f32 1e-05, %v5399_v9  ;;  %v5400_v11 = vmul.f32 0.00390625, %v5376_v40  ;;  %6434 = vmatmul.mubr.bf16.gmra.mrb[136].mxu1 %v15476_v60  ;;  %v5492_v25 = vmul.f32 %v15403_v55, %v5449_v47  ;;  %v9871_v59 = vcombine.low %v5612_v14, %v5616_v5  ;;  %v5632_v47 = vld [vmem:[#allocation21 + $0x1e8] sm:$0xff] }
 0xd7a   : > { %6660 = vmatmul.mubr.bf16.gmra.mrb[104].mxu0 %v15476_v60  ;;  %v5495_v21 = vmul.f32 %v15409_v44, %v5452_v32  ;;  %v5494_v39 = vmul.f32 %v15403_v55, %v5451_v1  ;;  %v9880_v13 = vcombine.high %v5620_v3, %v5624_v10  ;;  %v5536_v0 = vadd.f32 %v15417_v53, %v5493_v38 }
 0xd7b   : > { %6503 = vmatpush1.bf16.msra.mxu1 %v9863_v36  ;;  %11446 = vrsqrt.f32 %v5415_v37  ;;  %v5416_v51 = vadd.f32 1e-05, %v5400_v11  ;;  %v5535_v22 = vadd.f32 %v15414_v35, %v5492_v25  ;;  %v9879_v14 = vcombine.low %v5620_v3, %v5624_v10  ;;  %v5636_v3 = vld [vmem:[#allocation21 + $0x208] sm:$0xff] }
 0xd7c   : > { %6504 = vmatprep.subr.bf16.mxu1 %v9872_v45  ;;  %v5538_v16 = vadd.f32 %v15417_v53, %v5495_v21  ;;  %v5537_v63 = vadd.f32 %v15414_v35, %v5494_v39  ;;  %v9888_v32 = vcombine.high %v5628_v20, %v5632_v47  ;;  %v5640_v10 = vld [vmem:[#allocation21 + $0x228] sm:$0xff] }
 0xd7d   : > { %v11443_v36 = vpop.eup %11442  ;;  %11448 = vrsqrt.f32 %v5416_v51  ;;  %v9896_v39 = vcombine.high %v5636_v3, %v5640_v10 }
 0xd7e   : > { %v5453_v5 = vmul.f32 %v11443_v36, %v15312_v31  ;;  %v5454_v54 = vmul.f32 %v11443_v36, %v15315_v30  ;;  %v5379_v48 = vpop.xlane.xlu0 %5378  ;;  %v15494_v61 = vpack.c.bf16 %v5538_v16, %v5536_v0  ;;  %v15496_v9 = vpack.c.bf16 %v5537_v63, %v5535_v22  ;;  %v5644_v22 = vld [vmem:[#allocation21 + $0x248] sm:$0xff] }
 0xd7f   : > { %6505 = vmatpush1.bf16.msra.mxu1 %v9871_v59  ;;  %v11445_v45 = vpop.eup %11444  ;;  %v5401_v1 = vmul.f32 0.00390625, %v5379_v48  ;;  %v5648_v63 = vld [vmem:[#allocation21 + $0x268] sm:$0xff] }
 0xd80   : > { %6506 = vmatprep.subr.bf16.mxu1 %v9880_v13  ;;  %v5455_v40 = vmul.f32 %v11445_v45, %v15322_v46  ;;  %v5456_v38 = vmul.f32 %v11445_v45, %v15325_v34  ;;  %6443 = vmatprep.mubr.bf16.mxu1 %v15494_v61  ;;  %v5382_v31 = vpop.xlane.xlu1 %5381  ;;  %v5497_v30 = vmul.f32 %v15409_v44, %v5454_v54 }
 0xd81   : > { %6669 = vmatprep.mubr.bf16.mxu0 %v15494_v61  ;;  %v5417_v37 = vadd.f32 1e-05, %v5401_v1  ;;  %v5402_v11 = vmul.f32 0.00390625, %v5382_v31  ;;  %6444 = vmatmul.mubr.bf16.gmra.mrb[140].mxu1 %v15496_v9  ;;  %v5496_v25 = vmul.f32 %v15403_v55, %v5453_v5  ;;  %v9887_v46 = vcombine.low %v5628_v20, %v5632_v47  ;;  %v5652_v31 = vld [vmem:[#allocation21 + $0x288] sm:$0xff] }
 0xd82   : > { %6670 = vmatmul.mubr.bf16.gmra.mrb[108].mxu0 %v15496_v9  ;;  %v5499_v34 = vmul.f32 %v15409_v44, %v5456_v38  ;;  %v5498_v59 = vmul.f32 %v15403_v55, %v5455_v40  ;;  %v5540_v51 = vadd.f32 %v15417_v53, %v5497_v30  ;;  %v9895_v20 = vcombine.low %v5636_v3, %v5640_v10  ;;  %v5656_v30 = vld [vmem:[#allocation21 + $0x2a8] sm:$0xff] }
 0xd83   : > { %6507 = vmatpush1.bf16.msra.mxu1 %v9879_v14  ;;  %11450 = vrsqrt.f32 %v5417_v37  ;;  %v5418_v21 = vadd.f32 1e-05, %v5402_v11  ;;  %v5539_v0 = vadd.f32 %v15414_v35, %v5496_v25 }
 0xd84   : > { %6508 = vmatprep.subr.bf16.mxu1 %v9888_v32  ;;  %v5542_v13 = vadd.f32 %v15417_v53, %v5499_v34  ;;  %v5541_v16 = vadd.f32 %v15414_v35, %v5498_v59  ;;  %v9904_v32 = vcombine.high %v5644_v22, %v5648_v63 }
 0xd85   : > { %v11447_v36 = vpop.eup %11446  ;;  %11452 = vrsqrt.f32 %v5418_v21 }
 0xd86   : > { %v5457_v47 = vmul.f32 %v11447_v36, %v15332_v43  ;;  %v5458_v14 = vmul.f32 %v11447_v36, %v15335_v50  ;;  %v5385_v5 = vpop.xlane.xlu0 %5384  ;;  %v15514_v54 = vpack.c.bf16 %v5542_v13, %v5540_v51  ;;  %v15516_v48 = vpack.c.bf16 %v5541_v16, %v5539_v0  ;;  %v5660_v51 = vld [vmem:[#allocation21 + $0x2c8] sm:$0xff] }
 0xd87   : > { %6509 = vmatpush1.bf16.msra.mxu1 %v9887_v46  ;;  %v11449_v45 = vpop.eup %11448  ;;  %v5403_v1 = vmul.f32 0.00390625, %v5385_v5  ;;  %v9912_v46 = vcombine.high %v5652_v31, %v5656_v30  ;;  %v5664_v13 = vld [vmem:[#allocation21 + $0x2e8] sm:$0xff]  ;;  %v9911_v16 = vcombine.low %v5652_v31, %v5656_v30 }
 0xd88   : > { %6510 = vmatprep.subr.bf16.mxu1 %v9896_v39  ;;  %v5459_v40 = vmul.f32 %v11449_v45, %v15342_v18  ;;  %v5460_v38 = vmul.f32 %v11449_v45, %v15345_v8  ;;  %6453 = vmatprep.mubr.bf16.mxu1 %v15514_v54  ;;  %v5388_v43 = vpop.xlane.xlu1 %5387  ;;  %v5501_v50 = vmul.f32 %v15409_v44, %v5458_v14 }
 0xd89   : > { %6679 = vmatprep.mubr.bf16.mxu0 %v15514_v54  ;;  %v5419_v3 = vadd.f32 1e-05, %v5403_v1  ;;  %v5404_v10 = vmul.f32 0.00390625, %v5388_v43  ;;  %6454 = vmatmul.mubr.bf16.gmra.mrb[144].mxu1 %v15516_v48  ;;  %v5500_v37 = vmul.f32 %v15403_v55, %v5457_v47  ;;  %v9903_v18 = vcombine.low %v5644_v22, %v5648_v63  ;;  %v5668_v1 = vld [vmem:[#allocation21 + $0x308] sm:$0xff] }
 0xd8a   : > { %6680 = vmatmul.mubr.bf16.gmra.mrb[112].mxu0 %v15516_v48  ;;  %v5503_v8 = vmul.f32 %v15409_v44, %v5460_v38  ;;  %v5502_v11 = vmul.f32 %v15403_v55, %v5459_v40  ;;  %v5544_v34 = vadd.f32 %v15417_v53, %v5501_v50  ;;  %v9920_v14 = vcombine.high %v5660_v51, %v5664_v13  ;;  %v10994_v38 = vld [vmem:[#allocation23] ss:$8 sps:$4 sm:$0xff]   ;;  %v10996_v43 = vld [vmem:[#allocation23 + $0x4] ss:$8 sps:$4 sm:$0xff]  }
 0xd8b   : > { %6511 = vmatpush1.bf16.msra.mxu1 %v9895_v20  ;;  %11454 = vrsqrt.f32 %v5419_v3  ;;  %v5420_v25 = vadd.f32 1e-05, %v5404_v10  ;;  %v5543_v21 = vadd.f32 %v15414_v35, %v5500_v37  ;;  %v9919_v40 = vcombine.low %v5660_v51, %v5664_v13  ;;  %v5676_v37 = vld [vmem:[#allocation21 + $0x348] sm:$0xff]  ;;  %8317 = vmatprep.subr.bf16.mxu0 %v10996_v43  ;;  %v5578_v43 = vld [vmem:[#allocation21 + $0x38] sm:$0xff] }
 0xd8c   : > { %6512 = vmatprep.subr.bf16.mxu1 %v9904_v32  ;;  %v5546_v59 = vadd.f32 %v15417_v53, %v5503_v8  ;;  %v5545_v39 = vadd.f32 %v15414_v35, %v5502_v11  ;;  %8318 = vmatpush1.bf16.msra.mxu0 %v10994_v38  ;;  %v11000_v38 = vld [vmem:[#allocation23 + $0x20] ss:$8 sps:$4 sm:$0xff]  }
 0xd8d   : > { %v11451_v0 = vpop.eup %11450  ;;  %11456 = vrsqrt.f32 %v5420_v25 }
 0xd8e   : > { %v5461_v22 = vmul.f32 %v11451_v0, %v15360_v24  ;;  %v5462_v63 = vmul.f32 %v11451_v0, %v15363_v42  ;;  %v15534_v36 = vpack.c.bf16 %v5546_v59, %v5544_v34  ;;  %v15536_v20 = vpack.c.bf16 %v5545_v39, %v5543_v21  ;;  %v5672_v42 = vld [vmem:[#allocation21 + $0x328] sm:$0xff] }
 0xd8f   : > { %6513 = vmatpush1.bf16.msra.mxu1 %v9903_v18  ;;  %v11453_v47 = vpop.eup %11452  ;;  %v9928_v50 = vcombine.high %v5668_v1, %v5672_v42  ;;  %v5680_v18 = vld [vmem:[#allocation21 + $0x368] sm:$0xff]  ;;  %v9927_v11 = vcombine.low %v5668_v1, %v5672_v42 }
 0xd90   : > { %6514 = vmatprep.subr.bf16.mxu1 %v9912_v46  ;;  %v5463_v5 = vmul.f32 %v11453_v47, %v15370_v52  ;;  %v5464_v45 = vmul.f32 %v11453_v47, %v15373_v49  ;;  %6463 = vmatprep.mubr.bf16.mxu1 %v15534_v36  ;;  %v5505_v24 = vmul.f32 %v15409_v44, %v5462_v63  ;;  %v5684_v0 = vld [vmem:[#allocation21 + $0x388] sm:$0xff]  ;;  %v10999_v63 = vld [vmem:[#allocation23 + $0x14] ss:$8 sps:$4 sm:$0xff]  }
 0xd91   : > { %6689 = vmatprep.mubr.bf16.mxu0 %v15534_v36  ;;  %6464 = vmatmul.mubr.bf16.gmra.mrb[148].mxu1 %v15536_v20  ;;  %v5504_v32 = vmul.f32 %v15403_v55, %v5461_v22  ;;  %v9936_v39 = vcombine.high %v5676_v37, %v5680_v18  ;;  %v10997_v22 = vld [vmem:[#allocation23 + $0x10] ss:$8 sps:$4 sm:$0xff]  }
 0xd92   : > { %6690 = vmatmul.mubr.bf16.gmra.mrb[116].mxu0 %v15536_v20  ;;  %v5507_v52 = vmul.f32 %v15409_v44, %v5464_v45  ;;  %v5506_v49 = vmul.f32 %v15403_v55, %v5463_v5  ;;  %v5548_v31 = vadd.f32 %v15417_v53, %v5505_v24  ;;  %8319 = vmatprep.subr.bf16.mxu0 %v10999_v63  ;;  %v11012_v63 = vld [vmem:[#allocation23 + $0x60] ss:$8 sps:$4 sm:$0xff]  }
 0xd93   : > { %6515 = vmatpush1.bf16.msra.mxu1 %v9911_v16  ;;  %v5547_v3 = vadd.f32 %v15414_v35, %v5504_v32  ;;  %v5692_v32 = vld [vmem:[#allocation21 + $0x3c8] sm:$0xff]  ;;  %8320 = vmatpush1.bf16.msra.mxu0 %v10997_v22 }
 0xd94   : > { %6516 = vmatprep.subr.bf16.mxu1 %v9920_v14  ;;  %v5550_v30 = vadd.f32 %v15417_v53, %v5507_v52  ;;  %v5549_v10 = vadd.f32 %v15414_v35, %v5506_v49  ;;  %v11002_v14 = vld [vmem:[#allocation23 + $0x24] ss:$8 sps:$4 sm:$0xff]  }
 0xd95   : > { %v11455_v8 = vpop.eup %11454  ;;  %8321 = vmatprep.subr.bf16.mxu0 %v11002_v14 }
 0xd96   : > { %v5465_v25 = vmul.f32 %v11455_v8, %v15380_v15  ;;  %v5466_v46 = vmul.f32 %v11455_v8, %v15383_v56  ;;  %v15554_v34 = vpack.c.bf16 %v5550_v30, %v5548_v31  ;;  %v15556_v59 = vpack.c.bf16 %v5549_v10, %v5547_v3  ;;  %v5688_v56 = vld [vmem:[#allocation21 + $0x3a8] sm:$0xff]  ;;  %v11003_v30 = vld [vmem:[#allocation23 + $0x30] ss:$8 sps:$4 sm:$0xff]  }
 0xd97   : > { %6517 = vmatpush1.bf16.msra.mxu1 %v9919_v40  ;;  %v11457_v21 = vpop.eup %11456  ;;  %v9944_v5 = vcombine.high %v5684_v0, %v5688_v56  ;;  %v5696_v40 = vld [vmem:[#allocation21 + $0x3e8] sm:$0xff]  ;;  %8322 = vmatpush1.bf16.msra.mxu0 %v11000_v38  ;;  %v5582_v3 = vld [vmem:[#allocation21 + $0x58] sm:$0xff] }
 0xd98   : > { %6518 = vmatprep.subr.bf16.mxu1 %v9928_v50  ;;  %v5467_v51 = vmul.f32 %v11457_v21, %v15390_v7  ;;  %v5468_v13 = vmul.f32 %v11457_v21, %v15393_v19  ;;  %6473 = vmatprep.mubr.bf16.mxu1 %v15554_v34  ;;  %v5509_v15 = vmul.f32 %v15409_v44, %v5466_v46  ;;  %v5586_v10 = vld [vmem:[#allocation21 + $0x78] sm:$0xff] }
 0xd99   : > { %6699 = vmatprep.mubr.bf16.mxu0 %v15554_v34  ;;  %6474 = vmatmul.mubr.bf16.gmra.mrb[152].mxu1 %v15556_v59  ;;  %v5508_v16 = vmul.f32 %v15403_v55, %v5465_v25  ;;  %v9935_v7 = vcombine.low %v5676_v37, %v5680_v18  ;;  %v9952_v49 = vcombine.high %v5692_v32, %v5696_v40  ;;  %v11008_v37 = vld [vmem:[#allocation23 + $0x44] ss:$8 sps:$4 sm:$0xff]   ;;  %v5590_v25 = vld [vmem:[#allocation21 + $0x98] sm:$0xff] }
 0xd9a   : > { %6700 = vmatmul.mubr.bf16.gmra.mrb[120].mxu0 %v15556_v59  ;;  %v5511_v19 = vmul.f32 %v15409_v44, %v5468_v13  ;;  %v5510_v47 = vmul.f32 %v15403_v55, %v5467_v51  ;;  %v5552_v45 = vadd.f32 %v15417_v53, %v5509_v15  ;;  %v9943_v55 = vcombine.low %v5684_v0, %v5688_v56  ;;  %v5594_v46 = vld [vmem:[#allocation21 + $0xb8] sm:$0xff]  ;;  %v11014_v56 = vld [vmem:[#allocation23 + $0x64] ss:$8 sps:$4 sm:$0xff]  }
 0xd9b   : > { %6519 = vmatpush1.bf16.msra.mxu1 %v9927_v11  ;;  %v5551_v1 = vadd.f32 %v15414_v35, %v5508_v16  ;;  %v9951_v50 = vcombine.low %v5692_v32, %v5696_v40  ;;  %v9844_v8 = vcombine.high %v5582_v3, %v5586_v10  ;;  %v11006_v11 = vld [vmem:[#allocation23 + $0x40] ss:$8 sps:$4 sm:$0xff]   ;;  %v11011_v21 = vld [vmem:[#allocation23 + $0x54] ss:$8 sps:$4 sm:$0xff]   ;;  %v9852_v51 = vcombine.high %v5590_v25, %v5594_v46  ;;  %v11009_v13 = vld [vmem:[#allocation23 + $0x50] ss:$8 sps:$4 sm:$0xff]  }
 0xd9c   : > { %6520 = vmatprep.subr.bf16.mxu1 %v9936_v39  ;;  %v5554_v24 = vadd.f32 %v15417_v53, %v5511_v19  ;;  %v5553_v42 = vadd.f32 %v15414_v35, %v5510_v47  ;;  %v5574_v53 = vld [vmem:[#allocation21 + $0x18] sm:$0xff]  ;;  %v9843_v39 = vcombine.low %v5582_v3, %v5586_v10  ;;  %v9851_v16 = vcombine.low %v5590_v25, %v5594_v46  ;;  %v11026_v10 = vld [vmem:[#allocation23 + $0xa4] ss:$8 sps:$4 sm:$0xff]  }
 0xd9d   : > { %v11005_v35 = vld [vmem:[#allocation23 + $0x34] ss:$8 sps:$4 sm:$0xff]   ;;  %v9836_v31 = vcombine.high %v5574_v53, %v5578_v43  ;;  %v9835_v18 = vcombine.low %v5574_v53, %v5578_v43 }
 0xd9e   : > { %v15572_v44 = vpack.c.bf16 %v5554_v24, %v5552_v45  ;;  %v15574_v52 = vpack.c.bf16 %v5553_v42, %v5551_v1  ;;  %8323 = vmatprep.subr.bf16.mxu0 %v11005_v35  ;;  %v5598_v15 = vld [vmem:[#allocation21 + $0xd8] sm:$0xff]  ;;  %v11020_v42 = vld [vmem:[#allocation23 + $0x84] ss:$8 sps:$4 sm:$0xff]  }
 0xd9f   : > { %6521 = vmatpush1.bf16.msra.mxu1 %v9935_v7  ;;  %8324 = vmatpush1.bf16.msra.mxu0 %v11003_v30  ;;  %v5602_v0 = vld [vmem:[#allocation21 + $0xf8] sm:$0xff] }
 0xda0   : > { %6522 = vmatprep.subr.bf16.mxu1 %v9944_v5  ;;  %6483 = vmatprep.mubr.bf16.mxu1 %v15572_v44  ;;  %v9860_v22 = vcombine.high %v5598_v15, %v5602_v0  ;;  %v5606_v7 = vld [vmem:[#allocation21 + $0x118] sm:$0xff]  ;;  %v9859_v14 = vcombine.low %v5598_v15, %v5602_v0 }
 0xda1   : > { %6709 = vmatprep.mubr.bf16.mxu0 %v15572_v44  ;;  %6484 = vmatmul.mubr.bf16.gmra.mrb[156].mxu1 %v15574_v52  ;;  %v5610_v19 = vld [vmem:[#allocation21 + $0x138] sm:$0xff] }
 0xda2   : > { %6710 = vmatmul.mubr.bf16.gmra.mrb[124].mxu0 %v15574_v52  ;;  %6526 = vmatprep.mubr.bf16.mxu1 %v15431_v17  ;;  %v11017_v47 = vld [vmem:[#allocation23 + $0x74] ss:$8 sps:$4 sm:$0xff]   ;;  %v9868_v5 = vcombine.high %v5606_v7, %v5610_v19  ;;  %v11015_v45 = vld [vmem:[#allocation23 + $0x70] ss:$8 sps:$4 sm:$0xff]   ;;  %v9867_v32 = vcombine.low %v5606_v7, %v5610_v19 }
 0xda3   : > { %6523 = vmatpush1.bf16.msra.mxu1 %v9943_v55  ;;  %8325 = vmatprep.subr.bf16.mxu0 %v11008_v37  ;;  %v5614_v24 = vld [vmem:[#allocation21 + $0x158] sm:$0xff]  ;;  %v11018_v55 = vld [vmem:[#allocation23 + $0x80] ss:$8 sps:$4 sm:$0xff]  }
 0xda4   : > { %6524 = vmatprep.subr.bf16.mxu1 %v9952_v49  ;;  %8326 = vmatpush1.bf16.msra.mxu0 %v11006_v11  ;;  %v5618_v1 = vld [vmem:[#allocation21 + $0x178] sm:$0xff] }
 0xda5   : > { %8327 = vmatprep.subr.bf16.mxu0 %v11011_v21  ;;  %v9876_v40 = vcombine.high %v5614_v24, %v5618_v1  ;;  %v5622_v49 = vld [vmem:[#allocation21 + $0x198] sm:$0xff]  ;;  %v9875_v43 = vcombine.low %v5614_v24, %v5618_v1 }
 0xda6   : > { %v5626_v38 = vld [vmem:[#allocation21 + $0x1b8] sm:$0xff] }
 0xda7   : > { %6525 = vmatpush1.bf16.msra.mxu1 %v9951_v50  ;;  %v11023_v53 = vld [vmem:[#allocation23 + $0x94] ss:$8 sps:$4 sm:$0xff]   ;;  %v9884_v35 = vcombine.high %v5622_v49, %v5626_v38  ;;  %v11021_v50 = vld [vmem:[#allocation23 + $0x90] ss:$8 sps:$4 sm:$0xff]   ;;  %v9883_v3 = vcombine.low %v5622_v49, %v5626_v38 }
 0xda8   : > { %6720 = vmatprep.subr.bf16.mxu1 %v9836_v31  ;;  %8328 = vmatpush1.bf16.msra.mxu0 %v11009_v13  ;;  %v5630_v31 = vld [vmem:[#allocation21 + $0x1d8] sm:$0xff] }
 0xda9   : > { %8329 = vmatprep.subr.bf16.mxu0 %v11014_v56  ;;  %v5634_v30 = vld [vmem:[#allocation21 + $0x1f8] sm:$0xff] }
 0xdaa   : > { %6527 = vmatmul.mubr.bf16.vlgmr.msra.gmra.mrb[160].mxu1 %v15433_v28  ;;  %v9892_v37 = vcombine.high %v5630_v31, %v5634_v30  ;;  %v5642_v11 = vld [vmem:[#allocation21 + $0x238] sm:$0xff]  ;;  %v9891_v25 = vcombine.low %v5630_v31, %v5634_v30 }
 0xdab   : > { %6536 = vmatprep.mubr.bf16.mxu1 %v15454_v57  ;;  %6721 = vmatpush1.bf16.msra.mxu1 %v9835_v18  ;;  %v11024_v18 = vld [vmem:[#allocation23 + $0xa0] ss:$8 sps:$4 sm:$0xff]   ;;  %v5646_v21 = vld [vmem:[#allocation21 + $0x258] sm:$0xff] }
 0xdac   : > { %6722 = vmatprep.subr.bf16.mxu1 %v9844_v8  ;;  %8330 = vmatpush1.bf16.msra.mxu0 %v11012_v63  ;;  %v5638_v8 = vld [vmem:[#allocation21 + $0x218] sm:$0xff]  ;;  %v11030_v63 = vld [vmem:[#allocation23 + $0xc0] ss:$8 sps:$4 sm:$0xff]  }
 0xdad   : > { %8331 = vmatprep.subr.bf16.mxu0 %v11017_v47  ;;  %v9900_v46 = vcombine.high %v5638_v8, %v5642_v11  ;;  %v11027_v13 = vld [vmem:[#allocation23 + $0xb0] ss:$8 sps:$4 sm:$0xff]   ;;  %v9899_v15 = vcombine.low %v5638_v8, %v5642_v11  ;;  %v11041_v8 = vld [vmem:[#allocation23 + $0xf4] ss:$8 sps:$4 sm:$0xff]  }
 0xdae   : > { %v5654_v56 = vld [vmem:[#allocation21 + $0x298] sm:$0xff] }
 0xdaf   : > { %6723 = vmatpush1.bf16.msra.mxu1 %v9843_v39  ;;  %v5650_v39 = vld [vmem:[#allocation21 + $0x278] sm:$0xff] }
 0xdb0   : > { %6724 = vmatprep.subr.bf16.mxu1 %v9852_v51  ;;  %8332 = vmatpush1.bf16.msra.mxu0 %v11015_v45  ;;  %v11029_v51 = vld [vmem:[#allocation23 + $0xb4] ss:$8 sps:$4 sm:$0xff]   ;;  %v9908_v0 = vcombine.high %v5646_v21, %v5650_v39  ;;  %v9907_v7 = vcombine.low %v5646_v21, %v5650_v39  ;;  %v11033_v1 = vld [vmem:[#allocation23 + $0xd0] ss:$8 sps:$4 sm:$0xff]   ;;  %v11044_v39 = vld [vmem:[#allocation23 + $0x104] ss:$8 sps:$4 sm:$0xff]  }
 0xdb1   : > { %8333 = vmatprep.subr.bf16.mxu0 %v11020_v42  ;;  %v5662_v47 = vld [vmem:[#allocation21 + $0x2d8] sm:$0xff] }
 0xdb2   : > { %6537 = vmatmul.mubr.bf16.gmra.mrb[164].mxu1 %v15456_v6  ;;  %v11035_v45 = vld [vmem:[#allocation23 + $0xd4] ss:$8 sps:$4 sm:$0xff]  }
 0xdb3   : > { %6546 = vmatprep.mubr.bf16.mxu1 %v15474_v62  ;;  %6725 = vmatpush1.bf16.msra.mxu1 %v9851_v16  ;;  %v5658_v16 = vld [vmem:[#allocation21 + $0x2b8] sm:$0xff] }
 0xdb4   : > { %6726 = vmatprep.subr.bf16.mxu1 %v9860_v22  ;;  %8334 = vmatpush1.bf16.msra.mxu0 %v11018_v55  ;;  %v11032_v22 = vld [vmem:[#allocation23 + $0xc4] ss:$8 sps:$4 sm:$0xff]   ;;  %v9916_v19 = vcombine.high %v5654_v56, %v5658_v16  ;;  %v5670_v42 = vld [vmem:[#allocation21 + $0x318] sm:$0xff] }
 0xdb5   : > { %8335 = vmatprep.subr.bf16.mxu0 %v11023_v53  ;;  %v5678_v49 = vld [vmem:[#allocation21 + $0x358] sm:$0xff] }
 0xdb6   : > { %v5682_v38 = vld [vmem:[#allocation21 + $0x378] sm:$0xff] }
 0xdb7   : > { %6727 = vmatpush1.bf16.msra.mxu1 %v9859_v14  ;;  %v5666_v14 = vld [vmem:[#allocation21 + $0x2f8] sm:$0xff] }
 0xdb8   : > { %6728 = vmatprep.subr.bf16.mxu1 %v9868_v5  ;;  %8336 = vmatpush1.bf16.msra.mxu0 %v11021_v50  ;;  %v9915_v5 = vcombine.low %v5654_v56, %v5658_v16  ;;  %v9924_v24 = vcombine.high %v5662_v47, %v5666_v14  ;;  %v11036_v50 = vld [vmem:[#allocation23 + $0xe0] ss:$8 sps:$4 sm:$0xff]   ;;  %v5686_v31 = vld [vmem:[#allocation21 + $0x398] sm:$0xff] }
 0xdb9   : > { %8337 = vmatprep.subr.bf16.mxu0 %v11026_v10  ;;  %v5690_v30 = vld [vmem:[#allocation21 + $0x3b8] sm:$0xff] }
 0xdba   : > { %6547 = vmatmul.mubr.bf16.gmra.mrb[168].mxu1 %v15476_v60  ;;  %v9948_v10 = vcombine.high %v5686_v31, %v5690_v30  ;;  %v9947_v11 = vcombine.low %v5686_v31, %v5690_v30 }
 0xdbb   : > { %6556 = vmatprep.mubr.bf16.mxu1 %v15494_v61  ;;  %6729 = vmatpush1.bf16.msra.mxu1 %v9867_v32  ;;  %v5674_v32 = vld [vmem:[#allocation21 + $0x338] sm:$0xff] }
 0xdbc   : > { %6730 = vmatprep.subr.bf16.mxu1 %v9876_v40  ;;  %8338 = vmatpush1.bf16.msra.mxu0 %v11024_v18  ;;  %v9923_v40 = vcombine.low %v5662_v47, %v5666_v14  ;;  %v9932_v55 = vcombine.high %v5670_v42, %v5674_v32  ;;  %v9931_v53 = vcombine.low %v5670_v42, %v5674_v32  ;;  %v5698_v18 = vld [vmem:[#allocation21 + $0x3f8] sm:$0xff] }
 0xdbd   : > { %8339 = vmatprep.subr.bf16.mxu0 %v11029_v51 }
 0xdbf   : > { %6731 = vmatpush1.bf16.msra.mxu1 %v9875_v43  ;;  %v11038_v43 = vld [vmem:[#allocation23 + $0xe4] ss:$8 sps:$4 sm:$0xff]  }
 0xdc0   : > { %6732 = vmatprep.subr.bf16.mxu1 %v9884_v35  ;;  %8340 = vmatpush1.bf16.msra.mxu0 %v11027_v13  ;;  %v9940_v35 = vcombine.high %v5678_v49, %v5682_v38 }
 0xdc1   : > { %8341 = vmatprep.subr.bf16.mxu0 %v11032_v22 }
 0xdc2   : > { %6557 = vmatmul.mubr.bf16.gmra.mrb[172].mxu1 %v15496_v9 }
 0xdc3   : > { %6566 = vmatprep.mubr.bf16.mxu1 %v15514_v54  ;;  %6733 = vmatpush1.bf16.msra.mxu1 %v9883_v3  ;;  %v9939_v3 = vcombine.low %v5678_v49, %v5682_v38 }
 0xdc4   : > { %6734 = vmatprep.subr.bf16.mxu1 %v9892_v37  ;;  %8342 = vmatpush1.bf16.msra.mxu0 %v11030_v63  ;;  %v5694_v37 = vld [vmem:[#allocation21 + $0x3d8] sm:$0xff] }
 0xdc5   : > { %8343 = vmatprep.subr.bf16.mxu0 %v11035_v45  ;;  %v9955_v21 = vcombine.low %v5694_v37, %v5698_v18 }
 0xdc7   : > { %6735 = vmatpush1.bf16.msra.mxu1 %v9891_v25  ;;  %v11039_v25 = vld [vmem:[#allocation23 + $0xf0] ss:$8 sps:$4 sm:$0xff]  }
 0xdc8   : > { %6736 = vmatprep.subr.bf16.mxu1 %v9900_v46  ;;  %8344 = vmatpush1.bf16.msra.mxu0 %v11033_v1  ;;  %v9956_v46 = vcombine.high %v5694_v37, %v5698_v18 }
 0xdc9   : > { %8345 = vmatprep.subr.bf16.mxu0 %v11038_v43 }
 0xdca   : > { %6567 = vmatmul.mubr.bf16.gmra.mrb[176].mxu1 %v15516_v48 }
 0xdcb   : > { %6576 = vmatprep.mubr.bf16.mxu1 %v15534_v36  ;;  %6737 = vmatpush1.bf16.msra.mxu1 %v9899_v15 }
 0xdcc   : > { %6738 = vmatprep.subr.bf16.mxu1 %v9908_v0  ;;  %8346 = vmatpush1.bf16.msra.mxu0 %v11036_v50 }
 0xdcd   : > { %8347 = vmatprep.subr.bf16.mxu0 %v11041_v8 }
 0xdcf   : > { %6739 = vmatpush1.bf16.msra.mxu1 %v9907_v7 }
 0xdd0   : > { %6740 = vmatprep.subr.bf16.mxu1 %v9916_v19  ;;  %8348 = vmatpush1.bf16.msra.mxu0 %v11039_v25 }
 0xdd1   : > { %8430 = vmatprep.subr.bf16.mxu0 %v11044_v39 }
 0xdd2   : > { %6577 = vmatmul.mubr.bf16.gmra.mrb[180].mxu1 %v15536_v20 }
 0xdd3   : > { %6586 = vmatprep.mubr.bf16.mxu1 %v15554_v34  ;;  %6741 = vmatpush1.bf16.msra.mxu1 %v9915_v5 }
 0xdd4   : > { %6742 = vmatprep.subr.bf16.mxu1 %v9924_v24 }
 0xdd7   : > { %6743 = vmatpush1.bf16.msra.mxu1 %v9923_v40 }
 0xdd8   : > { %6744 = vmatprep.subr.bf16.mxu1 %v9932_v55 }
 0xdda   : > { %6587 = vmatmul.mubr.bf16.gmra.mrb[184].mxu1 %v15556_v59 }
 0xddb   : > { %6596 = vmatprep.mubr.bf16.mxu1 %v15572_v44  ;;  %6745 = vmatpush1.bf16.msra.mxu1 %v9931_v53 }
 0xddc   : > { %6746 = vmatprep.subr.bf16.mxu1 %v9940_v35 }
 0xddf   : > { %6747 = vmatpush1.bf16.msra.mxu1 %v9939_v3 }
 0xde0   : > { %6748 = vmatprep.subr.bf16.mxu1 %v9948_v10 }
 0xde2   : > { %6597 = vmatmul.mubr.bf16.gmra.mrb[188].mxu1 %v15574_v52 }
 0xde3   : > { %6749 = vmatpush1.bf16.msra.mxu1 %v9947_v11  ;;  %6752 = vmatprep.mubr.bf16.mxu1 %v15431_v17  ;;  %v17998_v17 = vld [vmem:[#allocation51_spill] sm:$0xff] }
 0xde4   : > { %6750 = vmatprep.subr.bf16.mxu1 %v9956_v46  ;;  %v5711_v45 = vsub.s32 2, %v17998_v17  ;;  %v5715_v32 = vsub.s32 3, %v17998_v17 }
 0xde7   : > { %6751 = vmatpush1.bf16.msra.mxu1 %v9955_v21 }
 0xdea   : > { %6753 = vmatmul.mubr.bf16.vlgmr.msra.gmra.mrb[192].mxu1 %v15433_v28  ;;  %v5719_v28 = vsub.s32 4, %v17998_v17 }
 0xdeb   : > { %6762 = vmatprep.mubr.bf16.mxu1 %v15454_v57  ;;  %v5699_v57 = vld [vmem:[%s17999_s15] sm:$0xff] }
 0xdec   : > { %v15641_v37 = vrot.slane %v5699_v57, %v5711_v45  ;;  %v15643_v25 = vrot.slane %v5699_v57, %v5715_v32 }
 0xdee   : > { %18000 = vst [vmem:[#allocation72_spill] sm:$0xff] %v15641_v37  ;;  %18001 = vst [vmem:[#allocation73_spill] sm:$0xff] %v15643_v25 }
 0xdf2   : > { %6763 = vmatmul.mubr.bf16.gmra.mrb[196].mxu1 %v15456_v6  ;;  %v5723_v6 = vsub.s32 5, %v17998_v17 }
 0xdf3   : > { %6772 = vmatprep.mubr.bf16.mxu1 %v15474_v62  ;;  %v15618_v62 = vrot.slane %v5699_v57, %v17929_v41 }
 0xdfa   : > { %6773 = vmatmul.mubr.bf16.gmra.mrb[200].mxu1 %v15476_v60  ;;  %v15620_v60 = vrot.slane %v5699_v57, %v5719_v28 }
 0xdfb   : > { %6782 = vmatprep.mubr.bf16.mxu1 %v15494_v61  ;;  %v15623_v61 = vrot.slane %v5699_v57, %v17930_v23 }
 0xe02   : > { %6783 = vmatmul.mubr.bf16.gmra.mrb[204].mxu1 %v15496_v9  ;;  %v15625_v9 = vrot.slane %v5699_v57, %v5723_v6 }
 0xe03   : > { %6792 = vmatprep.mubr.bf16.mxu1 %v15514_v54 }
 0xe0a   : > { %6793 = vmatmul.mubr.bf16.gmra.mrb[208].mxu1 %v15516_v48 }
 0xe0b   : > { %6802 = vmatprep.mubr.bf16.mxu1 %v15534_v36 }
 0xe12   : > { %6803 = vmatmul.mubr.bf16.gmra.mrb[212].mxu1 %v15536_v20 }
 0xe13   : > { %6812 = vmatprep.mubr.bf16.mxu1 %v15554_v34 }
 0xe1a   : > { %6813 = vmatmul.mubr.bf16.gmra.mrb[216].mxu1 %v15556_v59 }
 0xe1b   : > { %6822 = vmatprep.mubr.bf16.mxu1 %v15572_v44 }
 0xe22   : > { %6823 = vmatmul.mubr.bf16.gmra.mrb[220].mxu1 %v15574_v52 }
 0xe3c   : > { %v6415_v54 = vpop.f32.mrb[128].mxu1  ;;  %v6641_v48 = vpop.f32.mrb[96].mxu0 }
 0xe3d   : > { %v6416_v36 = vadd.f32 %v6415_v54, %v15618_v62  ;;  %v6642_v20 = vadd.f32 %v6641_v48, %v15620_v60  ;;  %v6417_v34 = vpop.f32.mrb[129].mxu1  ;;  %v6643_v59 = vpop.f32.mrb[97].mxu0 }
 0xe3e   : > { %v6418_v44 = vadd.f32 %v6417_v34, %v15623_v61  ;;  %v6644_v52 = vadd.f32 %v6643_v59, %v15625_v9  ;;  %v6419_v51 = vpop.f32.mrb[130].mxu1  ;;  %v6645_v13 = vpop.f32.mrb[98].mxu0 }
 0xe3f   : > { %v6961_v15 = vmul.f32 0.70710677, %v6416_v36  ;;  %v6965_v0 = vmul.f32 0.70710677, %v6642_v20  ;;  %v6420_v22 = vadd.f32 %v6419_v51, %v15618_v62  ;;  %v6646_v63 = vadd.f32 %v6645_v13, %v15620_v60  ;;  %v6421_v7 = vpop.f32.mrb[131].mxu1  ;;  %v6647_v19 = vpop.f32.mrb[99].mxu0 }
 0xe40   : > { %v6962_v56 = vmul.f32 0.70710677, %v6418_v44  ;;  %v6966_v16 = vmul.f32 0.70710677, %v6644_v52  ;;  %v6422_v47 = vadd.f32 %v6421_v7, %v15623_v61  ;;  %v6648_v14 = vadd.f32 %v6647_v19, %v15625_v9 }
 0xe41   : > { %11458 = verf.f32 %v6961_v15  ;;  %v6969_v5 = vmul.f32 0.70710677, %v6420_v22  ;;  %v6973_v24 = vmul.f32 0.70710677, %v6646_v63  ;;  %v6833_v18 = vmul.f32 0.5, %v6416_v36 }
 0xe42   : > { %11460 = verf.f32 %v6965_v0  ;;  %v6970_v1 = vmul.f32 0.70710677, %v6422_v47  ;;  %v6974_v40 = vmul.f32 0.70710677, %v6648_v14  ;;  %v6837_v46 = vmul.f32 0.5, %v6642_v20 }
 0xe43   : > { %11462 = verf.f32 %v6962_v56  ;;  %v15648_v34 = vmul.f32 0.5, %v6418_v44  ;;  %v15650_v36 = vmul.f32 0.5, %v6644_v52  ;;  %v6841_v59 = vmul.f32 0.5, %v6420_v22 }
 0xe44   : > { %11464 = verf.f32 %v6966_v16  ;;  %v6425_v42 = vpop.f32.mrb[132].mxu1  ;;  %v6845_v20 = vmul.f32 0.5, %v6646_v63  ;;  %v15653_v7 = vmul.f32 0.5, %v6422_v47  ;;  %v15655_v19 = vmul.f32 0.5, %v6648_v14 }
 0xe45   : > { %11466 = verf.f32 %v6969_v5  ;;  %v6426_v55 = vadd.f32 %v6425_v42, %v15618_v62  ;;  %v6651_v49 = vpop.f32.mrb[100].mxu0  ;;  %v6427_v38 = vpop.f32.mrb[133].mxu1 }
 0xe46   : > { %11468 = verf.f32 %v6973_v24  ;;  %v6652_v53 = vadd.f32 %v6651_v49, %v15620_v60  ;;  %v6428_v43 = vadd.f32 %v6427_v38, %v15623_v61  ;;  %v6653_v35 = vpop.f32.mrb[101].mxu0  ;;  %v6429_v50 = vpop.f32.mrb[134].mxu1 }
 0xe47   : > { %11470 = verf.f32 %v6970_v1  ;;  %v6977_v31 = vmul.f32 0.70710677, %v6426_v55  ;;  %v6654_v30 = vadd.f32 %v6653_v35, %v15625_v9  ;;  %v6655_v3 = vpop.f32.mrb[102].mxu0  ;;  %v6431_v10 = vpop.f32.mrb[135].mxu1  ;;  %v6430_v28 = vadd.f32 %v6429_v50, %v15618_v62 }
 0xe48   : > { %11472 = verf.f32 %v6974_v40  ;;  %v6981_v8 = vmul.f32 0.70710677, %v6652_v53  ;;  %v6657_v11 = vpop.f32.mrb[103].mxu0  ;;  %v6978_v21 = vmul.f32 0.70710677, %v6428_v43  ;;  %v6656_v6 = vadd.f32 %v6655_v3, %v15620_v60 }
 0xe49   : > { %11474 = verf.f32 %v6977_v31  ;;  %v6982_v39 = vmul.f32 0.70710677, %v6654_v30  ;;  %v6432_v54 = vadd.f32 %v6431_v10, %v15623_v61  ;;  %v6985_v13 = vmul.f32 0.70710677, %v6430_v28 }
 0xe4a   : > { %11476 = verf.f32 %v6981_v8  ;;  %v6658_v15 = vadd.f32 %v6657_v11, %v15625_v9  ;;  %v15657_v5 = vmul.f32 0.5, %v6426_v55  ;;  %v6989_v44 = vmul.f32 0.70710677, %v6656_v6 }
 0xe4b   : > { %v11459_v48 = vpop.eup %11458  ;;  %11478 = verf.f32 %v6978_v21  ;;  %v15659_v24 = vmul.f32 0.5, %v6652_v53  ;;  %v6986_v63 = vmul.f32 0.70710677, %v6432_v54  ;;  %v15661_v40 = vmul.f32 0.5, %v6428_v43 }
 0xe4c   : > { %v11461_v57 = vpop.eup %11460  ;;  %v7217_v51 = vadd.f32 1.0, %v11459_v48  ;;  %v6435_v0 = vpop.f32.mrb[136].mxu1  ;;  %11480 = verf.f32 %v6982_v39  ;;  %v15663_v49 = vmul.f32 0.5, %v6654_v30  ;;  %v15665_v47 = vmul.f32 0.5, %v6430_v28 }
 0xe4d   : > { %v6661_v56 = vpop.f32.mrb[104].mxu0  ;;  %v11463_v16 = vpop.eup %11462  ;;  %v7221_v22 = vadd.f32 1.0, %v11461_v57  ;;  %11482 = verf.f32 %v6985_v13  ;;  %v6990_v50 = vmul.f32 0.70710677, %v6658_v15  ;;  %v6436_v30 = vadd.f32 %v6435_v0, %v15618_v62 }
 0xe4e   : > { %v6437_v52 = vpop.f32.mrb[137].mxu1  ;;  %v11465_v45 = vpop.eup %11464  ;;  %v15669_v35 = vmul.f32 %v7217_v51, %v6833_v18  ;;  %11484 = verf.f32 %v6989_v44  ;;  %v7218_v10 = vadd.f32 1.0, %v11463_v16  ;;  %v6662_v18 = vadd.f32 %v6661_v56, %v15620_v60 }
 0xe4f   : > { %v6663_v1 = vpop.f32.mrb[105].mxu0  ;;  %v6439_v42 = vpop.f32.mrb[138].mxu1  ;;  %11486 = verf.f32 %v6986_v63  ;;  %v15674_v11 = vmul.f32 %v7221_v22, %v6837_v46  ;;  %v7222_v28 = vadd.f32 1.0, %v11465_v45  ;;  %v6993_v57 = vmul.f32 0.70710677, %v6436_v30 }
 0xe50   : > { %v11467_v32 = vpop.eup %11466  ;;  %v6665_v14 = vpop.f32.mrb[106].mxu0  ;;  %11488 = verf.f32 %v6990_v50  ;;  %v6438_v51 = vadd.f32 %v6437_v52, %v15623_v61  ;;  %v15684_v44 = vmul.f32 0.5, %v6656_v6  ;;  %v15686_v46 = vmul.f32 0.5, %v6432_v54 }
 0xe51   : > { %v15667_v55 = vpop.f32.mrb[139].mxu1  ;;  %v11469_v38 = vpop.eup %11468  ;;  %v7225_v53 = vadd.f32 1.0, %v11467_v32  ;;  %18002 = vst [vmem:[#allocation74_spill] sm:$0xff] %v15674_v11  ;;  %11490 = verf.f32 %v6993_v57  ;;  %v6997_v54 = vmul.f32 0.70710677, %v6662_v18  ;;  %v6666_v58 = vadd.f32 %v6665_v14, %v15620_v60 }
 0xe52   : > { %v15671_v31 = vpop.f32.mrb[107].mxu0  ;;  %v11471_v3 = vpop.eup %11470  ;;  %v7229_v43 = vadd.f32 1.0, %v11469_v38  ;;  %v15695_v38 = vmul.f32 %v7218_v10, %v15648_v34  ;;  %v15724_v2 = vmul.f32 0.5, %v6438_v51 }
 0xe53   : > { %v11473_v8 = vpop.eup %11472  ;;  %v15676_v21 = vmul.f32 %v7225_v53, %v6841_v59  ;;  %v7226_v0 = vadd.f32 1.0, %v11471_v3  ;;  %v15697_v53 = vmul.f32 0.5, %v6658_v15  ;;  %v15712_v15 = vmul.f32 0.5, %v6436_v30 }
 0xe54   : > { %v11475_v39 = vpop.eup %11474  ;;  %v15679_v48 = vmul.f32 %v7229_v43, %v6845_v20  ;;  %v6445_v59 = vpop.f32.mrb[140].mxu1  ;;  %v7230_v45 = vadd.f32 1.0, %v11473_v8  ;;  %v15702_v43 = vmul.f32 %v7222_v28, %v15650_v36  ;;  %v6994_v8 = vmul.f32 0.70710677, %v6438_v51 }
 0xe55   : > { %v11477_v13 = vpop.eup %11476  ;;  %v15688_v22 = vpop.f32.mrb[108].mxu0  ;;  %v7233_v63 = vadd.f32 1.0, %v11475_v39  ;;  %v6664_v39 = vadd.f32 %v6663_v1, %v15625_v9  ;;  %v15710_v10 = vmul.f32 %v7226_v0, %v15653_v7  ;;  %11492 = verf.f32 %v6997_v54 }
 0xe56   : > { %18003 = vst [vmem:[#allocation75_spill] sm:$0xff] %v15679_v48  ;;  %v11479_v56 = vpop.eup %11478  ;;  %v6447_v52 = vpop.f32.mrb[141].mxu1  ;;  %v7237_v6 = vadd.f32 1.0, %v11477_v13  ;;  %18004 = vst [vmem:[#allocation76_spill] sm:$0xff] %v15702_v43  ;;  %v6440_v13 = vadd.f32 %v6439_v42, %v15618_v62  ;;  %v15717_v28 = vmul.f32 %v7230_v45, %v15655_v19  ;;  %11494 = verf.f32 %v6994_v8 }
 0xe57   : > { %v15692_v32 = vpop.f32.mrb[109].mxu0  ;;  %v6449_v50 = vpop.f32.mrb[142].mxu1  ;;  %v7234_v20 = vadd.f32 1.0, %v11479_v56  ;;  %v15720_v1 = vmul.f32 %v7233_v63, %v15657_v5  ;;  %v15722_v56 = vmul.f32 0.5, %v6662_v18  ;;  %v6998_v30 = vmul.f32 0.70710677, %v6664_v39 }
 0xe58   : > { %v15699_v3 = vpop.f32.mrb[110].mxu0  ;;  %v15705_v57 = vpop.f32.mrb[143].mxu1  ;;  %18005 = vst [vmem:[#allocation77_spill] sm:$0xff] %v15717_v28  ;;  %v15727_v7 = vmul.f32 %v7237_v6, %v15659_v24  ;;  %v7001_v42 = vmul.f32 0.70710677, %v6440_v13  ;;  %v6442_v18 = vadd.f32 %v15667_v55, %v15623_v61  ;;  %v6668_v24 = vadd.f32 %v15671_v31, %v15625_v9 }
 0xe59   : > { %v15707_v16 = vpop.f32.mrb[111].mxu0  ;;  %v11481_v34 = vpop.eup %11480  ;;  %v15730_v14 = vmul.f32 %v7234_v20, %v15661_v40  ;;  %v7005_v45 = vmul.f32 0.70710677, %v6666_v58  ;;  %11496 = verf.f32 %v6998_v30  ;;  %v15740_v26 = vmul.f32 0.5, %v6664_v39 }
 0xe5a   : > { %v11483_v36 = vpop.eup %11482  ;;  %18006 = vst [vmem:[#allocation78_spill] sm:$0xff] %v15727_v7  ;;  %v7238_v19 = vadd.f32 1.0, %v11481_v34  ;;  %11498 = verf.f32 %v7001_v42  ;;  %v6446_v40 = vadd.f32 %v6445_v59, %v15618_v62  ;;  %v7002_v55 = vmul.f32 0.70710677, %v6442_v18 }
 0xe5b   : > { %v11485_v29 = vpop.eup %11484  ;;  %v7241_v63 = vadd.f32 1.0, %v11483_v36  ;;  %v15747_v36 = vmul.f32 0.5, %v6440_v13  ;;  %11500 = verf.f32 %v7005_v45  ;;  %v7006_v42 = vmul.f32 0.70710677, %v6668_v24 }
 0xe5c   : > { %v11487_v0 = vpop.eup %11486  ;;  %v15736_v51 = vpop.f32.mrb[144].mxu1  ;;  %v7245_v54 = vadd.f32 1.0, %v11485_v29  ;;  %v15754_v29 = vmul.f32 %v7238_v19, %v15663_v49  ;;  %v7009_v59 = vmul.f32 0.70710677, %v6446_v40  ;;  %11502 = verf.f32 %v7002_v55  ;;  %v11042_v19 = vld [vmem:[#allocation23 + $0x100] ss:$8 sps:$4 sm:$0xff]  }
 0xe5d   : > { %v11489_v5 = vpop.eup %11488  ;;  %v15738_v6 = vpop.f32.mrb[112].mxu0  ;;  %v7242_v34 = vadd.f32 1.0, %v11487_v0  ;;  %v6672_v13 = vadd.f32 %v15688_v22, %v15620_v60  ;;  %v6448_v0 = vadd.f32 %v6447_v52, %v15623_v61  ;;  %11504 = verf.f32 %v7006_v42  ;;  %v11047_v52 = vld [vmem:[#allocation23 + $0x114] ss:$8 sps:$4 sm:$0xff]  }
 0xe5e   : > { %v15743_v20 = vpop.f32.mrb[145].mxu1  ;;  %v15745_v8 = vpop.f32.mrb[113].mxu0  ;;  %18007 = vst [vmem:[#allocation79_spill] sm:$0xff] %v15754_v29  ;;  %v7246_v39 = vadd.f32 1.0, %v11489_v5  ;;  %v6674_v4 = vadd.f32 %v15692_v32, %v15625_v9  ;;  %v7474_v49 = vpack.c.bf16 %v15710_v10, %v15695_v38  ;;  %v6450_v5 = vadd.f32 %v6449_v50, %v15618_v62  ;;  %v11045_v10 = vld [vmem:[#allocation23 + $0x110] ss:$8 sps:$4 sm:$0xff]  }
 0xe5f   : > { %v15749_v31 = vpop.f32.mrb[146].mxu1  ;;  %v15751_v30 = vpop.f32.mrb[114].mxu0  ;;  %v15771_v55 = vmul.f32 0.5, %v6666_v58  ;;  %11506 = verf.f32 %v7009_v59  ;;  %v7013_v22 = vmul.f32 0.70710677, %v6672_v13  ;;  %v15774_v23 = vmul.f32 %v7245_v54, %v15684_v44 }
 0xe60   : > { %v11491_v27 = vpop.eup %11490  ;;  %v15756_v33 = vpop.f32.mrb[147].mxu1  ;;  %v15777_v42 = vmul.f32 %v7242_v34, %v15686_v46  ;;  %v15779_v32 = vmul.f32 0.5, %v6442_v18  ;;  %v7010_v38 = vmul.f32 0.70710677, %v6448_v0  ;;  %8349 = vmatprep.mubr.bf16.mxu0 %v7474_v49  ;;  %v15784_v58 = vmul.f32 0.5, %v6668_v24 }
 0xe61   : > { %v7249_v12 = vadd.f32 1.0, %v11491_v27  ;;  %v15761_v45 = vpop.f32.mrb[115].mxu0  ;;  %v15769_v27 = vmul.f32 %v7241_v63, %v15665_v47  ;;  %18008 = vst [vmem:[#allocation80_spill] sm:$0xff] %v15774_v23  ;;  %v11493_v50 = vpop.eup %11492  ;;  %v15782_v47 = vmul.f32 %v7246_v39, %v15697_v53  ;;  %11508 = verf.f32 %v7013_v22 }
 0xe62   : > { %v7014_v63 = vmul.f32 0.70710677, %v6674_v4  ;;  %v18010_v44 = vpack.c.bf16 %v15676_v21, %v15669_v35  ;;  %v11495_v18 = vpop.eup %11494  ;;  %v15796_v59 = vmul.f32 0.5, %v6446_v40  ;;  %v7017_v53 = vmul.f32 0.70710677, %v6450_v5 }
 0xe63   : > { %18009 = vst [vmem:[#allocation81_spill] sm:$0xff] %v15782_v47  ;;  %v15794_v34 = vmul.f32 %v7249_v12, %v15712_v15  ;;  %v6676_v24 = vadd.f32 %v15699_v3, %v15620_v60  ;;  %v11497_v35 = vpop.eup %11496  ;;  %v15804_v21 = vmul.f32 0.5, %v6672_v13  ;;  %11510 = verf.f32 %v7010_v38  ;;  %v11050_v15 = vld [vmem:[#allocation23 + $0x124] ss:$8 sps:$4 sm:$0xff]  }
 0xe64   : > { %8350 = vmatmul.mubr.bf16.vlgmr.msra.gmra.mrb[128].mxu0 %v18010_v44  ;;  %v15789_v54 = vpop.f32.mrb[148].mxu1  ;;  %v6452_v22 = vadd.f32 %v15705_v57, %v15623_v61  ;;  %v6678_v12 = vadd.f32 %v15707_v16, %v15625_v9  ;;  %v7253_v44 = vadd.f32 1.0, %v11493_v50  ;;  %v15814_v41 = vmul.f32 0.5, %v6448_v0  ;;  %v11048_v0 = vld [vmem:[#allocation23 + $0x120] ss:$8 sps:$4 sm:$0xff]  }
 0xe65   : > { %v15791_v46 = vpop.f32.mrb[116].mxu0  ;;  %8431 = vmatpush1.bf16.msra.mxu0 %v11042_v19  ;;  %v15800_v39 = vpop.f32.mrb[149].mxu1  ;;  %11512 = verf.f32 %v7014_v63  ;;  %v7021_v13 = vmul.f32 0.70710677, %v6676_v24  ;;  %v7250_v48 = vadd.f32 1.0, %v11495_v18  ;;  %v15820_v23 = vmul.f32 0.5, %v6674_v4 }
 0xe66   : > { %v15802_v49 = vpop.f32.mrb[117].mxu0  ;;  %8432 = vmatprep.subr.bf16.mxu0 %v11047_v52  ;;  %v15810_v40 = vpop.f32.mrb[150].mxu1  ;;  %11514 = verf.f32 %v7017_v53  ;;  %v7018_v16 = vmul.f32 0.70710677, %v6452_v22  ;;  %v7254_v52 = vadd.f32 1.0, %v11497_v35  ;;  %v15822_v7 = vmul.f32 0.5, %v6450_v5 }
 0xe67   : > { %v15812_v3 = vpop.f32.mrb[118].mxu0  ;;  %v11499_v19 = vpop.eup %11498  ;;  %11516 = verf.f32 %v7021_v13  ;;  %v7022_v47 = vmul.f32 0.70710677, %v6678_v12  ;;  %v6456_v29 = vadd.f32 %v15736_v51, %v15618_v62  ;;  %v6682_v18 = vadd.f32 %v15738_v6, %v15620_v60  ;;  %v11053_v4 = vld [vmem:[#allocation23 + $0x134] ss:$8 sps:$4 sm:$0xff]  }
 0xe68   : > { %v15816_v11 = vpop.f32.mrb[151].mxu1  ;;  %v15818_v38 = vpop.f32.mrb[119].mxu0  ;;  %v7257_v63 = vadd.f32 1.0, %v11499_v19  ;;  %11518 = verf.f32 %v7018_v16  ;;  %v15829_v35 = vmul.f32 %v7253_v44, %v15722_v56  ;;  %v11051_v13 = vld [vmem:[#allocation23 + $0x130] ss:$8 sps:$4 sm:$0xff]   ;;  %v15834_v16 = vmul.f32 %v7250_v48, %v15724_v2 }
 0xe69   : > { %v11501_v57 = vpop.eup %11500  ;;  %8433 = vmatpush1.bf16.msra.mxu0 %v11045_v10  ;;  %11520 = verf.f32 %v7022_v47  ;;  %v6458_v10 = vadd.f32 %v15743_v20, %v15623_v61  ;;  %v15836_v51 = vmul.f32 0.5, %v6676_v24  ;;  %v15838_v28 = vmul.f32 0.5, %v6452_v22 }
 0xe6a   : > { %v11503_v50 = vpop.eup %11502  ;;  %8434 = vmatprep.subr.bf16.mxu0 %v11050_v15  ;;  %18011 = vst [vmem:[#allocation82_spill] sm:$0xff] %v15829_v35  ;;  %v7261_v5 = vadd.f32 1.0, %v11501_v57  ;;  %v7025_v6 = vmul.f32 0.70710677, %v6456_v29  ;;  %v11056_v15 = vld [vmem:[#allocation23 + $0x144] ss:$8 sps:$4 sm:$0xff]   ;;  %v15843_v56 = vmul.f32 %v7254_v52, %v15740_v26  ;;  %v15852_v24 = vmul.f32 %v7257_v63, %v15747_v36 }
 0xe6b   : > { %v11505_v53 = vpop.eup %11504  ;;  %v7258_v47 = vadd.f32 1.0, %v11503_v50  ;;  %v15845_v44 = vmul.f32 0.5, %v6678_v12  ;;  %v7029_v20 = vmul.f32 0.70710677, %v6682_v18  ;;  %v7026_v35 = vmul.f32 0.70710677, %v6458_v10 }
 0xe6c   : > { %v11507_v19 = vpop.eup %11506  ;;  %v15840_v43 = vpop.f32.mrb[152].mxu1  ;;  %18012 = vst [vmem:[#allocation83_spill] sm:$0xff] %v15843_v56  ;;  %v7262_v22 = vadd.f32 1.0, %v11505_v53  ;;  %v6684_v17 = vadd.f32 %v15745_v8, %v15625_v9  ;;  %v15861_v52 = vmul.f32 %v7261_v5, %v15771_v55  ;;  %11522 = verf.f32 %v7025_v6 }
 0xe6d   : > { %8435 = vmatpush1.bf16.msra.mxu0 %v11048_v0  ;;  %v15847_v57 = vpop.f32.mrb[120].mxu0  ;;  %v15849_v2 = vpop.f32.mrb[153].mxu1  ;;  %v7265_v0 = vadd.f32 1.0, %v11507_v19  ;;  %v7482_v50 = vpack.c.bf16 %v15777_v42, %v15730_v14  ;;  %v15869_v56 = vmul.f32 0.5, %v6456_v29  ;;  %v15871_v8 = vmul.f32 0.5, %v6682_v18 }
 0xe6e   : > { %v11509_v48 = vpop.eup %11508  ;;  %8436 = vmatprep.subr.bf16.mxu0 %v11053_v4  ;;  %v15856_v26 = vpop.f32.mrb[121].mxu0  ;;  %18013 = vst [vmem:[#allocation84_spill] sm:$0xff] %v15861_v52  ;;  %11524 = verf.f32 %v7029_v20  ;;  %v7030_v4 = vmul.f32 0.70710677, %v6684_v17  ;;  %v15876_v5 = vmul.f32 %v7258_v47, %v15779_v32  ;;  %v6460_v14 = vadd.f32 %v15749_v31, %v15618_v62  ;;  %v11054_v29 = vld [vmem:[#allocation23 + $0x140] ss:$8 sps:$4 sm:$0xff]  }
 0xe6f   : > { %v15858_v12 = vpop.f32.mrb[154].mxu1  ;;  %v15865_v36 = vpop.f32.mrb[122].mxu0  ;;  %v7269_v19 = vadd.f32 1.0, %v11509_v48  ;;  %8359 = vmatprep.mubr.bf16.mxu0 %v7482_v50  ;;  %v6686_v42 = vadd.f32 %v15751_v30, %v15620_v60  ;;  %v15883_v6 = vmul.f32 %v7262_v22, %v15784_v58  ;;  %v15885_v20 = vmul.f32 0.5, %v6458_v10  ;;  %v11059_v47 = vld [vmem:[#allocation23 + $0x154] ss:$8 sps:$4 sm:$0xff]  }
 0xe70   : > { %v15867_v63 = vpop.f32.mrb[155].mxu1  ;;  %v11511_v53 = vpop.eup %11510  ;;  %11526 = verf.f32 %v7026_v35  ;;  %v7481_v32 = vpack.c.bf16 %v15769_v27, %v15720_v1  ;;  %v15890_v31 = vmul.f32 %v7265_v0, %v15796_v59  ;;  %v7033_v30 = vmul.f32 0.70710677, %v6460_v14  ;;  %v11057_v22 = vld [vmem:[#allocation23 + $0x150] ss:$8 sps:$4 sm:$0xff]  }
 0xe71   : > { %v15873_v25 = vpop.f32.mrb[123].mxu0  ;;  %v11513_v55 = vpop.eup %11512  ;;  %8437 = vmatpush1.bf16.msra.mxu0 %v11051_v13  ;;  %18014 = vst [vmem:[#allocation85_spill] sm:$0xff] %v15883_v6  ;;  %v7266_v50 = vadd.f32 1.0, %v11511_v53  ;;  %11528 = verf.f32 %v7030_v4  ;;  %v15892_v37 = vmul.f32 0.5, %v6684_v17  ;;  %v7037_v58 = vmul.f32 0.70710677, %v6686_v42 }
 0xe72   : > { %v11515_v18 = vpop.eup %11514  ;;  %8438 = vmatprep.subr.bf16.mxu0 %v11056_v15  ;;  %v7270_v52 = vadd.f32 1.0, %v11513_v55  ;;  %8360 = vmatmul.mubr.bf16.gmra.mrb[132].mxu0 %v7481_v32  ;;  %v6462_v35 = vadd.f32 %v15756_v33, %v15623_v61  ;;  %v15901_v59 = vmul.f32 %v7269_v19, %v15804_v21  ;;  %11530 = verf.f32 %v7033_v30  ;;  %v11062_v0 = vld [vmem:[#allocation23 + $0x164] ss:$8 sps:$4 sm:$0xff]  }
 0xe73   : > { %v11517_v48 = vpop.eup %11516  ;;  %v6688_v15 = vadd.f32 %v15761_v45, %v15625_v9  ;;  %v6466_v17 = vadd.f32 %v15789_v54, %v15618_v62  ;;  %v7273_v4 = vadd.f32 1.0, %v11515_v18  ;;  %11532 = verf.f32 %v7037_v58 }
 0xe74   : > { %v11519_v13 = vpop.eup %11518  ;;  %v15896_v10 = vpop.f32.mrb[156].mxu1  ;;  %18015 = vst [vmem:[#allocation100_spill] sm:$0xff] %v15901_v59  ;;  %v7277_v55 = vadd.f32 1.0, %v11517_v48  ;;  %v15916_v45 = vmul.f32 %v7266_v50, %v15814_v41  ;;  %v15921_v6 = vmul.f32 %v7270_v52, %v15820_v23  ;;  %v15923_v18 = vmul.f32 0.5, %v6460_v14  ;;  %v11060_v23 = vld [vmem:[#allocation23 + $0x160] ss:$8 sps:$4 sm:$0xff]  }
 0xe75   : > { %v15898_v1 = vpop.f32.mrb[124].mxu0  ;;  %v11521_v27 = vpop.eup %11520  ;;  %8439 = vmatpush1.bf16.msra.mxu0 %v11054_v29  ;;  %v7274_v32 = vadd.f32 1.0, %v11519_v13  ;;  %v7034_v29 = vmul.f32 0.70710677, %v6462_v35  ;;  %v7038_v30 = vmul.f32 0.70710677, %v6688_v15  ;;  %v6468_v41 = vadd.f32 %v15800_v39, %v15623_v61 }
 0xe76   : > { %v15907_v53 = vpop.f32.mrb[157].mxu1  ;;  %v15909_v33 = vpop.f32.mrb[125].mxu0  ;;  %8440 = vmatprep.subr.bf16.mxu0 %v11059_v47  ;;  %v7278_v54 = vadd.f32 1.0, %v11521_v27  ;;  %18017 = vst [vmem:[#allocation102_spill] sm:$0xff] %v15921_v6  ;;  %v7041_v48 = vmul.f32 0.70710677, %v6466_v17  ;;  %v6692_v47 = vadd.f32 %v15791_v46, %v15620_v60  ;;  %v6694_v50 = vadd.f32 %v15802_v49, %v15625_v9 }
 0xe77   : > { %v15911_v21 = vpop.f32.mrb[158].mxu1  ;;  %v15913_v19 = vpop.f32.mrb[126].mxu0  ;;  %11534 = verf.f32 %v7034_v29  ;;  %v15936_v14 = vmul.f32 %v7273_v4, %v15822_v7  ;;  %v15939_v46 = vmul.f32 %v7277_v55, %v15836_v51  ;;  %v15941_v27 = vmul.f32 0.5, %v6462_v35  ;;  %v11065_v29 = vld [vmem:[#allocation23 + $0x174] ss:$8 sps:$4 sm:$0xff]  }
 0xe78   : > { %18016 = vst [vmem:[#allocation101_spill] sm:$0xff] %v15913_v19  ;;  %v15918_v59 = vpop.f32.mrb[159].mxu1  ;;  %v15927_v13 = vpop.f32.mrb[127].mxu0  ;;  %v15929_v19 = vmul.f32 0.5, %v6686_v42  ;;  %v7045_v42 = vmul.f32 0.70710677, %v6692_v47  ;;  %v15944_v6 = vmul.f32 %v7274_v32, %v15838_v28  ;;  %v15947_v39 = vmul.f32 %v7278_v54, %v15845_v44 }
 0xe79   : > { %v11523_v58 = vpop.eup %11522  ;;  %8441 = vmatpush1.bf16.msra.mxu0 %v11057_v22  ;;  %18018 = vst [vmem:[#allocation103_spill] sm:$0xff] %v15939_v46  ;;  %v15949_v49 = vmul.f32 0.5, %v6688_v15  ;;  %11536 = verf.f32 %v7038_v30  ;;  %v15951_v4 = vmul.f32 0.5, %v6466_v17  ;;  %v7042_v51 = vmul.f32 0.70710677, %v6468_v41 }
 0xe7a   : > { %v11525_v52 = vpop.eup %11524  ;;  %8442 = vmatprep.subr.bf16.mxu0 %v11062_v0  ;;  %18019 = vst [vmem:[#allocation104_spill] sm:$0xff] %v15947_v39  ;;  %v7281_v7 = vadd.f32 1.0, %v11523_v58  ;;  %11538 = verf.f32 %v7041_v48  ;;  %v7046_v46 = vmul.f32 0.70710677, %v6694_v50  ;;  %v7490_v28 = vpack.c.bf16 %v15876_v5, %v15834_v16  ;;  %v11063_v44 = vld [vmem:[#allocation23 + $0x170] ss:$8 sps:$4 sm:$0xff]  }
 0xe7b   : > { %v11527_v22 = vpop.eup %11526  ;;  %v7285_v0 = vadd.f32 1.0, %v11525_v52  ;;  %11540 = verf.f32 %v7045_v42  ;;  %v6470_v17 = vadd.f32 %v15810_v40, %v15618_v62  ;;  %v6696_v32 = vadd.f32 %v15812_v3, %v15620_v60  ;;  %v11068_v30 = vld [vmem:[#allocation23 + $0x184] ss:$8 sps:$4 sm:$0xff]  }
 0xe7c   : > { %v11529_v55 = vpop.eup %11528  ;;  %11542 = verf.f32 %v7042_v51  ;;  %v7489_v54 = vpack.c.bf16 %v15852_v24, %v15794_v34  ;;  %v15967_v16 = vmul.f32 0.5, %v6692_v47  ;;  %8369 = vmatprep.mubr.bf16.mxu0 %v7490_v28  ;;  %v6472_v5 = vadd.f32 %v15816_v11, %v15623_v61  ;;  %v11066_v47 = vld [vmem:[#allocation23 + $0x180] ss:$8 sps:$4 sm:$0xff]  }
 0xe7d   : > { %v15953_v35 = vpop.f32.mrb[160].mxu1  ;;  %8443 = vmatpush1.bf16.msra.mxu0 %v11060_v23  ;;  %v11531_v58 = vpop.eup %11530  ;;  %11544 = verf.f32 %v7046_v46  ;;  %v6698_v40 = vadd.f32 %v15818_v38, %v15625_v9  ;;  %v15976_v34 = vmul.f32 %v7281_v7, %v15869_v56  ;;  %v7282_v24 = vadd.f32 1.0, %v11527_v22  ;;  %v11071_v56 = vld [vmem:[#allocation23 + $0x194] ss:$8 sps:$4 sm:$0xff]  }
 0xe7e   : > { %v15957_v15 = vpop.f32.mrb[161].mxu1  ;;  %8444 = vmatprep.subr.bf16.mxu0 %v11065_v29  ;;  %v11533_v3 = vpop.eup %11532  ;;  %v7286_v52 = vadd.f32 1.0, %v11529_v55  ;;  %v7049_v42 = vmul.f32 0.70710677, %v6470_v17  ;;  %8370 = vmatmul.mubr.bf16.gmra.mrb[136].mxu0 %v7489_v54  ;;  %v15979_v46 = vmul.f32 %v7285_v0, %v15871_v8  ;;  %v15981_v29 = vmul.f32 0.5, %v6468_v41 }
 0xe7f   : > { %v15965_v48 = vpop.f32.mrb[162].mxu1  ;;  %v7053_v11 = vmul.f32 0.70710677, %v6696_v32  ;;  %v7050_v51 = vmul.f32 0.70710677, %v6472_v5  ;;  %v7289_v38 = vadd.f32 1.0, %v11531_v58  ;;  %v6476_v55 = vadd.f32 %v15840_v43, %v15618_v62 }
 0xe80   : > { %v15973_v23 = vpop.f32.mrb[163].mxu1  ;;  %18020 = vst [vmem:[#allocation105_spill] sm:$0xff] %v15979_v46  ;;  %v15983_v28 = vmul.f32 0.5, %v6694_v50  ;;  %11546 = verf.f32 %v7049_v42  ;;  %v7054_v39 = vmul.f32 0.70710677, %v6698_v40  ;;  %v7293_v7 = vadd.f32 1.0, %v11533_v3 }
 0xe81   : > { %8445 = vmatpush1.bf16.msra.mxu0 %v11063_v44  ;;  %v11535_v22 = vpop.eup %11534  ;;  %11548 = verf.f32 %v7053_v11  ;;  %v6702_v8 = vadd.f32 %v15847_v57, %v15620_v60  ;;  %v15990_v41 = vmul.f32 %v7282_v24, %v15885_v20  ;;  %v15993_v0 = vmul.f32 %v7286_v52, %v15892_v37  ;;  %v11069_v44 = vld [vmem:[#allocation23 + $0x190] ss:$8 sps:$4 sm:$0xff]   ;;  %v11074_v20 = vld [vmem:[#allocation23 + $0x1a4] ss:$8 sps:$4 sm:$0xff]  }
 0xe82   : > { %8446 = vmatprep.subr.bf16.mxu0 %v11068_v30  ;;  %11550 = verf.f32 %v7050_v51  ;;  %v6478_v50 = vadd.f32 %v15849_v2, %v15623_v61  ;;  %v7290_v58 = vadd.f32 1.0, %v11535_v22  ;;  %v7057_v43 = vmul.f32 0.70710677, %v6476_v55 }
 0xe83   : > { %18021 = vst [vmem:[#allocation106_spill] sm:$0xff] %v15993_v0  ;;  %v11537_v30 = vpop.eup %11536  ;;  %11552 = verf.f32 %v7054_v39  ;;  %v6704_v57 = vadd.f32 %v15856_v26, %v15625_v9  ;;  %v16003_v24 = vmul.f32 0.5, %v6470_v17  ;;  %v16005_v52 = vmul.f32 0.5, %v6696_v32 }
 0xe84   : > { %v11539_v37 = vpop.eup %11538  ;;  %v16007_v2 = vmul.f32 0.5, %v6472_v5  ;;  %v7061_v42 = vmul.f32 0.70710677, %v6702_v8  ;;  %v16012_v51 = vmul.f32 %v7289_v38, %v15923_v18  ;;  %v16015_v26 = vmul.f32 %v7293_v7, %v15929_v19 }
 0xe85   : > { %v15997_v54 = vpop.f32.mrb[164].mxu1  ;;  %8447 = vmatpush1.bf16.msra.mxu0 %v11066_v47  ;;  %v11541_v39 = vpop.eup %11540  ;;  %v16017_v47 = vmul.f32 0.5, %v6698_v40  ;;  %11554 = verf.f32 %v7057_v43  ;;  %v7294_v22 = vadd.f32 1.0, %v11537_v30  ;;  %v16021_v5 = vmul.f32 0.5, %v6476_v55  ;;  %v11072_v30 = vld [vmem:[#allocation23 + $0x1a0] ss:$8 sps:$4 sm:$0xff]  }
 0xe86   : > { %v16001_v3 = vpop.f32.mrb[165].mxu1  ;;  %8448 = vmatprep.subr.bf16.mxu0 %v11071_v56  ;;  %18022 = vst [vmem:[#allocation107_spill] sm:$0xff] %v16015_v26  ;;  %v11543_v32 = vpop.eup %11542  ;;  %11556 = verf.f32 %v7061_v42  ;;  %v7058_v56 = vmul.f32 0.70710677, %v6478_v50  ;;  %v16024_v0 = vmul.f32 %v7290_v58, %v15941_v27  ;;  %v7297_v18 = vadd.f32 1.0, %v11539_v37 }
 0xe87   : > { %v16009_v11 = vpop.f32.mrb[166].mxu1  ;;  %v11545_v46 = vpop.eup %11544  ;;  %v7062_v38 = vmul.f32 0.70710677, %v6704_v57  ;;  %v7498_v19 = vpack.c.bf16 %v15944_v6, %v15916_v45  ;;  %v7301_v40 = vadd.f32 1.0, %v11541_v39  ;;  %v6480_v7 = vadd.f32 %v15858_v12, %v15618_v62  ;;  %v11077_v45 = vld [vmem:[#allocation23 + $0x1b4] ss:$8 sps:$4 sm:$0xff]  }
 0xe88   : > { %v16019_v17 = vpop.f32.mrb[167].mxu1  ;;  %11558 = verf.f32 %v7058_v56  ;;  %v6706_v55 = vadd.f32 %v15865_v36, %v15620_v60  ;;  %v7298_v43 = vadd.f32 1.0, %v11543_v32  ;;  %v16032_v42 = vmul.f32 0.5, %v6702_v8 }
 0xe89   : > { %8449 = vmatpush1.bf16.msra.mxu0 %v11069_v44  ;;  %8379 = vmatprep.mubr.bf16.mxu0 %v7498_v19  ;;  %v7497_v27 = vpack.c.bf16 %v15936_v14, %v15890_v31  ;;  %v6482_v6 = vadd.f32 %v15867_v63, %v15623_v61  ;;  %v16039_v58 = vmul.f32 %v7294_v22, %v15949_v49  ;;  %v7302_v12 = vadd.f32 1.0, %v11545_v46  ;;  %v11075_v22 = vld [vmem:[#allocation23 + $0x1b0] ss:$8 sps:$4 sm:$0xff]  }
 0xe8a   : > { %8450 = vmatprep.subr.bf16.mxu0 %v11074_v20  ;;  %v11547_v44 = vpop.eup %11546  ;;  %v16041_v37 = vmul.f32 0.5, %v6478_v50  ;;  %v7065_v36 = vmul.f32 0.70710677, %v6480_v7  ;;  %v16046_v39 = vmul.f32 %v7297_v18, %v15951_v4  ;;  %11560 = verf.f32 %v7062_v38 }
 0xe8b   : > { %v11549_v8 = vpop.eup %11548  ;;  %v7069_v31 = vmul.f32 0.70710677, %v6706_v55  ;;  %8380 = vmatmul.mubr.bf16.gmra.mrb[140].mxu0 %v7497_v27  ;;  %v7066_v14 = vmul.f32 0.70710677, %v6482_v6  ;;  %v16049_v32 = vmul.f32 %v7301_v40, %v15967_v16  ;;  %v16051_v49 = vmul.f32 0.5, %v6704_v57 }
 0xe8c   : > { %v11551_v63 = vpop.eup %11550  ;;  %v6708_v46 = vadd.f32 %v15873_v25, %v15625_v9  ;;  %v6486_v50 = vadd.f32 %v15896_v10, %v15618_v62  ;;  %v16060_v18 = vmul.f32 %v7298_v43, %v15981_v29  ;;  %v7305_v38 = vadd.f32 1.0, %v11547_v44  ;;  %v11080_v57 = vld [vmem:[#allocation23 + $0x1c4] ss:$8 sps:$4 sm:$0xff]  }
 0xe8d   : > { %v16043_v20 = vpop.f32.mrb[168].mxu1  ;;  %18023 = vst [vmem:[#allocation108_spill] sm:$0xff] %v16049_v32  ;;  %8451 = vmatpush1.bf16.msra.mxu0 %v11072_v30  ;;  %v11553_v56 = vpop.eup %11552  ;;  %11562 = verf.f32 %v7065_v36  ;;  %v6712_v16 = vadd.f32 %v15898_v1, %v15620_v60  ;;  %v16067_v25 = vmul.f32 %v7302_v12, %v15983_v28  ;;  %v16069_v10 = vmul.f32 0.5, %v6480_v7  ;;  %v11078_v30 = vld [vmem:[#allocation23 + $0x1c0] ss:$8 sps:$4 sm:$0xff]  }
 0xe8e   : > { %v16057_v4 = vpop.f32.mrb[169].mxu1  ;;  %8452 = vmatprep.subr.bf16.mxu0 %v11077_v45  ;;  %v16071_v40 = vmul.f32 0.5, %v6706_v55  ;;  %11564 = verf.f32 %v7066_v14  ;;  %v7309_v27 = vadd.f32 1.0, %v11549_v8  ;;  %v7070_v44 = vmul.f32 0.70710677, %v6708_v46 }
 0xe8f   : > { %v16064_v19 = vpop.f32.mrb[170].mxu1  ;;  %v11555_v43 = vpop.eup %11554  ;;  %11566 = verf.f32 %v7069_v31  ;;  %v7073_v1 = vmul.f32 0.70710677, %v6486_v50  ;;  %v7306_v36 = vadd.f32 1.0, %v11551_v63  ;;  %v7310_v32 = vadd.f32 1.0, %v11553_v56 }
 0xe90   : > { %v16073_v29 = vpop.f32.mrb[171].mxu1  ;;  %v11557_v45 = vpop.eup %11556  ;;  %v16075_v26 = vmul.f32 0.5, %v6482_v6  ;;  %v7077_v28 = vmul.f32 0.70710677, %v6712_v16  ;;  %v16078_v7 = vmul.f32 %v7305_v38, %v16003_v24  ;;  %11568 = verf.f32 %v7070_v44  ;;  %v11083_v8 = vld [vmem:[#allocation23 + $0x1d4] ss:$8 sps:$4 sm:$0xff]  }
 0xe91   : > { %8453 = vmatpush1.bf16.msra.mxu0 %v11075_v22  ;;  %v6488_v55 = vadd.f32 %v15907_v53, %v15623_v61  ;;  %v6714_v12 = vadd.f32 %v15909_v33, %v15625_v9  ;;  %v7313_v14 = vadd.f32 1.0, %v11555_v43  ;;  %11570 = verf.f32 %v7073_v1 }
 0xe92   : > { %8454 = vmatprep.subr.bf16.mxu0 %v11080_v57  ;;  %v11559_v31 = vpop.eup %11558  ;;  %v7506_v6 = vpack.c.bf16 %v16024_v0, %v15990_v41  ;;  %v6490_v63 = vadd.f32 %v15911_v21, %v15618_v62  ;;  %v16091_v22 = vmul.f32 %v7309_v27, %v16005_v52  ;;  %v7317_v53 = vadd.f32 1.0, %v11557_v45  ;;  %v11081_v62 = vld [vmem:[#allocation23 + $0x1d0] ss:$8 sps:$4 sm:$0xff]  }
 0xe93   : > { %v16093_v56 = vmul.f32 0.5, %v6708_v46  ;;  %11572 = verf.f32 %v7077_v28  ;;  %v7434_v38 = vmul.f32 %v7306_v36, %v16007_v2  ;;  %v16099_v57 = vmul.f32 %v7310_v32, %v16017_v47  ;;  %v18024_v46 = vld [vmem:[#allocation101_spill] sm:$0xff] }
 0xe94   : > { %v16101_v41 = vmul.f32 0.5, %v6486_v50  ;;  %v7074_v0 = vmul.f32 0.70710677, %v6488_v55  ;;  %8389 = vmatprep.mubr.bf16.mxu0 %v7506_v6  ;;  %v11561_v21 = vpop.eup %11560  ;;  %v7314_v52 = vadd.f32 1.0, %v11559_v31  ;;  %v7078_v43 = vmul.f32 0.70710677, %v6714_v12 }
 0xe95   : > { %v16088_v24 = vpop.f32.mrb[172].mxu1  ;;  %8455 = vmatpush1.bf16.msra.mxu0 %v11078_v30  ;;  %v7081_v27 = vmul.f32 0.70710677, %v6490_v63  ;;  %v6716_v44 = vadd.f32 %v18024_v46, %v15620_v60  ;;  %v16108_v2 = vmul.f32 %v7313_v14, %v16021_v5  ;;  %v16110_v47 = vmul.f32 0.5, %v6712_v16  ;;  %v11086_v30 = vld [vmem:[#allocation23 + $0x1e4] ss:$8 sps:$4 sm:$0xff]  }
 0xe96   : > { %v16095_v33 = vpop.f32.mrb[173].mxu1  ;;  %8456 = vmatprep.subr.bf16.mxu0 %v11083_v8  ;;  %v7505_v32 = vpack.c.bf16 %v16012_v51, %v15976_v34  ;;  %v6492_v50 = vadd.f32 %v15918_v59, %v15623_v61  ;;  %v16119_v60 = vmul.f32 %v7317_v53, %v16032_v42  ;;  %v16121_v28 = vmul.f32 0.5, %v6488_v55  ;;  %v11084_v55 = vld [vmem:[#allocation23 + $0x1e0] ss:$8 sps:$4 sm:$0xff]   ;;  %v18026_v53 = vld [vmem:[#allocation73_spill] sm:$0xff] }
 0xe97   : > { %v16105_v1 = vpop.f32.mrb[174].mxu1  ;;  %v11563_v36 = vpop.eup %11562  ;;  %11574 = verf.f32 %v7074_v0  ;;  %v7085_v5 = vmul.f32 0.70710677, %v6716_v44  ;;  %v7318_v16 = vadd.f32 1.0, %v11561_v21  ;;  %v16123_v31 = vmul.f32 0.5, %v6714_v12  ;;  %v18025_v6 = vld [vmem:[#allocation72_spill] sm:$0xff] }
 0xe98   : > { %v16116_v45 = vpop.f32.mrb[175].mxu1  ;;  %v11565_v8 = vpop.eup %11564  ;;  %11576 = verf.f32 %v7081_v27  ;;  %8390 = vmatmul.mubr.bf16.gmra.mrb[144].mxu0 %v7505_v32  ;;  %v7082_v34 = vmul.f32 0.70710677, %v6492_v50  ;;  %v16126_v61 = vmul.f32 %v7314_v52, %v16041_v37  ;;  %v6718_v42 = vadd.f32 %v15927_v13, %v15625_v9  ;;  %v11089_v21 = vld [vmem:[#allocation23 + $0x1f4] ss:$8 sps:$4 sm:$0xff]  }
 0xe99   : > { %v11567_v51 = vpop.eup %11566  ;;  %v7322_v59 = vadd.f32 1.0, %v11565_v8  ;;  %11578 = verf.f32 %v7078_v43  ;;  %8457 = vmatpush1.bf16.msra.mxu0 %v11081_v62  ;;  %v7321_v14 = vadd.f32 1.0, %v11563_v36  ;;  %v6529_v12 = vadd.f32 %v15953_v35, %v18025_v6 }
 0xe9a   : > { %11580 = verf.f32 %v7082_v34  ;;  %v6531_v0 = vadd.f32 %v15957_v15, %v18026_v53  ;;  %8458 = vmatprep.subr.bf16.mxu0 %v11086_v30  ;;  %v11569_v37 = vpop.eup %11568  ;;  %v16136_v52 = vmul.f32 0.5, %v6490_v63  ;;  %v7086_v43 = vmul.f32 0.70710677, %v6718_v42  ;;  %v11092_v34 = vld [vmem:[#allocation23 + $0x204] ss:$8 sps:$4 sm:$0xff]  }
 0xe9b   : > { %11582 = verf.f32 %v7085_v5  ;;  %v7514_v9 = vpack.c.bf16 %v7434_v38, %v16060_v18  ;;  %v11571_v62 = vpop.eup %11570  ;;  %v16142_v46 = vmul.f32 %v7318_v16, %v16051_v49  ;;  %v7325_v35 = vadd.f32 1.0, %v11567_v51  ;;  %v11087_v38 = vld [vmem:[#allocation23 + $0x1f0] ss:$8 sps:$4 sm:$0xff]  }
 0xe9c   : > { %v16144_v32 = vmul.f32 0.5, %v6716_v44  ;;  %v6963_v15 = vmul.f32 0.70710677, %v6529_v12  ;;  %v7450_v63 = vmul.f32 %v7322_v59, %v16075_v26  ;;  %11584 = verf.f32 %v7086_v43 }
 0xe9d   : > { %v16134_v27 = vpop.f32.mrb[176].mxu1  ;;  %v11573_v36 = vpop.eup %11572  ;;  %v6964_v5 = vmul.f32 0.70710677, %v6531_v0  ;;  %8399 = vmatprep.mubr.bf16.mxu0 %v7514_v9  ;;  %v6533_v18 = vadd.f32 %v15965_v48, %v18025_v6  ;;  %8459 = vmatpush1.bf16.msra.mxu0 %v11084_v55  ;;  %v7449_v49 = vmul.f32 %v7321_v14, %v16069_v10  ;;  %v6954_v44 = vmul.f32 0.5, %v6492_v50 }
 0xe9e   : > { %v16139_v13 = vpop.f32.mrb[177].mxu1  ;;  %11586 = verf.f32 %v6963_v15  ;;  %v7513_v16 = vpack.c.bf16 %v16078_v7, %v16046_v39  ;;  %8460 = vmatprep.subr.bf16.mxu0 %v11089_v21  ;;  %v7326_v26 = vadd.f32 1.0, %v11569_v37  ;;  %v7329_v51 = vadd.f32 1.0, %v11571_v62 }
 0xe9f   : > { %v16146_v30 = vpop.f32.mrb[178].mxu1  ;;  %11588 = verf.f32 %v6964_v5  ;;  %v6971_v59 = vmul.f32 0.70710677, %v6533_v18  ;;  %v7333_v43 = vadd.f32 1.0, %v11573_v36  ;;  %v6535_v48 = vadd.f32 %v15973_v23, %v18026_v53 }
 0xea0   : > { %v16151_v8 = vpop.f32.mrb[179].mxu1  ;;  %8400 = vmatmul.mubr.bf16.gmra.mrb[148].mxu0 %v7513_v16  ;;  %v6539_v55 = vadd.f32 %v15997_v54, %v18025_v6  ;;  %v6541_v10 = vadd.f32 %v16001_v3, %v18026_v53  ;;  %v16163_v39 = vmul.f32 %v7325_v35, %v16071_v40  ;;  %v16165_v7 = vmul.f32 0.5, %v6718_v42 }
 0xea1   : > { %v11575_v50 = vpop.eup %11574  ;;  %11590 = verf.f32 %v6971_v59  ;;  %v7522_v14 = vpack.c.bf16 %v7450_v63, %v16126_v61  ;;  %8461 = vmatpush1.bf16.msra.mxu0 %v11087_v38  ;;  %v16168_v37 = vmul.f32 0.5, %v6529_v12  ;;  %v16170_v23 = vmul.f32 0.5, %v6531_v0 }
 0xea2   : > { %v11577_v21 = vpop.eup %11576  ;;  %v6972_v9 = vmul.f32 0.70710677, %v6535_v48  ;;  %v6543_v54 = vadd.f32 %v16009_v11, %v18025_v6  ;;  %8543 = vmatprep.subr.bf16.mxu0 %v11092_v34  ;;  %v16177_v42 = vmul.f32 %v7326_v26, %v16093_v56  ;;  %v16180_v62 = vmul.f32 %v7329_v51, %v16101_v41 }
 0xea3   : > { %v11579_v40 = vpop.eup %11578  ;;  %v7337_v61 = vadd.f32 1.0, %v11577_v21  ;;  %v6979_v35 = vmul.f32 0.70710677, %v6539_v55  ;;  %8409 = vmatprep.mubr.bf16.mxu0 %v7522_v14  ;;  %v16185_v15 = vmul.f32 %v7333_v43, %v16110_v47  ;;  %v6843_v11 = vmul.f32 0.5, %v6533_v18 }
 0xea4   : > { %v11581_v0 = vpop.eup %11580  ;;  %11592 = verf.f32 %v6972_v9  ;;  %v6980_v36 = vmul.f32 0.70710677, %v6541_v10  ;;  %v7330_v56 = vadd.f32 1.0, %v11575_v50  ;;  %v7334_v34 = vadd.f32 1.0, %v11579_v40 }
 0xea5   : > { %v16174_v3 = vpop.f32.mrb[180].mxu1  ;;  %18027 = vst [vmem:[#allocation101_spill] sm:$0xff] %v16185_v15  ;;  %v11583_v5 = vpop.eup %11582  ;;  %v7465_v38 = vmul.f32 %v7337_v61, %v16136_v52  ;;  %v7338_v41 = vadd.f32 1.0, %v11581_v0  ;;  %11594 = verf.f32 %v6979_v35  ;;  %v6987_v26 = vmul.f32 0.70710677, %v6543_v54 }
 0xea6   : > { %v16182_v12 = vpop.f32.mrb[181].mxu1  ;;  %11596 = verf.f32 %v6980_v36  ;;  %v7521_v51 = vpack.c.bf16 %v7449_v49, %v16108_v2  ;;  %v11585_v47 = vpop.eup %11584  ;;  %v6545_v18 = vadd.f32 %v16019_v17, %v18026_v53  ;;  %v6549_v43 = vadd.f32 %v16043_v20, %v18025_v6 }
 0xea7   : > { %v16187_v63 = vpop.f32.mrb[182].mxu1  ;;  %v7466_v59 = vmul.f32 %v7338_v41, %v6954_v44  ;;  %v6551_v52 = vadd.f32 %v16057_v4, %v18026_v53  ;;  %v7341_v14 = vadd.f32 1.0, %v11583_v5  ;;  %v6844_v21 = vmul.f32 0.5, %v6535_v48 }
 0xea8   : > { %v16190_v16 = vpop.f32.mrb[183].mxu1  ;;  %v11587_v50 = vpop.eup %11586  ;;  %11598 = verf.f32 %v6987_v26  ;;  %8410 = vmatmul.mubr.bf16.gmra.mrb[152].mxu0 %v7521_v51  ;;  %v7529_v9 = vpack.c.bf16 %v7465_v38, %v16180_v62  ;;  %v7458_v2 = vmul.f32 %v7330_v56, %v16121_v28  ;;  %v16201_v49 = vmul.f32 0.5, %v6539_v55 }
 0xea9   : > { %v11589_v40 = vpop.eup %11588  ;;  %v6988_v44 = vmul.f32 0.70710677, %v6545_v18  ;;  %v6553_v17 = vadd.f32 %v16064_v19, %v18025_v6  ;;  %v16206_v20 = vmul.f32 %v7334_v34, %v16123_v31  ;;  %v7219_v4 = vadd.f32 1.0, %v11587_v50 }
 0xeaa   : > { %v16208_v61 = vmul.f32 0.5, %v6541_v10  ;;  %v6995_v48 = vmul.f32 0.70710677, %v6549_v43  ;;  %v6859_v62 = vmul.f32 0.5, %v6543_v54  ;;  %v6996_v36 = vmul.f32 0.70710677, %v6551_v52 }
 0xeab   : > { %v11591_v0 = vpop.eup %11590  ;;  %11600 = verf.f32 %v6988_v44  ;;  %v7530_v28 = vpack.c.bf16 %v7466_v59, %v7458_v2  ;;  %v16215_v5 = vmul.f32 %v7341_v14, %v16144_v32  ;;  %v7220_v19 = vadd.f32 1.0, %v11589_v40 }
 0xeac   : > { %v7227_v56 = vadd.f32 1.0, %v11591_v0  ;;  %11602 = verf.f32 %v6995_v48  ;;  %v7003_v10 = vmul.f32 0.70710677, %v6553_v17  ;;  %v6555_v38 = vadd.f32 %v16073_v29, %v18026_v53 }
 0xead   : > { %v16210_v35 = vpop.f32.mrb[184].mxu1  ;;  %18028 = vst [vmem:[#allocation72_spill] sm:$0xff] %v16215_v5  ;;  %11604 = verf.f32 %v6996_v36  ;;  %8419 = vmatprep.mubr.bf16.mxu0 %v7530_v28  ;;  %v6559_v54 = vadd.f32 %v16088_v24, %v18025_v6  ;;  %v16225_v26 = vadd.f32 1.0, %v11585_v47  ;;  %v7347_v32 = vmul.f32 %v7219_v4, %v16168_v37 }
 0xeae   : > { %v16212_v55 = vpop.f32.mrb[185].mxu1  ;;  %v11593_v34 = vpop.eup %11592  ;;  %v7355_v51 = vmul.f32 %v7227_v56, %v6843_v11  ;;  %v6561_v59 = vadd.f32 %v16095_v33, %v18026_v53  ;;  %11606 = verf.f32 %v7003_v10  ;;  %v7004_v40 = vmul.f32 0.70710677, %v6555_v38 }
 0xeaf   : > { %v16217_v31 = vpop.f32.mrb[186].mxu1  ;;  %v11595_v50 = vpop.eup %11594  ;;  %v7228_v14 = vadd.f32 1.0, %v11593_v34  ;;  %v16232_v29 = vadd.f32 %v16105_v1, %v18025_v6  ;;  %v6860_v44 = vmul.f32 0.5, %v6545_v18  ;;  %v7011_v47 = vmul.f32 0.70710677, %v6559_v54 }
 0xeb0   : > { %v16223_v41 = vpop.f32.mrb[187].mxu1  ;;  %v11597_v24 = vpop.eup %11596  ;;  %v7475_v2 = vpack.c.bf16 %v7355_v51, %v7347_v32  ;;  %8420 = vmatmul.mubr.bf16.gmra.mrb[156].mxu0 %v7529_v9  ;;  %v16236_v37 = vadd.f32 %v16116_v45, %v18026_v53  ;;  %v7348_v11 = vmul.f32 %v7220_v19, %v16170_v23  ;;  %v16239_v4 = vmul.f32 0.5, %v6549_v43  ;;  %v11090_v34 = vld [vmem:[#allocation23 + $0x200] ss:$8 sps:$4 sm:$0xff]  }
 0xeb1   : > { %v7356_v33 = vmul.f32 %v7228_v14, %v6844_v21  ;;  %11608 = verf.f32 %v7004_v40  ;;  %v7235_v0 = vadd.f32 1.0, %v11595_v50  ;;  %v16241_v36 = vmul.f32 0.5, %v6551_v52 }
 0xeb2   : > { %v11599_v48 = vpop.eup %11598  ;;  %v6875_v1 = vmul.f32 0.5, %v6553_v17  ;;  %v7012_v28 = vmul.f32 0.70710677, %v6561_v59  ;;  %11610 = verf.f32 %v7011_v47  ;;  %v7019_v45 = vmul.f32 0.70710677, %v16232_v29 }
 0xeb3   : > { %v7243_v18 = vadd.f32 1.0, %v11599_v48  ;;  %v7476_v9 = vpack.c.bf16 %v7356_v33, %v7348_v11  ;;  %v7236_v23 = vadd.f32 1.0, %v11597_v24  ;;  %v7020_v43 = vmul.f32 0.70710677, %v16236_v37  ;;  %v11095_v24 = vld [vmem:[#allocation23 + $0x214] ss:$8 sps:$4 sm:$0xff]  }
 0xeb4   : > { %11612 = verf.f32 %v7012_v28  ;;  %v6569_v21 = vadd.f32 %v16134_v27, %v18025_v6  ;;  %v6571_v32 = vadd.f32 %v16139_v13, %v18026_v53  ;;  %v16259_v51 = vadd.f32 %v16146_v30, %v18025_v6 }
 0xeb5   : > { %v16243_v56 = vpop.f32.mrb[188].mxu1  ;;  %v11601_v17 = vpop.eup %11600  ;;  %v16253_v19 = vmul.f32 %v7243_v18, %v6859_v62  ;;  %8462 = vmatprep.mubr.bf16.mxu0 %v7476_v9  ;;  %11614 = verf.f32 %v7019_v45  ;;  %v6876_v27 = vmul.f32 0.5, %v6555_v38  ;;  %v7363_v11 = vmul.f32 %v7235_v0, %v16201_v49  ;;  %v11093_v45 = vld [vmem:[#allocation23 + $0x210] ss:$8 sps:$4 sm:$0xff]  }
 0xeb6   : > { %v16246_v10 = vpop.f32.mrb[189].mxu1  ;;  %v11603_v14 = vpop.eup %11602  ;;  %v7244_v40 = vadd.f32 1.0, %v11601_v17  ;;  %11616 = verf.f32 %v7020_v43  ;;  %v7027_v47 = vmul.f32 0.70710677, %v6569_v21  ;;  %v16264_v33 = vmul.f32 0.5, %v6559_v54 }
 0xeb7   : > { %v16251_v52 = vpop.f32.mrb[190].mxu1  ;;  %v11605_v62 = vpop.eup %11604  ;;  %v16266_v48 = vmul.f32 0.5, %v6561_v59  ;;  %v7028_v13 = vmul.f32 0.70710677, %v6571_v32  ;;  %v7364_v28 = vmul.f32 %v7236_v23, %v16208_v61  ;;  %v7035_v18 = vmul.f32 0.70710677, %v16259_v51 }
 0xeb8   : > { %v16261_v50 = vpop.f32.mrb[191].mxu1  ;;  %v7372_v30 = vmul.f32 %v7244_v40, %v6860_v44  ;;  %8463 = vmatmul.mubr.bf16.vlgmr.msra.gmra.mrb[128].mxu0 %v7475_v2  ;;  %11618 = verf.f32 %v7027_v47  ;;  %v11607_v9 = vpop.eup %11606  ;;  %v7251_v38 = vadd.f32 1.0, %v11603_v14  ;;  %v7483_v43 = vpack.c.bf16 %v16253_v19, %v7363_v11  ;;  %v11098_v61 = vld [vmem:[#allocation23 + $0x224] ss:$8 sps:$4 sm:$0xff]   ;;  %v11096_v11 = vld [vmem:[#allocation23 + $0x220] ss:$8 sps:$4 sm:$0xff]  }
 0xeb9   : > { %8544 = vmatpush1.bf16.msra.mxu0 %v11090_v34  ;;  %11620 = verf.f32 %v7028_v13  ;;  %v6575_v49 = vadd.f32 %v16151_v8, %v18026_v53  ;;  %v7252_v54 = vadd.f32 1.0, %v11605_v62  ;;  %v7259_v59 = vadd.f32 1.0, %v11607_v9 }
 0xeba   : > { %8545 = vmatprep.subr.bf16.mxu0 %v11095_v24  ;;  %v7484_v0 = vpack.c.bf16 %v7372_v30, %v7364_v28  ;;  %11622 = verf.f32 %v7035_v18  ;;  %v6891_v23 = vmul.f32 0.5, %v16232_v29  ;;  %v16278_v34 = vadd.f32 %v16174_v3, %v18025_v6 }
 0xebb   : > { %v11609_v44 = vpop.eup %11608  ;;  %v7036_v17 = vmul.f32 0.70710677, %v6575_v49  ;;  %v16282_v19 = vadd.f32 %v16182_v12, %v18026_v53  ;;  %v16286_v14 = vmul.f32 %v7259_v59, %v6875_v1  ;;  %v6892_v24 = vmul.f32 0.5, %v16236_v37 }
 0xebc   : > { %v7260_v40 = vadd.f32 1.0, %v11609_v44  ;;  %8472 = vmatprep.mubr.bf16.mxu0 %v7484_v0  ;;  %v16291_v29 = vadd.f32 %v16187_v63, %v18025_v6  ;;  %v11611_v3 = vpop.eup %11610  ;;  %v16296_v62 = vmul.f32 %v7251_v38, %v16239_v4  ;;  %v6899_v12 = vmul.f32 0.5, %v6569_v21  ;;  %v11101_v63 = vld [vmem:[#allocation23 + $0x234] ss:$8 sps:$4 sm:$0xff]   ;;  %v11099_v44 = vld [vmem:[#allocation23 + $0x230] ss:$8 sps:$4 sm:$0xff]  }
 0xebd   : > { %v16273_v2 = vpop.f32.mrb[192].mxu1  ;;  %8546 = vmatpush1.bf16.msra.mxu0 %v11093_v45  ;;  %11624 = verf.f32 %v7036_v17  ;;  %v7043_v1 = vmul.f32 0.70710677, %v16278_v34  ;;  %v7380_v28 = vmul.f32 %v7252_v54, %v16241_v36  ;;  %v7044_v18 = vmul.f32 0.70710677, %v16282_v19 }
 0xebe   : > { %v16284_v8 = vpop.f32.mrb[193].mxu1  ;;  %v11613_v37 = vpop.eup %11612  ;;  %v7388_v30 = vmul.f32 %v7260_v40, %v6876_v27  ;;  %8547 = vmatprep.subr.bf16.mxu0 %v11098_v61  ;;  %v16305_v4 = vadd.f32 %v16190_v16, %v18026_v53  ;;  %v16307_v38 = vmul.f32 0.5, %v6571_v32  ;;  %v7051_v45 = vmul.f32 0.70710677, %v16291_v29  ;;  %v11104_v40 = vld [vmem:[#allocation23 + $0x244] ss:$8 sps:$4 sm:$0xff]  }
 0xebf   : > { %v16293_v47 = vpop.f32.mrb[194].mxu1  ;;  %v11615_v9 = vpop.eup %11614  ;;  %v7268_v21 = vadd.f32 1.0, %v11613_v37  ;;  %11626 = verf.f32 %v7043_v1  ;;  %v7491_v27 = vpack.c.bf16 %v16286_v14, %v16296_v62  ;;  %v7267_v54 = vadd.f32 1.0, %v11611_v3 }
 0xec0   : > { %v16299_v13 = vpop.f32.mrb[195].mxu1  ;;  %v11617_v59 = vpop.eup %11616  ;;  %v7275_v0 = vadd.f32 1.0, %v11615_v9  ;;  %8473 = vmatmul.mubr.bf16.gmra.mrb[132].mxu0 %v7483_v43  ;;  %11628 = verf.f32 %v7044_v18  ;;  %v7492_v36 = vpack.c.bf16 %v7388_v30, %v7380_v28  ;;  %v6907_v16 = vmul.f32 0.5, %v16259_v51 }
 0xec1   : > { %v7276_v61 = vadd.f32 1.0, %v11617_v59  ;;  %8548 = vmatpush1.bf16.msra.mxu0 %v11096_v11  ;;  %11630 = verf.f32 %v7051_v45  ;;  %v6908_v17 = vmul.f32 0.5, %v6575_v49  ;;  %v7052_v1 = vmul.f32 0.70710677, %v16305_v4 }
 0xec2   : > { %v11619_v32 = vpop.eup %11618  ;;  %8549 = vmatprep.subr.bf16.mxu0 %v11101_v63  ;;  %8482 = vmatprep.mubr.bf16.mxu0 %v7492_v36  ;;  %v6589_v43 = vadd.f32 %v16210_v35, %v18025_v6  ;;  %v16318_v14 = vadd.f32 %v16212_v55, %v18026_v53  ;;  %v16322_v62 = vmul.f32 %v7275_v0, %v6891_v23  ;;  %v11102_v63 = vld [vmem:[#allocation23 + $0x240] ss:$8 sps:$4 sm:$0xff]   ;;  %v16347_v0 = vmul.f32 0.5, %v16282_v19 }
 0xec3   : > { %v11621_v51 = vpop.eup %11620  ;;  %v7404_v11 = vmul.f32 %v7276_v61, %v6892_v24  ;;  %v7283_v37 = vadd.f32 1.0, %v11619_v32  ;;  %v16326_v49 = vadd.f32 %v16217_v31, %v18025_v6  ;;  %v7396_v35 = vmul.f32 %v7268_v21, %v16266_v48 }
 0xec4   : > { %v11623_v30 = vpop.eup %11622  ;;  %11632 = verf.f32 %v7052_v1  ;;  %v7059_v55 = vmul.f32 0.70710677, %v6589_v43  ;;  %v16333_v18 = vadd.f32 %v16223_v41, %v18026_v53  ;;  %v16338_v24 = vmul.f32 %v7267_v54, %v16264_v33  ;;  %v11107_v41 = vld [vmem:[#allocation23 + $0x254] ss:$8 sps:$4 sm:$0xff]  }
 0xec5   : > { %v16320_v3 = vpop.f32.mrb[196].mxu1  ;;  %v7291_v9 = vadd.f32 1.0, %v11623_v30  ;;  %8550 = vmatpush1.bf16.msra.mxu0 %v11099_v44  ;;  %v6915_v31 = vmul.f32 0.5, %v16278_v34  ;;  %v7060_v45 = vmul.f32 0.70710677, %v16318_v14  ;;  %v16344_v48 = vmul.f32 %v7283_v37, %v6899_v12 }
 0xec6   : > { %v16328_v28 = vpop.f32.mrb[197].mxu1  ;;  %v7284_v21 = vadd.f32 1.0, %v11621_v51  ;;  %8551 = vmatprep.subr.bf16.mxu0 %v11104_v40  ;;  %v7500_v36 = vpack.c.bf16 %v7404_v11, %v7396_v35  ;;  %v7067_v54 = vmul.f32 0.70710677, %v16326_v49  ;;  %v7499_v34 = vpack.c.bf16 %v16322_v62, %v16338_v24  ;;  %v11105_v40 = vld [vmem:[#allocation23 + $0x250] ss:$8 sps:$4 sm:$0xff]  }
 0xec7   : > { %v16335_v23 = vpop.f32.mrb[198].mxu1  ;;  %v11625_v61 = vpop.eup %11624  ;;  %v16349_v33 = vmul.f32 %v7291_v9, %v6907_v16  ;;  %11634 = verf.f32 %v7060_v45  ;;  %v7068_v12 = vmul.f32 0.70710677, %v16333_v18  ;;  %v16357_v19 = vadd.f32 %v16243_v56, %v18025_v6  ;;  %v11110_v37 = vld [vmem:[#allocation23 + $0x264] ss:$8 sps:$4 sm:$0xff]  }
 0xec8   : > { %v16342_v59 = vpop.f32.mrb[199].mxu1  ;;  %v7292_v44 = vadd.f32 1.0, %v11625_v61  ;;  %8483 = vmatmul.mubr.bf16.gmra.mrb[136].mxu0 %v7491_v27  ;;  %11636 = verf.f32 %v7059_v55  ;;  %v16361_v16 = vadd.f32 %v16246_v10, %v18026_v53  ;;  %v16365_v1 = vadd.f32 %v16251_v52, %v18025_v6  ;;  %v11119_v27 = vld [vmem:[#allocation23 + $0x294] ss:$8 sps:$4 sm:$0xff]  }
 0xec9   : > { %v11627_v32 = vpop.eup %11626  ;;  %8552 = vmatpush1.bf16.msra.mxu0 %v11102_v63  ;;  %8492 = vmatprep.mubr.bf16.mxu0 %v7500_v36  ;;  %11638 = verf.f32 %v7067_v54  ;;  %v7412_v56 = vmul.f32 %v7284_v21, %v16307_v38  ;;  %v6923_v10 = vmul.f32 0.5, %v16291_v29  ;;  %v6924_v63 = vmul.f32 0.5, %v16305_v4  ;;  %v11108_v21 = vld [vmem:[#allocation23 + $0x260] ss:$8 sps:$4 sm:$0xff]  }
 0xeca   : > { %v11629_v51 = vpop.eup %11628  ;;  %v7420_v62 = vmul.f32 %v7292_v44, %v6908_v17  ;;  %v7299_v11 = vadd.f32 1.0, %v11627_v32  ;;  %8553 = vmatprep.subr.bf16.mxu0 %v11107_v41  ;;  %11640 = verf.f32 %v7068_v12  ;;  %v7075_v6 = vmul.f32 0.70710677, %v16357_v19  ;;  %v18029_v54 = vld [vmem:[#allocation51_spill] sm:$0xff] }
 0xecb   : > { %v11631_v35 = vpop.eup %11630  ;;  %v7076_v52 = vmul.f32 0.70710677, %v16361_v16  ;;  %v7300_v55 = vadd.f32 1.0, %v11629_v51  ;;  %v16376_v9 = vmul.f32 0.5, %v6589_v43  ;;  %v7083_v29 = vmul.f32 0.70710677, %v16365_v1 }
 0xecc   : > { %v7307_v24 = vadd.f32 1.0, %v11631_v35  ;;  %v7508_v38 = vpack.c.bf16 %v7420_v62, %v7412_v56  ;;  %v16380_v45 = vmul.f32 %v7299_v11, %v6915_v31  ;;  %11642 = verf.f32 %v7075_v6  ;;  %v11113_v43 = vld [vmem:[#allocation23 + $0x274] ss:$8 sps:$4 sm:$0xff]   ;;  %v18030_v11 = vld [vmem:[#allocation76_spill] sm:$0xff] }
 0xecd   : > { %v16370_v30 = vpop.f32.mrb[200].mxu1  ;;  %8554 = vmatpush1.bf16.msra.mxu0 %v11105_v40  ;;  %v6605_v4 = vadd.f32 %v16261_v50, %v18026_v53  ;;  %11644 = verf.f32 %v7076_v52  ;;  %v5727_v44 = vsub.s32 6, %v18029_v54  ;;  %v5731_v31 = vsub.s32 7, %v18029_v54  ;;  %v11746_v53 = vld [vmem:[%s17999_s15] sm:$0xff] }
 0xece   : > { %v16378_v17 = vpop.f32.mrb[201].mxu1  ;;  %v11633_v36 = vpop.eup %11632  ;;  %v16387_v61 = vmul.f32 %v7307_v24, %v6923_v10  ;;  %8555 = vmatprep.subr.bf16.mxu0 %v11110_v37  ;;  %v6932_v40 = vmul.f32 0.5, %v16318_v14  ;;  %11646 = verf.f32 %v7083_v29  ;;  %v18031_v37 = vld [vmem:[#allocation77_spill] sm:$0xff]  ;;  %v7428_v14 = vmul.f32 %v7300_v55, %v16347_v0  ;;  %v18032_v52 = vld [vmem:[#allocation79_spill] sm:$0xff] }
 0xecf   : > { %v16385_v41 = vpop.f32.mrb[202].mxu1  ;;  %v7308_v32 = vadd.f32 1.0, %v11633_v36  ;;  %v7084_v51 = vmul.f32 0.70710677, %v6605_v4  ;;  %v16397_v50 = vrot.slane %v11746_v53, %v5727_v44  ;;  %v16399_v56 = vrot.slane %v11746_v53, %v5731_v31  ;;  %v18033_v24 = vld [vmem:[#allocation81_spill] sm:$0xff] }
 0xed0   : > { %v16391_v12 = vpop.f32.mrb[203].mxu1  ;;  %8493 = vmatmul.mubr.bf16.gmra.mrb[140].mxu0 %v7499_v34  ;;  %v11111_v34 = vld [vmem:[#allocation23 + $0x270] ss:$8 sps:$4 sm:$0xff]   ;;  %v6939_v54 = vmul.f32 0.5, %v16326_v49  ;;  %v11116_v44 = vld [vmem:[#allocation23 + $0x284] ss:$8 sps:$4 sm:$0xff]  }
 0xed1   : > { %v11635_v10 = vpop.eup %11634  ;;  %v7436_v6 = vmul.f32 %v7308_v32, %v6924_v63  ;;  %8556 = vmatpush1.bf16.msra.mxu0 %v11108_v21  ;;  %8502 = vmatprep.mubr.bf16.mxu0 %v7508_v38  ;;  %11648 = verf.f32 %v7084_v51  ;;  %v6755_v31 = vadd.f32 %v16273_v2, %v16397_v50  ;;  %v16413_v53 = vadd.f32 %v16284_v8, %v16399_v56  ;;  %v11114_v49 = vld [vmem:[#allocation23 + $0x280] ss:$8 sps:$4 sm:$0xff]  }
 0xed2   : > { %v11637_v36 = vpop.eup %11636  ;;  %8557 = vmatprep.subr.bf16.mxu0 %v11113_v43  ;;  %v16417_v0 = vadd.f32 %v16293_v47, %v16397_v50  ;;  %v7316_v38 = vadd.f32 1.0, %v11635_v10  ;;  %v6940_v21 = vmul.f32 0.5, %v16333_v18  ;;  %v16424_v32 = vadd.f32 %v16299_v13, %v16399_v56 }
 0xed3   : > { %v11639_v55 = vpop.eup %11638  ;;  %v7516_v43 = vpack.c.bf16 %v7436_v6, %v7428_v14  ;;  %v16429_v29 = vmul.f32 0.5, %v16357_v19  ;;  %v6967_v47 = vmul.f32 0.70710677, %v6755_v31  ;;  %v16433_v35 = vadd.f32 %v16320_v3, %v16397_v50 }
 0xed4   : > { %v11641_v8 = vpop.eup %11640  ;;  %v7323_v51 = vadd.f32 1.0, %v11639_v55  ;;  %v7315_v18 = vadd.f32 1.0, %v11637_v36  ;;  %v6948_v13 = vmul.f32 0.5, %v16361_v16  ;;  %v6968_v6 = vmul.f32 0.70710677, %v16413_v53 }
 0xed5   : > { %v16419_v63 = vpop.f32.mrb[204].mxu1  ;;  %v7324_v14 = vadd.f32 1.0, %v11641_v8  ;;  %8558 = vmatpush1.bf16.msra.mxu0 %v11111_v34  ;;  %v6955_v19 = vmul.f32 0.5, %v16365_v1  ;;  %v6956_v55 = vmul.f32 0.5, %v6605_v4  ;;  %11650 = verf.f32 %v6967_v47 }
 0xed6   : > { %v16426_v2 = vpop.f32.mrb[205].mxu1  ;;  %8559 = vmatprep.subr.bf16.mxu0 %v11116_v44  ;;  %v6975_v3 = vmul.f32 0.70710677, %v16417_v0  ;;  %v11643_v5 = vpop.eup %11642  ;;  %v16443_v15 = vmul.f32 %v7316_v38, %v6932_v40  ;;  %11652 = verf.f32 %v6968_v6  ;;  %v6976_v34 = vmul.f32 0.70710677, %v16424_v32 }
 0xed7   : > { %v16435_v10 = vpop.f32.mrb[206].mxu1  ;;  %v7452_v36 = vmul.f32 %v7324_v14, %v6940_v21  ;;  %v11645_v16 = vpop.eup %11644  ;;  %v16446_v8 = vmul.f32 %v7323_v51, %v6939_v54  ;;  %v18034_v44 = vpack.c.bf16 %v16349_v33, %v16344_v48  ;;  %v6983_v1 = vmul.f32 0.70710677, %v16433_v35  ;;  %v11117_v21 = vld [vmem:[#allocation23 + $0x290] ss:$8 sps:$4 sm:$0xff]  }
 0xed8   : > { %v16439_v62 = vpop.f32.mrb[207].mxu1  ;;  %11654 = verf.f32 %v6975_v3  ;;  %v16454_v4 = vadd.f32 %v16328_v28, %v16399_v56  ;;  %v11647_v40 = vpop.eup %11646  ;;  %v16457_v38 = vmul.f32 %v7315_v18, %v16376_v9  ;;  %v16462_v48 = vadd.f32 %v16335_v23, %v16397_v50  ;;  %v11122_v28 = vld [vmem:[#allocation23 + $0x2a4] ss:$8 sps:$4 sm:$0xff]  }
 0xed9   : > { %8503 = vmatmul.mubr.bf16.gmra.mrb[144].mxu0 %v18034_v44  ;;  %11656 = verf.f32 %v6976_v34  ;;  %v7524_v54 = vpack.c.bf16 %v7452_v36, %v16443_v15  ;;  %v7332_v33 = vadd.f32 1.0, %v11645_v16  ;;  %v7339_v51 = vadd.f32 1.0, %v11647_v40 }
 0xeda   : > { %8560 = vmatpush1.bf16.msra.mxu0 %v11114_v49  ;;  %8512 = vmatprep.mubr.bf16.mxu0 %v7516_v43  ;;  %v16464_v47 = vmul.f32 0.5, %v6755_v31  ;;  %11658 = verf.f32 %v6983_v1  ;;  %v16470_v49 = vmul.f32 %v16225_v26, %v16165_v7  ;;  %v7331_v43 = vadd.f32 1.0, %v11643_v5  ;;  %v11120_v7 = vld [vmem:[#allocation23 + $0x2a0] ss:$8 sps:$4 sm:$0xff]   ;;  %v11125_v1 = vld [vmem:[#allocation23 + $0x2b4] ss:$8 sps:$4 sm:$0xff]  }
 0xedb   : > { %8561 = vmatprep.subr.bf16.mxu0 %v11119_v27  ;;  %v11649_v9 = vpop.eup %11648  ;;  %v6984_v15 = vmul.f32 0.70710677, %v16454_v4  ;;  %v6991_v23 = vmul.f32 0.70710677, %v16462_v48  ;;  %v16476_v6 = vmul.f32 %v7339_v51, %v6955_v19  ;;  %v6771_v3 = vadd.f32 %v16342_v59, %v16399_v56 }
 0xedc   : > { %v7340_v27 = vadd.f32 1.0, %v11649_v9  ;;  %v6775_v5 = vadd.f32 %v16370_v30, %v16397_v50  ;;  %v6777_v26 = vadd.f32 %v16378_v17, %v16399_v56  ;;  %v16490_v19 = vadd.f32 %v16385_v41, %v16397_v50 }
 0xedd   : > { %v16466_v14 = vpop.f32.mrb[208].mxu1  ;;  %11660 = verf.f32 %v6984_v15  ;;  %v16494_v16 = vmul.f32 %v7332_v33, %v6948_v13  ;;  %v16499_v44 = vmul.f32 0.5, %v16413_v53  ;;  %v6992_v40 = vmul.f32 0.70710677, %v6771_v3 }
 0xede   : > { %v16474_v18 = vpop.f32.mrb[209].mxu1  ;;  %8562 = vmatpush1.bf16.msra.mxu0 %v11117_v21  ;;  %v16496_v59 = vmul.f32 %v7340_v27, %v6956_v55  ;;  %v16502_v30 = vmul.f32 %v7331_v43, %v16429_v29  ;;  %11662 = verf.f32 %v6991_v23  ;;  %v6999_v17 = vmul.f32 0.70710677, %v6775_v5  ;;  %v11123_v29 = vld [vmem:[#allocation23 + $0x2b0] ss:$8 sps:$4 sm:$0xff]  }
 0xedf   : > { %v16482_v36 = vpop.f32.mrb[210].mxu1  ;;  %8563 = vmatprep.subr.bf16.mxu0 %v11122_v28  ;;  %v7000_v21 = vmul.f32 0.70710677, %v6777_v26  ;;  %v11651_v41 = vpop.eup %11650  ;;  %v6847_v51 = vmul.f32 0.5, %v16417_v0  ;;  %v18035_v13 = vpack.c.bf16 %v16387_v61, %v16380_v45  ;;  %11664 = verf.f32 %v6992_v40  ;;  %v11128_v43 = vld [vmem:[#allocation23 + $0x2c4] ss:$8 sps:$4 sm:$0xff]  }
 0xee0   : > { %v16492_v34 = vpop.f32.mrb[211].mxu1  ;;  %v7532_v53 = vpack.c.bf16 %v16496_v59, %v16494_v16  ;;  %v7007_v55 = vmul.f32 0.70710677, %v16490_v19  ;;  %v11653_v33 = vpop.eup %11652  ;;  %v7223_v28 = vadd.f32 1.0, %v11651_v41  ;;  %11666 = verf.f32 %v6999_v17 }
 0xee1   : > { %8513 = vmatmul.mubr.bf16.gmra.mrb[148].mxu0 %v18035_v13  ;;  %v6781_v0 = vadd.f32 %v16391_v12, %v16399_v56  ;;  %v6848_v61 = vmul.f32 0.5, %v16424_v32  ;;  %11668 = verf.f32 %v7000_v21  ;;  %v6785_v15 = vadd.f32 %v16419_v63, %v16397_v50 }
 0xee2   : > { %8564 = vmatpush1.bf16.msra.mxu0 %v11120_v7  ;;  %8522 = vmatprep.mubr.bf16.mxu0 %v7524_v54  ;;  %v11655_v45 = vpop.eup %11654  ;;  %v6787_v23 = vadd.f32 %v16426_v2, %v16399_v56  ;;  %v6855_v16 = vmul.f32 0.5, %v16433_v35  ;;  %v6856_v12 = vmul.f32 0.5, %v16454_v4  ;;  %11670 = verf.f32 %v7007_v55  ;;  %v11126_v4 = vld [vmem:[#allocation23 + $0x2c0] ss:$8 sps:$4 sm:$0xff]  }
 0xee3   : > { %8565 = vmatprep.subr.bf16.mxu0 %v11125_v1  ;;  %v11657_v27 = vpop.eup %11656  ;;  %v7231_v7 = vadd.f32 1.0, %v11655_v45  ;;  %v16527_v1 = vmul.f32 0.5, %v16462_v48  ;;  %v16529_v40 = vmul.f32 0.5, %v6771_v3  ;;  %v16531_v63 = vmul.f32 0.5, %v6775_v5  ;;  %v11131_v5 = vld [vmem:[#allocation23 + $0x2d4] ss:$8 sps:$4 sm:$0xff]  }
 0xee4   : > { %v11659_v32 = vpop.eup %11658  ;;  %v7008_v2 = vmul.f32 0.70710677, %v6781_v0  ;;  %v16536_v21 = vmul.f32 %v7223_v28, %v16464_v47  ;;  %v16540_v41 = vmul.f32 0.5, %v6777_v26  ;;  %v7015_v13 = vmul.f32 0.70710677, %v6785_v15 }
 0xee5   : > { %v16520_v54 = vpop.f32.mrb[212].mxu1  ;;  %v16538_v35 = vmul.f32 %v7231_v7, %v6847_v51  ;;  %v7224_v48 = vadd.f32 1.0, %v11653_v33  ;;  %v7232_v3 = vadd.f32 1.0, %v11657_v27  ;;  %v7016_v45 = vmul.f32 0.70710677, %v6787_v23 }
 0xee6   : > { %v16524_v59 = vpop.f32.mrb[213].mxu1  ;;  %18036 = vst [vmem:[#allocation73_spill] sm:$0xff] %v16536_v21  ;;  %8566 = vmatpush1.bf16.msra.mxu0 %v11123_v29  ;;  %v6789_v9 = vadd.f32 %v16435_v10, %v16397_v50  ;;  %v7239_v51 = vadd.f32 1.0, %v11659_v32  ;;  %11672 = verf.f32 %v7008_v2  ;;  %v6791_v26 = vadd.f32 %v16439_v62, %v16399_v56  ;;  %v11129_v7 = vld [vmem:[#allocation23 + $0x2d0] ss:$8 sps:$4 sm:$0xff]  }
 0xee7   : > { %v16533_v17 = vpop.f32.mrb[214].mxu1  ;;  %18037 = vst [vmem:[#allocation51_spill] sm:$0xff] %v16538_v35  ;;  %8567 = vmatprep.subr.bf16.mxu0 %v11128_v43  ;;  %v11661_v31 = vpop.eup %11660  ;;  %v18038_v28 = vpack.c.bf16 %v16446_v8, %v16457_v38  ;;  %v16554_v33 = vmul.f32 0.5, %v16490_v19  ;;  %v16556_v29 = vmul.f32 0.5, %v6781_v0  ;;  %11674 = verf.f32 %v7015_v13  ;;  %v11134_v38 = vld [vmem:[#allocation23 + $0x2e4] ss:$8 sps:$4 sm:$0xff]  }
 0xee8   : > { %v16542_v55 = vpop.f32.mrb[215].mxu1  ;;  %v7023_v10 = vmul.f32 0.70710677, %v6789_v9  ;;  %v11663_v43 = vpop.eup %11662  ;;  %v7240_v27 = vadd.f32 1.0, %v11661_v31  ;;  %11676 = verf.f32 %v7016_v45  ;;  %v7024_v32 = vmul.f32 0.70710677, %v6791_v26 }
 0xee9   : > { %8523 = vmatmul.mubr.bf16.gmra.mrb[152].mxu0 %v18038_v28  ;;  %v6795_v62 = vadd.f32 %v16466_v14, %v16397_v50  ;;  %v11665_v2 = vpop.eup %11664  ;;  %v16561_v8 = vmul.f32 %v7224_v48, %v16499_v44  ;;  %v6797_v19 = vadd.f32 %v16474_v18, %v16399_v56  ;;  %v6799_v31 = vadd.f32 %v16482_v36, %v16397_v50  ;;  %v11137_v21 = vld [vmem:[#allocation23 + $0x2f4] ss:$8 sps:$4 sm:$0xff]   ;;  %v11138_v35 = vld [vmem:[#allocation23 + $0x300] ss:$8 sps:$4 sm:$0xff]  }
 0xeea   : > { %8568 = vmatpush1.bf16.msra.mxu0 %v11126_v4  ;;  %8532 = vmatprep.mubr.bf16.mxu0 %v7532_v53  ;;  %11678 = verf.f32 %v7023_v10  ;;  %v11667_v53 = vpop.eup %11666  ;;  %v16569_v4 = vmul.f32 %v7232_v3, %v6848_v61  ;;  %v16571_v13 = vmul.f32 %v7239_v51, %v6855_v16  ;;  %v16573_v14 = vmul.f32 0.5, %v6785_v15  ;;  %v11132_v61 = vld [vmem:[#allocation23 + $0x2e0] ss:$8 sps:$4 sm:$0xff]  }
 0xeeb   : > { %8569 = vmatprep.subr.bf16.mxu0 %v11131_v5  ;;  %v16575_v44 = vmul.f32 0.5, %v6787_v23  ;;  %v11669_v5 = vpop.eup %11668  ;;  %v7247_v45 = vadd.f32 1.0, %v11663_v43  ;;  %v16579_v28 = vmul.f32 0.5, %v6789_v9  ;;  %v7031_v18 = vmul.f32 0.70710677, %v6795_v62  ;;  %v18042_v43 = vld [vmem:[#allocation78_spill] sm:$0xff] }
 0xeec   : > { %18039 = vst [vmem:[#allocation76_spill] sm:$0xff] %v16569_v4  ;;  %18040 = vst [vmem:[#allocation77_spill] sm:$0xff] %v16571_v13  ;;  %v7032_v10 = vmul.f32 0.70710677, %v6797_v19  ;;  %v11671_v36 = vpop.eup %11670  ;;  %v16581_v47 = vmul.f32 %v7240_v27, %v6856_v12  ;;  %v16583_v3 = vmul.f32 0.5, %v6791_v26  ;;  %11680 = verf.f32 %v7024_v32  ;;  %v18043_v9 = vld [vmem:[#allocation80_spill] sm:$0xff] }
 0xeed   : > { %v16567_v0 = vpop.f32.mrb[216].mxu1  ;;  %v7039_v15 = vmul.f32 0.70710677, %v6799_v31  ;;  %v7248_v23 = vadd.f32 1.0, %v11665_v2  ;;  %v7255_v51 = vadd.f32 1.0, %v11667_v53  ;;  %11682 = verf.f32 %v7031_v18  ;;  %v18044_v26 = vld [vmem:[#allocation83_spill] sm:$0xff] }
 0xeee   : > { %v16577_v48 = vpop.f32.mrb[217].mxu1  ;;  %18041 = vst [vmem:[#allocation79_spill] sm:$0xff] %v16581_v47  ;;  %8570 = vmatpush1.bf16.msra.mxu0 %v11129_v7  ;;  %v7256_v4 = vadd.f32 1.0, %v11669_v5  ;;  %11684 = verf.f32 %v7032_v10  ;;  %v6801_v12 = vadd.f32 %v16492_v34, %v16399_v56  ;;  %v18045_v27 = vld [vmem:[#allocation85_spill] sm:$0xff]  ;;  %v7263_v32 = vadd.f32 1.0, %v11671_v36 }
 0xeef   : > { %v6818_v16 = vpop.f32.mrb[218].mxu1  ;;  %8571 = vmatprep.subr.bf16.mxu0 %v11134_v38  ;;  %v18046_v2 = vpack.c.bf16 %v16476_v6, %v16502_v30  ;;  %v11135_v38 = vld [vmem:[#allocation23 + $0x2f0] ss:$8 sps:$4 sm:$0xff]   ;;  %11686 = verf.f32 %v7039_v15  ;;  %v6805_v53 = vadd.f32 %v16520_v54, %v16397_v50  ;;  %v6807_v5 = vadd.f32 %v16524_v59, %v16399_v56  ;;  %v11140_v36 = vld [vmem:[#allocation23 + $0x304] ss:$8 sps:$4 sm:$0xff]  }
 0xef0   : > { %v16587_v13 = vpop.f32.mrb[219].mxu1  ;;  %v11673_v18 = vpop.eup %11672  ;;  %v16601_v10 = vmul.f32 %v7247_v45, %v16527_v1  ;;  %v18048_v34 = vpack.c.bf16 %v18031_v37, %v18030_v11  ;;  %v16606_v6 = vmul.f32 0.5, %v6795_v62  ;;  %v7040_v30 = vmul.f32 0.70710677, %v6801_v12 }
 0xef1   : > { %8533 = vmatmul.mubr.bf16.gmra.mrb[156].mxu0 %v18046_v2  ;;  %v6809_v15 = vadd.f32 %v16533_v17, %v16397_v50  ;;  %v11675_v54 = vpop.eup %11674  ;;  %v16611_v2 = vmul.f32 %v7248_v23, %v16529_v40  ;;  %v16613_v59 = vmul.f32 0.5, %v6797_v19  ;;  %v16615_v1 = vmul.f32 0.5, %v6799_v31 }
 0xef2   : > { %18047 = vst [vmem:[#allocation81_spill] sm:$0xff] %v16601_v10  ;;  %8572 = vmatpush1.bf16.msra.mxu0 %v11132_v61  ;;  %8575 = vmatprep.mubr.bf16.mxu0 %v18048_v34  ;;  %v7047_v45 = vmul.f32 0.70710677, %v6805_v53  ;;  %v11677_v11 = vpop.eup %11676  ;;  %v16620_v37 = vmul.f32 %v7255_v51, %v16531_v63  ;;  %v16623_v62 = vmul.f32 %v7256_v4, %v16540_v41  ;;  %11688 = verf.f32 %v7040_v30  ;;  %v18055_v4 = vld [vmem:[#allocation75_spill] sm:$0xff] }
 0xef3   : > { %8573 = vmatprep.subr.bf16.mxu0 %v11137_v21  ;;  %v7048_v17 = vmul.f32 0.70710677, %v6807_v5  ;;  %v16626_v21 = vmul.f32 %v7263_v32, %v16554_v33  ;;  %v7264_v19 = vadd.f32 1.0, %v11673_v18  ;;  %v7055_v31 = vmul.f32 0.70710677, %v6809_v15  ;;  %v18059_v32 = vld [vmem:[#allocation103_spill] sm:$0xff] }
 0xef4   : > { %18049 = vst [vmem:[#allocation78_spill] sm:$0xff] %v16620_v37  ;;  %v11679_v40 = vpop.eup %11678  ;;  %11690 = verf.f32 %v7047_v45  ;;  %v7271_v7 = vadd.f32 1.0, %v11675_v54  ;;  %v16628_v10 = vmul.f32 0.5, %v6801_v12  ;;  %v7272_v30 = vadd.f32 1.0, %v11677_v11  ;;  %v11143_v37 = vld [vmem:[#allocation23 + $0x314] ss:$8 sps:$4 sm:$0xff]  }
 0xef5   : > { %v16617_v61 = vpop.f32.mrb[220].mxu1  ;;  %18050 = vst [vmem:[#allocation80_spill] sm:$0xff] %v16626_v21  ;;  %11692 = verf.f32 %v7048_v17  ;;  %v6811_v33 = vadd.f32 %v16542_v55, %v16399_v56  ;;  %v7279_v45 = vadd.f32 1.0, %v11679_v40  ;;  %v6815_v12 = vadd.f32 %v16567_v0, %v16397_v50  ;;  %v18058_v40 = vld [vmem:[#allocation100_spill] sm:$0xff] }
 0xef6   : > { %v6826_v34 = vpop.f32.mrb[221].mxu1  ;;  %8574 = vmatpush1.bf16.msra.mxu0 %v11135_v38  ;;  %11694 = verf.f32 %v7055_v31  ;;  %v11681_v54 = vpop.eup %11680  ;;  %v16642_v17 = vadd.f32 %v16577_v48, %v16399_v56  ;;  %v6819_v11 = vadd.f32 %v6818_v16, %v16397_v50  ;;  %v18056_v31 = vld [vmem:[#allocation74_spill] sm:$0xff]  ;;  %v16648_v55 = vmul.f32 0.5, %v6805_v53 }
 0xef7   : > { %v6828_v23 = vpop.f32.mrb[222].mxu1  ;;  %8656 = vmatprep.subr.bf16.mxu0 %v11140_v36  ;;  %v11683_v36 = vpop.eup %11682  ;;  %v18057_v21 = vpack.c.bf16 %v18055_v4, %v18056_v31  ;;  %v16650_v63 = vmul.f32 0.5, %v6807_v5  ;;  %v7056_v38 = vmul.f32 0.70710677, %v6811_v33  ;;  %v16655_v41 = vmul.f32 %v7264_v19, %v16556_v29  ;;  %v11141_v53 = vld [vmem:[#allocation23 + $0x310] ss:$8 sps:$4 sm:$0xff]  }
 0xef8   : > { %v16632_v51 = vpop.f32.mrb[223].mxu1  ;;  %v11685_v0 = vpop.eup %11684  ;;  %v16658_v48 = vmul.f32 %v7271_v7, %v16573_v14  ;;  %v18060_v16 = vpack.c.bf16 %v18033_v24, %v18032_v52  ;;  %v7063_v5 = vmul.f32 0.70710677, %v6815_v12  ;;  %v16666_v31 = vmul.f32 %v7272_v30, %v16575_v44  ;;  %v11146_v29 = vld [vmem:[#allocation23 + $0x324] ss:$8 sps:$4 sm:$0xff]   ;;  %v18061_v44 = vld [vmem:[#allocation106_spill] sm:$0xff] }
 0xef9   : > { %8576 = vmatmul.mubr.bf16.vlgmr.msra.gmra.mrb[128].mxu0 %v18057_v21  ;;  %v16663_v21 = vmul.f32 0.5, %v6809_v15  ;;  %v11687_v4 = vpop.eup %11686  ;;  %v7280_v18 = vadd.f32 1.0, %v11681_v54  ;;  %11696 = verf.f32 %v7056_v38  ;;  %v7064_v14 = vmul.f32 0.70710677, %v16642_v17  ;;  %v11144_v30 = vld [vmem:[#allocation23 + $0x320] ss:$8 sps:$4 sm:$0xff]  }
 0xefa   : > { %8657 = vmatpush1.bf16.msra.mxu0 %v11138_v35  ;;  %8585 = vmatprep.mubr.bf16.mxu0 %v18060_v16  ;;  %v16670_v35 = vmul.f32 %v7279_v45, %v16579_v28  ;;  %v7287_v7 = vadd.f32 1.0, %v11683_v36  ;;  %11698 = verf.f32 %v7063_v5  ;;  %v7071_v52 = vmul.f32 0.70710677, %v6819_v11 }
 0xefb   : > { %8658 = vmatprep.subr.bf16.mxu0 %v11143_v37  ;;  %v7288_v24 = vadd.f32 1.0, %v11685_v0  ;;  %11700 = verf.f32 %v7064_v14  ;;  %v16674_v15 = vadd.f32 %v16587_v13, %v16399_v56  ;;  %v7295_v38 = vadd.f32 1.0, %v11687_v4  ;;  %v11149_v0 = vld [vmem:[#allocation23 + $0x334] ss:$8 sps:$4 sm:$0xff]  }
 0xefc   : > { %v11689_v37 = vpop.eup %11688  ;;  %11702 = verf.f32 %v7071_v52  ;;  %v16680_v28 = vadd.f32 %v16617_v61, %v16397_v50  ;;  %v16683_v54 = vadd.f32 %v6826_v34, %v16399_v56  ;;  %v16686_v36 = vmul.f32 %v7280_v18, %v16583_v3  ;;  %v18075_v47 = vld [vmem:[#allocation78_spill] sm:$0xff] }
 0xefd   : > { %v7296_v13 = vadd.f32 1.0, %v11689_v37  ;;  %v7072_v16 = vmul.f32 0.70710677, %v16674_v15  ;;  %v6928_v4 = vmul.f32 0.5, %v6811_v33  ;;  %v6935_v14 = vmul.f32 0.5, %v6815_v12  ;;  %v18066_v37 = vld [vmem:[#allocation108_spill] sm:$0xff] }
 0xefe   : > { %8659 = vmatpush1.bf16.msra.mxu0 %v11141_v53  ;;  %v11691_v45 = vpop.eup %11690  ;;  %v16690_v53 = vadd.f32 %v6828_v23, %v16397_v50  ;;  %v16692_v61 = vmul.f32 0.5, %v6819_v11  ;;  %v7079_v34 = vmul.f32 0.70710677, %v16680_v28  ;;  %v16696_v19 = vmul.f32 %v7287_v7, %v16606_v6  ;;  %v11147_v6 = vld [vmem:[#allocation23 + $0x330] ss:$8 sps:$4 sm:$0xff]  }
 0xeff   : > { %8660 = vmatprep.subr.bf16.mxu0 %v11146_v29  ;;  %v11693_v5 = vpop.eup %11692  ;;  %v16699_v3 = vmul.f32 %v7288_v24, %v16613_v59  ;;  %v18062_v18 = vpack.c.bf16 %v18043_v9, %v18042_v43  ;;  %11704 = verf.f32 %v7072_v16  ;;  %v7080_v50 = vmul.f32 0.70710677, %v16683_v54  ;;  %v11152_v9 = vld [vmem:[#allocation23 + $0x344] ss:$8 sps:$4 sm:$0xff]   ;;  %v18064_v7 = vld [vmem:[#allocation105_spill] sm:$0xff] }
 0xf00   : > { %v11695_v52 = vpop.eup %11694  ;;  %v16706_v23 = vmul.f32 %v7295_v38, %v16615_v1  ;;  %v18063_v33 = vpack.c.bf16 %v18045_v27, %v18044_v26  ;;  %v7303_v12 = vadd.f32 1.0, %v11691_v45  ;;  %11706 = verf.f32 %v7079_v34  ;;  %v18065_v1 = vld [vmem:[#allocation107_spill] sm:$0xff]  ;;  %v18067_v34 = vld [vmem:[#allocation101_spill] sm:$0xff]  ;;  %v18069_v45 = vld [vmem:[#allocation76_spill] sm:$0xff] }
 0xf01   : > { %8586 = vmatmul.mubr.bf16.gmra.mrb[132].mxu0 %v18062_v18  ;;  %v7311_v11 = vadd.f32 1.0, %v11695_v52  ;;  %v16712_v59 = vmul.f32 %v7296_v13, %v16628_v10  ;;  %v7304_v43 = vadd.f32 1.0, %v11693_v5  ;;  %v7087_v29 = vmul.f32 0.70710677, %v16690_v53  ;;  %v18068_v52 = vld [vmem:[#allocation72_spill] sm:$0xff]  ;;  %v18071_v10 = vld [vmem:[#allocation81_spill] sm:$0xff] }
 0xf02   : > { %8661 = vmatpush1.bf16.msra.mxu0 %v11144_v30  ;;  %8595 = vmatprep.mubr.bf16.mxu0 %v18063_v33  ;;  %11708 = verf.f32 %v7080_v50  ;;  %v16719_v26 = vadd.f32 %v16632_v51, %v16399_v56  ;;  %v11150_v56 = vld [vmem:[#allocation23 + $0x340] ss:$8 sps:$4 sm:$0xff]   ;;  %v11155_v33 = vld [vmem:[#allocation23 + $0x354] ss:$8 sps:$4 sm:$0xff]  }
 0xf03   : > { %8662 = vmatprep.subr.bf16.mxu0 %v11149_v0  ;;  %v11697_v30 = vpop.eup %11696  ;;  %11710 = verf.f32 %v7087_v29  ;;  %v16732_v51 = vmul.f32 %v7311_v11, %v16663_v21  ;;  %v18072_v38 = vld [vmem:[#allocation84_spill] sm:$0xff]  ;;  %v18073_v18 = vld [vmem:[#allocation82_spill] sm:$0xff] }
 0xf04   : > { %v11699_v0 = vpop.eup %11698  ;;  %v7312_v16 = vadd.f32 1.0, %v11697_v30  ;;  %v7088_v5 = vmul.f32 0.70710677, %v16719_v26  ;;  %v16744_v30 = vmul.f32 %v7303_v12, %v16648_v55  ;;  %v18074_v24 = vpack.c.bf16 %v18072_v38, %v18073_v18  ;;  %v18076_v21 = vld [vmem:[#allocation80_spill] sm:$0xff]  ;;  %v18078_v12 = vld [vmem:[#allocation102_spill] sm:$0xff] }
 0xf05   : > { %v11701_v50 = vpop.eup %11700  ;;  %v7319_v29 = vadd.f32 1.0, %v11699_v0  ;;  %v16751_v0 = vmul.f32 %v7304_v43, %v16650_v63  ;;  %v7495_v13 = vpack.c.bf16 %v18076_v21, %v18075_v47  ;;  %v11158_v18 = vld [vmem:[#allocation23 + $0x364] ss:$8 sps:$4 sm:$0xff]   ;;  %v6951_v55 = vmul.f32 0.5, %v16680_v28 }
 0xf06   : > { %8663 = vmatpush1.bf16.msra.mxu0 %v11147_v6  ;;  %v11703_v11 = vpop.eup %11702  ;;  %v16746_v27 = vmul.f32 %v7312_v16, %v6928_v4  ;;  %11712 = verf.f32 %v7088_v5  ;;  %v18077_v4 = vld [vmem:[#allocation104_spill] sm:$0xff]  ;;  %v11153_v5 = vld [vmem:[#allocation23 + $0x350] ss:$8 sps:$4 sm:$0xff]   ;;  %v7320_v63 = vadd.f32 1.0, %v11701_v50  ;;  %v11161_v50 = vld [vmem:[#allocation23 + $0x374] ss:$8 sps:$4 sm:$0xff]  }
 0xf07   : > { %8664 = vmatprep.subr.bf16.mxu0 %v11152_v9  ;;  %v7327_v6 = vadd.f32 1.0, %v11703_v11  ;;  %v18079_v16 = vpack.c.bf16 %v18077_v4, %v18078_v12  ;;  %v16763_v9 = vmul.f32 %v7319_v29, %v6935_v14  ;;  %v6936_v4 = vmul.f32 0.5, %v16642_v17 }
 0xf08   : > { %v6944_v12 = vmul.f32 0.5, %v16674_v15  ;;  %v6959_v17 = vmul.f32 0.5, %v16690_v53  ;;  %v6952_v53 = vmul.f32 0.5, %v16683_v54  ;;  %v18083_v54 = vpack.c.bf16 %v16099_v57, %v16067_v25  ;;  %v11176_v25 = vld [vmem:[#allocation23 + $0x3c4] ss:$8 sps:$4 sm:$0xff]  }
 0xf09   : > { %8596 = vmatmul.mubr.bf16.gmra.mrb[136].mxu0 %v18074_v24  ;;  %v11705_v38 = vpop.eup %11704  ;;  %v16770_v11 = vmul.f32 %v7327_v6, %v16692_v61  ;;  %v16782_v6 = vmul.f32 %v7320_v63, %v6936_v4  ;;  %v11174_v57 = vld [vmem:[#allocation23 + $0x3c0] ss:$8 sps:$4 sm:$0xff]   ;;  %v18102_v47 = vpack.c.bf16 %v16746_v27, %v16751_v0 }
 0xf0a   : > { %8665 = vmatpush1.bf16.msra.mxu0 %v11150_v56  ;;  %8605 = vmatprep.mubr.bf16.mxu0 %v18079_v16  ;;  %v11707_v29 = vpop.eup %11706  ;;  %v7328_v16 = vadd.f32 1.0, %v11705_v38  ;;  %v11156_v56 = vld [vmem:[#allocation23 + $0x360] ss:$8 sps:$4 sm:$0xff]  }
 0xf0b   : > { %8666 = vmatprep.subr.bf16.mxu0 %v11155_v33  ;;  %v7527_v33 = vpack.c.bf16 %v16770_v11, %v16763_v9  ;;  %v7335_v14 = vadd.f32 1.0, %v11707_v29  ;;  %v18081_v29 = vpack.c.bf16 %v16039_v58, %v18061_v44  ;;  %v11162_v58 = vld [vmem:[#allocation23 + $0x380] ss:$8 sps:$4 sm:$0xff]   ;;  %v11167_v44 = vld [vmem:[#allocation23 + $0x394] ss:$8 sps:$4 sm:$0xff]  }
 0xf0c   : > { %v11709_v61 = vpop.eup %11708  ;;  %v16784_v24 = vmul.f32 %v7328_v16, %v6944_v12  ;;  %v6960_v16 = vmul.f32 0.5, %v16719_v26  ;;  %v11165_v26 = vld [vmem:[#allocation23 + $0x390] ss:$8 sps:$4 sm:$0xff]  }
 0xf0d   : > { %v11711_v43 = vpop.eup %11710  ;;  %v7336_v63 = vadd.f32 1.0, %v11709_v61  ;;  %v16796_v12 = vmul.f32 %v7335_v14, %v6951_v55  ;;  %v18082_v14 = vpack.c.bf16 %v18065_v1, %v18064_v7  ;;  %v18085_v7 = vpack.c.bf16 %v16177_v42, %v16142_v46  ;;  %v11171_v1 = vld [vmem:[#allocation23 + $0x3b0] ss:$8 sps:$4 sm:$0xff]   ;;  %v11182_v46 = vld [vmem:[#allocation23 + $0x3e4] ss:$8 sps:$4 sm:$0xff]  }
 0xf0e   : > { %8667 = vmatpush1.bf16.msra.mxu0 %v11153_v5  ;;  %v7343_v15 = vadd.f32 1.0, %v11711_v43  ;;  %v7528_v38 = vpack.c.bf16 %v16784_v24, %v16782_v6  ;;  %v18080_v5 = vpack.c.bf16 %v18059_v32, %v18058_v40  ;;  %v11164_v43 = vld [vmem:[#allocation23 + $0x384] ss:$8 sps:$4 sm:$0xff]   ;;  %v11180_v42 = vld [vmem:[#allocation23 + $0x3e0] ss:$8 sps:$4 sm:$0xff]   ;;  %v18108_v9 = vld [vmem:[#allocation94_spill] sm:$0xff] }
 0xf0f   : > { %8668 = vmatprep.subr.bf16.mxu0 %v11158_v18  ;;  %v11159_v18 = vld [vmem:[#allocation23 + $0x370] ss:$8 sps:$4 sm:$0xff]   ;;  %v18110_v6 = vld [vmem:[#allocation95_spill] sm:$0xff] }
 0xf10   : > { %v11713_v4 = vpop.eup %11712  ;;  %v16798_v28 = vmul.f32 %v7343_v15, %v6959_v17  ;;  %v11168_v17 = vld [vmem:[#allocation23 + $0x3a0] ss:$8 sps:$4 sm:$0xff]   ;;  %v11173_v15 = vld [vmem:[#allocation23 + $0x3b4] ss:$8 sps:$4 sm:$0xff]  }
 0xf11   : > { %8606 = vmatmul.mubr.bf16.gmra.mrb[140].mxu0 %v18080_v5  ;;  %v7344_v32 = vadd.f32 1.0, %v11713_v4  ;;  %v18084_v5 = vpack.c.bf16 %v16091_v22, %v18066_v37  ;;  %v18086_v4 = vpack.c.bf16 %v16163_v39, %v16119_v60  ;;  %v18087_v22 = vpack.c.bf16 %v16470_v49, %v16206_v20  ;;  %v11177_v37 = vld [vmem:[#allocation23 + $0x3d0] ss:$8 sps:$4 sm:$0xff]   ;;  %v18090_v20 = vld [vmem:[#allocation51_spill] sm:$0xff] }
 0xf12   : > { %8669 = vmatpush1.bf16.msra.mxu0 %v11156_v56  ;;  %8615 = vmatprep.mubr.bf16.mxu0 %v18081_v29  ;;  %v7535_v40 = vpack.c.bf16 %v16798_v28, %v16796_v12  ;;  %v7464_v56 = vmul.f32 %v7336_v63, %v6952_v53  ;;  %v11179_v63 = vld [vmem:[#allocation23 + $0x3d4] ss:$8 sps:$4 sm:$0xff]   ;;  %v18089_v60 = vpack.c.bf16 %v18069_v45, %v16561_v8  ;;  %v11183_v39 = vld [vmem:[#allocation23 + $0x3f0] ss:$8 sps:$4 sm:$0xff]   ;;  %v18093_v28 = vld [vmem:[#allocation79_spill] sm:$0xff] }
 0xf13   : > { %8670 = vmatprep.subr.bf16.mxu0 %v11161_v50  ;;  %v7472_v61 = vmul.f32 %v7344_v32, %v6960_v16  ;;  %v11170_v50 = vld [vmem:[#allocation23 + $0x3a4] ss:$8 sps:$4 sm:$0xff]   ;;  %v11185_v29 = vld [vmem:[#allocation23 + $0x3f4] ss:$8 sps:$4 sm:$0xff]   ;;  %v18094_v53 = vpack.c.bf16 %v16611_v2, %v18093_v28  ;;  %v18098_v8 = vpack.c.bf16 %v16686_v36, %v16666_v31  ;;  %v18099_v2 = vpack.c.bf16 %v16670_v35, %v16658_v48 }
 0xf14   : > { %v18091_v49 = vld [vmem:[#allocation73_spill] sm:$0xff]  ;;  %v7665_v48 = vld [vmem:[%s18104_s21] sm:$0x3]  ;;  %v18105_v31 = vld [vmem:[#allocation52_spill] sm:$0xff] }
 0xf15   : > { %v7536_v55 = vpack.c.bf16 %v7472_v61, %v7464_v56  ;;  %v18092_v12 = vpack.c.bf16 %v18090_v20, %v18091_v49  ;;  %v16871_v35 = vrot.slane %v7665_v48, %v18105_v31  ;;  %v18109_v11 = vld [vmem:[#allocation86_spill] sm:$0xff]  ;;  %v18116_v20 = vld [vmem:[#allocation89_spill] sm:$0xff]  ;;  %v18117_v28 = vld [vmem:[#allocation87_spill] sm:$0xff] }
 0xf16   : > { %8671 = vmatpush1.bf16.msra.mxu0 %v11159_v18  ;;  %v18088_v18 = vpack.c.bf16 %v18068_v52, %v18067_v34  ;;  %v18097_v52 = vpack.c.bf16 %v16655_v41, %v16623_v62  ;;  %v18101_v62 = vpack.c.bf16 %v16706_v23, %v16696_v19  ;;  %v18103_v41 = vpack.c.bf16 %v16732_v51, %v16744_v30  ;;  %v18106_v19 = vld [vmem:[#allocation53_spill] sm:$0xff] }
 0xf17   : > { %8672 = vmatprep.subr.bf16.mxu0 %v11164_v43  ;;  %v18095_v43 = vld [vmem:[#allocation77_spill] sm:$0xff]  ;;  %v16874_v36 = vrot.slane %v7665_v48, %v18106_v19  ;;  %v18119_v48 = vld [vmem:[#allocation99_spill] sm:$0xff] }
 0xf18   : > { %v18096_v34 = vpack.c.bf16 %v18071_v10, %v18095_v43  ;;  %v18100_v10 = vpack.c.bf16 %v16712_v59, %v16699_v3  ;;  %v18118_v43 = vld [vmem:[#allocation92_spill] sm:$0xff] }
 0xf19   : > { %8616 = vmatmul.mubr.bf16.gmra.mrb[144].mxu0 %v18082_v14 }
 0xf1a   : > { %8673 = vmatpush1.bf16.msra.mxu0 %v11162_v58  ;;  %8625 = vmatprep.mubr.bf16.mxu0 %v18083_v54 }
 0xf1b   : > { %8674 = vmatprep.subr.bf16.mxu0 %v11167_v44 }
 0xf1e   : > { %8675 = vmatpush1.bf16.msra.mxu0 %v11165_v26 }
 0xf1f   : > { %8676 = vmatprep.subr.bf16.mxu0 %v11170_v50  ;;  %v18112_v50 = vld [vmem:[#allocation98_spill] sm:$0xff] }
 0xf21   : > { %8626 = vmatmul.mubr.bf16.gmra.mrb[148].mxu0 %v18084_v5  ;;  %v18113_v5 = vld [vmem:[#allocation90_spill] sm:$0xff] }
 0xf22   : > { %8677 = vmatpush1.bf16.msra.mxu0 %v11168_v17  ;;  %8635 = vmatprep.mubr.bf16.mxu0 %v18085_v7 }
 0xf23   : > { %8678 = vmatprep.subr.bf16.mxu0 %v11173_v15 }
 0xf26   : > { %8679 = vmatpush1.bf16.msra.mxu0 %v11171_v1  ;;  %v18114_v1 = vld [vmem:[#allocation96_spill] sm:$0xff] }
 0xf27   : > { %8680 = vmatprep.subr.bf16.mxu0 %v11176_v25 }
 0xf29   : > { %8636 = vmatmul.mubr.bf16.gmra.mrb[152].mxu0 %v18086_v4 }
 0xf2a   : > { %8681 = vmatpush1.bf16.msra.mxu0 %v11174_v57  ;;  %8645 = vmatprep.mubr.bf16.mxu0 %v18087_v22 }
 0xf2b   : > { %8682 = vmatprep.subr.bf16.mxu0 %v11179_v63 }
 0xf2e   : > { %8683 = vmatpush1.bf16.msra.mxu0 %v11177_v37 }
 0xf2f   : > { %8684 = vmatprep.subr.bf16.mxu0 %v11182_v46 }
 0xf31   : > { %8646 = vmatmul.mubr.bf16.gmra.mrb[156].mxu0 %v18088_v18 }
 0xf32   : > { %8685 = vmatpush1.bf16.msra.mxu0 %v11180_v42  ;;  %8688 = vmatprep.mubr.bf16.mxu0 %v18089_v60 }
 0xf33   : > { %8686 = vmatprep.subr.bf16.mxu0 %v11185_v29  ;;  %v18115_v29 = vld [vmem:[#allocation88_spill] sm:$0xff] }
 0xf36   : > { %8687 = vmatpush1.bf16.msra.mxu0 %v11183_v39 }
 0xf39   : > { %8689 = vmatmul.mubr.bf16.vlgmr.msra.gmra.mrb[128].mxu0 %v18092_v12 }
 0xf3a   : > { %8698 = vmatprep.mubr.bf16.mxu0 %v18094_v53 }
 0xf41   : > { %8699 = vmatmul.mubr.bf16.gmra.mrb[132].mxu0 %v18096_v34 }
 0xf42   : > { %8708 = vmatprep.mubr.bf16.mxu0 %v18097_v52 }
 0xf49   : > { %8709 = vmatmul.mubr.bf16.gmra.mrb[136].mxu0 %v7495_v13  ;;  %v18107_v13 = vld [vmem:[#allocation93_spill] sm:$0xff] }
 0xf4a   : > { %8718 = vmatprep.mubr.bf16.mxu0 %v18098_v8 }
 0xf51   : > { %8719 = vmatmul.mubr.bf16.gmra.mrb[140].mxu0 %v18099_v2 }
 0xf52   : > { %8728 = vmatprep.mubr.bf16.mxu0 %v18100_v10 }
 0xf59   : > { %8729 = vmatmul.mubr.bf16.gmra.mrb[144].mxu0 %v18101_v62 }
 0xf5a   : > { %8738 = vmatprep.mubr.bf16.mxu0 %v18102_v47 }
 0xf61   : > { %8739 = vmatmul.mubr.bf16.gmra.mrb[148].mxu0 %v18103_v41 }
 0xf62   : > { %8748 = vmatprep.mubr.bf16.mxu0 %v7528_v38 }
 0xf69   : > { %8749 = vmatmul.mubr.bf16.gmra.mrb[152].mxu0 %v7527_v33 }
 0xf6a   : > { %8758 = vmatprep.mubr.bf16.mxu0 %v7536_v55  ;;  %v18111_v55 = vld [vmem:[#allocation97_spill] sm:$0xff] }
 0xf71   : > { %8759 = vmatmul.mubr.bf16.gmra.mrb[156].mxu0 %v7535_v40 }
0x100c   : > { %v8690_v3 = vpop.f32.mrb[128].mxu0 }
0x100d   : > { %v10361_v23 = vadd.f32 %v8690_v3, %v16871_v35  ;;  %v8692_v59 = vpop.f32.mrb[129].mxu0 }
0x100e   : > { %v10362_v27 = vadd.f32 %v8692_v59, %v16874_v36  ;;  %v8694_v45 = vpop.f32.mrb[130].mxu0 }
0x100f   : > { %v16879_v51 = vadd.f32 %v10361_v23, %v18107_v13  ;;  %v10363_v21 = vadd.f32 %v8694_v45, %v16871_v35  ;;  %v8696_v30 = vpop.f32.mrb[131].mxu0 }
0x1010   : > { %v16883_v0 = vadd.f32 %v10362_v27, %v18108_v9  ;;  %v10364_v24 = vadd.f32 %v8696_v30, %v16874_v36  ;;  %v18120_v27 = vld [vmem:[#allocation91_spill] sm:$0xff] }
0x1011   : > { %v16887_v33 = vadd.f32 %v10363_v21, %v18109_v11  ;;  %v18121_v21 = vld [vmem:[#allocation54_spill] sm:$0xff]  ;;  %v18122_v9 = vld [vmem:[#allocation55_spill] sm:$0xff] }
0x1012   : > { %v16890_v38 = vadd.f32 %v10364_v24, %v18110_v6  ;;  %v8803_v16 = vadd.f32 %v16883_v0, %v16879_v51 }
0x1014   : > { %v8700_v32 = vpop.f32.mrb[132].mxu0  ;;  %8804 = vadd.xlane.f32.xlu0 %v8803_v16  ;;  %v8806_v40 = vadd.f32 %v16890_v38, %v16887_v33 }
0x1015   : > { %v10365_v56 = vadd.f32 %v8700_v32, %v16871_v35  ;;  %v8702_v61 = vpop.f32.mrb[133].mxu0 }
0x1016   : > { %v10366_v58 = vadd.f32 %v8702_v61, %v16874_v36  ;;  %v8704_v44 = vpop.f32.mrb[134].mxu0  ;;  %8807 = vadd.xlane.f32.xlu1 %v8806_v40 }
0x1017   : > { %v16899_v14 = vadd.f32 %v10365_v56, %v18111_v55  ;;  %v10367_v54 = vadd.f32 %v8704_v44, %v16871_v35  ;;  %v8706_v26 = vpop.f32.mrb[135].mxu0 }
0x1018   : > { %v16903_v17 = vadd.f32 %v10366_v58, %v18112_v50  ;;  %v10368_v15 = vadd.f32 %v8706_v26, %v16874_v36  ;;  %v18123_v58 = vld [vmem:[#allocation56_spill] sm:$0xff]  ;;  %v18124_v26 = vld [vmem:[#allocation57_spill] sm:$0xff] }
0x1019   : > { %v16907_v7 = vadd.f32 %v10367_v54, %v18113_v5  ;;  %v18125_v5 = vld [vmem:[#allocation58_spill] sm:$0xff] }
0x101a   : > { %v16910_v25 = vadd.f32 %v10368_v15, %v18114_v1  ;;  %v8809_v57 = vadd.f32 %v16903_v17, %v16899_v14 }
0x101c   : > { %v8710_v63 = vpop.f32.mrb[136].mxu0  ;;  %8810 = vadd.xlane.f32.xlu0 %v8809_v57  ;;  %v8812_v4 = vadd.f32 %v16910_v25, %v16907_v7  ;;  %v18126_v57 = vld [vmem:[#allocation59_spill] sm:$0xff] }
0x101d   : > { %v10369_v22 = vadd.f32 %v8710_v63, %v16871_v35  ;;  %v8712_v37 = vpop.f32.mrb[137].mxu0 }
0x101e   : > { %v10370_v46 = vadd.f32 %v8712_v37, %v16874_v36  ;;  %v8714_v42 = vpop.f32.mrb[138].mxu0  ;;  %8813 = vadd.xlane.f32.xlu1 %v8812_v4 }
0x101f   : > { %v16919_v18 = vadd.f32 %v10369_v22, %v18115_v29  ;;  %v10371_v60 = vadd.f32 %v8714_v42, %v16871_v35  ;;  %v8716_v39 = vpop.f32.mrb[139].mxu0 }
0x1020   : > { %v16923_v49 = vadd.f32 %v10370_v46, %v18116_v20  ;;  %v10372_v12 = vadd.f32 %v8716_v39, %v16874_v36  ;;  %v18127_v39 = vld [vmem:[#allocation60_spill] sm:$0xff] }
0x1021   : > { %v16927_v53 = vadd.f32 %v10371_v60, %v18117_v28 }
0x1022   : > { %v16930_v34 = vadd.f32 %v10372_v12, %v18118_v43  ;;  %v8815_v52 = vadd.f32 %v16923_v49, %v16919_v18  ;;  %v18128_v43 = vld [vmem:[#allocation61_spill] sm:$0xff] }
0x1024   : > { %v8720_v8 = vpop.f32.mrb[140].mxu0  ;;  %8816 = vadd.xlane.f32.xlu0 %v8815_v52  ;;  %v8818_v2 = vadd.f32 %v16930_v34, %v16927_v53 }
0x1025   : > { %v10373_v10 = vadd.f32 %v8720_v8, %v16871_v35  ;;  %v8722_v62 = vpop.f32.mrb[141].mxu0 }
0x1026   : > { %v10374_v47 = vadd.f32 %v8722_v62, %v16874_v36  ;;  %v8724_v41 = vpop.f32.mrb[142].mxu0  ;;  %8819 = vadd.xlane.f32.xlu1 %v8818_v2  ;;  %v18129_v2 = vld [vmem:[#allocation62_spill] sm:$0xff]  ;;  %v18130_v62 = vld [vmem:[#allocation63_spill] sm:$0xff] }
0x1027   : > { %v16939_v3 = vadd.f32 %v10373_v10, %v18119_v48  ;;  %v10375_v23 = vadd.f32 %v8724_v41, %v16871_v35  ;;  %v8726_v59 = vpop.f32.mrb[143].mxu0 }
0x1028   : > { %v16943_v45 = vadd.f32 %v10374_v47, %v18120_v27  ;;  %v10376_v13 = vadd.f32 %v8726_v59, %v16874_v36 }
0x1029   : > { %v16947_v30 = vadd.f32 %v10375_v23, %v18121_v21 }
0x102a   : > { %v16950_v24 = vadd.f32 %v10376_v13, %v18122_v9  ;;  %v8821_v11 = vadd.f32 %v16943_v45, %v16939_v3  ;;  %v18131_v9 = vld [vmem:[#allocation64_spill] sm:$0xff] }
0x102c   : > { %v8730_v6 = vpop.f32.mrb[144].mxu0  ;;  %8822 = vadd.xlane.f32.xlu0 %v8821_v11  ;;  %v8824_v16 = vadd.f32 %v16950_v24, %v16947_v30 }
0x102d   : > { %v10377_v32 = vadd.f32 %v8730_v6, %v16871_v35  ;;  %v8732_v40 = vpop.f32.mrb[145].mxu0 }
0x102e   : > { %v10378_v56 = vadd.f32 %v8732_v40, %v16874_v36  ;;  %v8734_v61 = vpop.f32.mrb[146].mxu0  ;;  %8825 = vadd.xlane.f32.xlu1 %v8824_v16 }
0x102f   : > { %v16959_v44 = vadd.f32 %v10377_v32, %v18123_v58  ;;  %v10379_v55 = vadd.f32 %v8734_v61, %v16871_v35  ;;  %v8736_v54 = vpop.f32.mrb[147].mxu0  ;;  %v18132_v32 = vld [vmem:[#allocation65_spill] sm:$0xff]  ;;  %v18133_v61 = vld [vmem:[#allocation66_spill] sm:$0xff] }
0x1030   : > { %v16963_v50 = vadd.f32 %v10378_v56, %v18124_v26  ;;  %v10380_v15 = vadd.f32 %v8736_v54, %v16874_v36 }
0x1031   : > { %v16967_v1 = vadd.f32 %v10379_v55, %v18125_v5  ;;  %v18134_v55 = vld [vmem:[#allocation67_spill] sm:$0xff] }
0x1032   : > { %v16970_v63 = vadd.f32 %v10380_v15, %v18126_v57  ;;  %v8827_v4 = vadd.f32 %v16963_v50, %v16959_v44 }
0x1034   : > { %v8740_v22 = vpop.f32.mrb[148].mxu0  ;;  %8828 = vadd.xlane.f32.xlu0 %v8827_v4  ;;  %v8830_v37 = vadd.f32 %v16970_v63, %v16967_v1 }
0x1035   : > { %v10381_v46 = vadd.f32 %v8740_v22, %v16871_v35  ;;  %v8742_v42 = vpop.f32.mrb[149].mxu0 }
0x1036   : > { %v10382_v29 = vadd.f32 %v8742_v42, %v16874_v36  ;;  %v8744_v60 = vpop.f32.mrb[150].mxu0  ;;  %8831 = vadd.xlane.f32.xlu1 %v8830_v37 }
0x1037   : > { %v16979_v20 = vadd.f32 %v10381_v46, %v18127_v39  ;;  %v10383_v12 = vadd.f32 %v8744_v60, %v16871_v35  ;;  %v8746_v28 = vpop.f32.mrb[151].mxu0  ;;  %v18135_v46 = vld [vmem:[#allocation68_spill] sm:$0xff]  ;;  %v18136_v39 = vld [vmem:[#allocation69_spill] sm:$0xff] }
0x1038   : > { %v16983_v52 = vadd.f32 %v10382_v29, %v18128_v43  ;;  %v10384_v8 = vadd.f32 %v8746_v28, %v16874_v36  ;;  %v18137_v43 = vld [vmem:[#allocation70_spill] sm:$0xff] }
0x1039   : > { %v16987_v10 = vadd.f32 %v10383_v12, %v18129_v2  ;;  %v18138_v2 = vld [vmem:[#allocation71_spill] sm:$0xff] }
0x103a   : > { %v16990_v47 = vadd.f32 %v10384_v8, %v18130_v62  ;;  %v8833_v41 = vadd.f32 %v16983_v52, %v16979_v20 }
0x103c   : > { %v8750_v48 = vpop.f32.mrb[152].mxu0  ;;  %8834 = vadd.xlane.f32.xlu0 %v8833_v41  ;;  %v8836_v23 = vadd.f32 %v16990_v47, %v16987_v10 }
0x103d   : > { %v10385_v59 = vadd.f32 %v8750_v48, %v16871_v35  ;;  %v8752_v27 = vpop.f32.mrb[153].mxu0 }
0x103e   : > { %v10386_v13 = vadd.f32 %v8752_v27, %v16874_v36  ;;  %v8754_v21 = vpop.f32.mrb[154].mxu0  ;;  %8837 = vadd.xlane.f32.xlu1 %v8836_v23  ;;  %v11188_v23 = vld [vmem:[%s18139_s22 + $0x48] sm:$0xff]   ;;  %v11190_v27 = vld [vmem:[%s18139_s22 + $0x50] sm:$0xff]  }
0x103f   : > { %v16999_v11 = vadd.f32 %v10385_v59, %v18131_v9  ;;  %v10387_v6 = vadd.f32 %v8754_v21, %v16871_v35  ;;  %v8756_v16 = vpop.f32.mrb[155].mxu0  ;;  %v11189_v59 = vld [vmem:[%s18139_s22 + $0x8] sm:$0xff]   ;;  %v11192_v21 = vld [vmem:[%s18139_s22 + $0x58] sm:$0xff]  }
0x1040   : > { %v17003_v40 = vadd.f32 %v10386_v13, %v18132_v32  ;;  %v10388_v56 = vadd.f32 %v8756_v16, %v16874_v36  ;;  %v11191_v13 = vld [vmem:[%s18139_s22 + $0x10] sm:$0xff]   ;;  %v11193_v9 = vld [vmem:[%s18139_s22 + $0x18] sm:$0xff]   ;;  %v11195_v16 = vld [vmem:[%s18139_s22 + $0x20] sm:$0xff]  }
0x1041   : > { %v17007_v58 = vadd.f32 %v10387_v6, %v18133_v61  ;;  %v11194_v6 = vld [vmem:[%s18139_s22 + $0x60] sm:$0xff]  }
0x1042   : > { %v17010_v54 = vadd.f32 %v10388_v56, %v18134_v55  ;;  %v8839_v26 = vadd.f32 %v17003_v40, %v16999_v11 }
0x1044   : > { %v8760_v15 = vpop.f32.mrb[156].mxu0  ;;  %8840 = vadd.xlane.f32.xlu0 %v8839_v26  ;;  %v8842_v5 = vadd.f32 %v17010_v54, %v17007_v58 }
0x1045   : > { %v10389_v57 = vadd.f32 %v8760_v15, %v16871_v35  ;;  %v8762_v4 = vpop.f32.mrb[157].mxu0 }
0x1046   : > { %v10390_v22 = vadd.f32 %v8762_v4, %v16874_v36  ;;  %v8764_v37 = vpop.f32.mrb[158].mxu0  ;;  %8843 = vadd.xlane.f32.xlu1 %v8842_v5 }
0x1047   : > { %v17019_v42 = vadd.f32 %v10389_v57, %v18135_v46  ;;  %v10391_v29 = vadd.f32 %v8764_v37, %v16871_v35  ;;  %v8766_v60 = vpop.f32.mrb[159].mxu0  ;;  %v11186_v35 = vld [vmem:[%s18139_s22 + $0x40] sm:$0xff]  }
0x1048   : > { %v17023_v12 = vadd.f32 %v10390_v22, %v18136_v39  ;;  %v10392_v28 = vadd.f32 %v8766_v60, %v16874_v36  ;;  %v11187_v36 = vld [vmem:[%s18139_s22] sm:$0xff]   ;;  %10297 = vmatprep.subr.bf16.mxu1 %v11186_v35 }
0x1049   : > { %v17027_v8 = vadd.f32 %v10391_v29, %v18137_v43  ;;  %10298 = vmatpush3.bf16.msra.mxu1 %v11187_v36 }
0x104a   : > { %v17030_v62 = vadd.f32 %v10392_v28, %v18138_v2  ;;  %v8845_v41 = vadd.f32 %v17023_v12, %v17019_v42  ;;  %10299 = vmatprep.subr.bf16.mxu1 %v11188_v23 }
0x104c   : > { %8846 = vadd.xlane.f32.xlu0 %v8845_v41  ;;  %v8848_v48 = vadd.f32 %v17030_v62, %v17027_v8 }
0x104d   : > { %10300 = vmatpush3.bf16.msra.mxu1 %v11189_v59 }
0x104e   : > { %8849 = vadd.xlane.f32.xlu1 %v8848_v48  ;;  %10301 = vmatprep.subr.bf16.mxu1 %v11190_v27 }
0x1051   : > { %10302 = vmatpush3.bf16.msra.mxu1 %v11191_v13 }
0x1052   : > { %10303 = vmatprep.subr.bf16.mxu1 %v11192_v21 }
0x1055   : > { %10304 = vmatpush3.bf16.msra.mxu1 %v11193_v9 }
0x1056   : > { %10305 = vmatprep.subr.bf16.mxu1 %v11194_v6 }
0x1059   : > { %10306 = vmatpush3.bf16.msra.mxu1 %v11195_v16 }
0x10a1   : > { %v8805_v32 = vpop.xlane.xlu0 %8804 }
0x10a2   : > { %v8851_v56 = vmul.f32 0.00390625, %v8805_v32 }
0x10a3   : > { %v8808_v61 = vpop.xlane.xlu1 %8807 }
0x10a4   : > { %v17067_v55 = vsub.f32 %v16879_v51, %v8851_v56  ;;  %v17070_v26 = vsub.f32 %v16883_v0, %v8851_v56  ;;  %v8852_v15 = vmul.f32 0.00390625, %v8808_v61 }
0x10a6   : > { %v8899_v5 = vmul.f32 %v17067_v55, %v17067_v55  ;;  %v8900_v57 = vmul.f32 %v17070_v26, %v17070_v26  ;;  %v17077_v4 = vsub.f32 %v16887_v33, %v8852_v15  ;;  %v17080_v22 = vsub.f32 %v16890_v38, %v8852_v15 }
0x10a8   : > { %v8901_v51 = vmul.f32 %v17077_v4, %v17077_v4  ;;  %v8902_v0 = vmul.f32 %v17080_v22, %v17080_v22  ;;  %v8931_v37 = vadd.f32 %v8900_v57, %v8899_v5 }
0x10a9   : > { %v8811_v46 = vpop.xlane.xlu0 %8810 }
0x10aa   : > { %v8853_v29 = vmul.f32 0.00390625, %v8811_v46  ;;  %8932 = vadd.xlane.f32.xlu0 %v8931_v37  ;;  %v8934_v60 = vadd.f32 %v8902_v0, %v8901_v51 }
0x10ab   : > { %v8814_v39 = vpop.xlane.xlu1 %8813 }
0x10ac   : > { %v17087_v28 = vsub.f32 %v16899_v14, %v8853_v29  ;;  %v17090_v33 = vsub.f32 %v16903_v17, %v8853_v29  ;;  %v8854_v38 = vmul.f32 0.00390625, %v8814_v39  ;;  %8935 = vadd.xlane.f32.xlu1 %v8934_v60 }
0x10ae   : > { %v8903_v43 = vmul.f32 %v17087_v28, %v17087_v28  ;;  %v8904_v2 = vmul.f32 %v17090_v33, %v17090_v33  ;;  %v17097_v41 = vsub.f32 %v16907_v7, %v8854_v38  ;;  %v17100_v48 = vsub.f32 %v16910_v25, %v8854_v38 }
0x10b0   : > { %v8905_v14 = vmul.f32 %v17097_v41, %v17097_v41  ;;  %v8906_v17 = vmul.f32 %v17100_v48, %v17100_v48  ;;  %v8937_v35 = vadd.f32 %v8904_v2, %v8903_v43 }
0x10b1   : > { %v8817_v36 = vpop.xlane.xlu0 %8816 }
0x10b2   : > { %v8855_v23 = vmul.f32 0.00390625, %v8817_v36  ;;  %8938 = vadd.xlane.f32.xlu0 %v8937_v35  ;;  %v8940_v59 = vadd.f32 %v8906_v17, %v8905_v14 }
0x10b3   : > { %v8820_v27 = vpop.xlane.xlu1 %8819 }
0x10b4   : > { %v17107_v13 = vsub.f32 %v16919_v18, %v8855_v23  ;;  %v17110_v7 = vsub.f32 %v16923_v49, %v8855_v23  ;;  %v8856_v25 = vmul.f32 0.00390625, %v8820_v27  ;;  %8941 = vadd.xlane.f32.xlu1 %v8940_v59  ;;  %v11196_v27 = vld [vmem:[%s18139_s22 + $0x68] sm:$0xff]  }
0x10b5   : > { %10307 = vmatprep.subr.bf16.mxu1 %v11196_v27 }
0x10b6   : > { %v8907_v21 = vmul.f32 %v17107_v13, %v17107_v13  ;;  %v8908_v9 = vmul.f32 %v17110_v7, %v17110_v7  ;;  %v17117_v6 = vsub.f32 %v16927_v53, %v8856_v25  ;;  %v17120_v16 = vsub.f32 %v16930_v34, %v8856_v25 }
0x10b8   : > { %v8909_v18 = vmul.f32 %v17117_v6, %v17117_v6  ;;  %v8910_v49 = vmul.f32 %v17120_v16, %v17120_v16  ;;  %v8943_v32 = vadd.f32 %v8908_v9, %v8907_v21  ;;  %v11198_v9 = vld [vmem:[%s18139_s22 + $0x70] sm:$0xff]  }
0x10b9   : > { %v8823_v56 = vpop.xlane.xlu0 %8822 }
0x10ba   : > { %v8857_v61 = vmul.f32 0.00390625, %v8823_v56  ;;  %8944 = vadd.xlane.f32.xlu0 %v8943_v32  ;;  %v8946_v15 = vadd.f32 %v8910_v49, %v8909_v18  ;;  %v11199_v56 = vld [vmem:[%s18139_s22 + $0x30] sm:$0xff]  }
0x10bb   : > { %v8826_v5 = vpop.xlane.xlu1 %8825 }
0x10bc   : > { %v17127_v57 = vsub.f32 %v16939_v3, %v8857_v61  ;;  %v17130_v53 = vsub.f32 %v16943_v45, %v8857_v61  ;;  %v8858_v34 = vmul.f32 0.00390625, %v8826_v5  ;;  %8947 = vadd.xlane.f32.xlu1 %v8946_v15 }
0x10be   : > { %v8911_v51 = vmul.f32 %v17127_v57, %v17127_v57  ;;  %v8912_v0 = vmul.f32 %v17130_v53, %v17130_v53  ;;  %v17137_v37 = vsub.f32 %v16947_v30, %v8858_v34  ;;  %v17140_v46 = vsub.f32 %v16950_v24, %v8858_v34 }
0x10c0   : > { %v8913_v3 = vmul.f32 %v17137_v37, %v17137_v37  ;;  %v8914_v45 = vmul.f32 %v17140_v46, %v17140_v46  ;;  %v8949_v29 = vadd.f32 %v8912_v0, %v8911_v51 }
0x10c1   : > { %v8829_v60 = vpop.xlane.xlu0 %8828 }
0x10c2   : > { %v8859_v39 = vmul.f32 0.00390625, %v8829_v60  ;;  %8950 = vadd.xlane.f32.xlu0 %v8949_v29  ;;  %v8952_v38 = vadd.f32 %v8914_v45, %v8913_v3 }
0x10c3   : > { %v8832_v43 = vpop.xlane.xlu1 %8831 }
0x10c4   : > { %v17147_v2 = vsub.f32 %v16959_v44, %v8859_v39  ;;  %v17150_v30 = vsub.f32 %v16963_v50, %v8859_v39  ;;  %v8860_v24 = vmul.f32 0.00390625, %v8832_v43  ;;  %8953 = vadd.xlane.f32.xlu1 %v8952_v38 }
0x10c6   : > { %v8915_v14 = vmul.f32 %v17147_v2, %v17147_v2  ;;  %v8916_v17 = vmul.f32 %v17150_v30, %v17150_v30  ;;  %v17157_v35 = vsub.f32 %v16967_v1, %v8860_v24  ;;  %v17160_v36 = vsub.f32 %v16970_v63, %v8860_v24  ;;  %v11197_v63 = vld [vmem:[%s18139_s22 + $0x28] sm:$0xff]  }
0x10c7   : > { %10308 = vmatpush3.bf16.msra.mxu1 %v11197_v63 }
0x10c8   : > { %v8917_v44 = vmul.f32 %v17157_v35, %v17157_v35  ;;  %v8918_v50 = vmul.f32 %v17160_v36, %v17160_v36  ;;  %v8955_v23 = vadd.f32 %v8916_v17, %v8915_v14  ;;  %10309 = vmatprep.subr.bf16.mxu1 %v11198_v9 }
0x10c9   : > { %v8835_v59 = vpop.xlane.xlu0 %8834 }
0x10ca   : > { %v8861_v25 = vmul.f32 0.00390625, %v8835_v59  ;;  %8956 = vadd.xlane.f32.xlu0 %v8955_v23  ;;  %v8958_v21 = vadd.f32 %v8918_v50, %v8917_v44 }
0x10cb   : > { %v8838_v1 = vpop.xlane.xlu1 %8837  ;;  %10310 = vmatpush3.bf16.msra.mxu1 %v11199_v56 }
0x10cc   : > { %v17176_v18 = vsub.f32 %v16979_v20, %v8861_v25  ;;  %v17179_v49 = vsub.f32 %v16983_v52, %v8861_v25  ;;  %v8862_v32 = vmul.f32 0.00390625, %v8838_v1  ;;  %8959 = vadd.xlane.f32.xlu1 %v8958_v21  ;;  %v11200_v52 = vld [vmem:[%s18139_s22 + $0x78] sm:$0xff]  }
0x10cd   : > { %10311 = vmatprep.subr.bf16.mxu1 %v11200_v52 }
0x10ce   : > { %v8919_v61 = vmul.f32 %v17176_v18, %v17176_v18  ;;  %v8920_v15 = vmul.f32 %v17179_v49, %v17179_v49  ;;  %v17189_v5 = vsub.f32 %v16987_v10, %v8862_v32  ;;  %v17192_v20 = vsub.f32 %v16990_v47, %v8862_v32  ;;  %v11201_v10 = vld [vmem:[%s18139_s22 + $0x38] sm:$0xff]  }
0x10cf   : > { %10312 = vmatpush3.bf16.msra.mxu1 %v11201_v10  ;;  %v8801_v10 = vld [vmem:[%s18140_s2] sm:$0x3] }
0x10d0   : > { %v8921_v34 = vmul.f32 %v17189_v5, %v17189_v5  ;;  %v8922_v51 = vmul.f32 %v17192_v20, %v17192_v20  ;;  %v8961_v0 = vadd.f32 %v8920_v15, %v8919_v61 }
0x10d1   : > { %v8841_v3 = vpop.xlane.xlu0 %8840 }
0x10d2   : > { %v8863_v47 = vmul.f32 0.00390625, %v8841_v3  ;;  %8962 = vadd.xlane.f32.xlu0 %v8961_v0  ;;  %v8964_v45 = vadd.f32 %v8922_v51, %v8921_v34 }
0x10d3   : > { %v8844_v29 = vpop.xlane.xlu1 %8843 }
0x10d4   : > { %v17205_v60 = vsub.f32 %v16999_v11, %v8863_v47  ;;  %v17208_v39 = vsub.f32 %v17003_v40, %v8863_v47  ;;  %v8864_v38 = vmul.f32 0.00390625, %v8844_v29  ;;  %8965 = vadd.xlane.f32.xlu1 %v8964_v45 }
0x10d6   : > { %v8923_v43 = vmul.f32 %v17205_v60, %v17205_v60  ;;  %v8924_v24 = vmul.f32 %v17208_v39, %v17208_v39  ;;  %v17215_v14 = vsub.f32 %v17007_v58, %v8864_v38  ;;  %v17218_v17 = vsub.f32 %v17010_v54, %v8864_v38 }
0x10d7   : > { %v17248_v38 = vrot.slane %v8801_v10, %v18105_v31 }
0x10d8   : > { %v8925_v11 = vmul.f32 %v17215_v14, %v17215_v14  ;;  %v8926_v40 = vmul.f32 %v17218_v17, %v17218_v17  ;;  %v8967_v44 = vadd.f32 %v8924_v24, %v8923_v43  ;;  %v8802_v43 = vld [vmem:[%s18141_s10] sm:$0x3]  ;;  %v17254_v24 = vrot.slane %v8801_v10, %v18106_v19 }
0x10d9   : > { %v8847_v50 = vpop.xlane.xlu0 %8846 }
0x10da   : > { %v8865_v23 = vmul.f32 0.00390625, %v8847_v50  ;;  %8968 = vadd.xlane.f32.xlu0 %v8967_v44  ;;  %v8970_v59 = vadd.f32 %v8926_v40, %v8925_v11 }
0x10db   : > { %v8850_v27 = vpop.xlane.xlu1 %8849 }
0x10dc   : > { %v17225_v25 = vsub.f32 %v17019_v42, %v8865_v23  ;;  %v17228_v58 = vsub.f32 %v17023_v12, %v8865_v23  ;;  %v8866_v54 = vmul.f32 0.00390625, %v8850_v27  ;;  %8971 = vadd.xlane.f32.xlu1 %v8970_v59  ;;  %v17259_v27 = vrot.slane %v8802_v43, %v18105_v31 }
0x10de   : > { %v8927_v21 = vmul.f32 %v17225_v25, %v17225_v25  ;;  %v8928_v1 = vmul.f32 %v17228_v58, %v17228_v58  ;;  %v17235_v63 = vsub.f32 %v17027_v8, %v8866_v54  ;;  %v17238_v9 = vsub.f32 %v17030_v62, %v8866_v54 }
0x10df   : > { %v17262_v54 = vrot.slane %v8802_v43, %v18106_v19 }
0x10e0   : > { %v8929_v42 = vmul.f32 %v17235_v63, %v17235_v63  ;;  %v8930_v12 = vmul.f32 %v17238_v9, %v17238_v9  ;;  %v8973_v32 = vadd.f32 %v8928_v1, %v8927_v21 }
0x10e2   : > { %8974 = vadd.xlane.f32.xlu0 %v8973_v32  ;;  %v8976_v56 = vadd.f32 %v8930_v12, %v8929_v42 }
0x10e4   : > { %8977 = vadd.xlane.f32.xlu1 %v8976_v56 }
0x1137   : > { %v8933_v61 = vpop.xlane.xlu0 %8932 }
0x1138   : > { %v8979_v15 = vmul.f32 0.00390625, %v8933_v61 }
0x1139   : > { %v8936_v52 = vpop.xlane.xlu1 %8935 }
0x113a   : > { %v8995_v34 = vadd.f32 1e-05, %v8979_v15  ;;  %v8980_v51 = vmul.f32 0.00390625, %v8936_v52 }
0x113c   : > { %11714 = vrsqrt.f32 %v8995_v34  ;;  %v8996_v8 = vadd.f32 1e-05, %v8980_v51 }
0x113e   : > { %11716 = vrsqrt.f32 %v8996_v8 }
0x113f   : > { %v8939_v62 = vpop.xlane.xlu0 %8938 }
0x1140   : > { %v8981_v0 = vmul.f32 0.00390625, %v8939_v62 }
0x1141   : > { %v8942_v3 = vpop.xlane.xlu1 %8941 }
0x1142   : > { %v8997_v47 = vadd.f32 1e-05, %v8981_v0  ;;  %v8982_v45 = vmul.f32 0.00390625, %v8942_v3 }
0x1144   : > { %11718 = vrsqrt.f32 %v8997_v47  ;;  %v8998_v29 = vadd.f32 1e-05, %v8982_v45 }
0x1146   : > { %v11715_v11 = vpop.eup %11714  ;;  %11720 = vrsqrt.f32 %v8998_v29 }
0x1147   : > { %v9027_v40 = vmul.f32 %v11715_v11, %v17067_v55  ;;  %v8945_v44 = vpop.xlane.xlu0 %8944  ;;  %v9028_v50 = vmul.f32 %v11715_v11, %v17070_v26 }
0x1148   : > { %v11717_v23 = vpop.eup %11716  ;;  %v8983_v59 = vmul.f32 0.00390625, %v8945_v44 }
0x1149   : > { %v9070_v21 = vmul.f32 %v17248_v38, %v9027_v40  ;;  %v9029_v1 = vmul.f32 %v11717_v23, %v17077_v4  ;;  %v8948_v42 = vpop.xlane.xlu1 %8947  ;;  %v9030_v12 = vmul.f32 %v11717_v23, %v17080_v22  ;;  %v9071_v55 = vmul.f32 %v17254_v24, %v9028_v50 }
0x114a   : > { %v8999_v32 = vadd.f32 1e-05, %v8983_v59  ;;  %v8984_v56 = vmul.f32 0.00390625, %v8948_v42 }
0x114b   : > { %v9072_v26 = vmul.f32 %v17248_v38, %v9029_v1  ;;  %v9073_v61 = vmul.f32 %v17254_v24, %v9030_v12  ;;  %v9114_v19 = vadd.f32 %v17262_v54, %v9071_v55  ;;  %v9113_v52 = vadd.f32 %v17259_v27, %v9070_v21 }
0x114c   : > { %11722 = vrsqrt.f32 %v8999_v32  ;;  %v9000_v31 = vadd.f32 1e-05, %v8984_v56 }
0x114d   : > { %v9116_v15 = vadd.f32 %v17262_v54, %v9073_v61  ;;  %v9115_v4 = vadd.f32 %v17259_v27, %v9072_v26 }
0x114e   : > { %v11719_v34 = vpop.eup %11718  ;;  %11724 = vrsqrt.f32 %v9000_v31 }
0x114f   : > { %v8951_v22 = vpop.xlane.xlu0 %8950  ;;  %v9146_v51 = vpack.c.bf16 %v9116_v15, %v9114_v19  ;;  %v9145_v8 = vpack.c.bf16 %v9115_v4, %v9113_v52  ;;  %v9032_v62 = vmul.f32 %v11719_v34, %v17090_v33  ;;  %v9031_v0 = vmul.f32 %v11719_v34, %v17087_v28 }
0x1150   : > { %v11721_v3 = vpop.eup %11720  ;;  %v8985_v10 = vmul.f32 0.00390625, %v8951_v22 }
0x1151   : > { %v8954_v47 = vpop.xlane.xlu1 %8953  ;;  %9328 = vmatprep.mubr.bf16.mxu1 %v9146_v51  ;;  %v9034_v45 = vmul.f32 %v11721_v3, %v17100_v48  ;;  %v9075_v29 = vmul.f32 %v17254_v24, %v9032_v62  ;;  %v9033_v43 = vmul.f32 %v11721_v3, %v17097_v41  ;;  %v9074_v11 = vmul.f32 %v17248_v38, %v9031_v0 }
0x1152   : > { %v9001_v40 = vadd.f32 1e-05, %v8985_v10  ;;  %v8986_v44 = vmul.f32 0.00390625, %v8954_v47  ;;  %9329 = vmatmul.mubr.bf16.vlgmr.msra.gmra.mrb[224].mxu1 %v9145_v8 }
0x1153   : > { %v9077_v50 = vmul.f32 %v17254_v24, %v9034_v45  ;;  %v9076_v33 = vmul.f32 %v17248_v38, %v9033_v43  ;;  %v9118_v23 = vadd.f32 %v17262_v54, %v9075_v29  ;;  %v9117_v48 = vadd.f32 %v17259_v27, %v9074_v11 }
0x1154   : > { %11726 = vrsqrt.f32 %v9001_v40  ;;  %v9002_v28 = vadd.f32 1e-05, %v8986_v44 }
0x1155   : > { %v9120_v59 = vadd.f32 %v17262_v54, %v9077_v50  ;;  %v9119_v21 = vadd.f32 %v17259_v27, %v9076_v33 }
0x1156   : > { %v11723_v41 = vpop.eup %11722  ;;  %11728 = vrsqrt.f32 %v9002_v28 }
0x1157   : > { %v8957_v1 = vpop.xlane.xlu0 %8956  ;;  %v9148_v42 = vpack.c.bf16 %v9120_v59, %v9118_v23  ;;  %v9147_v12 = vpack.c.bf16 %v9119_v21, %v9117_v48  ;;  %v9036_v55 = vmul.f32 %v11723_v41, %v17110_v7  ;;  %v9035_v32 = vmul.f32 %v11723_v41, %v17107_v13 }
0x1158   : > { %v11725_v56 = vpop.eup %11724  ;;  %v8987_v26 = vmul.f32 0.00390625, %v8957_v1 }
0x1159   : > { %v8960_v61 = vpop.xlane.xlu1 %8959  ;;  %9336 = vmatprep.mubr.bf16.mxu1 %v9148_v42  ;;  %v9038_v31 = vmul.f32 %v11725_v56, %v17120_v16  ;;  %v9079_v19 = vmul.f32 %v17254_v24, %v9036_v55  ;;  %v9037_v15 = vmul.f32 %v11725_v56, %v17117_v6  ;;  %v9078_v52 = vmul.f32 %v17248_v38, %v9035_v32 }
0x115a   : > { %v9003_v4 = vadd.f32 1e-05, %v8987_v26  ;;  %v8988_v34 = vmul.f32 0.00390625, %v8960_v61  ;;  %9337 = vmatmul.mubr.bf16.gmra.mrb[228].mxu1 %v9147_v12 }
0x115b   : > { %v9081_v22 = vmul.f32 %v17254_v24, %v9038_v31  ;;  %v9080_v7 = vmul.f32 %v17248_v38, %v9037_v15  ;;  %v9122_v51 = vadd.f32 %v17262_v54, %v9079_v19  ;;  %v9121_v16 = vadd.f32 %v17259_v27, %v9078_v52 }
0x115c   : > { %11730 = vrsqrt.f32 %v9003_v4  ;;  %v9004_v13 = vadd.f32 1e-05, %v8988_v34 }
0x115d   : > { %v9124_v8 = vadd.f32 %v17262_v54, %v9081_v22  ;;  %v9123_v62 = vadd.f32 %v17259_v27, %v9080_v7 }
0x115e   : > { %v11727_v6 = vpop.eup %11726  ;;  %11732 = vrsqrt.f32 %v9004_v13 }
0x115f   : > { %v8963_v0 = vpop.xlane.xlu0 %8962  ;;  %v9150_v3 = vpack.c.bf16 %v9124_v8, %v9122_v51  ;;  %v9149_v10 = vpack.c.bf16 %v9123_v62, %v9121_v16  ;;  %v9040_v47 = vmul.f32 %v11727_v6, %v17130_v53  ;;  %v9039_v45 = vmul.f32 %v11727_v6, %v17127_v57 }
0x1160   : > { %v11729_v29 = vpop.eup %11728  ;;  %v8989_v43 = vmul.f32 0.00390625, %v8963_v0 }
0x1161   : > { %v8966_v11 = vpop.xlane.xlu1 %8965  ;;  %9344 = vmatprep.mubr.bf16.mxu1 %v9150_v3  ;;  %v9042_v40 = vmul.f32 %v11729_v29, %v17140_v46  ;;  %v9083_v44 = vmul.f32 %v17254_v24, %v9040_v47  ;;  %v9041_v50 = vmul.f32 %v11729_v29, %v17137_v37  ;;  %v9082_v33 = vmul.f32 %v17248_v38, %v9039_v45 }
0x1162   : > { %v9005_v28 = vadd.f32 1e-05, %v8989_v43  ;;  %v8990_v23 = vmul.f32 0.00390625, %v8966_v11  ;;  %9345 = vmatmul.mubr.bf16.gmra.mrb[232].mxu1 %v9149_v10 }
0x1163   : > { %v9085_v59 = vmul.f32 %v17254_v24, %v9042_v40  ;;  %v9084_v53 = vmul.f32 %v17248_v38, %v9041_v50  ;;  %v9126_v48 = vadd.f32 %v17262_v54, %v9083_v44  ;;  %v9125_v46 = vadd.f32 %v17259_v27, %v9082_v33 }
0x1164   : > { %11734 = vrsqrt.f32 %v9005_v28  ;;  %v9006_v57 = vadd.f32 1e-05, %v8990_v23 }
0x1165   : > { %v9128_v21 = vadd.f32 %v17262_v54, %v9085_v59  ;;  %v9127_v41 = vadd.f32 %v17259_v27, %v9084_v53 }
0x1166   : > { %v11731_v37 = vpop.eup %11730  ;;  %11736 = vrsqrt.f32 %v9006_v57 }
0x1167   : > { %v8969_v1 = vpop.xlane.xlu0 %8968  ;;  %v9152_v42 = vpack.c.bf16 %v9128_v21, %v9126_v48  ;;  %v9151_v12 = vpack.c.bf16 %v9127_v41, %v9125_v46  ;;  %v9044_v55 = vmul.f32 %v11731_v37, %v17150_v30  ;;  %v9043_v32 = vmul.f32 %v11731_v37, %v17147_v2 }
0x1168   : > { %v11733_v56 = vpop.eup %11732  ;;  %v8991_v26 = vmul.f32 0.00390625, %v8969_v1 }
0x1169   : > { %v8972_v61 = vpop.xlane.xlu1 %8971  ;;  %9352 = vmatprep.mubr.bf16.mxu1 %v9152_v42  ;;  %v9046_v31 = vmul.f32 %v11733_v56, %v17160_v36  ;;  %v9087_v19 = vmul.f32 %v17254_v24, %v9044_v55  ;;  %v9045_v15 = vmul.f32 %v11733_v56, %v17157_v35  ;;  %v9086_v52 = vmul.f32 %v17248_v38, %v9043_v32 }
0x116a   : > { %v9007_v4 = vadd.f32 1e-05, %v8991_v26  ;;  %v8992_v34 = vmul.f32 0.00390625, %v8972_v61  ;;  %9353 = vmatmul.mubr.bf16.gmra.mrb[236].mxu1 %v9151_v12 }
0x116b   : > { %v9089_v22 = vmul.f32 %v17254_v24, %v9046_v31  ;;  %v9088_v30 = vmul.f32 %v17248_v38, %v9045_v15  ;;  %v9130_v7 = vadd.f32 %v17262_v54, %v9087_v19  ;;  %v9129_v36 = vadd.f32 %v17259_v27, %v9086_v52 }
0x116c   : > { %11738 = vrsqrt.f32 %v9007_v4  ;;  %v9008_v2 = vadd.f32 1e-05, %v8992_v34 }
0x116d   : > { %v9132_v13 = vadd.f32 %v17262_v54, %v9089_v22  ;;  %v9131_v51 = vadd.f32 %v17259_v27, %v9088_v30 }
0x116e   : > { %v11735_v35 = vpop.eup %11734  ;;  %11740 = vrsqrt.f32 %v9008_v2 }
0x116f   : > { %v8975_v8 = vpop.xlane.xlu0 %8974  ;;  %v9154_v16 = vpack.c.bf16 %v9132_v13, %v9130_v7  ;;  %v9153_v62 = vpack.c.bf16 %v9131_v51, %v9129_v36  ;;  %v9048_v6 = vmul.f32 %v11735_v35, %v17179_v49  ;;  %v9047_v0 = vmul.f32 %v11735_v35, %v17176_v18 }
0x1170   : > { %v11737_v3 = vpop.eup %11736  ;;  %v8993_v10 = vmul.f32 0.00390625, %v8975_v8 }
0x1171   : > { %v8978_v47 = vpop.xlane.xlu1 %8977  ;;  %9360 = vmatprep.mubr.bf16.mxu1 %v9154_v16  ;;  %v9050_v45 = vmul.f32 %v11737_v3, %v17192_v20  ;;  %v9091_v29 = vmul.f32 %v17254_v24, %v9048_v6  ;;  %v9049_v43 = vmul.f32 %v11737_v3, %v17189_v5  ;;  %v9090_v11 = vmul.f32 %v17248_v38, %v9047_v0 }
0x1172   : > { %v9009_v40 = vadd.f32 1e-05, %v8993_v10  ;;  %v8994_v44 = vmul.f32 0.00390625, %v8978_v47  ;;  %9361 = vmatmul.mubr.bf16.gmra.mrb[240].mxu1 %v9153_v62 }
0x1173   : > { %v9093_v50 = vmul.f32 %v17254_v24, %v9050_v45  ;;  %v9092_v49 = vmul.f32 %v17248_v38, %v9049_v43  ;;  %v9134_v33 = vadd.f32 %v17262_v54, %v9091_v29  ;;  %v9133_v20 = vadd.f32 %v17259_v27, %v9090_v11 }
0x1174   : > { %11742 = vrsqrt.f32 %v9009_v40  ;;  %v9010_v18 = vadd.f32 1e-05, %v8994_v44 }
0x1175   : > { %v9136_v28 = vadd.f32 %v17262_v54, %v9093_v50  ;;  %v9135_v23 = vadd.f32 %v17259_v27, %v9092_v49 }
0x1176   : > { %v11739_v5 = vpop.eup %11738  ;;  %11744 = vrsqrt.f32 %v9010_v18 }
0x1177   : > { %v9156_v59 = vpack.c.bf16 %v9136_v28, %v9134_v33  ;;  %v9155_v53 = vpack.c.bf16 %v9135_v23, %v9133_v20  ;;  %v9052_v57 = vmul.f32 %v11739_v5, %v17208_v39  ;;  %v9051_v48 = vmul.f32 %v11739_v5, %v17205_v60 }
0x1178   : > { %v11741_v21 = vpop.eup %11740 }
0x1179   : > { %9368 = vmatprep.mubr.bf16.mxu1 %v9156_v59  ;;  %v9054_v46 = vmul.f32 %v11741_v21, %v17218_v17  ;;  %v9095_v41 = vmul.f32 %v17254_v24, %v9052_v57  ;;  %v9053_v37 = vmul.f32 %v11741_v21, %v17215_v14  ;;  %v9094_v1 = vmul.f32 %v17248_v38, %v9051_v48 }
0x117a   : > { %9369 = vmatmul.mubr.bf16.gmra.mrb[244].mxu1 %v9155_v53 }
0x117b   : > { %v9097_v42 = vmul.f32 %v17254_v24, %v9054_v46  ;;  %v9096_v12 = vmul.f32 %v17248_v38, %v9053_v37  ;;  %v9138_v55 = vadd.f32 %v17262_v54, %v9095_v41  ;;  %v9137_v60 = vadd.f32 %v17259_v27, %v9094_v1 }
0x117d   : > { %v9140_v39 = vadd.f32 %v17262_v54, %v9097_v42  ;;  %v9139_v32 = vadd.f32 %v17259_v27, %v9096_v12 }
0x117e   : > { %v11743_v17 = vpop.eup %11742 }
0x117f   : > { %v9158_v56 = vpack.c.bf16 %v9140_v39, %v9138_v55  ;;  %v9157_v26 = vpack.c.bf16 %v9139_v32, %v9137_v60  ;;  %v9056_v14 = vmul.f32 %v11743_v17, %v17228_v58  ;;  %v9055_v61 = vmul.f32 %v11743_v17, %v17225_v25 }
0x1180   : > { %v11745_v31 = vpop.eup %11744 }
0x1181   : > { %9376 = vmatprep.mubr.bf16.mxu1 %v9158_v56  ;;  %v9058_v19 = vmul.f32 %v11745_v31, %v17238_v9  ;;  %v9099_v15 = vmul.f32 %v17254_v24, %v9056_v14  ;;  %v9057_v52 = vmul.f32 %v11745_v31, %v17235_v63  ;;  %v9098_v4 = vmul.f32 %v17248_v38, %v9055_v61 }
0x1182   : > { %9377 = vmatmul.mubr.bf16.gmra.mrb[248].mxu1 %v9157_v26 }
0x1183   : > { %v9101_v34 = vmul.f32 %v17254_v24, %v9058_v19  ;;  %v9100_v22 = vmul.f32 %v17248_v38, %v9057_v52  ;;  %v9142_v30 = vadd.f32 %v17262_v54, %v9099_v15  ;;  %v9141_v25 = vadd.f32 %v17259_v27, %v9098_v4  ;;  %v17361_v24 = vld [vmem:[%s18142_s23] ss:$0 sm:$0xff] }
0x1185   : > { %v9144_v58 = vadd.f32 %v17262_v54, %v9101_v34  ;;  %v9143_v9 = vadd.f32 %v17259_v27, %v9100_v22 }
0x1187   : > { %v9160_v2 = vpack.c.bf16 %v9144_v58, %v9142_v30  ;;  %v9159_v7 = vpack.c.bf16 %v9143_v9, %v9141_v25 }
0x1189   : > { %9384 = vmatprep.mubr.bf16.mxu1 %v9160_v2 }
0x118a   : > { %9385 = vmatmul.mubr.bf16.gmra.mrb[252].mxu1 %v9159_v7 }
0x1225   : > { %v10313_v63 = vpop.f32.mrb[224].mxu1 }
0x1226   : > { %v10314_v38 = vpop.f32.mrb[225].mxu1 }
0x1227   : > { %v10315_v13 = vadd.f32 %v10314_v38, %v10313_v63  ;;  %v10316_v54 = vpop.f32.mrb[226].mxu1 }
0x1228   : > { %v10317_v36 = vpop.f32.mrb[227].mxu1 }
0x1229   : > { %v9331_v27 = vadd.f32 %v10315_v13, %v17361_v24  ;;  %v10318_v51 = vadd.f32 %v10317_v36, %v10316_v54 }
0x122b   : > { %9394 = vst.msk [vmem:[%s12814_s27] sm:$0xff] %vm9393_vm3, %v9331_v27  ;;  %v9334_v35 = vadd.f32 %v10318_v51, %v17361_v24 }
0x122d   : > { %9395 = vst.msk [vmem:[%s12814_s27 + $0x8] sm:$0xff] %vm9393_vm3, %v9334_v35  ;;  %v10319_v8 = vpop.f32.mrb[228].mxu1 }
0x122e   : > { %v10320_v16 = vpop.f32.mrb[229].mxu1 }
0x122f   : > { %v10321_v62 = vadd.f32 %v10320_v16, %v10319_v8  ;;  %v10322_v6 = vpop.f32.mrb[230].mxu1 }
0x1230   : > { %v10323_v0 = vpop.f32.mrb[231].mxu1 }
0x1231   : > { %v9339_v3 = vadd.f32 %v10321_v62, %v17361_v24  ;;  %v10324_v10 = vadd.f32 %v10323_v0, %v10322_v6 }
0x1233   : > { %9396 = vst.msk [vmem:[%s12814_s27 + $0x10] sm:$0xff] %vm9393_vm3, %v9339_v3  ;;  %v9342_v47 = vadd.f32 %v10324_v10, %v17361_v24 }
0x1235   : > { %9397 = vst.msk [vmem:[%s12814_s27 + $0x18] sm:$0xff] %vm9393_vm3, %v9342_v47  ;;  %v10325_v45 = vpop.f32.mrb[232].mxu1 }
0x1236   : > { %v10326_v29 = vpop.f32.mrb[233].mxu1 }
0x1237   : > { %v10327_v43 = vadd.f32 %v10326_v29, %v10325_v45  ;;  %v10328_v11 = vpop.f32.mrb[234].mxu1 }
0x1238   : > { %v10329_v40 = vpop.f32.mrb[235].mxu1 }
0x1239   : > { %v9347_v44 = vadd.f32 %v10327_v43, %v17361_v24  ;;  %v10330_v50 = vadd.f32 %v10329_v40, %v10328_v11 }
0x123b   : > { %9398 = vst.msk [vmem:[%s12814_s27 + $0x20] sm:$0xff] %vm9393_vm3, %v9347_v44  ;;  %v9350_v49 = vadd.f32 %v10330_v50, %v17361_v24 }
0x123d   : > { %9399 = vst.msk [vmem:[%s12814_s27 + $0x28] sm:$0xff] %vm9393_vm3, %v9350_v49  ;;  %v10331_v18 = vpop.f32.mrb[236].mxu1 }
0x123e   : > { %v10332_v33 = vpop.f32.mrb[237].mxu1 }
0x123f   : > { %v10333_v28 = vadd.f32 %v10332_v33, %v10331_v18  ;;  %v10334_v20 = vpop.f32.mrb[238].mxu1 }
0x1240   : > { %v10335_v23 = vpop.f32.mrb[239].mxu1 }
0x1241   : > { %v9355_v5 = vadd.f32 %v10333_v28, %v17361_v24  ;;  %v10336_v59 = vadd.f32 %v10335_v23, %v10334_v20 }
0x1243   : > { %9400 = vst.msk [vmem:[%s12814_s27 + $0x30] sm:$0xff] %vm9393_vm3, %v9355_v5  ;;  %v9358_v53 = vadd.f32 %v10336_v59, %v17361_v24 }
0x1245   : > { %9401 = vst.msk [vmem:[%s12814_s27 + $0x38] sm:$0xff] %vm9393_vm3, %v9358_v53  ;;  %v10337_v57 = vpop.f32.mrb[240].mxu1 }
0x1246   : > { %v10338_v48 = vpop.f32.mrb[241].mxu1 }
0x1247   : > { %v10339_v21 = vadd.f32 %v10338_v48, %v10337_v57  ;;  %v10340_v46 = vpop.f32.mrb[242].mxu1 }
0x1248   : > { %v10341_v41 = vpop.f32.mrb[243].mxu1 }
0x1249   : > { %v9363_v37 = vadd.f32 %v10339_v21, %v17361_v24  ;;  %v10342_v1 = vadd.f32 %v10341_v41, %v10340_v46 }
0x124b   : > { %9402 = vst.msk [vmem:[%s12814_s27 + $0x40] sm:$0xff] %vm9393_vm3, %v9363_v37  ;;  %v9366_v42 = vadd.f32 %v10342_v1, %v17361_v24 }
0x124d   : > { %9403 = vst.msk [vmem:[%s12814_s27 + $0x48] sm:$0xff] %vm9393_vm3, %v9366_v42  ;;  %v10343_v12 = vpop.f32.mrb[244].mxu1 }
0x124e   : > { %v10344_v55 = vpop.f32.mrb[245].mxu1 }
0x124f   : > { %v10345_v39 = vadd.f32 %v10344_v55, %v10343_v12  ;;  %v10346_v60 = vpop.f32.mrb[246].mxu1 }
0x1250   : > { %v10347_v32 = vpop.f32.mrb[247].mxu1 }
0x1251   : > { %v9371_v17 = vadd.f32 %v10345_v39, %v17361_v24  ;;  %v10348_v56 = vadd.f32 %v10347_v32, %v10346_v60 }
0x1253   : > { %9404 = vst.msk [vmem:[%s12814_s27 + $0x50] sm:$0xff] %vm9393_vm3, %v9371_v17  ;;  %v9374_v26 = vadd.f32 %v10348_v56, %v17361_v24 }
0x1255   : > { %9405 = vst.msk [vmem:[%s12814_s27 + $0x58] sm:$0xff] %vm9393_vm3, %v9374_v26  ;;  %v10349_v14 = vpop.f32.mrb[248].mxu1 }
0x1256   : > { %v10350_v61 = vpop.f32.mrb[249].mxu1 }
0x1257   : > { %v10351_v31 = vadd.f32 %v10350_v61, %v10349_v14  ;;  %v10352_v19 = vpop.f32.mrb[250].mxu1 }
0x1258   : > { %v10353_v15 = vpop.f32.mrb[251].mxu1 }
0x1259   : > { %v9379_v52 = vadd.f32 %v10351_v31, %v17361_v24  ;;  %v10354_v4 = vadd.f32 %v10353_v15, %v10352_v19 }
0x125b   : > { %9406 = vst.msk [vmem:[%s12814_s27 + $0x60] sm:$0xff] %vm9393_vm3, %v9379_v52  ;;  %v9382_v34 = vadd.f32 %v10354_v4, %v17361_v24 }
0x125d   : > { %9407 = vst.msk [vmem:[%s12814_s27 + $0x68] sm:$0xff] %vm9393_vm3, %v9382_v34  ;;  %v10355_v22 = vpop.f32.mrb[252].mxu1 }
0x125e   : > { %v10356_v30 = vpop.f32.mrb[253].mxu1 }
0x125f   : > { %v10357_v58 = vadd.f32 %v10356_v30, %v10355_v22  ;;  %v10358_v25 = vpop.f32.mrb[254].mxu1 }
0x1260   : > { %v10359_v9 = vpop.f32.mrb[255].mxu1 }
0x1261   : > { %v9387_v2 = vadd.f32 %v10357_v58, %v17361_v24  ;;  %v10360_v7 = vadd.f32 %v10359_v9, %v10358_v25 }
0x1263   : > { %9408 = vst.msk [vmem:[%s12814_s27 + $0x70] sm:$0xff] %vm9393_vm3, %v9387_v2  ;;  %v9390_v63 = vadd.f32 %v10360_v7, %v17361_v24 }
0x1265   : > { %9409 = vst.msk [vmem:[%s12814_s27 + $0x78] sm:$0xff] %vm9393_vm3, %v9390_v63 }
0x1266 PF: > { %s45_s0 = sadd.s32 1, %s12203_s0   ;;  %s18143_s27 = smov %s12179_s3 }
0x1267   : > { %p42_p5 = scmp.ge.s32.totalorder %s45_s0, 6   ;;  %s18144_s3 = smov %s12183_s7 }
0x1268   : > { %s18145_s7 = smov %s12727_s1  ;;  %s18146_s28 = smov %s12195_s4 }
0x1269   : > { %s18147_s8 = smov %s12199_s29  ;;  %s18148_s4 = smov %s18151_s16 }
0x126a   : > { %s18149_s29 = smov %s18155_s6  ;;  %44 = sbr.rel (!%p42_p5) target bundleno = 35 (0x23), region = 219 }
0x1271   :  { %9440 = vsyncpa [#allocation5], 1 }
0x1272   :  { %9442 = vsyncpa [#allocation5 + $0x1], 1 }
0x1273   :  { %9443 = vsyncpa [#allocation7], 1 }
0x1274   :  { %9444 = vsyncpa [#allocation10], 1 }
0x1275   :  { %9445 = vsyncpa [#allocation13], 1 }
0x1276   :  { %9446 = vsyncpa [#allocation16], 1 }
0x1277   :  { %9447 = vsyncpa [#allocation19], 1 }
0x1278   :  { %9448 = vsyncpa [#allocation22], 1 }

</bundles_post_ra>
